<compile_context>
chip_gen: v5e
topology: v5e:2x2
jax: 0.10.0
libtpu: 0.0.40
codegen_flags: <defaults>
</compile_context>

<pallas_src>
import functools

import jax
import jax.numpy as jnp
import numpy as np
from jax import lax
from jax.experimental import pallas as pl
from jax.experimental.pallas import tpu as pltpu


def _round_up(v, m):
    return (v + m - 1) // m * m


def _vmem_budget_bytes():
    """VMEM budget for scratch/blocks, leaving headroom for compiler scratch."""
    try:
        info = pltpu.get_tpu_info()
        cap = getattr(info, "vmem_capacity_bytes", 0) or 0
        if cap:
            # ~75% of physical, capped (v5e/v6e: 128 MiB phys -> 96 MiB;
            # v7x: 64 MiB phys -> 48 MiB).
            return min(int(cap) * 3 // 4, 96 * 1024 * 1024)
    except Exception:
        pass
    return 48 * 1024 * 1024          # conservative default, fits v7x


def _pick_row_tile(N, H, W4, Ws, Wp, C, d, budget):
    """Largest row tile whose per-step working set fits the VMEM budget."""
    PH = d + 1
    th_cap = _round_up(H, 8)
    if N == 1 and H > 8:
        # keep >= 2 grid steps so both v7x TensorCores get work
        th_cap = min(th_cap, max(8, _round_up((H + 1) // 2, 8)))
    for cand in (64, 48, 32, 24, 16, 8):
        TH = min(cand, th_cap)
        R0 = TH + 2 * PH
        est = (2 * R0 * Wp * C * 4            # double-buffered halo input (f32)
               + 2 * TH * W4 * C * 4          # double-buffered output block
               + 6 * R0 * Ws * C * 4          # live intermediates + im2col concats
               + 4 * 3 * C * C * 2            # resident packed bf16 weights
               + 4 * C * 4)                   # biases
        if est <= budget:
            return TH
    return 8


def _make_kernel(*, TH, T, H, W, W4, C, d, PH, PW_L, Wp, Ws, Hp, R0):
    """Builds the fused bottleneck_1d kernel for fixed (static) geometry."""
    R1 = TH + 2 * d                      # rows of the stage-1/2 intermediates
    bf = jnp.bfloat16

    def kernel(x_hbm, w1, b1, w2, b2, w3, b3, w4, b4, o_ref, xbuf, sem):
        n = pl.program_id(0)
        t = pl.program_id(1)
        slot = t & 1

        def win(tt, sl):
            start = n * Hp + tt * TH
            return pltpu.make_async_copy(
                x_hbm.at[pl.ds(start, R0)], xbuf.at[sl], sem.at[sl])

        # prime slot 0 at the first row tile of this image
        @pl.when(t == 0)
        def _():
            win(0, 0).start()

        # wait for the current tile's window, then immediately prefetch the
        # next tile's window into the other slot (overlaps all compute below)
        win(t, slot).wait()

        @pl.when(t + 1 < T)
        def _():
            win(t + 1, 1 - slot).start()

        cur = xbuf.at[slot]              # (R0, Wp, C) halo'd rows, VMEM view

        def conv3(taps, w_ref, b_ref):
            # 3-tap "valid" conv as ONE K=3C matmul (taps packed along channels)
            r, wd = taps[0].shape[0], taps[0].shape[1]
            vs = jnp.concatenate(
                [tp.astype(bf).reshape(r * wd, C) for tp in taps], axis=-1)
            acc = jnp.dot(vs, w_ref[...], preferred_element_type=jnp.float32)
            return (acc + b_ref[...]).reshape(r, wd, C)

        # Masks reproducing the per-stage zero padding of the original convs
        # (one cheap broadcast multiply each).
        c_wp = lax.broadcasted_iota(jnp.int32, (1, Wp, 1), 1)
        m_wp = ((c_wp >= PW_L) & (c_wp < PW_L + W)).astype(jnp.float32)
        c_ws = lax.broadcasted_iota(jnp.int32, (1, Ws, 1), 1)
        m_ws = ((c_ws >= d) & (c_ws < d + W)).astype(jnp.float32)
        r_g = lax.broadcasted_iota(jnp.int32, (R1, 1, 1), 0) + (t * TH - d)
        m_r = ((r_g >= 0) & (r_g < H)).astype(jnp.float32)

        # stage 1: conv3x1_1 (rows, dil 1) + ReLU        -> (R1, Wp, C)
        s1 = conv3([cur[pl.ds(j, R1)] for j in range(3)], w1, b1)
        s1 = jnp.maximum(s1, 0.0) * m_wp           # zero cols outside image

        # stage 2: conv1x3_1 (cols, dil 1) + BN1 + ReLU  -> (R1, Ws, C)
        s2 = conv3([s1[:, j:j + Ws, :] for j in range(3)], w2, b2)
        s2 = jnp.maximum(s2, 0.0) * m_r            # zero rows outside image

        # stage 3: conv3x1_2 (rows, dil d) + ReLU        -> (TH, Ws, C)
        s3 = conv3([s2[j * d:j * d + TH] for j in range(3)], w3, b3)
        s3 = jnp.maximum(s3, 0.0) * m_ws           # zero cols outside image

        # stage 4: conv1x3_2 (cols, dil d) + BN2         -> (TH, W4, C)
        s4 = conv3([s3[:, j * d:j * d + W4, :] for j in range(3)], w4, b4)

        # residual + final ReLU (Dropout2d with p=0 / eval mode is identity)
        res = cur[pl.ds(PH, TH)][:, PW_L:PW_L + W, :]
        o_ref[0] = jnp.maximum(s4[:, :W, :] + res, 0.0).astype(o_ref.dtype)

    return kernel


def bottleneck_1d_forward(x, params, *, dilated, eps=1e-3, row_tile=None):
    """x: (N, H, W, C) NHWC float32. params: PyTorch-layout tensors."""
    N, H, W, C = x.shape
    d = int(dilated)

    PH = d + 1                                   # halo rows DMA'd on each side
    PW_L = d + 1                                 # zero cols pre-padded on the left
    W4 = _round_up(W, 8)                         # stage-4 compute width
    Ws = _round_up(W4 + 2 * d, 8)                # stage-2/3 intermediate width
    Wp = _round_up(max(Ws + 2, W + 2 * PW_L), 8)  # padded input width

    budget = _vmem_budget_bytes()
    if row_tile is None:
        TH = _pick_row_tile(N, H, W4, Ws, Wp, C, d, budget)
    else:
        TH = max(8, int(row_tile))
    Ht = _round_up(H, TH)                        # pad H to a tile multiple
    T = Ht // TH
    R0 = TH + 2 * PH                             # rows per manual DMA window
    Hp = Ht + 2 * PH

    # pad the input once; per-stage zero padding is recreated in-kernel by masks
    xp = jnp.pad(x, ((0, 0), (PH, PH + Ht - H), (PW_L, Wp - W - PW_L), (0, 0)))
    xp = xp.reshape(N * Hp, Wp, C)               # flat rows -> contiguous DMA windows

    # ---- fold parameters; pack the 3 taps into a (3C, C) bf16 operand ----
    def tap_pack(w_pt, along_h):                 # (Cout, Cin, kh, kw) -> (3*Cin, Cout)
        w = w_pt[:, :, :, 0] if along_h else w_pt[:, :, 0, :]      # (Cout, Cin, 3)
        return jnp.transpose(w, (2, 1, 0)).reshape(3 * C, C)

    sc1 = params["bn1_g"] * lax.rsqrt(params["bn1_v"] + eps)
    sc2 = params["bn2_g"] * lax.rsqrt(params["bn2_v"] + eps)

    w1 = tap_pack(params["w3x1_1"], True).astype(jnp.bfloat16)
    w2 = (tap_pack(params["w1x3_1"], False) * sc1[None, :]).astype(jnp.bfloat16)
    w3 = tap_pack(params["w3x1_2"], True).astype(jnp.bfloat16)
    w4 = (tap_pack(params["w1x3_2"], False) * sc2[None, :]).astype(jnp.bfloat16)

    b1 = params["b3x1_1"].reshape(1, C)
    b3 = params["b3x1_2"].reshape(1, C)
    b2 = (params["b1x3_1"] * sc1 + params["bn1_b"] - params["bn1_m"] * sc1).reshape(1, C)
    b4 = (params["b1x3_2"] * sc2 + params["bn2_b"] - params["bn2_m"] * sc2).reshape(1, C)

    kernel = _make_kernel(TH=TH, T=T, H=H, W=W, W4=W4, C=C, d=d, PH=PH,
                          PW_L=PW_L, Wp=Wp, Ws=Ws, Hp=Hp, R0=R0)

    wspec = pl.BlockSpec((3 * C, C), lambda n, t: (0, 0))   # constant index -> resident
    bspec = pl.BlockSpec((1, C), lambda n, t: (0, 0))

    out = pl.pallas_call(
        kernel,
        out_shape=jax.ShapeDtypeStruct((N, Ht, W, C), x.dtype),
        grid_spec=pltpu.PrefetchScalarGridSpec(
            num_scalar_prefetch=0,
            grid=(N, T),
            in_specs=[
                pl.BlockSpec(memory_space=pl.ANY),   # padded input stays in HBM
                wspec, bspec, wspec, bspec, wspec, bspec, wspec, bspec,
            ],
            out_specs=pl.BlockSpec((1, TH, W, C), lambda n, t: (n, t, 0, 0)),
            scratch_shapes=[
                pltpu.VMEM((2, R0, Wp, C), jnp.float32),   # double-buffered halo rows
                pltpu.SemaphoreType.DMA((2,)),
            ],
        ),
        compiler_params=pltpu.CompilerParams(
            # N parallel (feeds both v7x TCs); the row-tile axis is sequential
            # so the double-buffered halo DMA ordering is well defined per core.
            dimension_semantics=("parallel", "arbitrary"),
            vmem_limit_bytes=budget,
        ),
    )(xp, w1, b1, w2, b2, w3, b3, w4, b4)
    return out[:, :H] if Ht != H else out


def _reference(x, params, *, dilated, eps=1e-3):
    """Pure-JAX/XLA reference of the PyTorch forward (NHWC, inference mode)."""
    d = int(dilated)

    def conv(v, w, b, dh, dw):
        kh, kw = w.shape[2], w.shape[3]
        y = lax.conv_general_dilated(
            v, jnp.transpose(w, (2, 3, 1, 0)),            # OIHW -> HWIO
            window_strides=(1, 1),
            padding=((dh * (kh - 1) // 2,) * 2, (dw * (kw - 1) // 2,) * 2),
            rhs_dilation=(dh, dw),
            dimension_numbers=("NHWC", "HWIO", "NHWC"))
        return y + b[None, None, None, :]

    def bn(v, g, b, m, var):
        return (v - m) * (g / jnp.sqrt(var + eps)) + b

    y = jax.nn.relu(conv(x, params["w3x1_1"], params["b3x1_1"], 1, 1))
    y = conv(y, params["w1x3_1"], params["b1x3_1"], 1, 1)
    y = jax.nn.relu(bn(y, params["bn1_g"], params["bn1_b"], params["bn1_m"], params["bn1_v"]))
    y = jax.nn.relu(conv(y, params["w3x1_2"], params["b3x1_2"], d, 1))
    y = conv(y, params["w1x3_2"], params["b1x3_2"], 1, d)
    y = bn(y, params["bn2_g"], params["bn2_b"], params["bn2_m"], params["bn2_v"])
    return jax.nn.relu(y + x)


if __name__ == "__main__":
    # ERFNet dilated-stack config: chann=128, dilated=2, dropprob=0 (eval mode).
    N, H, W, C = 2, 16, 16, 128
    dilated = 2

    key = jax.random.PRNGKey(0)
    ks = jax.random.split(key, 17)
    wstd = 0.05    # keeps activations O(1) through the 4-conv chain

    params = {
        "w3x1_1": wstd * jax.random.normal(ks[0], (C, C, 3, 1), jnp.float32),
        "b3x1_1": 0.1 * jax.random.normal(ks[1], (C,), jnp.float32),
        "w1x3_1": wstd * jax.random.normal(ks[2], (C, C, 1, 3), jnp.float32),
        "b1x3_1": 0.1 * jax.random.normal(ks[3], (C,), jnp.float32),
        "bn1_g": 1.0 + 0.1 * jax.random.normal(ks[4], (C,), jnp.float32),
        "bn1_b": 0.1 * jax.random.normal(ks[5], (C,), jnp.float32),
        "bn1_m": 0.1 * jax.random.normal(ks[6], (C,), jnp.float32),
        "bn1_v": 1.0 + 0.1 * jax.random.uniform(ks[7], (C,), jnp.float32),
        "w3x1_2": wstd * jax.random.normal(ks[8], (C, C, 3, 1), jnp.float32),
        "b3x1_2": 0.1 * jax.random.normal(ks[9], (C,), jnp.float32),
        "w1x3_2": wstd * jax.random.normal(ks[10], (C, C, 1, 3), jnp.float32),
        "b1x3_2": 0.1 * jax.random.normal(ks[11], (C,), jnp.float32),
        "bn2_g": 1.0 + 0.1 * jax.random.normal(ks[12], (C,), jnp.float32),
        "bn2_b": 0.1 * jax.random.normal(ks[13], (C,), jnp.float32),
        "bn2_m": 0.1 * jax.random.normal(ks[14], (C,), jnp.float32),
        "bn2_v": 1.0 + 0.1 * jax.random.uniform(ks[15], (C,), jnp.float32),
    }
    x = jax.random.normal(ks[16], (N, H, W, C), jnp.float32)   # NHWC input

    fwd = jax.jit(functools.partial(bottleneck_1d_forward, dilated=dilated))
    out = jax.block_until_ready(fwd(x, params))

    ref = _reference(x, params, dilated=dilated)
    # tolerance covers the bf16 matmul operands (f32 accumulation) across the
    # four chained convs vs XLA's f32 reference convolutions
    np.testing.assert_allclose(np.asarray(out), np.asarray(ref), rtol=3e-2, atol=3e-2)

    print("KERNEL_OK")
</pallas_src>

<mosaic_0001>
module attributes {stable_mosaic.version = 11 : i64} {
  func.func @kernel(%arg0: i32, %arg1: i32, %arg2: memref<44x32x128xf32, #tpu.memory_space<any>>, %arg3: memref<384x128xbf16, #tpu.memory_space<vmem>>, %arg4: memref<1x128xf32, #tpu.memory_space<vmem>>, %arg5: memref<384x128xbf16, #tpu.memory_space<vmem>>, %arg6: memref<1x128xf32, #tpu.memory_space<vmem>>, %arg7: memref<384x128xbf16, #tpu.memory_space<vmem>>, %arg8: memref<1x128xf32, #tpu.memory_space<vmem>>, %arg9: memref<384x128xbf16, #tpu.memory_space<vmem>>, %arg10: memref<1x128xf32, #tpu.memory_space<vmem>>, %arg11: memref<1x16x16x128xf32, #tpu.memory_space<vmem>>, %arg12: memref<2x22x32x128xf32, #tpu.memory_space<vmem>>, %arg13: memref<2x!tpu.dma_semaphore, #tpu.memory_space<semaphore_mem>>) attributes {dimension_semantics = [#tpu.dimension_semantics<parallel>, #tpu.dimension_semantics<arbitrary>], iteration_bounds = array<i64: 2, 1>, scalar_prefetch = 0 : i64, scratch_operands = 2 : i64, tpu.core_type = #tpu.core_type<tc>, window_params = [{}, {pipeline_mode = #tpu.pipeline_mode<synchronous>, transform_indices = @transform_1, window_bounds = array<i64: 384, 128>}, {pipeline_mode = #tpu.pipeline_mode<synchronous>, transform_indices = @transform_2, window_bounds = array<i64: 1, 128>}, {pipeline_mode = #tpu.pipeline_mode<synchronous>, transform_indices = @transform_3, window_bounds = array<i64: 384, 128>}, {pipeline_mode = #tpu.pipeline_mode<synchronous>, transform_indices = @transform_4, window_bounds = array<i64: 1, 128>}, {pipeline_mode = #tpu.pipeline_mode<synchronous>, transform_indices = @transform_5, window_bounds = array<i64: 384, 128>}, {pipeline_mode = #tpu.pipeline_mode<synchronous>, transform_indices = @transform_6, window_bounds = array<i64: 1, 128>}, {pipeline_mode = #tpu.pipeline_mode<synchronous>, transform_indices = @transform_7, window_bounds = array<i64: 384, 128>}, {pipeline_mode = #tpu.pipeline_mode<synchronous>, transform_indices = @transform_8, window_bounds = array<i64: 1, 128>}, {transform_indices = @transform_9, window_bounds = array<i64: 1, 16, 16, 128>}]} {
    %c1_i32 = arith.constant 1 : i32
    %0 = arith.andi %arg1, %c1_i32 : i32
    %c0_i32 = arith.constant 0 : i32
    %1 = arith.cmpi eq, %arg1, %c0_i32 : i32
    %2 = arith.extui %1 : i1 to i32
    %c0_i32_0 = arith.constant 0 : i32
    %3 = arith.cmpi ne, %2, %c0_i32_0 : i32
    scf.if %3 {
      %c22_i32_60 = arith.constant 22 : i32
      %136 = arith.muli %arg0, %c22_i32_60 : i32
      %c0_i32_61 = arith.constant 0 : i32
      %137 = arith.addi %136, %c0_i32_61 : i32
      %c0_i32_62 = arith.constant 0 : i32
      %c0_i32_63 = arith.constant 0 : i32
      %c0_i32_64 = arith.constant 0 : i32
      %c0_i32_65 = arith.constant 0 : i32
      %138 = tpu.memref_slice %arg2[%137, %c0_i32_64, %c0_i32_65] : memref<44x32x128xf32, #tpu.memory_space<any>> -> memref<22x32x128xf32, #tpu.memory_space<any>>
      %c0_i32_66 = arith.constant 0 : i32
      %c0_i32_67 = arith.constant 0 : i32
      %c0_i32_68 = arith.constant 0 : i32
      %139 = tpu.memref_slice %arg12[%c0_i32_62, %c0_i32_66, %c0_i32_67, %c0_i32_68] : memref<2x22x32x128xf32, #tpu.memory_space<vmem>> -> memref<1x22x32x128xf32, #tpu.memory_space<vmem>>
      %140 = tpu.memref_squeeze %139 : memref<1x22x32x128xf32, #tpu.memory_space<vmem>> -> memref<22x32x128xf32, #tpu.memory_space<vmem>>
      %141 = tpu.memref_slice %arg13[%c0_i32_63] : memref<2x!tpu.dma_semaphore, #tpu.memory_space<semaphore_mem>> -> memref<1x!tpu.dma_semaphore, #tpu.memory_space<semaphore_mem>>
      %142 = tpu.memref_squeeze %141 : memref<1x!tpu.dma_semaphore, #tpu.memory_space<semaphore_mem>> -> memref<!tpu.dma_semaphore, #tpu.memory_space<semaphore_mem>>
      tpu.enqueue_dma source(%138 : memref<22x32x128xf32, #tpu.memory_space<any>>) target(%140 : memref<22x32x128xf32, #tpu.memory_space<vmem>>) target_semaphore(%142 : memref<!tpu.dma_semaphore, #tpu.memory_space<semaphore_mem>>)
    } else {
    }
    %c22_i32 = arith.constant 22 : i32
    %4 = arith.muli %arg0, %c22_i32 : i32
    %c16_i32 = arith.constant 16 : i32
    %5 = arith.muli %arg1, %c16_i32 : i32
    %6 = arith.addi %4, %5 : i32
    %c0_i32_1 = arith.constant 0 : i32
    %c0_i32_2 = arith.constant 0 : i32
    %7 = tpu.memref_slice %arg2[%6, %c0_i32_1, %c0_i32_2] : memref<44x32x128xf32, #tpu.memory_space<any>> -> memref<22x32x128xf32, #tpu.memory_space<any>>
    %c0_i32_3 = arith.constant 0 : i32
    %c0_i32_4 = arith.constant 0 : i32
    %c0_i32_5 = arith.constant 0 : i32
    %8 = tpu.memref_slice %arg12[%0, %c0_i32_3, %c0_i32_4, %c0_i32_5] : memref<2x22x32x128xf32, #tpu.memory_space<vmem>> -> memref<1x22x32x128xf32, #tpu.memory_space<vmem>>
    %9 = tpu.memref_squeeze %8 : memref<1x22x32x128xf32, #tpu.memory_space<vmem>> -> memref<22x32x128xf32, #tpu.memory_space<vmem>>
    %10 = tpu.memref_slice %arg13[%0] : memref<2x!tpu.dma_semaphore, #tpu.memory_space<semaphore_mem>> -> memref<1x!tpu.dma_semaphore, #tpu.memory_space<semaphore_mem>>
    %11 = tpu.memref_squeeze %10 : memref<1x!tpu.dma_semaphore, #tpu.memory_space<semaphore_mem>> -> memref<!tpu.dma_semaphore, #tpu.memory_space<semaphore_mem>>
    tpu.wait_dma2 semaphore(%11 : memref<!tpu.dma_semaphore, #tpu.memory_space<semaphore_mem>>) src(%7 : memref<22x32x128xf32, #tpu.memory_space<any>>) dst(%9 : memref<22x32x128xf32, #tpu.memory_space<vmem>>)
    %c1_i32_6 = arith.constant 1 : i32
    %12 = arith.addi %arg1, %c1_i32_6 : i32
    %c1_i32_7 = arith.constant 1 : i32
    %13 = arith.cmpi slt, %12, %c1_i32_7 : i32
    %14 = arith.extui %13 : i1 to i32
    %c0_i32_8 = arith.constant 0 : i32
    %15 = arith.cmpi ne, %14, %c0_i32_8 : i32
    scf.if %15 {
      %c1_i32_60 = arith.constant 1 : i32
      %136 = arith.addi %arg1, %c1_i32_60 : i32
      %c1_i32_61 = arith.constant 1 : i32
      %137 = arith.subi %c1_i32_61, %0 : i32
      %c22_i32_62 = arith.constant 22 : i32
      %138 = arith.muli %arg0, %c22_i32_62 : i32
      %c16_i32_63 = arith.constant 16 : i32
      %139 = arith.muli %136, %c16_i32_63 : i32
      %140 = arith.addi %138, %139 : i32
      %c0_i32_64 = arith.constant 0 : i32
      %c0_i32_65 = arith.constant 0 : i32
      %141 = tpu.memref_slice %arg2[%140, %c0_i32_64, %c0_i32_65] : memref<44x32x128xf32, #tpu.memory_space<any>> -> memref<22x32x128xf32, #tpu.memory_space<any>>
      %c0_i32_66 = arith.constant 0 : i32
      %c0_i32_67 = arith.constant 0 : i32
      %c0_i32_68 = arith.constant 0 : i32
      %142 = tpu.memref_slice %arg12[%137, %c0_i32_66, %c0_i32_67, %c0_i32_68] : memref<2x22x32x128xf32, #tpu.memory_space<vmem>> -> memref<1x22x32x128xf32, #tpu.memory_space<vmem>>
      %143 = tpu.memref_squeeze %142 : memref<1x22x32x128xf32, #tpu.memory_space<vmem>> -> memref<22x32x128xf32, #tpu.memory_space<vmem>>
      %144 = tpu.memref_slice %arg13[%137] : memref<2x!tpu.dma_semaphore, #tpu.memory_space<semaphore_mem>> -> memref<1x!tpu.dma_semaphore, #tpu.memory_space<semaphore_mem>>
      %145 = tpu.memref_squeeze %144 : memref<1x!tpu.dma_semaphore, #tpu.memory_space<semaphore_mem>> -> memref<!tpu.dma_semaphore, #tpu.memory_space<semaphore_mem>>
      tpu.enqueue_dma source(%141 : memref<22x32x128xf32, #tpu.memory_space<any>>) target(%143 : memref<22x32x128xf32, #tpu.memory_space<vmem>>) target_semaphore(%145 : memref<!tpu.dma_semaphore, #tpu.memory_space<semaphore_mem>>)
    } else {
    }
    %16 = tpu.iota {dimensions = array<i32: 1>} : vector<1x32x1xi32>
    %c3_i32 = arith.constant 3 : i32
    %17 = vector.broadcast %c3_i32 : i32 to vector<1x32x1xi32>
    %18 = arith.cmpi sge, %16, %17 : vector<1x32x1xi32>
    %c19_i32 = arith.constant 19 : i32
    %19 = vector.broadcast %c19_i32 : i32 to vector<1x32x1xi32>
    %20 = arith.cmpi slt, %16, %19 : vector<1x32x1xi32>
    %21 = arith.andi %18, %20 : vector<1x32x1xi1>
    %22 = arith.extui %21 : vector<1x32x1xi1> to vector<1x32x1xi32>
    %23 = arith.sitofp %22 : vector<1x32x1xi32> to vector<1x32x1xf32>
    %24 = tpu.iota {dimensions = array<i32: 1>} : vector<1x24x1xi32>
    %c2_i32 = arith.constant 2 : i32
    %25 = vector.broadcast %c2_i32 : i32 to vector<1x24x1xi32>
    %26 = arith.cmpi sge, %24, %25 : vector<1x24x1xi32>
    %c18_i32 = arith.constant 18 : i32
    %27 = vector.broadcast %c18_i32 : i32 to vector<1x24x1xi32>
    %28 = arith.cmpi slt, %24, %27 : vector<1x24x1xi32>
    %29 = arith.andi %26, %28 : vector<1x24x1xi1>
    %30 = arith.extui %29 : vector<1x24x1xi1> to vector<1x24x1xi32>
    %31 = arith.sitofp %30 : vector<1x24x1xi32> to vector<1x24x1xf32>
    %32 = tpu.iota {dimensions = array<i32: 0>} : vector<20x1x1xi32>
    %c16_i32_9 = arith.constant 16 : i32
    %33 = arith.muli %arg1, %c16_i32_9 : i32
    %c2_i32_10 = arith.constant 2 : i32
    %34 = arith.subi %33, %c2_i32_10 : i32
    %35 = vector.broadcast %34 : i32 to vector<20x1x1xi32>
    %36 = arith.addi %32, %35 : vector<20x1x1xi32>
    %c0_i32_11 = arith.constant 0 : i32
    %37 = vector.broadcast %c0_i32_11 : i32 to vector<20x1x1xi32>
    %38 = arith.cmpi sge, %36, %37 : vector<20x1x1xi32>
    %c16_i32_12 = arith.constant 16 : i32
    %39 = vector.broadcast %c16_i32_12 : i32 to vector<20x1x1xi32>
    %40 = arith.cmpi slt, %36, %39 : vector<20x1x1xi32>
    %41 = arith.andi %38, %40 : vector<20x1x1xi1>
    %42 = arith.extui %41 : vector<20x1x1xi1> to vector<20x1x1xi32>
    %43 = arith.sitofp %42 : vector<20x1x1xi32> to vector<20x1x1xf32>
    %c0_i32_13 = arith.constant 0 : i32
    %c0_i32_14 = arith.constant 0 : i32
    %c0_i32_15 = arith.constant 0 : i32
    %44 = tpu.memref_slice %arg12[%0, %c0_i32_13, %c0_i32_14, %c0_i32_15] : memref<2x22x32x128xf32, #tpu.memory_space<vmem>> -> memref<1x22x32x128xf32, #tpu.memory_space<vmem>>
    %45 = tpu.memref_squeeze %44 : memref<1x22x32x128xf32, #tpu.memory_space<vmem>> -> memref<22x32x128xf32, #tpu.memory_space<vmem>>
    %c0 = arith.constant 0 : index
    %c0_16 = arith.constant 0 : index
    %c0_17 = arith.constant 0 : index
    %46 = vector.load %45[%c0, %c0_16, %c0_17] : memref<22x32x128xf32, #tpu.memory_space<vmem>>, vector<20x32x128xf32>
    %c0_i32_18 = arith.constant 0 : i32
    %c0_i32_19 = arith.constant 0 : i32
    %c0_i32_20 = arith.constant 0 : i32
    %47 = tpu.memref_slice %arg12[%0, %c0_i32_18, %c0_i32_19, %c0_i32_20] : memref<2x22x32x128xf32, #tpu.memory_space<vmem>> -> memref<1x22x32x128xf32, #tpu.memory_space<vmem>>
    %48 = tpu.memref_squeeze %47 : memref<1x22x32x128xf32, #tpu.memory_space<vmem>> -> memref<22x32x128xf32, #tpu.memory_space<vmem>>
    %c1 = arith.constant 1 : index
    %c0_21 = arith.constant 0 : index
    %c0_22 = arith.constant 0 : index
    %49 = vector.load %48[%c1, %c0_21, %c0_22] : memref<22x32x128xf32, #tpu.memory_space<vmem>>, vector<20x32x128xf32>
    %c0_i32_23 = arith.constant 0 : i32
    %c0_i32_24 = arith.constant 0 : i32
    %c0_i32_25 = arith.constant 0 : i32
    %50 = tpu.memref_slice %arg12[%0, %c0_i32_23, %c0_i32_24, %c0_i32_25] : memref<2x22x32x128xf32, #tpu.memory_space<vmem>> -> memref<1x22x32x128xf32, #tpu.memory_space<vmem>>
    %51 = tpu.memref_squeeze %50 : memref<1x22x32x128xf32, #tpu.memory_space<vmem>> -> memref<22x32x128xf32, #tpu.memory_space<vmem>>
    %c2 = arith.constant 2 : index
    %c0_26 = arith.constant 0 : index
    %c0_27 = arith.constant 0 : index
    %52 = vector.load %51[%c2, %c0_26, %c0_27] : memref<22x32x128xf32, #tpu.memory_space<vmem>>, vector<20x32x128xf32>
    %53 = arith.truncf %46 : vector<20x32x128xf32> to vector<20x32x128xbf16>
    %54 = vector.shape_cast %53 : vector<20x32x128xbf16> to vector<640x128xbf16>
    %55 = arith.truncf %49 : vector<20x32x128xf32> to vector<20x32x128xbf16>
    %56 = vector.shape_cast %55 : vector<20x32x128xbf16> to vector<640x128xbf16>
    %57 = arith.truncf %52 : vector<20x32x128xf32> to vector<20x32x128xbf16>
    %58 = vector.shape_cast %57 : vector<20x32x128xbf16> to vector<640x128xbf16>
    %59 = tpu.concatenate %54, %56, %58 in 1 : vector<640x128xbf16>, vector<640x128xbf16>, vector<640x128xbf16> -> vector<640x384xbf16>
    %c0_28 = arith.constant 0 : index
    %c0_29 = arith.constant 0 : index
    %60 = vector.load %arg3[%c0_28, %c0_29] : memref<384x128xbf16, #tpu.memory_space<vmem>>, vector<384x128xbf16>
    %cst = arith.constant dense<0.000000e+00> : vector<640x128xf32>
    %61 = tpu.matmul %59, %60, %cst {dimension_numbers = #tpu.dot_dimension_numbers<[1], [0], [0], [1], [0, 0, 1, 1], [], []>} : vector<640x384xbf16>, vector<384x128xbf16>, vector<640x128xf32> -> vector<640x128xf32>
    %c0_30 = arith.constant 0 : index
    %c0_31 = arith.constant 0 : index
    %62 = vector.load %arg4[%c0_30, %c0_31] : memref<1x128xf32, #tpu.memory_space<vmem>>, vector<1x128xf32>
    %63 = vector.broadcast %62 : vector<1x128xf32> to vector<640x128xf32>
    %64 = arith.addf %61, %63 : vector<640x128xf32>
    %65 = vector.shape_cast %64 : vector<640x128xf32> to vector<20x32x128xf32>
    %cst_32 = arith.constant 0.000000e+00 : f32
    %66 = vector.broadcast %cst_32 : f32 to vector<20x32x128xf32>
    %67 = arith.maximumf %65, %66 : vector<20x32x128xf32>
    %68 = vector.broadcast %23 : vector<1x32x1xf32> to vector<20x32x128xf32>
    %69 = arith.mulf %67, %68 : vector<20x32x128xf32>
    %70 = vector.extract_strided_slice %69 {offsets = [0, 0, 0], sizes = [20, 24, 128], strides = [1, 1, 1]} : vector<20x32x128xf32> to vector<20x24x128xf32>
    %71 = vector.extract_strided_slice %69 {offsets = [0, 1, 0], sizes = [20, 24, 128], strides = [1, 1, 1]} : vector<20x32x128xf32> to vector<20x24x128xf32>
    %72 = vector.extract_strided_slice %69 {offsets = [0, 2, 0], sizes = [20, 24, 128], strides = [1, 1, 1]} : vector<20x32x128xf32> to vector<20x24x128xf32>
    %73 = arith.truncf %70 : vector<20x24x128xf32> to vector<20x24x128xbf16>
    %74 = vector.shape_cast %73 : vector<20x24x128xbf16> to vector<480x128xbf16>
    %75 = arith.truncf %71 : vector<20x24x128xf32> to vector<20x24x128xbf16>
    %76 = vector.shape_cast %75 : vector<20x24x128xbf16> to vector<480x128xbf16>
    %77 = arith.truncf %72 : vector<20x24x128xf32> to vector<20x24x128xbf16>
    %78 = vector.shape_cast %77 : vector<20x24x128xbf16> to vector<480x128xbf16>
    %79 = tpu.concatenate %74, %76, %78 in 1 : vector<480x128xbf16>, vector<480x128xbf16>, vector<480x128xbf16> -> vector<480x384xbf16>
    %c0_33 = arith.constant 0 : index
    %c0_34 = arith.constant 0 : index
    %80 = vector.load %arg5[%c0_33, %c0_34] : memref<384x128xbf16, #tpu.memory_space<vmem>>, vector<384x128xbf16>
    %cst_35 = arith.constant dense<0.000000e+00> : vector<480x128xf32>
    %81 = tpu.matmul %79, %80, %cst_35 {dimension_numbers = #tpu.dot_dimension_numbers<[1], [0], [0], [1], [0, 0, 1, 1], [], []>} : vector<480x384xbf16>, vector<384x128xbf16>, vector<480x128xf32> -> vector<480x128xf32>
    %c0_36 = arith.constant 0 : index
    %c0_37 = arith.constant 0 : index
    %82 = vector.load %arg6[%c0_36, %c0_37] : memref<1x128xf32, #tpu.memory_space<vmem>>, vector<1x128xf32>
    %83 = vector.broadcast %82 : vector<1x128xf32> to vector<480x128xf32>
    %84 = arith.addf %81, %83 : vector<480x128xf32>
    %85 = vector.shape_cast %84 : vector<480x128xf32> to vector<20x24x128xf32>
    %cst_38 = arith.constant 0.000000e+00 : f32
    %86 = vector.broadcast %cst_38 : f32 to vector<20x24x128xf32>
    %87 = arith.maximumf %85, %86 : vector<20x24x128xf32>
    %88 = vector.broadcast %43 : vector<20x1x1xf32> to vector<20x24x128xf32>
    %89 = arith.mulf %87, %88 : vector<20x24x128xf32>
    %90 = vector.extract_strided_slice %89 {offsets = [0, 0, 0], sizes = [16, 24, 128], strides = [1, 1, 1]} : vector<20x24x128xf32> to vector<16x24x128xf32>
    %91 = vector.extract_strided_slice %89 {offsets = [2, 0, 0], sizes = [16, 24, 128], strides = [1, 1, 1]} : vector<20x24x128xf32> to vector<16x24x128xf32>
    %92 = vector.extract_strided_slice %89 {offsets = [4, 0, 0], sizes = [16, 24, 128], strides = [1, 1, 1]} : vector<20x24x128xf32> to vector<16x24x128xf32>
    %93 = arith.truncf %90 : vector<16x24x128xf32> to vector<16x24x128xbf16>
    %94 = vector.shape_cast %93 : vector<16x24x128xbf16> to vector<384x128xbf16>
    %95 = arith.truncf %91 : vector<16x24x128xf32> to vector<16x24x128xbf16>
    %96 = vector.shape_cast %95 : vector<16x24x128xbf16> to vector<384x128xbf16>
    %97 = arith.truncf %92 : vector<16x24x128xf32> to vector<16x24x128xbf16>
    %98 = vector.shape_cast %97 : vector<16x24x128xbf16> to vector<384x128xbf16>
    %99 = tpu.concatenate %94, %96, %98 in 1 : vector<384x128xbf16>, vector<384x128xbf16>, vector<384x128xbf16> -> vector<384x384xbf16>
    %c0_39 = arith.constant 0 : index
    %c0_40 = arith.constant 0 : index
    %100 = vector.load %arg7[%c0_39, %c0_40] : memref<384x128xbf16, #tpu.memory_space<vmem>>, vector<384x128xbf16>
    %cst_41 = arith.constant dense<0.000000e+00> : vector<384x128xf32>
    %101 = tpu.matmul %99, %100, %cst_41 {dimension_numbers = #tpu.dot_dimension_numbers<[1], [0], [0], [1], [0, 0, 1, 1], [], []>} : vector<384x384xbf16>, vector<384x128xbf16>, vector<384x128xf32> -> vector<384x128xf32>
    %c0_42 = arith.constant 0 : index
    %c0_43 = arith.constant 0 : index
    %102 = vector.load %arg8[%c0_42, %c0_43] : memref<1x128xf32, #tpu.memory_space<vmem>>, vector<1x128xf32>
    %103 = vector.broadcast %102 : vector<1x128xf32> to vector<384x128xf32>
    %104 = arith.addf %101, %103 : vector<384x128xf32>
    %105 = vector.shape_cast %104 : vector<384x128xf32> to vector<16x24x128xf32>
    %cst_44 = arith.constant 0.000000e+00 : f32
    %106 = vector.broadcast %cst_44 : f32 to vector<16x24x128xf32>
    %107 = arith.maximumf %105, %106 : vector<16x24x128xf32>
    %108 = vector.broadcast %31 : vector<1x24x1xf32> to vector<16x24x128xf32>
    %109 = arith.mulf %107, %108 : vector<16x24x128xf32>
    %110 = vector.extract_strided_slice %109 {offsets = [0, 0, 0], sizes = [16, 16, 128], strides = [1, 1, 1]} : vector<16x24x128xf32> to vector<16x16x128xf32>
    %111 = vector.extract_strided_slice %109 {offsets = [0, 2, 0], sizes = [16, 16, 128], strides = [1, 1, 1]} : vector<16x24x128xf32> to vector<16x16x128xf32>
    %112 = vector.extract_strided_slice %109 {offsets = [0, 4, 0], sizes = [16, 16, 128], strides = [1, 1, 1]} : vector<16x24x128xf32> to vector<16x16x128xf32>
    %113 = arith.truncf %110 : vector<16x16x128xf32> to vector<16x16x128xbf16>
    %114 = vector.shape_cast %113 : vector<16x16x128xbf16> to vector<256x128xbf16>
    %115 = arith.truncf %111 : vector<16x16x128xf32> to vector<16x16x128xbf16>
    %116 = vector.shape_cast %115 : vector<16x16x128xbf16> to vector<256x128xbf16>
    %117 = arith.truncf %112 : vector<16x16x128xf32> to vector<16x16x128xbf16>
    %118 = vector.shape_cast %117 : vector<16x16x128xbf16> to vector<256x128xbf16>
    %119 = tpu.concatenate %114, %116, %118 in 1 : vector<256x128xbf16>, vector<256x128xbf16>, vector<256x128xbf16> -> vector<256x384xbf16>
    %c0_45 = arith.constant 0 : index
    %c0_46 = arith.constant 0 : index
    %120 = vector.load %arg9[%c0_45, %c0_46] : memref<384x128xbf16, #tpu.memory_space<vmem>>, vector<384x128xbf16>
    %cst_47 = arith.constant dense<0.000000e+00> : vector<256x128xf32>
    %121 = tpu.matmul %119, %120, %cst_47 {dimension_numbers = #tpu.dot_dimension_numbers<[1], [0], [0], [1], [0, 0, 1, 1], [], []>} : vector<256x384xbf16>, vector<384x128xbf16>, vector<256x128xf32> -> vector<256x128xf32>
    %c0_48 = arith.constant 0 : index
    %c0_49 = arith.constant 0 : index
    %122 = vector.load %arg10[%c0_48, %c0_49] : memref<1x128xf32, #tpu.memory_space<vmem>>, vector<1x128xf32>
    %123 = vector.broadcast %122 : vector<1x128xf32> to vector<256x128xf32>
    %124 = arith.addf %121, %123 : vector<256x128xf32>
    %125 = vector.shape_cast %124 : vector<256x128xf32> to vector<16x16x128xf32>
    %c0_i32_50 = arith.constant 0 : i32
    %c0_i32_51 = arith.constant 0 : i32
    %c0_i32_52 = arith.constant 0 : i32
    %126 = tpu.memref_slice %arg12[%0, %c0_i32_50, %c0_i32_51, %c0_i32_52] : memref<2x22x32x128xf32, #tpu.memory_space<vmem>> -> memref<1x22x32x128xf32, #tpu.memory_space<vmem>>
    %127 = tpu.memref_squeeze %126 : memref<1x22x32x128xf32, #tpu.memory_space<vmem>> -> memref<22x32x128xf32, #tpu.memory_space<vmem>>
    %c3 = arith.constant 3 : index
    %c0_53 = arith.constant 0 : index
    %c0_54 = arith.constant 0 : index
    %128 = vector.load %127[%c3, %c0_53, %c0_54] : memref<22x32x128xf32, #tpu.memory_space<vmem>>, vector<16x32x128xf32>
    %129 = vector.extract_strided_slice %128 {offsets = [0, 3, 0], sizes = [16, 16, 128], strides = [1, 1, 1]} : vector<16x32x128xf32> to vector<16x16x128xf32>
    %130 = arith.addf %125, %129 : vector<16x16x128xf32>
    %cst_55 = arith.constant 0.000000e+00 : f32
    %131 = vector.broadcast %cst_55 : f32 to vector<16x16x128xf32>
    %132 = arith.maximumf %130, %131 : vector<16x16x128xf32>
    %c0_56 = arith.constant 0 : index
    %c0_57 = arith.constant 0 : index
    %c0_58 = arith.constant 0 : index
    %c0_59 = arith.constant 0 : index
    %133 = vector.load %arg11[%c0_56, %c0_57, %c0_58, %c0_59] : memref<1x16x16x128xf32, #tpu.memory_space<vmem>>, vector<1x16x16x128xf32>
    %134 = vector.shape_cast %133 : vector<1x16x16x128xf32> to vector<16x16x128xf32>
    %135 = vector.shape_cast %132 : vector<16x16x128xf32> to vector<1x16x16x128xf32>
    tpu.vector_store %arg11[%c0_56, %c0_57, %c0_58, %c0_59], %135 {strides = array<i32>} : memref<1x16x16x128xf32, #tpu.memory_space<vmem>>, vector<1x16x16x128xf32>,
    return
  }
  func.func @transform_1(%arg0: i32, %arg1: i32) -> (i32, i32) {
    %c0_i32 = arith.constant 0 : i32
    %c0_i32_0 = arith.constant 0 : i32
    %c0_i32_1 = arith.constant 0 : i32
    return %c0_i32, %c0_i32_0 : i32, i32
  }
  func.func @transform_2(%arg0: i32, %arg1: i32) -> (i32, i32) {
    %c0_i32 = arith.constant 0 : i32
    %c0_i32_0 = arith.constant 0 : i32
    %c0_i32_1 = arith.constant 0 : i32
    return %c0_i32, %c0_i32_0 : i32, i32
  }
  func.func @transform_3(%arg0: i32, %arg1: i32) -> (i32, i32) {
    %c0_i32 = arith.constant 0 : i32
    %c0_i32_0 = arith.constant 0 : i32
    %c0_i32_1 = arith.constant 0 : i32
    return %c0_i32, %c0_i32_0 : i32, i32
  }
  func.func @transform_4(%arg0: i32, %arg1: i32) -> (i32, i32) {
    %c0_i32 = arith.constant 0 : i32
    %c0_i32_0 = arith.constant 0 : i32
    %c0_i32_1 = arith.constant 0 : i32
    return %c0_i32, %c0_i32_0 : i32, i32
  }
  func.func @transform_5(%arg0: i32, %arg1: i32) -> (i32, i32) {
    %c0_i32 = arith.constant 0 : i32
    %c0_i32_0 = arith.constant 0 : i32
    %c0_i32_1 = arith.constant 0 : i32
    return %c0_i32, %c0_i32_0 : i32, i32
  }
  func.func @transform_6(%arg0: i32, %arg1: i32) -> (i32, i32) {
    %c0_i32 = arith.constant 0 : i32
    %c0_i32_0 = arith.constant 0 : i32
    %c0_i32_1 = arith.constant 0 : i32
    return %c0_i32, %c0_i32_0 : i32, i32
  }
  func.func @transform_7(%arg0: i32, %arg1: i32) -> (i32, i32) {
    %c0_i32 = arith.constant 0 : i32
    %c0_i32_0 = arith.constant 0 : i32
    %c0_i32_1 = arith.constant 0 : i32
    return %c0_i32, %c0_i32_0 : i32, i32
  }
  func.func @transform_8(%arg0: i32, %arg1: i32) -> (i32, i32) {
    %c0_i32 = arith.constant 0 : i32
    %c0_i32_0 = arith.constant 0 : i32
    %c0_i32_1 = arith.constant 0 : i32
    return %c0_i32, %c0_i32_0 : i32, i32
  }
  func.func @transform_9(%arg0: i32, %arg1: i32) -> (i32, i32, i32, i32) {
    %c0_i32 = arith.constant 0 : i32
    %c0_i32_0 = arith.constant 0 : i32
    %c0_i32_1 = arith.constant 0 : i32
    return %arg0, %arg1, %c0_i32, %c0_i32_0 : i32, i32, i32, i32
  }
}

</mosaic_0001>

<bundles_post_ra>
// kernel: bottleneck_1d_forward.1
= control target key start
LH: loop header
LB: loop body
LE: loop exit
PB: predicated region body
PF: predicated region fallthrough
CT: control target
= control target key end

     0   :  { %14 = vsyncpa [#allocation5], 0  ;;  %s12106_s0 = inlined_call_operand.vmem [shape: f32[44,32,128], index: 0, kind: input, shape index: {}]   ;;  %s12107_s1 = inlined_call_operand.vmem [shape: bf16[384,128], index: 1, kind: input, shape index: {}]   ;;  %s12108_s2 = inlined_call_operand.vmem [shape: f32[1,128], index: 2, kind: input, shape index: {}]   ;;  %s12109_s3 = inlined_call_operand.vmem [shape: bf16[384,128], index: 3, kind: input, shape index: {}]   ;;  %s12110_s4 = inlined_call_operand.vmem [shape: f32[1,128], index: 4, kind: input, shape index: {}]   ;;  %s12111_s5 = inlined_call_operand.vmem [shape: bf16[384,128], index: 5, kind: input, shape index: {}]   ;;  %s12112_s6 = inlined_call_operand.vmem [shape: f32[1,128], index: 6, kind: input, shape index: {}]   ;;  %s12113_s7 = inlined_call_operand.vmem [shape: bf16[384,128], index: 7, kind: input, shape index: {}]   ;;  %s12114_s8 = inlined_call_operand.vmem [shape: f32[1,128], index: 8, kind: input, shape index: {}]   ;;  %s12115_s9 = inlined_call_operand.hbm [shape: f32[2,16,16,128], index: 9, kind: output, shape index: {}]  }
   0x1   :  { %16 = vsyncpa [#allocation5 + $0x1], 0  ;;  %s8724_s30 = smov 0   ;;  %s8726_s10 = smov 0  }
   0x2   :  { %s8728_s11 = smov 0   ;;  %s8730_s12 = smov 0  }
   0x3   :  { %s8732_s13 = smov 0   ;;  %s8734_s14 = smov 0  }
   0x4 LB: > { %s7577_s15 = sadd.s32 4294967295, %s8669_s14   ;;  %s7578_s16 = sadd.s32 4294967294, %s8669_s14   ;;  %s8669_s14 = sphi %s8734_s14, %s22_s14   ;;  %s8665_s13 = sphi %s8732_s13, %s12696_s13   ;;  %s8661_s12 = sphi %s8730_s12, %s12695_s12   ;;  %s8657_s11 = sphi %s8728_s11, %s12694_s11   ;;  %s8653_s10 = sphi %s8726_s10, %s12693_s10   ;;  %s8649_s30 = sphi %s8724_s30, %s12692_s30  }
   0x5   : > { %s34_s17 = sadd.s32 1, %s8665_s13  ;;  %s211_s18 = sadd.s32 1, %s8657_s11 }
   0x6   : > { %p36_p0 = scmp.ge.s32.totalorder %s34_s17, 2  ;;  %p221_p1 = scmp.ne.s32.totalorder %s8657_s11, %s8653_s10 }
   0x7   : > { %p222_p2 = scmp.eq.s32.totalorder %s7577_s15, 1  ;;  %p227_p3 = scmp.ne.s32.totalorder %s8653_s10, %s8649_s30 }
   0x8   : > { %s12698_s17 = smov (%p36_p0, %s34_s17), 0  ;;  %p228_p5 = scmp.eq.s32.totalorder %s7578_s16, 1 }
   0x9   : > { %p8764_p4 = por %p222_p2, %p221_p1  ;;  %s206_s20 = ssub.s32 %s8665_s13, %s12698_s17 }
   0xa   : > { %p7580_p6 = scmp.ge.s32.totalorder %s8669_s14, 1  ;;  %p209_p7 = scmp.eq.s32.totalorder %s206_s20, 0 }
   0xb   : > { %p8771_p8 = por %p228_p5, %p227_p3  ;;  %p270_p9 = scmp.lt.s32.totalorder %s8669_s14, 3 }
   0xc   : > { %s8777_s22 = scalar_select %p209_p7, %s8657_s11, %s211_s18  }
   0xd   : > { %p271_p10 = pnand %p7580_p6, %p270_p9 }
   0xf   : > { %274 = sbr.rel (%p271_p10) target bundleno = 2108 (0x83c), region = 52 }
  0x14   : > { %s12134_s23 = sand.u32 1, %s8653_s10   ;;  %s7582_s24 = smul.u32 704, %s8661_s12 }
  0x15   : > { %s8783_s25 = sshll.u32 %s12134_s23, 8 }
  0x16   : > { %s8788_s28 = scalar_lea.vmem %s12106_s0, %s7582_s24  ;;  %s9053_s29 = scalar_lea.vmem [#allocation4], %s8783_s25 }
  0x17   : > { %v8791_v0 = vld [vmem:[%s8788_s28] sm:$0xff]  ;;  %v8794_v1 = vld [vmem:[%s8788_s28 + $0x8] sm:$0xff]  ;;  %v8797_v2 = vld [vmem:[%s8788_s28 + $0x10] sm:$0xff] }
  0x18   : > { %v8800_v3 = vld [vmem:[%s8788_s28 + $0x18] sm:$0xff]  ;;  %v8803_v4 = vld [vmem:[%s8788_s28 + $0x20] sm:$0xff]  ;;  %v8806_v5 = vld [vmem:[%s8788_s28 + $0x28] sm:$0xff] }
  0x19   : > { %v8809_v6 = vld [vmem:[%s8788_s28 + $0x30] sm:$0xff]  ;;  %v8812_v7 = vld [vmem:[%s8788_s28 + $0x38] sm:$0xff]  ;;  %v8815_v8 = vld [vmem:[%s8788_s28 + $0x40] sm:$0xff] }
  0x1a   : > { %v8818_v9 = vld [vmem:[%s8788_s28 + $0x48] sm:$0xff]  ;;  %v8821_v10 = vld [vmem:[%s8788_s28 + $0x50] sm:$0xff]  ;;  %v8824_v11 = vld [vmem:[%s8788_s28 + $0x58] sm:$0xff] }
  0x1b   : > { %v8827_v12 = vld [vmem:[%s8788_s28 + $0x60] sm:$0xff]  ;;  %v8830_v13 = vld [vmem:[%s8788_s28 + $0x68] sm:$0xff]  ;;  %v8833_v14 = vld [vmem:[%s8788_s28 + $0x70] sm:$0xff] }
  0x1c   : > { %12226 = vst [vmem:[#allocation10_spill] sm:$0xff] %v8827_v12  ;;  %v8836_v15 = vld [vmem:[%s8788_s28 + $0x78] sm:$0xff]  ;;  %v8839_v16 = vld [vmem:[%s8788_s28 + $0x80] sm:$0xff]  ;;  %v8842_v17 = vld [vmem:[%s8788_s28 + $0x88] sm:$0xff] }
  0x1d   : > { %12227 = vst [vmem:[#allocation11_spill] sm:$0xff] %v8830_v13  ;;  %v8845_v18 = vld [vmem:[%s8788_s28 + $0x90] sm:$0xff]  ;;  %v8848_v19 = vld [vmem:[%s8788_s28 + $0x98] sm:$0xff]  ;;  %v8851_v20 = vld [vmem:[%s8788_s28 + $0xa0] sm:$0xff] }
  0x1e   : > { %12228 = vst [vmem:[#allocation12_spill] sm:$0xff] %v8833_v14  ;;  %v8854_v21 = vld [vmem:[%s8788_s28 + $0xa8] sm:$0xff]  ;;  %v8857_v22 = vld [vmem:[%s8788_s28 + $0xb0] sm:$0xff]  ;;  %v8860_v23 = vld [vmem:[%s8788_s28 + $0xb8] sm:$0xff] }
  0x1f   : > { %12229 = vst [vmem:[#allocation13_spill] sm:$0xff] %v8839_v16  ;;  %v8863_v24 = vld [vmem:[%s8788_s28 + $0xc0] sm:$0xff]  ;;  %v8866_v25 = vld [vmem:[%s8788_s28 + $0xc8] sm:$0xff]  ;;  %v8869_v26 = vld [vmem:[%s8788_s28 + $0xd0] sm:$0xff] }
  0x20   : > { %12230 = vst [vmem:[#allocation14_spill] sm:$0xff] %v8842_v17  ;;  %v8872_v27 = vld [vmem:[%s8788_s28 + $0xd8] sm:$0xff]  ;;  %v8875_v28 = vld [vmem:[%s8788_s28 + $0xe0] sm:$0xff]  ;;  %v8878_v29 = vld [vmem:[%s8788_s28 + $0xe8] sm:$0xff] }
  0x21   : > { %12231 = vst [vmem:[#allocation15_spill] sm:$0xff] %v8845_v18  ;;  %v8881_v30 = vld [vmem:[%s8788_s28 + $0xf0] sm:$0xff]  ;;  %v8884_v31 = vld [vmem:[%s8788_s28 + $0xf8] sm:$0xff]  ;;  %v8887_v32 = vld [vmem:[%s8788_s28 + $0x100] sm:$0xff] }
  0x22   : > { %12232 = vst [vmem:[#allocation16_spill] sm:$0xff] %v8851_v20  ;;  %v8890_v33 = vld [vmem:[%s8788_s28 + $0x108] sm:$0xff]  ;;  %v8893_v34 = vld [vmem:[%s8788_s28 + $0x110] sm:$0xff]  ;;  %v8896_v35 = vld [vmem:[%s8788_s28 + $0x118] sm:$0xff] }
  0x23   : > { %12233 = vst [vmem:[#allocation17_spill] sm:$0xff] %v8854_v21  ;;  %v8899_v36 = vld [vmem:[%s8788_s28 + $0x120] sm:$0xff]  ;;  %v8902_v37 = vld [vmem:[%s8788_s28 + $0x128] sm:$0xff]  ;;  %v8905_v38 = vld [vmem:[%s8788_s28 + $0x130] sm:$0xff] }
  0x24   : > { %12234 = vst [vmem:[#allocation18_spill] sm:$0xff] %v8857_v22  ;;  %v8908_v39 = vld [vmem:[%s8788_s28 + $0x138] sm:$0xff]  ;;  %v8911_v40 = vld [vmem:[%s8788_s28 + $0x140] sm:$0xff]  ;;  %v8914_v41 = vld [vmem:[%s8788_s28 + $0x148] sm:$0xff] }
  0x25   : > { %12235 = vst [vmem:[#allocation19_spill] sm:$0xff] %v8863_v24  ;;  %v8917_v42 = vld [vmem:[%s8788_s28 + $0x150] sm:$0xff]  ;;  %v8920_v43 = vld [vmem:[%s8788_s28 + $0x158] sm:$0xff]  ;;  %v8923_v44 = vld [vmem:[%s8788_s28 + $0x160] sm:$0xff] }
  0x26   : > { %12236 = vst [vmem:[#allocation20_spill] sm:$0xff] %v8866_v25  ;;  %v8926_v45 = vld [vmem:[%s8788_s28 + $0x168] sm:$0xff]  ;;  %v8929_v46 = vld [vmem:[%s8788_s28 + $0x170] sm:$0xff]  ;;  %v8932_v47 = vld [vmem:[%s8788_s28 + $0x178] sm:$0xff] }
  0x27   : > { %12237 = vst [vmem:[#allocation21_spill] sm:$0xff] %v8869_v26  ;;  %v8935_v48 = vld [vmem:[%s8788_s28 + $0x180] sm:$0xff]  ;;  %v8938_v49 = vld [vmem:[%s8788_s28 + $0x188] sm:$0xff]  ;;  %v8941_v50 = vld [vmem:[%s8788_s28 + $0x190] sm:$0xff] }
  0x28   : > { %12238 = vst [vmem:[#allocation22_spill] sm:$0xff] %v8875_v28  ;;  %v8944_v51 = vld [vmem:[%s8788_s28 + $0x198] sm:$0xff]  ;;  %v8947_v52 = vld [vmem:[%s8788_s28 + $0x1a0] sm:$0xff]  ;;  %v8950_v53 = vld [vmem:[%s8788_s28 + $0x1a8] sm:$0xff] }
  0x29   : > { %12239 = vst [vmem:[#allocation23_spill] sm:$0xff] %v8878_v29  ;;  %v8953_v54 = vld [vmem:[%s8788_s28 + $0x1b0] sm:$0xff]  ;;  %v8956_v55 = vld [vmem:[%s8788_s28 + $0x1b8] sm:$0xff]  ;;  %v8959_v56 = vld [vmem:[%s8788_s28 + $0x1c0] sm:$0xff] }
  0x2a   : > { %12240 = vst [vmem:[#allocation24_spill] sm:$0xff] %v8881_v30  ;;  %v8962_v57 = vld [vmem:[%s8788_s28 + $0x1c8] sm:$0xff]  ;;  %v8965_v58 = vld [vmem:[%s8788_s28 + $0x1d0] sm:$0xff]  ;;  %v8968_v59 = vld [vmem:[%s8788_s28 + $0x1d8] sm:$0xff] }
  0x2b   : > { %12241 = vst [vmem:[#allocation25_spill] sm:$0xff] %v8887_v32  ;;  %v8971_v60 = vld [vmem:[%s8788_s28 + $0x1e0] sm:$0xff]  ;;  %v8974_v61 = vld [vmem:[%s8788_s28 + $0x1e8] sm:$0xff]  ;;  %v8977_v62 = vld [vmem:[%s8788_s28 + $0x1f0] sm:$0xff] }
  0x2c   : > { %12242 = vst [vmem:[#allocation26_spill] sm:$0xff] %v8890_v33  ;;  %v8980_v63 = vld [vmem:[%s8788_s28 + $0x1f8] sm:$0xff] }
  0x2d   : > { %12243 = vst [vmem:[#allocation27_spill] sm:$0xff] %v8893_v34 }
  0x2e   : > { %12244 = vst [vmem:[#allocation28_spill] sm:$0xff] %v8899_v36 }
  0x2f   : > { %12245 = vst [vmem:[#allocation29_spill] sm:$0xff] %v8902_v37 }
  0x30   : > { %12246 = vst [vmem:[#allocation30_spill] sm:$0xff] %v8905_v38 }
  0x31   : > { %12247 = vst [vmem:[#allocation31_spill] sm:$0xff] %v8911_v40 }
  0x32   : > { %12248 = vst [vmem:[#allocation32_spill] sm:$0xff] %v8914_v41 }
  0x33   : > { %12249 = vst [vmem:[#allocation33_spill] sm:$0xff] %v8917_v42 }
  0x34   : > { %12250 = vst [vmem:[#allocation34_spill] sm:$0xff] %v8923_v44 }
  0x35   : > { %12251 = vst [vmem:[#allocation35_spill] sm:$0xff] %v8926_v45 }
  0x36   : > { %12252 = vst [vmem:[#allocation36_spill] sm:$0xff] %v8929_v46 }
  0x37   : > { %12253 = vst [vmem:[#allocation37_spill] sm:$0xff] %v8932_v47 }
  0x38   : > { %12254 = vst [vmem:[#allocation38_spill] sm:$0xff] %v8935_v48 }
  0x39   : > { %12255 = vst [vmem:[#allocation39_spill] sm:$0xff] %v8938_v49 }
  0x3a   : > { %12256 = vst [vmem:[#allocation40_spill] sm:$0xff] %v8941_v50  ;;  %v9050_v50 = vld [vmem:[%s8788_s28 + $0x2b8] sm:$0xff] }
  0x3b   : > { %12257 = vst [vmem:[#allocation41_spill] sm:$0xff] %v8944_v51  ;;  %v9047_v51 = vld [vmem:[%s8788_s28 + $0x2b0] sm:$0xff] }
  0x3c   : > { %12258 = vst [vmem:[#allocation42_spill] sm:$0xff] %v8947_v52  ;;  %v9044_v52 = vld [vmem:[%s8788_s28 + $0x2a8] sm:$0xff] }
  0x3d   : > { %12259 = vst [vmem:[#allocation43_spill] sm:$0xff] %v8950_v53  ;;  %v9035_v53 = vld [vmem:[%s8788_s28 + $0x290] sm:$0xff] }
  0x3e   : > { %12260 = vst [vmem:[#allocation44_spill] sm:$0xff] %v8953_v54  ;;  %v9026_v54 = vld [vmem:[%s8788_s28 + $0x278] sm:$0xff] }
  0x3f   : > { %12261 = vst [vmem:[#allocation45_spill] sm:$0xff] %v8956_v55  ;;  %v9017_v55 = vld [vmem:[%s8788_s28 + $0x260] sm:$0xff] }
  0x40   : > { %12262 = vst [vmem:[#allocation46_spill] sm:$0xff] %v8959_v56  ;;  %v9013_v56 = vld [vmem:[%s8788_s28 + $0x250] sm:$0xff] }
  0x41   : > { %12263 = vst [vmem:[#allocation47_spill] sm:$0xff] %v8962_v57  ;;  %v8983_v57 = vld [vmem:[%s8788_s28 + $0x200] sm:$0xff] }
  0x42   : > { %12264 = vst [vmem:[#allocation48_spill] sm:$0xff] %v8965_v58  ;;  %v8986_v58 = vld [vmem:[%s8788_s28 + $0x208] sm:$0xff] }
  0x43   : > { %12265 = vst [vmem:[#allocation49_spill] sm:$0xff] %v8968_v59  ;;  %v8989_v59 = vld [vmem:[%s8788_s28 + $0x210] sm:$0xff] }
  0x44   : > { %12266 = vst [vmem:[#allocation50_spill] sm:$0xff] %v8971_v60  ;;  %v8992_v60 = vld [vmem:[%s8788_s28 + $0x218] sm:$0xff] }
  0x45   : > { %12267 = vst [vmem:[#allocation51_spill] sm:$0xff] %v8974_v61  ;;  %v8995_v61 = vld [vmem:[%s8788_s28 + $0x220] sm:$0xff] }
  0x46   : > { %12268 = vst [vmem:[#allocation52_spill] sm:$0xff] %v8977_v62  ;;  %v8998_v62 = vld [vmem:[%s8788_s28 + $0x228] sm:$0xff] }
  0x47   : > { %12269 = vst [vmem:[#allocation53_spill] sm:$0xff] %v8980_v63  ;;  %v9001_v63 = vld [vmem:[%s8788_s28 + $0x230] sm:$0xff] }
  0x48   : > { %12270 = vst [vmem:[#allocation54_spill] sm:$0xff] %v8983_v57  ;;  %v9004_v57 = vld [vmem:[%s8788_s28 + $0x238] sm:$0xff] }
  0x49   : > { %12271 = vst [vmem:[#allocation55_spill] sm:$0xff] %v8986_v58  ;;  %v9007_v58 = vld [vmem:[%s8788_s28 + $0x240] sm:$0xff] }
  0x4a   : > { %12272 = vst [vmem:[#allocation56_spill] sm:$0xff] %v8989_v59  ;;  %v9010_v59 = vld [vmem:[%s8788_s28 + $0x248] sm:$0xff] }
  0x4b   : > { %12273 = vst [vmem:[#allocation57_spill] sm:$0xff] %v8992_v60  ;;  %v468_v60 = vld [vmem:[%s8788_s28 + $0x258] sm:$0xff] }
  0x4c   : > { %12274 = vst [vmem:[#allocation58_spill] sm:$0xff] %v8995_v61  ;;  %v9020_v61 = vld [vmem:[%s8788_s28 + $0x268] sm:$0xff] }
  0x4d   : > { %12275 = vst [vmem:[#allocation59_spill] sm:$0xff] %v8998_v62  ;;  %v9023_v62 = vld [vmem:[%s8788_s28 + $0x270] sm:$0xff] }
  0x4e   : > { %12276 = vst [vmem:[#allocation60_spill] sm:$0xff] %v9001_v63  ;;  %v9029_v63 = vld [vmem:[%s8788_s28 + $0x280] sm:$0xff] }
  0x4f   : > { %12277 = vst [vmem:[#allocation61_spill] sm:$0xff] %v9004_v57  ;;  %v9032_v57 = vld [vmem:[%s8788_s28 + $0x288] sm:$0xff] }
  0x50   : > { %12278 = vst [vmem:[#allocation62_spill] sm:$0xff] %v9007_v58  ;;  %v9038_v58 = vld [vmem:[%s8788_s28 + $0x298] sm:$0xff] }
  0x51   : > { %12279 = vst [vmem:[#allocation63_spill] sm:$0xff] %v9010_v59  ;;  %v9041_v59 = vld [vmem:[%s8788_s28 + $0x2a0] sm:$0xff] }
  0x52   : > { %12280 = vst [vmem:[#allocation64_spill] sm:$0xff] %v9013_v56 }
  0x53   : > { %12281 = vst [vmem:[#allocation65_spill] sm:$0xff] %v9029_v63 }
  0x54   : > { %12282 = vst [vmem:[#allocation66_spill] sm:$0xff] %v9032_v57 }
  0x55   : > { %12283 = vst [vmem:[#allocation67_spill] sm:$0xff] %v9035_v53 }
  0x56   : > { %12284 = vst [vmem:[#allocation68_spill] sm:$0xff] %v9038_v58 }
  0x57   : > { %12285 = vst [vmem:[#allocation69_spill] sm:$0xff] %v9041_v59 }
  0x58   : > { %12286 = vst [vmem:[#allocation70_spill] sm:$0xff] %v9044_v52 }
  0x59   : > { %12287 = vst [vmem:[#allocation71_spill] sm:$0xff] %v9047_v51 }
  0x5a   : > { %12288 = vst [vmem:[#allocation72_spill] sm:$0xff] %v9050_v50 }
  0x5b   : > { %499 = vsyncadd [#allocation3], 11264 }
  0x5c   : > { %8641 = dma.done.wait [#allocation3], 11264 }
  0x5d   : > { %8642 = vsyncadd [#allocation3], 4294956032  ;;  %v8422_v57 = vld [vmem:[%s12107_s1 + $0x38] sm:$0xff]  ;;  %v8421_v59 = vld [vmem:[%s12107_s1 + $0x30] sm:$0xff]  ;;  %v1118_v58 = vpack.c.bf16 %v8794_v1, %v8794_v1  ;;  %v1191_v53 = vpack.c.bf16 %v9013_v56, %v9013_v56  ;;  %v1192_v63 = vpack.c.bf16 %v468_v60, %v468_v60  ;;  %v1147_v56 = vpack.c.bf16 %v8881_v30, %v8881_v30  ;;  %s8511_s24 = sshll.u32 %s8661_s12, 8  ;;  %s7478_s12 = sshll.u32 %s9053_s29, 4  ;;  %s7479_s12 = int_to_ptr.vmem [resolvable:$true] %s7478_s12 }
  0x5e   : > { %2273 = vmatpush.bf16.msra.mxu0 %v8422_v57  ;;  %8512 = vmatpush.bf16.msra.mxu1 %v8422_v57  ;;  %v8438_v51 = vld [vmem:[%s12107_s1 + $0xb8] sm:$0xff]  ;;  %v8437_v50 = vld [vmem:[%s12107_s1 + $0xb0] sm:$0xff]  ;;  %v8420_v52 = vld [vmem:[%s12107_s1 + $0x28] sm:$0xff]  ;;  %vm3903_vm1 = vcmask 1042432   ;;  %vm3904_vm2 = vcmask 1046532   ;;  %vm6386_vm9 = vcmask 1041408   ;;  %s7477_s27 = scalar_lea.hbm %s12115_s9, %s8511_s24 }
  0x5f   : > { %2691 = vmatpush.bf16.msra.mxu2 %v8438_v51  ;;  %v8436_v57 = vld [vmem:[%s12107_s1 + $0xa8] sm:$0xff]  ;;  %v8419_v51 = vld [vmem:[%s12107_s1 + $0x20] sm:$0xff]  ;;  %v1511_v48 = vunpack.c.l.b16 %v1191_v53  ;;  %v1512_v47 = vunpack.c.l.b16 %v1192_v63  ;;  %v8430_v60 = vld [vmem:[%s12107_s1 + $0x78] sm:$0xff]  ;;  %v1126_v63 = vpack.c.bf16 %v8818_v9, %v8818_v9  ;;  %v1120_v9 = vpack.c.bf16 %v8800_v3, %v8800_v3  ;;  %s7480_s23 = sshll.u32 %s7477_s27, 4  ;;  %s12691_s28 = sand.u32 1, %s8653_s10   ;;  %s7481_s23 = int_to_ptr.hbm [resolvable:$true] %s7480_s23 }
  0x60   : > { %v8415_v1 = vld [vmem:[%s12107_s1] sm:$0xff]  ;;  %v8429_v53 = vld [vmem:[%s12107_s1 + $0x70] sm:$0xff]  ;;  %v8426_v3 = vld [vmem:[%s12107_s1 + $0x58] sm:$0xff]  ;;  %vm3140_vm3 = vsmask.f32 3328  ;;  %vm6387_vm10 = vcmask 1045508  }
  0x61   : > { %vm9324_vm5 = vmor %vm3903_vm1, %vm3904_vm2  ;;  %vm3141_vm6 = vsmask.f32 7440  ;;  %vm7253_vm13 = vcmask 1044480   ;;  %s7463_s15 = scalar_lea.sflag [#allocation5], %s12691_s28  ;;  %s8603_s16 = sshra.s32 %s7481_s23, 4  ;;  %s8604_s16 = int_to_ptr.hbm [resolvable:$true] %s8603_s16 }
  0x62   : > { %2274 = vmatpush.bf16.msra.mxu0 %v8421_v59  ;;  %8513 = vmatpush.bf16.msra.mxu1 %v8421_v59  ;;  %v8418_v59 = vld [vmem:[%s12107_s1 + $0x18] sm:$0xff]  ;;  %vm9341_vm7 = vmor %vm3140_vm3, %vm3141_vm6  ;;  %s8605_s18 = scalar_lea.hbm %s8604_s16, 256  ;;  %s8609_s26 = scalar_lea.hbm %s12115_s9, 512 }
  0x63   : > { %2692 = vmatpush.bf16.msra.mxu2 %v8437_v50  ;;  %v8435_v50 = vld [vmem:[%s12107_s1 + $0xa0] sm:$0xff]  ;;  %vm11616_vm11 = vmor %vm6386_vm9, %vm6387_vm10  ;;  %p8606_p11 = scmp.ne.s32.totalorder %s8604_s16, %s8605_s18  ;;  %p8610_p0 = scmp.lt.s32.totalorder %s8604_s16, %s12115_s9 }
  0x64   : > { %p8611_p1 = scmp.lt.s32.totalorder %s8609_s26, %s8605_s18 }
  0x65   : > { %p8607_p12 = pnand %p8606_p11, %p8764_p4 }
  0x66   : > { %2275 = vmatpush.bf16.msra.mxu0 %v8420_v52  ;;  %8514 = vmatpush.bf16.msra.mxu1 %v8420_v52  ;;  %v8417_v52 = vld [vmem:[%s12107_s1 + $0x10] sm:$0xff]  ;;  %p8612_p2 = por %p8611_p1, %p8610_p0 }
  0x67   : > { %2693 = vmatpush.bf16.msra.mxu2 %v8436_v57  ;;  %v8434_v57 = vld [vmem:[%s12107_s1 + $0x98] sm:$0xff]  ;;  %p8608_p13 = pneg %p8607_p12 }
  0x69   : > { %p8613_p3 = pnand %p8612_p2, %p8608_p13 }
  0x6a   : > { %2276 = vmatpush.bf16.msra.mxu0 %v8419_v51  ;;  %8515 = vmatpush.bf16.msra.mxu1 %v8419_v51  ;;  %v1117_v51 = vpack.c.bf16 %v8791_v0, %v8791_v0  ;;  %v1438_v0 = vunpack.c.l.b16 %v1118_v58  ;;  %v1125_v58 = vpack.c.bf16 %v8815_v8, %v8815_v8  ;;  %v1119_v8 = vpack.c.bf16 %v8797_v2, %v8797_v2 }
  0x6b   : > { %2694 = vmatpush.bf16.msra.mxu2 %v8435_v50  ;;  %v8433_v50 = vld [vmem:[%s12107_s1 + $0x90] sm:$0xff] }
  0x6c   : > { %v1437_v49 = vunpack.c.l.b16 %v1117_v51  ;;  %v9109_v51 = vpack.c.b16 %v1512_v47, %v1511_v48  ;;  %v1445_v47 = vunpack.c.l.b16 %v1125_v58  ;;  %v1446_v48 = vunpack.c.l.b16 %v1126_v63 }
  0x6d   : > { %v1127_v63 = vpack.c.bf16 %v8821_v10, %v8821_v10  ;;  %v1122_v10 = vpack.c.bf16 %v8806_v5, %v8806_v5  ;;  %v1129_v5 = vpack.c.bf16 %v8827_v12, %v8827_v12 }
  0x6e   : > { %2277 = vmatpush.bf16.msra.mxu0 %v8418_v59  ;;  %8516 = vmatpush.bf16.msra.mxu1 %v8418_v59  ;;  %v8416_v59 = vld [vmem:[%s12107_s1 + $0x8] sm:$0xff] }
  0x6f   : > { %2695 = vmatpush.bf16.msra.mxu2 %v8434_v57  ;;  %v1517_v57 = vpack.c.b16 %v1438_v0, %v1437_v49  ;;  %v8431_v49 = vld [vmem:[%s12107_s1 + $0x80] sm:$0xff]  ;;  %v1193_v0 = vpack.c.bf16 %v9017_v55, %v9017_v55 }
  0x72   : > { %2278 = vmatpush.bf16.msra.mxu0 %v8417_v52  ;;  %8517 = vmatpush.bf16.msra.mxu1 %v8417_v52  ;;  %v8432_v52 = vld [vmem:[%s12107_s1 + $0x88] sm:$0xff] }
  0x73   : > { %2696 = vmatpush.bf16.msra.mxu2 %v8433_v50  ;;  %v9125_v50 = vpack.c.b16 %v1446_v48, %v1445_v47  ;;  %v1447_v47 = vunpack.c.l.b16 %v1127_v63  ;;  %v1124_v63 = vpack.c.bf16 %v8812_v7, %v8812_v7  ;;  %v1134_v7 = vpack.c.bf16 %v8842_v17, %v8842_v17 }
  0x76   : > { %2279 = vmatpush.bf16.msra.mxu0 %v8416_v59  ;;  %8518 = vmatpush.bf16.msra.mxu1 %v8416_v59  ;;  %v8428_v59 = vld [vmem:[%s12107_s1 + $0x68] sm:$0xff] }
  0x77   : > { %2697 = vmatpush.bf16.msra.mxu2 %v8432_v52  ;;  %v1439_v52 = vunpack.c.l.b16 %v1119_v8 }
  0x7a   : > { %2280 = vmatpush.bf16.msra.mxu0 %v8415_v1  ;;  %8519 = vmatpush.bf16.msra.mxu1 %v8415_v1  ;;  %v1194_v1 = vpack.c.bf16 %v9020_v61, %v9020_v61  ;;  %v8425_v61 = vld [vmem:[%s12107_s1 + $0x50] sm:$0xff] }
  0x7b   : > { %2698 = vmatpush.bf16.msra.mxu2 %v8431_v49  ;;  %v1128_v49 = vpack.c.bf16 %v8824_v11, %v8824_v11  ;;  %v1195_v11 = vpack.c.bf16 %v9023_v62, %v9023_v62  ;;  %v1449_v62 = vunpack.c.l.b16 %v1129_v5 }
  0x7c   : > { %v1514_v2 = vunpack.c.l.b16 %v1194_v1  ;;  %v8423_v1 = vld [vmem:[%s12107_s1 + $0x40] sm:$0xff] }
  0x7d   : > { %2281 = vmatmul.bf16.vlgmr.msra.gmra.mxu0 %v1517_v57  ;;  %2466 = vmatmul.bf16.vlgmr.msra.gmra.mxu1 %v9109_v51  ;;  %v1440_v57 = vunpack.c.l.b16 %v1120_v9  ;;  %v1448_v48 = vunpack.c.l.b16 %v1128_v49  ;;  %v1121_v9 = vpack.c.bf16 %v8803_v4, %v8803_v4 }
  0x7e   : > { %2482 = vmatpush.bf16.msrb.mxu1 %v8430_v60  ;;  %2699 = vmatmul.bf16.vlgmr.msra.gmra.mxu2 %v9125_v50  ;;  %v8427_v60 = vld [vmem:[%s12107_s1 + $0x60] sm:$0xff] }
  0x7f   : > { %v1518_v55 = vpack.c.b16 %v1440_v57, %v1439_v52  ;;  %v1522_v8 = vpack.c.b16 %v1448_v48, %v1447_v47  ;;  %v1442_v52 = vunpack.c.l.b16 %v1122_v10  ;;  %v1515_v57 = vunpack.c.l.b16 %v1195_v11 }
  0x80   : > { %v1444_v47 = vunpack.c.l.b16 %v1124_v63  ;;  %v1140_v63 = vpack.c.bf16 %v8860_v23, %v8860_v23  ;;  %v8446_v23 = vld [vmem:[%s12109_s3 + $0x38] sm:$0xff] }
  0x81   : > { %4662 = vmatpush.bf16.msra.mxu3 %v8446_v23 }
  0x82   : > { %2483 = vmatpush.bf16.msrb.mxu1 %v8429_v53  ;;  %v1513_v53 = vunpack.c.l.b16 %v1193_v0  ;;  %v1196_v0 = vpack.c.bf16 %v9026_v54, %v9026_v54  ;;  %v1130_v54 = vpack.c.bf16 %v8830_v13, %v8830_v13 }
  0x84   : > { %v9142_v58 = vpack.c.b16 %v1514_v2, %v1513_v53  ;;  %v1516_v53 = vunpack.c.l.b16 %v1196_v0 }
  0x86   : > { %2484 = vmatpush.bf16.msrb.mxu1 %v8428_v59  ;;  %v8424_v59 = vld [vmem:[%s12107_s1 + $0x48] sm:$0xff]  ;;  %v9166_v2 = vpack.c.b16 %v1516_v53, %v1515_v57  ;;  %v1136_v57 = vpack.c.bf16 %v8848_v19, %v8848_v19 }
  0x8a   : > { %2485 = vmatpush.bf16.msrb.mxu1 %v8427_v60  ;;  %v1441_v60 = vunpack.c.l.b16 %v1121_v9  ;;  %v1132_v9 = vpack.c.bf16 %v8836_v15, %v8836_v15  ;;  %v1135_v15 = vpack.c.bf16 %v8845_v18, %v8845_v18 }
  0x8c   : > { %v1519_v4 = vpack.c.b16 %v1442_v52, %v1441_v60  ;;  %v1452_v11 = vunpack.c.l.b16 %v1132_v9  ;;  %v1454_v60 = vunpack.c.l.b16 %v1134_v7  ;;  %v1455_v53 = vunpack.c.l.b16 %v1135_v15 }
  0x8d   : > { %2286 = vmatmul.bf16.gmra.mxu0 %v1518_v55  ;;  %2471 = vmatmul.bf16.gmra.mxu1 %v9142_v58  ;;  %v1141_v9 = vpack.c.bf16 %v8863_v24, %v8863_v24 }
  0x8e   : > { %2486 = vmatpush.bf16.msrb.mxu1 %v8426_v3  ;;  %2704 = vmatmul.bf16.gmra.mxu2 %v1522_v8  ;;  %v1450_v3 = vunpack.c.l.b16 %v1130_v54  ;;  %v1137_v54 = vpack.c.bf16 %v8851_v20, %v8851_v20 }
  0x90   : > { %v1523_v55 = vpack.c.b16 %v1450_v3, %v1449_v62  ;;  %v1138_v62 = vpack.c.bf16 %v8854_v21, %v8854_v21  ;;  %v1457_v3 = vunpack.c.l.b16 %v1137_v54  ;;  %v1143_v54 = vpack.c.bf16 %v8869_v26, %v8869_v26 }
  0x92   : > { %2487 = vmatpush.bf16.msrb.mxu1 %v8425_v61  ;;  %v1123_v61 = vpack.c.bf16 %v8809_v6, %v8809_v6  ;;  %v1133_v6 = vpack.c.bf16 %v8839_v16, %v8839_v16  ;;  %v1150_v16 = vpack.c.bf16 %v8890_v33, %v8890_v33 }
  0x94   : > { %v1443_v49 = vunpack.c.l.b16 %v1123_v61  ;;  %v1458_v61 = vunpack.c.l.b16 %v1138_v62  ;;  %v1144_v62 = vpack.c.bf16 %v8872_v27, %v8872_v27  ;;  %v8441_v27 = vld [vmem:[%s12109_s3 + $0x10] sm:$0xff] }
  0x96   : > { %2488 = vmatpush.bf16.msrb.mxu1 %v8424_v59  ;;  %v1520_v48 = vpack.c.b16 %v1444_v47, %v1443_v49  ;;  %v1131_v59 = vpack.c.bf16 %v8833_v14, %v8833_v14  ;;  %v9198_v19 = vpack.c.b16 %v1458_v61, %v1457_v3  ;;  %v1460_v47 = vunpack.c.l.b16 %v1140_v63  ;;  %v8442_v61 = vld [vmem:[%s12109_s3 + $0x18] sm:$0xff] }
  0x97   : > { %v1464_v63 = vunpack.c.l.b16 %v1144_v62 }
  0x98   : > { %v1451_v10 = vunpack.c.l.b16 %v1131_v59 }
  0x9a   : > { %2489 = vmatpush.bf16.msrb.mxu1 %v8423_v1  ;;  %v1524_v0 = vpack.c.b16 %v1452_v11, %v1451_v10  ;;  %v1453_v1 = vunpack.c.l.b16 %v1133_v6  ;;  %v1142_v10 = vpack.c.bf16 %v8866_v25, %v8866_v25  ;;  %v1467_v25 = vunpack.c.l.b16 %v1147_v56 }
  0x9c   : > { %v1525_v52 = vpack.c.b16 %v1454_v60, %v1453_v1  ;;  %v1462_v11 = vunpack.c.l.b16 %v1142_v10  ;;  %v8445_v60 = vld [vmem:[%s12109_s3 + $0x30] sm:$0xff]  ;;  %v8440_v10 = vld [vmem:[%s12109_s3 + $0x8] sm:$0xff] }
  0x9d   : > { %2291 = vmatmul.bf16.gmra.mxu0 %v1519_v4  ;;  %2476 = vmatmul.bf16.gmra.mxu1 %v9166_v2 }
  0x9e   : > { %2709 = vmatmul.bf16.gmra.mxu2 %v1523_v55  ;;  %4663 = vmatpush.bf16.msra.mxu3 %v8445_v60  ;;  %v1145_v60 = vpack.c.bf16 %v8875_v28, %v8875_v28 }
  0xad   : > { %2296 = vmatmul.bf16.gmra.mxu0 %v1520_v48  ;;  %2490 = vmatmul.bf16.vlgmr.msrb.gmra.mxu1 %v1519_v4  ;;  %v1456_v4 = vunpack.c.l.b16 %v1136_v57 }
  0xae   : > { %2714 = vmatmul.bf16.gmra.mxu2 %v1524_v0 }
  0xaf   : > { %v9191_v5 = vpack.c.b16 %v1456_v4, %v1455_v53  ;;  %v8443_v4 = vld [vmem:[%s12109_s3 + $0x20] sm:$0xff] }
  0xbd   : > { %2301 = vmatmul.bf16.gmra.mxu0 %v9125_v50  ;;  %2495 = vmatmul.bf16.gmra.mxu1 %v1520_v48 }
  0xbe   : > { %2719 = vmatmul.bf16.gmra.mxu2 %v1525_v52 }
  0xcd   : > { %2306 = vmatmul.bf16.gmra.mxu0 %v1522_v8  ;;  %2500 = vmatmul.bf16.gmra.mxu1 %v9125_v50  ;;  %v1139_v50 = vpack.c.bf16 %v8857_v22, %v8857_v22 }
  0xce   : > { %2724 = vmatmul.bf16.gmra.mxu2 %v9191_v5 }
  0xcf   : > { %v1459_v49 = vunpack.c.l.b16 %v1139_v50  ;;  %v1463_v50 = vunpack.c.l.b16 %v1143_v54  ;;  %v1465_v54 = vunpack.c.l.b16 %v1145_v60 }
  0xd1   : > { %v9205_v48 = vpack.c.b16 %v1460_v47, %v1459_v49  ;;  %v9245_v49 = vpack.c.b16 %v1464_v63, %v1463_v50 }
  0xdd   : > { %2311 = vmatmul.bf16.gmra.mxu0 %v1523_v55  ;;  %2505 = vmatmul.bf16.gmra.mxu1 %v1522_v8 }
  0xde   : > { %2729 = vmatmul.bf16.gmra.mxu2 %v9198_v19 }
  0xed   : > { %2316 = vmatmul.bf16.gmra.mxu0 %v1524_v0  ;;  %2510 = vmatmul.bf16.gmra.mxu1 %v1523_v55  ;;  %v1461_v55 = vunpack.c.l.b16 %v1141_v9 }
  0xee   : > { %2734 = vmatmul.bf16.gmra.mxu2 %v9205_v48 }
  0xef   : > { %v9217_v6 = vpack.c.b16 %v1462_v11, %v1461_v55  ;;  %v8439_v11 = vld [vmem:[%s12109_s3] sm:$0xff] }
  0xfa   : > { %v2282_v8 = vpop.f32.mrf.mxu0  ;;  %v9208_v59 = vpop.f32.mrf.mxu1 }
  0xfd   : > { %2321 = vmatmul.bf16.gmra.mxu0 %v1525_v52  ;;  %2515 = vmatmul.bf16.gmra.mxu1 %v1524_v0  ;;  %v8444_v0 = vld [vmem:[%s12109_s3 + $0x28] sm:$0xff] }
  0xfe   : > { %2739 = vmatmul.bf16.gmra.mxu2 %v9217_v6  ;;  %4664 = vmatpush.bf16.msra.mxu3 %v8444_v0  ;;  %v1146_v0 = vpack.c.bf16 %v8878_v29, %v8878_v29  ;;  %v1148_v29 = vpack.c.bf16 %v8884_v31, %v8884_v31 }
 0x100   : > { %v1466_v62 = vunpack.c.l.b16 %v1146_v0  ;;  %v1468_v24 = vunpack.c.l.b16 %v1148_v29 }
 0x101   : > { %v2700_v15 = vpop.f32.mrf.mxu2 }
 0x102   : > { %v9219_v7 = vpop.f32.mrf.mxu0  ;;  %v9221_v1 = vpop.f32.mrf.mxu1  ;;  %4665 = vmatpush.bf16.msra.mxu3 %v8443_v4  ;;  %v9308_v30 = vpack.c.b16 %v1468_v24, %v1467_v25 }
 0x106   : > { %4666 = vmatpush.bf16.msra.mxu3 %v8442_v61  ;;  %v9275_v61 = vpack.c.b16 %v1466_v62, %v1465_v54 }
 0x109   : > { %v2702_v3 = vpop.f32.mrf.mxu2 }
 0x10a   : > { %v9230_v57 = vpop.f32.mrf.mxu0  ;;  %v9232_v53 = vpop.f32.mrf.mxu1  ;;  %4667 = vmatpush.bf16.msra.mxu3 %v8441_v27  ;;  %v714_v27 = vlaneseq }
 0x10c   : > { %v9290_v60 = vshrl.u32 %v714_v27, 7  ;;  %v12146_v27 = vmov 0.0  }
 0x10d   : > { %2326 = vmatmul.bf16.gmra.mxu0 %v9191_v5  ;;  %2520 = vmatmul.bf16.gmra.mxu1 %v1525_v52 }
 0x10e   : > { %2744 = vmatmul.bf16.gmra.mxu2 %v9245_v49  ;;  %4668 = vmatpush.bf16.msra.mxu3 %v8440_v10  ;;  %v9285_v10 = vld [vmem:[%s12108_s2] ss:$0 sm:$0xff]  ;;  %12292 = vst [vmem:[#allocation76_spill] sm:$0xff] %v9290_v60  ;;  %vm719_vm0 = vcmp.ge.s32.totalorder %v9290_v60, 3  ;;  %v9317_v29 = vadd.s32 16, %v9290_v60 }
 0x10f   : > { %v9304_v26 = vsel %vm719_vm0, 1.0, %v12146_v27 }
 0x110   : > { %12293 = vst [vmem:[#allocation77_spill] sm:$0xff] %v9317_v29  ;;  %vm725_vm4 = vcmp.lt.s32.totalorder %v9317_v29, 19 }
 0x111   : > { %v9255_v52 = vpop.f32.mrf.mxu2 }
 0x112   : > { %v9247_v47 = vpop.f32.mrf.mxu0  ;;  %v9249_v9 = vpop.f32.mrf.mxu1  ;;  %4669 = vmatpush.bf16.msra.mxu3 %v8439_v11  ;;  %v2283_v11 = vadd.f32 %v9285_v10, %v2282_v8 }
 0x113   : > { %12289 = vst [vmem:[#allocation73_spill] sm:$0xff] %v9249_v9 }
 0x119   : > { %v9273_v4 = vpop.f32.mrf.mxu2 }
 0x11a   : > { %v9260_v23 = vpop.f32.mrf.mxu0  ;;  %v9262_v55 = vpop.f32.mrf.mxu1 }
 0x11b   : > { %12290 = vst [vmem:[#allocation74_spill] sm:$0xff] %v9262_v55 }
 0x11d   : > { %2331 = vmatmul.bf16.gmra.mxu0 %v9198_v19  ;;  %2525 = vmatmul.bf16.gmra.mxu1 %v9191_v5 }
 0x11e   : > { %2749 = vmatmul.bf16.gmra.mxu2 %v9275_v61 }
 0x121   : > { %v9287_v5 = vpop.f32.mrf.mxu2 }
 0x122   : > { %v9277_v50 = vpop.f32.mrf.mxu0  ;;  %v9279_v63 = vpop.f32.mrf.mxu1 }
 0x123   : > { %12291 = vst [vmem:[#allocation75_spill] sm:$0xff] %v9279_v63 }
 0x129   : > { %v9301_v8 = vpop.f32.mrf.mxu2 }
 0x12a   : > { %v9292_v0 = vpop.f32.mrf.mxu0  ;;  %v2491_v54 = vpop.f32.mrf.mxu1 }
 0x12b   : > { %v2492_v62 = vadd.f32 %v2491_v54, %v2283_v11  ;;  %v2285_v11 = vadd.f32 %v9285_v10, %v9219_v7  ;;  %v2288_v7 = vadd.f32 %v9285_v10, %v9230_v57 }
 0x12d   : > { %v2701_v28 = vadd.f32 %v2700_v15, %v2492_v62  ;;  %2336 = vmatmul.bf16.gmra.mxu0 %v9205_v48  ;;  %2530 = vmatmul.bf16.gmra.mxu1 %v9198_v19 }
 0x12e   : > { %2754 = vmatmul.bf16.gmra.mxu2 %v9308_v30 }
 0x12f   : > { %v2900_v54 = vmax.f32 %v2701_v28, 0.0 }
 0x131   : > { %v2980_v31 = vmul.f32 %v9304_v26, %v2900_v54  ;;  %v9314_v56 = vpop.f32.mrf.mxu2 }
 0x132   : > { %v9311_v15 = vpop.f32.mrf.mxu0  ;;  %v2493_v62 = vpop.f32.mrf.mxu1 }
 0x133   : > { %v3060_v19 = vpack.c.bf16 %v2980_v31, %v2980_v31  ;;  %v2494_v22 = vadd.f32 %v2493_v62, %v2285_v11  ;;  %v12294_v62 = vmov 0 }
 0x134   : > { %v12295_v62 = vsel %vm9324_vm5, 4294967295, %v12294_v62 }
 0x135   : > { %v3144_v21 = vshrl.u32 %v3060_v19, 16  ;;  %v3147_v27 = vshll.u32 %v3060_v19, 16  ;;  %v2703_v20 = vadd.f32 %v2702_v3, %v2494_v22  ;;  %v8020_v31 = vrot.slane %v3060_v19, 9  ;;  %12296 = vst [vmem:[#allocation78_spill] sm:$0xff] %v12295_v62 }
 0x136   : > { %v4106_v3 = vunpack.c.l.b16 %v3060_v19 }
 0x137   : > { %v3146_v24 = vrot.slane %v3144_v21, 4  ;;  %v3149_v25 = vrot.slane %v3147_v27, 5  ;;  %v2901_v28 = vmax.f32 %v2703_v20, 0.0 }
 0x139   : > { %v3061_v54 = vpack.c.bf16 %v2901_v28, %v2901_v28  ;;  %v3150_v18 = vor.u32 %v3149_v25, %v3146_v24  ;;  %v1149_v28 = vpack.c.bf16 %v8887_v32, %v8887_v32  ;;  %v9334_v19 = vpop.f32.mrf.mxu2 }
 0x13a   : > { %v9321_v11 = vpop.f32.mrf.mxu0  ;;  %v2496_v22 = vpop.f32.mrf.mxu1 }
 0x13b   : > { %v3153_v21 = vshll.u32 %v3061_v54, 16  ;;  %v3157_v20 = vshrl.u32 %v3061_v54, 16  ;;  %v3908_v27 = vrot.slane %v3061_v54, 5  ;;  %v2497_v17 = vadd.f32 %v2496_v22, %v2288_v7 }
 0x13c   : > { %v4107_v57 = vunpack.c.l.b16 %v3061_v54  ;;  %v1469_v7 = vunpack.c.l.b16 %v1149_v28  ;;  %v1470_v54 = vunpack.c.l.b16 %v1150_v16 }
 0x13d   : > { %v3155_v14 = vrot.slane %v3153_v21, 5  ;;  %2341 = vmatmul.bf16.gmra.mxu0 %v9217_v6  ;;  %2535 = vmatmul.bf16.gmra.mxu1 %v9205_v48  ;;  %v3909_v13 = vsel %vm9324_vm5, %v8020_v31, %v3908_v27  ;;  %v2706_v24 = vadd.f32 %v9255_v52, %v2497_v17  ;;  %v2290_v21 = vadd.f32 %v9285_v10, %v9247_v47 }
 0x13e   : > { %v4166_v25 = vpack.c.b16 %v4107_v57, %v4106_v3  ;;  %v12299_v48 = vmov 0.0   ;;  %v3151_v31 = vrot.slane %v3150_v18, 4  ;;  %v3159_v32 = vrot.slane %v3157_v20, 4 }
 0x13f   : > { %v9350_v33 = vsel %vm725_vm4, 1.0, %v12299_v48  ;;  %v2902_v17 = vmax.f32 %v2706_v24, 0.0  ;;  %v9352_v52 = vpack.c.b16 %v1470_v54, %v1469_v7  ;;  %v3910_v54 = vrot.slane %v3908_v27, 4 }
 0x140   : > { %4670 = vmatmul.bf16.vlgmr.msra.gmra.mxu3 %v4166_v25  ;;  %v3156_v16 = vsel %vm9341_vm7, %v3151_v31, %v3155_v14  ;;  %v3160_v29 = vor.u32 %v3159_v32, %v3155_v14  ;;  %v2293_v31 = vadd.f32 %v9285_v10, %v9260_v23  ;;  %v4346_v14 = vunpack.c.l.b16 %v3909_v13 }
 0x141   : > { %v2982_v3 = vmul.f32 %v9350_v33, %v2902_v17  ;;  %2759 = vmatmul.bf16.gmra.mxu2 %v9352_v52  ;;  %v9361_v20 = vpop.f32.mrf.mxu2 }
 0x142   : > { %v9357_v57 = vpop.f32.mrf.mxu0  ;;  %v2498_v28 = vpop.f32.mrf.mxu1  ;;  %v3161_v63 = vrot.slane %v3160_v29, 4  ;;  %v1152_v29 = vpack.c.bf16 %v8896_v35, %v8896_v35 }
 0x143   : > { %v2499_v47 = vadd.f32 %v2498_v28, %v2290_v21  ;;  %v3062_v12 = vpack.c.bf16 %v2982_v3, %v2982_v3 }
 0x144   : > { %v1472_v35 = vunpack.c.l.b16 %v1152_v29 }
 0x145   : > { %v2708_v18 = vadd.f32 %v9273_v4, %v2499_v47  ;;  %v3163_v24 = vshll.u32 %v3062_v12, 16  ;;  %v3167_v25 = vshrl.u32 %v3062_v12, 16  ;;  %v3911_v7 = vrot.slane %v3062_v12, 5 }
 0x147   : > { %v2903_v17 = vmax.f32 %v2708_v18, 0.0  ;;  %v3165_v48 = vrot.slane %v3163_v24, 5  ;;  %v3912_v60 = vsel %vm9324_vm5, %v3910_v54, %v3911_v7  ;;  %v3169_v21 = vrot.slane %v3167_v25, 4 }
 0x148   : > { %v4347_v32 = vunpack.c.l.b16 %v3912_v60  ;;  %v1151_v18 = vpack.c.bf16 %v8893_v34, %v8893_v34  ;;  %v9377_v24 = vunpack.c.l.b16 %v3156_v16 }
 0x149   : > { %v2983_v3 = vmul.f32 0.0, %v2903_v17  ;;  %v3166_v47 = vsel %vm9341_vm7, %v3161_v63, %v3165_v48  ;;  %v3170_v23 = vor.u32 %v3169_v21, %v3165_v48  ;;  %v9384_v63 = vpop.f32.mrf.mxu2  ;;  %v3913_v48 = vrot.slane %v3911_v7, 4 }
 0x14a   : > { %v9367_v4 = vpop.f32.mrf.mxu0  ;;  %v2501_v28 = vpop.f32.mrf.mxu1  ;;  %v9371_v9 = vpack.c.b16 %v4347_v32, %v4346_v14  ;;  %12300 = vst [vmem:[#allocation79_spill] sm:$0xff] %v9377_v24  ;;  %v9379_v13 = vunpack.c.l.b16 %v3166_v47  ;;  %v1471_v17 = vunpack.c.l.b16 %v1151_v18 }
 0x14b   : > { %v3120_v27 = vpack.c.bf16 %v2983_v3, %v2983_v3  ;;  %v2502_v55 = vadd.f32 %v2501_v28, %v2293_v31  ;;  %v2295_v31 = vadd.f32 %v9285_v10, %v9277_v50 }
 0x14c   : > { %12301 = vst [vmem:[#allocation80_spill] sm:$0xff] %v9379_v13  ;;  %v9392_v14 = vpack.c.b16 %v1472_v35, %v1471_v17 }
 0x14d   : > { %v3173_v60 = vshll.u32 %v3120_v27, 16  ;;  %v3914_v25 = vrot.slane %v3120_v27, 5  ;;  %v2711_v54 = vadd.f32 %v9287_v5, %v2502_v55  ;;  %2346 = vmatmul.bf16.gmra.mxu0 %v9245_v49  ;;  %2540 = vmatmul.bf16.gmra.mxu1 %v9217_v6  ;;  %v3171_v5 = vrot.slane %v3170_v23, 4 }
 0x14e   : > { %v4108_v27 = vunpack.c.l.b16 %v3062_v12 }
 0x14f   : > { %v3175_v21 = vrot.slane %v3173_v60, 5  ;;  %v2904_v3 = vmax.f32 %v2711_v54, 0.0  ;;  %v3915_v55 = vsel %vm9324_vm5, %v3913_v48, %v3914_v25  ;;  %v2298_v54 = vadd.f32 %v9285_v10, %v9292_v0 }
 0x151   : > { %v2984_v6 = vmul.f32 %v9304_v26, %v2904_v3  ;;  %v3176_v7 = vsel %vm9341_vm7, %v3171_v5, %v3175_v21  ;;  %2764 = vmatmul.bf16.gmra.mxu2 %v9392_v14  ;;  %v9401_v25 = vpop.f32.mrf.mxu2 }
 0x152   : > { %v9397_v32 = vpop.f32.mrf.mxu0  ;;  %v2503_v50 = vpop.f32.mrf.mxu1 }
 0x153   : > { %v3063_v28 = vpack.c.bf16 %v2984_v6, %v2984_v6  ;;  %v2504_v47 = vadd.f32 %v2503_v50, %v2295_v31 }
 0x155   : > { %v3178_v18 = vshrl.u32 %v3063_v28, 16  ;;  %v3181_v29 = vshll.u32 %v3063_v28, 16  ;;  %v2713_v60 = vadd.f32 %v9301_v8, %v2504_v47  ;;  %v4109_v23 = vunpack.c.l.b16 %v3063_v28 }
 0x156   : > { %v8021_v6 = vrot.slane %v3063_v28, 9  ;;  %v1153_v8 = vpack.c.bf16 %v8899_v36, %v8899_v36  ;;  %v1154_v47 = vpack.c.bf16 %v8902_v37, %v8902_v37 }
 0x157   : > { %v2905_v48 = vmax.f32 %v2713_v60, 0.0  ;;  %v4167_v17 = vpack.c.b16 %v4109_v23, %v4108_v27  ;;  %v3180_v35 = vrot.slane %v3178_v18, 4  ;;  %v3183_v21 = vrot.slane %v3181_v29, 5 }
 0x158   : > { %v2300_v27 = vadd.f32 %v9285_v10, %v9311_v15  ;;  %v1473_v60 = vunpack.c.l.b16 %v1153_v8  ;;  %v1474_v23 = vunpack.c.l.b16 %v1154_v47 }
 0x159   : > { %v3064_v3 = vpack.c.bf16 %v2905_v48, %v2905_v48  ;;  %4675 = vmatmul.bf16.gmra.mxu3 %v4167_v17  ;;  %v3184_v50 = vor.u32 %v3183_v21, %v3180_v35  ;;  %v9416_v29 = vpop.f32.mrf.mxu2  ;;  %v4348_v48 = vunpack.c.l.b16 %v3915_v55  ;;  %v9430_v55 = vunpack.c.l.b16 %v3176_v7 }
 0x15a   : > { %v9405_v5 = vpop.f32.mrf.mxu0  ;;  %v2506_v31 = vpop.f32.mrf.mxu1  ;;  %v9420_v15 = vpack.c.b16 %v1474_v23, %v1473_v60  ;;  %v2303_v7 = vadd.f32 %v9285_v10, %v9321_v11  ;;  %v1155_v11 = vpack.c.bf16 %v8905_v38, %v8905_v38 }
 0x15b   : > { %v2507_v12 = vadd.f32 %v2506_v31, %v2298_v54  ;;  %v3191_v16 = vshrl.u32 %v3064_v3, 16  ;;  %v3918_v0 = vrot.slane %v3064_v3, 5  ;;  %v3187_v28 = vshll.u32 %v3064_v3, 16  ;;  %12302 = vst [vmem:[#allocation81_spill] sm:$0xff] %v9430_v55  ;;  %v12336_v55 = vld [vmem:[#allocation51_spill] sm:$0xff] }
 0x15c   : > { %v3185_v21 = vrot.slane %v3184_v50, 4 }
 0x15d   : > { %v2716_v18 = vadd.f32 %v9314_v56, %v2507_v12  ;;  %2351 = vmatmul.bf16.gmra.mxu0 %v9275_v61  ;;  %2545 = vmatmul.bf16.gmra.mxu1 %v9245_v49  ;;  %v3919_v54 = vsel %vm9324_vm5, %v8021_v6, %v3918_v0  ;;  %v3189_v31 = vrot.slane %v3187_v28, 5  ;;  %v3193_v56 = vrot.slane %v3191_v16, 4 }
 0x15e   : > { %v4349_v35 = vunpack.c.l.b16 %v3919_v54  ;;  %v4110_v28 = vunpack.c.l.b16 %v3064_v3  ;;  %v3920_v16 = vrot.slane %v3918_v0, 4 }
 0x15f   : > { %v2906_v17 = vmax.f32 %v2716_v18, 0.0  ;;  %v3190_v49 = vsel %vm9341_vm7, %v3185_v21, %v3189_v31  ;;  %v3194_v23 = vor.u32 %v3193_v56, %v3189_v31 }
 0x160   : > { %v9423_v37 = vpack.c.b16 %v4349_v35, %v4348_v48  ;;  %v9432_v6 = vunpack.c.l.b16 %v3190_v49 }
 0x161   : > { %v2986_v12 = vmul.f32 %v9350_v33, %v2906_v17  ;;  %2769 = vmatmul.bf16.gmra.mxu2 %v9420_v15  ;;  %v9437_v35 = vpop.f32.mrf.mxu2  ;;  %v3195_v0 = vrot.slane %v3194_v23, 4 }
 0x162   : > { %v9427_v8 = vpop.f32.mrf.mxu0  ;;  %v2508_v47 = vpop.f32.mrf.mxu1  ;;  %12303 = vst [vmem:[#allocation82_spill] sm:$0xff] %v9432_v6 }
 0x163   : > { %v3065_v50 = vpack.c.bf16 %v2986_v12, %v2986_v12  ;;  %v2509_v18 = vadd.f32 %v2508_v47, %v2300_v27 }
 0x165   : > { %v3201_v54 = vshrl.u32 %v3065_v50, 16  ;;  %v2718_v48 = vadd.f32 %v9334_v19, %v2509_v18  ;;  %v4111_v17 = vunpack.c.l.b16 %v3065_v50  ;;  %v3921_v21 = vrot.slane %v3065_v50, 5 }
 0x166   : > { %v3197_v36 = vshll.u32 %v3065_v50, 16 }
 0x167   : > { %v2907_v49 = vmax.f32 %v2718_v48, 0.0  ;;  %v4168_v12 = vpack.c.b16 %v4111_v17, %v4110_v28  ;;  %v3922_v3 = vsel %vm9324_vm5, %v3920_v16, %v3921_v21  ;;  %v3203_v47 = vrot.slane %v3201_v54, 4 }
 0x168   : > { %v3199_v27 = vrot.slane %v3197_v36, 5  ;;  %v1156_v28 = vpack.c.bf16 %v8908_v39, %v8908_v39  ;;  %v3923_v48 = vrot.slane %v3921_v21, 4  ;;  %v2305_v17 = vadd.f32 %v9285_v10, %v9357_v57 }
 0x169   : > { %v2987_v31 = vmul.f32 0.0, %v2907_v49  ;;  %4680 = vmatmul.bf16.gmra.mxu3 %v4168_v12  ;;  %v9454_v54 = vpop.f32.mrf.mxu2 }
 0x16a   : > { %v9443_v56 = vpop.f32.mrf.mxu0  ;;  %v2511_v19 = vpop.f32.mrf.mxu1  ;;  %v3200_v18 = vsel %vm9341_vm7, %v3195_v0, %v3199_v27  ;;  %v3204_v34 = vor.u32 %v3203_v47, %v3199_v27  ;;  %v1476_v49 = vunpack.c.l.b16 %v1156_v28 }
 0x16b   : > { %v3121_v50 = vpack.c.bf16 %v2987_v31, %v2987_v31  ;;  %v2512_v60 = vadd.f32 %v2511_v19, %v2303_v7  ;;  %v1475_v7 = vunpack.c.l.b16 %v1155_v11 }
 0x16c   : > { %v3205_v27 = vrot.slane %v3204_v34, 4 }
 0x16d   : > { %v3207_v16 = vshll.u32 %v3121_v50, 16  ;;  %v3924_v36 = vrot.slane %v3121_v50, 5  ;;  %v2721_v23 = vadd.f32 %v9361_v20, %v2512_v60  ;;  %2356 = vmatmul.bf16.gmra.mxu0 %v9308_v30  ;;  %2550 = vmatmul.bf16.gmra.mxu1 %v9275_v61  ;;  %v9460_v47 = vpack.c.b16 %v1476_v49, %v1475_v7 }
 0x16e   : > { %v4350_v20 = vunpack.c.l.b16 %v3922_v3  ;;  %v9470_v50 = vunpack.c.l.b16 %v3200_v18  ;;  %v2308_v7 = vadd.f32 %v9285_v10, %v9367_v4 }
 0x16f   : > { %v3209_v12 = vrot.slane %v3207_v16, 5  ;;  %v2908_v0 = vmax.f32 %v2721_v23, 0.0  ;;  %v3925_v39 = vsel %vm9324_vm5, %v3923_v48, %v3924_v36 }
 0x170   : > { %v4351_v60 = vunpack.c.l.b16 %v3925_v39  ;;  %12304 = vst [vmem:[#allocation83_spill] sm:$0xff] %v9470_v50 }
 0x171   : > { %v2988_v61 = vmul.f32 %v9304_v26, %v2908_v0  ;;  %v3210_v21 = vsel %vm9341_vm7, %v3205_v27, %v3209_v12  ;;  %2774 = vmatmul.bf16.gmra.mxu2 %v9460_v47  ;;  %v9477_v48 = vpop.f32.mrf.mxu2 }
 0x172   : > { %v9465_v31 = vpop.f32.mrf.mxu0  ;;  %v2513_v57 = vpop.f32.mrf.mxu1  ;;  %v9468_v19 = vpack.c.b16 %v4351_v60, %v4350_v20  ;;  %v9472_v11 = vunpack.c.l.b16 %v3210_v21 }
 0x173   : > { %v3066_v34 = vpack.c.bf16 %v2988_v61, %v2988_v61  ;;  %v2514_v28 = vadd.f32 %v2513_v57, %v2305_v17 }
 0x174   : > { %12305 = vst [vmem:[#allocation84_spill] sm:$0xff] %v9472_v11 }
 0x175   : > { %v3212_v16 = vshrl.u32 %v3066_v34, 16  ;;  %v3215_v36 = vshll.u32 %v3066_v34, 16  ;;  %v2723_v23 = vadd.f32 %v9384_v63, %v2514_v28  ;;  %v4112_v17 = vunpack.c.l.b16 %v3066_v34 }
 0x176   : > { %v8022_v61 = vrot.slane %v3066_v34, 9  ;;  %v1157_v63 = vpack.c.bf16 %v8911_v40, %v8911_v40  ;;  %v1158_v28 = vpack.c.bf16 %v8914_v41, %v8914_v41 }
 0x177   : > { %v2909_v49 = vmax.f32 %v2723_v23, 0.0  ;;  %v3214_v12 = vrot.slane %v3212_v16, 4  ;;  %v3217_v18 = vrot.slane %v3215_v36, 5 }
 0x178   : > { %v1477_v34 = vunpack.c.l.b16 %v1157_v63 }
 0x179   : > { %v3067_v0 = vpack.c.bf16 %v2909_v49, %v2909_v49  ;;  %v3218_v21 = vor.u32 %v3217_v18, %v3214_v12  ;;  %v9490_v23 = vpop.f32.mrf.mxu2  ;;  %v1478_v49 = vunpack.c.l.b16 %v1158_v28  ;;  %v2310_v18 = vadd.f32 %v9285_v10, %v9397_v32 }
 0x17a   : > { %v9481_v39 = vpop.f32.mrf.mxu0  ;;  %v2516_v27 = vpop.f32.mrf.mxu1 }
 0x17b   : > { %v2517_v20 = vadd.f32 %v2516_v27, %v2308_v7  ;;  %v4113_v60 = vunpack.c.l.b16 %v3067_v0  ;;  %v3225_v57 = vshrl.u32 %v3067_v0, 16  ;;  %v3928_v4 = vrot.slane %v3067_v0, 5 }
 0x17c   : > { %v3221_v7 = vshll.u32 %v3067_v0, 16  ;;  %v3219_v3 = vrot.slane %v3218_v21, 4 }
 0x17d   : > { %v2726_v16 = vadd.f32 %v9401_v25, %v2517_v20  ;;  %2361 = vmatmul.bf16.gmra.mxu0 %v9352_v52  ;;  %2555 = vmatmul.bf16.gmra.mxu1 %v9308_v30  ;;  %v4169_v36 = vpack.c.b16 %v4113_v60, %v4112_v17  ;;  %v3929_v12 = vsel %vm9324_vm5, %v8022_v61, %v3928_v4  ;;  %v3227_v41 = vrot.slane %v3225_v57, 4 }
 0x17e   : > { %v3223_v25 = vrot.slane %v3221_v7, 5  ;;  %v9496_v20 = vpack.c.b16 %v1478_v49, %v1477_v34  ;;  %v2313_v34 = vadd.f32 %v9285_v10, %v9405_v5  ;;  %v4352_v40 = vunpack.c.l.b16 %v3929_v12 }
 0x17f   : > { %v2910_v27 = vmax.f32 %v2726_v16, 0.0  ;;  %4685 = vmatmul.bf16.gmra.mxu3 %v4169_v36  ;;  %v3930_v36 = vrot.slane %v3928_v4, 4  ;;  %v1159_v12 = vpack.c.bf16 %v8917_v42, %v8917_v42 }
 0x180   : > { %v3224_v0 = vsel %vm9341_vm7, %v3219_v3, %v3223_v25  ;;  %v3228_v32 = vor.u32 %v3227_v41, %v3223_v25 }
 0x181   : > { %v2990_v30 = vmul.f32 %v9350_v33, %v2910_v27  ;;  %2779 = vmatmul.bf16.gmra.mxu2 %v9496_v20  ;;  %v9505_v16 = vpop.f32.mrf.mxu2  ;;  %v9517_v38 = vunpack.c.l.b16 %v3224_v0 }
 0x182   : > { %v9501_v17 = vpop.f32.mrf.mxu0  ;;  %v2518_v60 = vpop.f32.mrf.mxu1 }
 0x183   : > { %v3068_v61 = vpack.c.bf16 %v2990_v30, %v2990_v30  ;;  %v2519_v63 = vadd.f32 %v2518_v60, %v2310_v18  ;;  %v3229_v18 = vrot.slane %v3228_v32, 4  ;;  %12306 = vst [vmem:[#allocation85_spill] sm:$0xff] %v9517_v38  ;;  %v1160_v32 = vpack.c.bf16 %v8920_v43, %v8920_v43 }
 0x185   : > { %v3235_v28 = vshrl.u32 %v3068_v61, 16  ;;  %v2728_v21 = vadd.f32 %v9416_v29, %v2519_v63  ;;  %v3931_v57 = vrot.slane %v3068_v61, 5  ;;  %v3231_v7 = vshll.u32 %v3068_v61, 16 }
 0x187   : > { %v2911_v3 = vmax.f32 %v2728_v21, 0.0  ;;  %v3932_v49 = vsel %vm9324_vm5, %v3930_v36, %v3931_v57  ;;  %v3237_v27 = vrot.slane %v3235_v28, 4  ;;  %v3233_v41 = vrot.slane %v3231_v7, 5 }
 0x188   : > { %v4353_v30 = vunpack.c.l.b16 %v3932_v49  ;;  %v3933_v36 = vrot.slane %v3931_v57, 4  ;;  %v2315_v49 = vadd.f32 %v9285_v10, %v9427_v8 }
 0x189   : > { %v2991_v25 = vmul.f32 0.0, %v2911_v3  ;;  %v3234_v4 = vsel %vm9341_vm7, %v3229_v18, %v3233_v41  ;;  %v3238_v28 = vor.u32 %v3237_v27, %v3233_v41  ;;  %v9528_v0 = vpop.f32.mrf.mxu2  ;;  %v1479_v27 = vunpack.c.l.b16 %v1159_v12 }
 0x18a   : > { %v9511_v60 = vpop.f32.mrf.mxu0  ;;  %v2521_v29 = vpop.f32.mrf.mxu1  ;;  %v9513_v63 = vpack.c.b16 %v4353_v30, %v4352_v40  ;;  %v9519_v50 = vunpack.c.l.b16 %v3234_v4  ;;  %v1480_v30 = vunpack.c.l.b16 %v1160_v32 }
 0x18b   : > { %v3122_v5 = vpack.c.bf16 %v2991_v25, %v2991_v25  ;;  %v2522_v21 = vadd.f32 %v2521_v29, %v2313_v34 }
 0x18c   : > { %12307 = vst [vmem:[#allocation86_spill] sm:$0xff] %v9519_v50  ;;  %v9536_v41 = vpack.c.b16 %v1480_v30, %v1479_v27 }
 0x18d   : > { %v3241_v7 = vshll.u32 %v3122_v5, 16  ;;  %v3934_v40 = vrot.slane %v3122_v5, 5  ;;  %v2731_v3 = vadd.f32 %v9437_v35, %v2522_v21  ;;  %2366 = vmatmul.bf16.gmra.mxu0 %v9392_v14  ;;  %2560 = vmatmul.bf16.gmra.mxu1 %v9352_v52  ;;  %v3239_v35 = vrot.slane %v3238_v28, 4 }
 0x18e   : > { %v4114_v21 = vunpack.c.l.b16 %v3068_v61 }
 0x18f   : > { %v3243_v43 = vrot.slane %v3241_v7, 5  ;;  %v2912_v57 = vmax.f32 %v2731_v3, 0.0  ;;  %v3935_v18 = vsel %vm9324_vm5, %v3933_v36, %v3934_v40  ;;  %v2318_v40 = vadd.f32 %v9285_v10, %v9443_v56 }
 0x191   : > { %v2992_v52 = vmul.f32 %v9304_v26, %v2912_v57  ;;  %v3244_v25 = vsel %vm9341_vm7, %v3239_v35, %v3243_v43  ;;  %2784 = vmatmul.bf16.gmra.mxu2 %v9536_v41  ;;  %v9545_v7 = vpop.f32.mrf.mxu2 }
 0x192   : > { %v9541_v29 = vpop.f32.mrf.mxu0  ;;  %v2523_v4 = vpop.f32.mrf.mxu1 }
 0x193   : > { %v3069_v8 = vpack.c.bf16 %v2992_v52, %v2992_v52  ;;  %v2524_v5 = vadd.f32 %v2523_v4, %v2315_v49 }
 0x195   : > { %v3246_v12 = vshrl.u32 %v3069_v8, 16  ;;  %v3249_v32 = vshll.u32 %v3069_v8, 16  ;;  %v2733_v36 = vadd.f32 %v9454_v54, %v2524_v5  ;;  %v4115_v28 = vunpack.c.l.b16 %v3069_v8 }
 0x196   : > { %v8023_v52 = vrot.slane %v3069_v8, 9  ;;  %v1161_v54 = vpack.c.bf16 %v8923_v44, %v8923_v44  ;;  %v1162_v5 = vpack.c.bf16 %v8926_v45, %v8926_v45 }
 0x197   : > { %v2913_v3 = vmax.f32 %v2733_v36, 0.0  ;;  %v4170_v27 = vpack.c.b16 %v4115_v28, %v4114_v21  ;;  %v3248_v30 = vrot.slane %v3246_v12, 4  ;;  %v3251_v43 = vrot.slane %v3249_v32, 5 }
 0x198   : > { %v2320_v21 = vadd.f32 %v9285_v10, %v9465_v31  ;;  %v1481_v36 = vunpack.c.l.b16 %v1161_v54  ;;  %v1482_v28 = vunpack.c.l.b16 %v1162_v5 }
 0x199   : > { %v3070_v57 = vpack.c.bf16 %v2913_v3, %v2913_v3  ;;  %4690 = vmatmul.bf16.gmra.mxu3 %v4170_v27  ;;  %v3252_v4 = vor.u32 %v3251_v43, %v3248_v30  ;;  %v9560_v32 = vpop.f32.mrf.mxu2  ;;  %v4354_v3 = vunpack.c.l.b16 %v3935_v18  ;;  %v9574_v18 = vunpack.c.l.b16 %v3244_v25 }
 0x19a   : > { %v9549_v35 = vpop.f32.mrf.mxu0  ;;  %v2526_v49 = vpop.f32.mrf.mxu1  ;;  %v9564_v31 = vpack.c.b16 %v1482_v28, %v1481_v36  ;;  %v2323_v25 = vadd.f32 %v9285_v10, %v9481_v39  ;;  %v1163_v39 = vpack.c.bf16 %v8929_v46, %v8929_v46 }
 0x19b   : > { %v2527_v61 = vadd.f32 %v2526_v49, %v2318_v40  ;;  %v3259_v34 = vshrl.u32 %v3070_v57, 16  ;;  %v3938_v56 = vrot.slane %v3070_v57, 5  ;;  %v3255_v8 = vshll.u32 %v3070_v57, 16  ;;  %12308 = vst [vmem:[#allocation87_spill] sm:$0xff] %v9574_v18 }
 0x19c   : > { %v3253_v43 = vrot.slane %v3252_v4, 4 }
 0x19d   : > { %v2736_v12 = vadd.f32 %v9477_v48, %v2527_v61  ;;  %2371 = vmatmul.bf16.gmra.mxu0 %v9420_v15  ;;  %2565 = vmatmul.bf16.gmra.mxu1 %v9392_v14  ;;  %v3939_v40 = vsel %vm9324_vm5, %v8023_v52, %v3938_v56  ;;  %v3257_v49 = vrot.slane %v3255_v8, 5  ;;  %v3261_v48 = vrot.slane %v3259_v34, 4 }
 0x19e   : > { %v4355_v30 = vunpack.c.l.b16 %v3939_v40  ;;  %v4116_v8 = vunpack.c.l.b16 %v3070_v57  ;;  %v3940_v34 = vrot.slane %v3938_v56, 4 }
 0x19f   : > { %v2914_v27 = vmax.f32 %v2736_v12, 0.0  ;;  %v3258_v14 = vsel %vm9341_vm7, %v3253_v43, %v3257_v49  ;;  %v3262_v28 = vor.u32 %v3261_v48, %v3257_v49 }
 0x1a0   : > { %v9567_v45 = vpack.c.b16 %v4355_v30, %v4354_v3  ;;  %v9576_v52 = vunpack.c.l.b16 %v3258_v14 }
 0x1a1   : > { %v2994_v61 = vmul.f32 %v9350_v33, %v2914_v27  ;;  %2789 = vmatmul.bf16.gmra.mxu2 %v9564_v31  ;;  %v9581_v30 = vpop.f32.mrf.mxu2  ;;  %v3263_v56 = vrot.slane %v3262_v28, 4 }
 0x1a2   : > { %v9571_v54 = vpop.f32.mrf.mxu0  ;;  %v2528_v5 = vpop.f32.mrf.mxu1  ;;  %12309 = vst [vmem:[#allocation88_spill] sm:$0xff] %v9576_v52 }
 0x1a3   : > { %v3071_v4 = vpack.c.bf16 %v2994_v61, %v2994_v61  ;;  %v2529_v12 = vadd.f32 %v2528_v5, %v2320_v21 }
 0x1a5   : > { %v3269_v40 = vshrl.u32 %v3071_v4, 16  ;;  %v2738_v3 = vadd.f32 %v9490_v23, %v2529_v12  ;;  %v4117_v27 = vunpack.c.l.b16 %v3071_v4  ;;  %v3941_v43 = vrot.slane %v3071_v4, 5 }
 0x1a6   : > { %v3265_v44 = vshll.u32 %v3071_v4, 16 }
 0x1a7   : > { %v2915_v14 = vmax.f32 %v2738_v3, 0.0  ;;  %v4171_v61 = vpack.c.b16 %v4117_v27, %v4116_v8  ;;  %v3942_v57 = vsel %vm9324_vm5, %v3940_v34, %v3941_v43  ;;  %v3271_v5 = vrot.slane %v3269_v40, 4  ;;  %v12310_v8 = vld [vmem:[#allocation37_spill] sm:$0xff] }
 0x1a8   : > { %v3267_v21 = vrot.slane %v3265_v44, 5  ;;  %v1164_v34 = vpack.c.bf16 %v12310_v8, %v12310_v8  ;;  %v3943_v27 = vrot.slane %v3941_v43, 4 }
 0x1a9   : > { %v2995_v49 = vmul.f32 0.0, %v2915_v14  ;;  %4695 = vmatmul.bf16.gmra.mxu3 %v4171_v61  ;;  %v9598_v3 = vpop.f32.mrf.mxu2  ;;  %v1483_v14 = vunpack.c.l.b16 %v1163_v39 }
 0x1aa   : > { %v9587_v48 = vpop.f32.mrf.mxu0  ;;  %v2531_v23 = vpop.f32.mrf.mxu1  ;;  %v3268_v12 = vsel %vm9341_vm7, %v3263_v56, %v3267_v21  ;;  %v3272_v42 = vor.u32 %v3271_v5, %v3267_v21  ;;  %v1484_v61 = vunpack.c.l.b16 %v1164_v34 }
 0x1ab   : > { %v3123_v4 = vpack.c.bf16 %v2995_v49, %v2995_v49  ;;  %v2532_v36 = vadd.f32 %v2531_v23, %v2323_v25  ;;  %v2325_v25 = vadd.f32 %v9285_v10, %v9501_v17  ;;  %v9614_v8 = vunpack.c.l.b16 %v3268_v12 }
 0x1ac   : > { %v3273_v49 = vrot.slane %v3272_v42, 4  ;;  %v9604_v23 = vpack.c.b16 %v1484_v61, %v1483_v14  ;;  %v2328_v61 = vadd.f32 %v9285_v10, %v9511_v60 }
 0x1ad   : > { %v3275_v28 = vshll.u32 %v3123_v4, 16  ;;  %v3944_v44 = vrot.slane %v3123_v4, 5  ;;  %v2741_v40 = vadd.f32 %v9505_v16, %v2532_v36  ;;  %2376 = vmatmul.bf16.gmra.mxu0 %v9460_v47  ;;  %2570 = vmatmul.bf16.gmra.mxu1 %v9420_v15  ;;  %v4356_v16 = vunpack.c.l.b16 %v3942_v57  ;;  %12311 = vst [vmem:[#allocation37_spill] sm:$0xff] %v9614_v8  ;;  %v12313_v57 = vld [vmem:[#allocation38_spill] sm:$0xff] }
 0x1ae   : > { %v1165_v60 = vpack.c.bf16 %v12313_v57, %v12313_v57 }
 0x1af   : > { %v3277_v56 = vrot.slane %v3275_v28, 5  ;;  %v2916_v21 = vmax.f32 %v2741_v40, 0.0  ;;  %v3945_v5 = vsel %vm9324_vm5, %v3943_v27, %v3944_v44 }
 0x1b0   : > { %v4357_v36 = vunpack.c.l.b16 %v3945_v5 }
 0x1b1   : > { %v2996_v15 = vmul.f32 %v9304_v26, %v2916_v21  ;;  %v3278_v43 = vsel %vm9341_vm7, %v3273_v49, %v3277_v56  ;;  %2794 = vmatmul.bf16.gmra.mxu2 %v9604_v23  ;;  %v9621_v14 = vpop.f32.mrf.mxu2 }
 0x1b2   : > { %v9609_v4 = vpop.f32.mrf.mxu0  ;;  %v2533_v17 = vpop.f32.mrf.mxu1  ;;  %v9612_v39 = vpack.c.b16 %v4357_v36, %v4356_v16  ;;  %v9616_v34 = vunpack.c.l.b16 %v3278_v43  ;;  %v8454_v43 = vld [vmem:[%s12109_s3 + $0x78] sm:$0xff] }
 0x1b3   : > { %v3072_v42 = vpack.c.bf16 %v2996_v15, %v2996_v15  ;;  %v2534_v28 = vadd.f32 %v2533_v17, %v2325_v25  ;;  %4821 = vmatpush.bf16.msrb.mxu3 %v8454_v43 }
 0x1b4   : > { %12312 = vst [vmem:[#allocation89_spill] sm:$0xff] %v9616_v34 }
 0x1b5   : > { %v3280_v44 = vshrl.u32 %v3072_v42, 16  ;;  %v3283_v40 = vshll.u32 %v3072_v42, 16  ;;  %v2743_v27 = vadd.f32 %v9528_v0, %v2534_v28  ;;  %v4118_v25 = vunpack.c.l.b16 %v3072_v42 }
 0x1b6   : > { %v8024_v0 = vrot.slane %v3072_v42, 9  ;;  %v1485_v42 = vunpack.c.l.b16 %v1165_v60 }
 0x1b7   : > { %v2917_v56 = vmax.f32 %v2743_v27, 0.0  ;;  %v3282_v21 = vrot.slane %v3280_v44, 4  ;;  %v3285_v12 = vrot.slane %v3283_v40, 5  ;;  %v12314_v27 = vld [vmem:[#allocation39_spill] sm:$0xff] }
 0x1b8   : > { %v1166_v44 = vpack.c.bf16 %v12314_v27, %v12314_v27  ;;  %v2330_v27 = vadd.f32 %v9285_v10, %v9541_v29 }
 0x1b9   : > { %v3073_v5 = vpack.c.bf16 %v2917_v56, %v2917_v56  ;;  %v3286_v17 = vor.u32 %v3285_v12, %v3282_v21 }
 0x1ba   : > { %v9625_v49 = vpop.f32.mrf.mxu0  ;;  %v2536_v16 = vpop.f32.mrf.mxu1  ;;  %v1486_v21 = vunpack.c.l.b16 %v1166_v44 }
 0x1bb   : > { %v2537_v36 = vadd.f32 %v2536_v16, %v2328_v61  ;;  %v4119_v15 = vunpack.c.l.b16 %v3073_v5  ;;  %v3293_v28 = vshrl.u32 %v3073_v5, 16  ;;  %v3948_v40 = vrot.slane %v3073_v5, 5  ;;  %v9637_v16 = vpop.f32.mrf.mxu2 }
 0x1bc   : > { %v3289_v46 = vshll.u32 %v3073_v5, 16  ;;  %v9643_v8 = vpack.c.b16 %v1486_v21, %v1485_v42 }
 0x1bd   : > { %v2746_v56 = vadd.f32 %v9545_v7, %v2537_v36  ;;  %2381 = vmatmul.bf16.gmra.mxu0 %v9496_v20  ;;  %2575 = vmatmul.bf16.gmra.mxu1 %v9460_v47  ;;  %v4172_v61 = vpack.c.b16 %v4119_v15, %v4118_v25  ;;  %v3949_v12 = vsel %vm9324_vm5, %v8024_v0, %v3948_v40  ;;  %v3287_v7 = vrot.slane %v3286_v17, 4 }
 0x1be   : > { %v3291_v36 = vrot.slane %v3289_v46, 5  ;;  %v3295_v47 = vrot.slane %v3293_v28, 4  ;;  %v4358_v34 = vunpack.c.l.b16 %v3949_v12  ;;  %v12317_v12 = vld [vmem:[#allocation40_spill] sm:$0xff] }
 0x1bf   : > { %v2918_v57 = vmax.f32 %v2746_v56, 0.0  ;;  %4700 = vmatmul.bf16.gmra.mxu3 %v4172_v61  ;;  %v3950_v56 = vrot.slane %v3948_v40, 4 }
 0x1c0   : > { %v3292_v5 = vsel %vm9341_vm7, %v3287_v7, %v3291_v36  ;;  %v3296_v29 = vor.u32 %v3295_v47, %v3291_v36 }
 0x1c1   : > { %v2998_v25 = vmul.f32 %v9350_v33, %v2918_v57  ;;  %2799 = vmatmul.bf16.gmra.mxu2 %v9643_v8  ;;  %v2333_v57 = vadd.f32 %v9285_v10, %v9549_v35  ;;  %v9664_v18 = vunpack.c.l.b16 %v3292_v5 }
 0x1c2   : > { %v9648_v15 = vpop.f32.mrf.mxu0  ;;  %v2538_v43 = vpop.f32.mrf.mxu1 }
 0x1c3   : > { %v3074_v0 = vpack.c.bf16 %v2998_v25, %v2998_v25  ;;  %v2539_v60 = vadd.f32 %v2538_v43, %v2330_v27  ;;  %v3297_v27 = vrot.slane %v3296_v29, 4  ;;  %12315 = vst [vmem:[#allocation90_spill] sm:$0xff] %v9664_v18  ;;  %v1167_v29 = vpack.c.bf16 %v12317_v12, %v12317_v12  ;;  %v12319_v12 = vld [vmem:[#allocation42_spill] sm:$0xff] }
 0x1c4   : > { %v9652_v46 = vpop.f32.mrf.mxu2  ;;  %v1169_v18 = vpack.c.bf16 %v12319_v12, %v12319_v12 }
 0x1c5   : > { %v3303_v44 = vshrl.u32 %v3074_v0, 16  ;;  %v2748_v17 = vadd.f32 %v9560_v32, %v2539_v60  ;;  %v3951_v28 = vrot.slane %v3074_v0, 5  ;;  %v3299_v61 = vshll.u32 %v3074_v0, 16 }
 0x1c7   : > { %v2919_v42 = vmax.f32 %v2748_v17, 0.0  ;;  %v3952_v21 = vsel %vm9324_vm5, %v3950_v56, %v3951_v28  ;;  %v3305_v7 = vrot.slane %v3303_v44, 4  ;;  %v3301_v36 = vrot.slane %v3299_v61, 5  ;;  %v12318_v56 = vld [vmem:[#allocation41_spill] sm:$0xff] }
 0x1c8   : > { %v4359_v25 = vunpack.c.l.b16 %v3952_v21  ;;  %v1168_v61 = vpack.c.bf16 %v12318_v56, %v12318_v56 }
 0x1c9   : > { %v2999_v47 = vmul.f32 0.0, %v2919_v42  ;;  %v3302_v40 = vsel %vm9341_vm7, %v3297_v27, %v3301_v36  ;;  %v3306_v44 = vor.u32 %v3305_v7, %v3301_v36  ;;  %v3953_v42 = vrot.slane %v3951_v28, 4 }
 0x1ca   : > { %v9658_v43 = vpop.f32.mrf.mxu0  ;;  %v2541_v32 = vpop.f32.mrf.mxu1  ;;  %v9660_v60 = vpack.c.b16 %v4359_v25, %v4358_v34  ;;  %v9666_v52 = vunpack.c.l.b16 %v3302_v40  ;;  %v2335_v7 = vadd.f32 %v9285_v10, %v9571_v54  ;;  %v1487_v27 = vunpack.c.l.b16 %v1167_v29 }
 0x1cb   : > { %v3124_v35 = vpack.c.bf16 %v2999_v47, %v2999_v47  ;;  %v2542_v17 = vadd.f32 %v2541_v32, %v2333_v57  ;;  %v1488_v36 = vunpack.c.l.b16 %v1168_v61  ;;  %v4120_v29 = vunpack.c.l.b16 %v3074_v0 }
 0x1cc   : > { %12316 = vst [vmem:[#allocation91_spill] sm:$0xff] %v9666_v52  ;;  %v9675_v5 = vpop.f32.mrf.mxu2  ;;  %v12320_v52 = vld [vmem:[#allocation43_spill] sm:$0xff] }
 0x1cd   : > { %v3309_v21 = vshll.u32 %v3124_v35, 16  ;;  %v3954_v34 = vrot.slane %v3124_v35, 5  ;;  %v2751_v25 = vadd.f32 %v9581_v30, %v2542_v17  ;;  %2386 = vmatmul.bf16.gmra.mxu0 %v9536_v41  ;;  %2580 = vmatmul.bf16.gmra.mxu1 %v9496_v20  ;;  %v3307_v30 = vrot.slane %v3306_v44, 4 }
 0x1ce   : > { %v9683_v40 = vpack.c.b16 %v1488_v36, %v1487_v27  ;;  %v1170_v38 = vpack.c.bf16 %v12320_v52, %v12320_v52 }
 0x1cf   : > { %v3311_v47 = vrot.slane %v3309_v21, 5  ;;  %v2920_v28 = vmax.f32 %v2751_v25, 0.0  ;;  %v3955_v32 = vsel %vm9324_vm5, %v3953_v42, %v3954_v34  ;;  %v9697_v25 = vld [vmem:[%s12108_s2] ss:$0 sm:$0xff] }
 0x1d0   : > { %v2338_v27 = vadd.f32 %v9697_v25, %v9587_v48 }
 0x1d1   : > { %v3000_v20 = vmul.f32 %v9304_v26, %v2920_v28  ;;  %v3312_v35 = vsel %vm9341_vm7, %v3307_v30, %v3311_v47  ;;  %2804 = vmatmul.bf16.gmra.mxu2 %v9683_v40 }
 0x1d2   : > { %v9688_v17 = vpop.f32.mrf.mxu0  ;;  %v2543_v56 = vpop.f32.mrf.mxu1 }
 0x1d3   : > { %v3075_v10 = vpack.c.bf16 %v3000_v20, %v3000_v20  ;;  %v2544_v54 = vadd.f32 %v2543_v56, %v2335_v7 }
 0x1d4   : > { %v9692_v34 = vpop.f32.mrf.mxu2 }
 0x1d5   : > { %v3314_v61 = vshrl.u32 %v3075_v10, 16  ;;  %v3317_v21 = vshll.u32 %v3075_v10, 16  ;;  %v2753_v42 = vadd.f32 %v9598_v3, %v2544_v54  ;;  %v4121_v44 = vunpack.c.l.b16 %v3075_v10 }
 0x1d6   : > { %v8025_v56 = vrot.slane %v3075_v10, 9 }
 0x1d7   : > { %v2921_v36 = vmax.f32 %v2753_v42, 0.0  ;;  %v4173_v47 = vpack.c.b16 %v4121_v44, %v4120_v29  ;;  %v3316_v28 = vrot.slane %v3314_v61, 4  ;;  %v3319_v7 = vrot.slane %v3317_v21, 5 }
 0x1d8   : > { %v2340_v29 = vadd.f32 %v9697_v25, %v9609_v4  ;;  %v1489_v42 = vunpack.c.l.b16 %v1169_v18  ;;  %v1490_v44 = vunpack.c.l.b16 %v1170_v38 }
 0x1d9   : > { %v3076_v0 = vpack.c.bf16 %v2921_v36, %v2921_v36  ;;  %4705 = vmatmul.bf16.gmra.mxu3 %v4173_v47  ;;  %v3320_v54 = vor.u32 %v3319_v7, %v3316_v28  ;;  %v4360_v36 = vunpack.c.l.b16 %v3955_v32  ;;  %v9726_v32 = vunpack.c.l.b16 %v3312_v35 }
 0x1da   : > { %v9701_v30 = vpop.f32.mrf.mxu0  ;;  %v2546_v3 = vpop.f32.mrf.mxu1  ;;  %v9716_v4 = vpack.c.b16 %v1490_v44, %v1489_v42  ;;  %v2343_v35 = vadd.f32 %v9697_v25, %v9625_v49  ;;  %v12323_v49 = vld [vmem:[#allocation44_spill] sm:$0xff] }
 0x1db   : > { %v2547_v20 = vadd.f32 %v2546_v3, %v2338_v27  ;;  %v3327_v57 = vshrl.u32 %v3076_v0, 16  ;;  %v3958_v48 = vrot.slane %v3076_v0, 5  ;;  %v3323_v10 = vshll.u32 %v3076_v0, 16  ;;  %12321 = vst [vmem:[#allocation41_spill] sm:$0xff] %v9726_v32 }
 0x1dc   : > { %v9712_v21 = vpop.f32.mrf.mxu2  ;;  %v3321_v7 = vrot.slane %v3320_v54, 4 }
 0x1dd   : > { %v2756_v61 = vadd.f32 %v9621_v14, %v2547_v20  ;;  %2391 = vmatmul.bf16.gmra.mxu0 %v9564_v31  ;;  %2585 = vmatmul.bf16.gmra.mxu1 %v9536_v41  ;;  %v3959_v27 = vsel %vm9324_vm5, %v8025_v56, %v3958_v48  ;;  %v3325_v3 = vrot.slane %v3323_v10, 5  ;;  %v3329_v14 = vrot.slane %v3327_v57, 4 }
 0x1de   : > { %v4361_v28 = vunpack.c.l.b16 %v3959_v27  ;;  %v4122_v27 = vunpack.c.l.b16 %v3076_v0 }
 0x1df   : > { %v2922_v47 = vmax.f32 %v2756_v61, 0.0  ;;  %v3326_v41 = vsel %vm9341_vm7, %v3321_v7, %v3325_v3  ;;  %v3330_v10 = vor.u32 %v3329_v14, %v3325_v3 }
 0x1e0   : > { %v9719_v52 = vpack.c.b16 %v4361_v28, %v4360_v36  ;;  %v9728_v56 = vunpack.c.l.b16 %v3326_v41  ;;  %v3960_v28 = vrot.slane %v3958_v48, 4 }
 0x1e1   : > { %v3002_v20 = vmul.f32 %v9350_v33, %v2922_v47  ;;  %2809 = vmatmul.bf16.gmra.mxu2 %v9716_v4  ;;  %v3331_v3 = vrot.slane %v3330_v10, 4 }
 0x1e2   : > { %v9723_v18 = vpop.f32.mrf.mxu0  ;;  %v2548_v38 = vpop.f32.mrf.mxu1  ;;  %12322 = vst [vmem:[#allocation92_spill] sm:$0xff] %v9728_v56 }
 0x1e3   : > { %v3077_v54 = vpack.c.bf16 %v3002_v20, %v3002_v20  ;;  %v2549_v61 = vadd.f32 %v2548_v38, %v2340_v29 }
 0x1e4   : > { %v9733_v47 = vpop.f32.mrf.mxu2 }
 0x1e5   : > { %v3337_v42 = vshrl.u32 %v3077_v54, 16  ;;  %v2758_v44 = vadd.f32 %v9637_v16, %v2549_v61  ;;  %v4123_v36 = vunpack.c.l.b16 %v3077_v54  ;;  %v3961_v7 = vrot.slane %v3077_v54, 5 }
 0x1e6   : > { %v3333_v12 = vshll.u32 %v3077_v54, 16 }
 0x1e7   : > { %v2923_v41 = vmax.f32 %v2758_v44, 0.0  ;;  %v4174_v20 = vpack.c.b16 %v4123_v36, %v4122_v27  ;;  %v3339_v29 = vrot.slane %v3337_v42, 4  ;;  %v3962_v38 = vsel %vm9324_vm5, %v3960_v28, %v3961_v7  ;;  %v12324_v42 = vld [vmem:[#allocation45_spill] sm:$0xff] }
 0x1e8   : > { %v3335_v14 = vrot.slane %v3333_v12, 5  ;;  %v1171_v44 = vpack.c.bf16 %v12323_v49, %v12323_v49  ;;  %v1172_v27 = vpack.c.bf16 %v12324_v42, %v12324_v42  ;;  %v12327_v49 = vld [vmem:[#allocation46_spill] sm:$0xff] }
 0x1e9   : > { %v3003_v57 = vmul.f32 0.0, %v2923_v41  ;;  %4710 = vmatmul.bf16.gmra.mxu3 %v4174_v20  ;;  %v3963_v41 = vrot.slane %v3961_v7, 4 }
 0x1ea   : > { %v9739_v16 = vpop.f32.mrf.mxu0  ;;  %v2551_v0 = vpop.f32.mrf.mxu1  ;;  %v3336_v48 = vsel %vm9341_vm7, %v3331_v3, %v3335_v14  ;;  %v3340_v32 = vor.u32 %v3339_v29, %v3335_v14  ;;  %v1492_v20 = vunpack.c.l.b16 %v1172_v27 }
 0x1eb   : > { %v3125_v54 = vpack.c.bf16 %v3003_v57, %v3003_v57  ;;  %v2552_v61 = vadd.f32 %v2551_v0, %v2343_v35  ;;  %v2345_v57 = vadd.f32 %v9697_v25, %v9648_v15  ;;  %v1491_v35 = vunpack.c.l.b16 %v1171_v44 }
 0x1ec   : > { %v9750_v28 = vpop.f32.mrf.mxu2  ;;  %v3341_v0 = vrot.slane %v3340_v32, 4  ;;  %v9766_v27 = vunpack.c.l.b16 %v3336_v48 }
 0x1ed   : > { %v3343_v36 = vshll.u32 %v3125_v54, 16  ;;  %v3964_v10 = vrot.slane %v3125_v54, 5  ;;  %v2761_v12 = vadd.f32 %v9652_v46, %v2552_v61  ;;  %2396 = vmatmul.bf16.gmra.mxu0 %v9604_v23  ;;  %2590 = vmatmul.bf16.gmra.mxu1 %v9564_v31  ;;  %v9756_v54 = vpack.c.b16 %v1492_v20, %v1491_v35 }
 0x1ee   : > { %v4362_v46 = vunpack.c.l.b16 %v3962_v38  ;;  %12325 = vst [vmem:[#allocation45_spill] sm:$0xff] %v9766_v27 }
 0x1ef   : > { %v3345_v29 = vrot.slane %v3343_v36, 5  ;;  %v2924_v3 = vmax.f32 %v2761_v12, 0.0  ;;  %v3965_v14 = vsel %vm9324_vm5, %v3963_v41, %v3964_v10 }
 0x1f0   : > { %v4363_v61 = vunpack.c.l.b16 %v3965_v14 }
 0x1f1   : > { %v3004_v31 = vmul.f32 %v9304_v26, %v2924_v3  ;;  %v3346_v7 = vsel %vm9341_vm7, %v3341_v0, %v3345_v29  ;;  %2814 = vmatmul.bf16.gmra.mxu2 %v9756_v54  ;;  %v2348_v29 = vadd.f32 %v9697_v25, %v9658_v43  ;;  %v1173_v43 = vpack.c.bf16 %v12327_v49, %v12327_v49 }
 0x1f2   : > { %v9761_v42 = vpop.f32.mrf.mxu0  ;;  %v2553_v15 = vpop.f32.mrf.mxu1  ;;  %v9764_v44 = vpack.c.b16 %v4363_v61, %v4362_v46  ;;  %v9768_v36 = vunpack.c.l.b16 %v3346_v7 }
 0x1f3   : > { %v3078_v32 = vpack.c.bf16 %v3004_v31, %v3004_v31  ;;  %v2554_v10 = vadd.f32 %v2553_v15, %v2345_v57  ;;  %v8453_v15 = vld [vmem:[%s12109_s3 + $0x70] sm:$0xff] }
 0x1f4   : > { %12326 = vst [vmem:[#allocation93_spill] sm:$0xff] %v9768_v36  ;;  %v9773_v20 = vpop.f32.mrf.mxu2  ;;  %4822 = vmatpush.bf16.msrb.mxu3 %v8453_v15 }
 0x1f5   : > { %v3348_v12 = vshrl.u32 %v3078_v32, 16  ;;  %v3351_v41 = vshll.u32 %v3078_v32, 16  ;;  %v2763_v35 = vadd.f32 %v9675_v5, %v2554_v10  ;;  %v4124_v57 = vunpack.c.l.b16 %v3078_v32 }
 0x1f6   : > { %v8026_v5 = vrot.slane %v3078_v32, 9  ;;  %v1493_v32 = vunpack.c.l.b16 %v1173_v43 }
 0x1f7   : > { %v2925_v3 = vmax.f32 %v2763_v35, 0.0  ;;  %v3350_v14 = vrot.slane %v3348_v12, 4  ;;  %v3353_v48 = vrot.slane %v3351_v41, 5  ;;  %v12328_v35 = vld [vmem:[#allocation47_spill] sm:$0xff] }
 0x1f8   : > { %v1174_v12 = vpack.c.bf16 %v12328_v35, %v12328_v35  ;;  %v2350_v35 = vadd.f32 %v9697_v25, %v9688_v17 }
 0x1f9   : > { %v3079_v0 = vpack.c.bf16 %v2925_v3, %v2925_v3  ;;  %v3354_v10 = vor.u32 %v3353_v48, %v3350_v14 }
 0x1fa   : > { %v9777_v46 = vpop.f32.mrf.mxu0  ;;  %v2556_v61 = vpop.f32.mrf.mxu1  ;;  %v1494_v14 = vunpack.c.l.b16 %v1174_v12 }
 0x1fb   : > { %v2557_v31 = vadd.f32 %v2556_v61, %v2348_v29  ;;  %v4125_v7 = vunpack.c.l.b16 %v3079_v0  ;;  %v3361_v38 = vshrl.u32 %v3079_v0, 16  ;;  %v3968_v41 = vrot.slane %v3079_v0, 5 }
 0x1fc   : > { %v9789_v61 = vpop.f32.mrf.mxu2  ;;  %v3357_v27 = vshll.u32 %v3079_v0, 16  ;;  %v9795_v36 = vpack.c.b16 %v1494_v14, %v1493_v32 }
 0x1fd   : > { %v2766_v3 = vadd.f32 %v9692_v34, %v2557_v31  ;;  %2401 = vmatmul.bf16.gmra.mxu0 %v9643_v8  ;;  %2595 = vmatmul.bf16.gmra.mxu1 %v9604_v23  ;;  %v4175_v29 = vpack.c.b16 %v4125_v7, %v4124_v57  ;;  %v3969_v48 = vsel %vm9324_vm5, %v8026_v5, %v3968_v41  ;;  %v3355_v34 = vrot.slane %v3354_v10, 4 }
 0x1fe   : > { %v3359_v31 = vrot.slane %v3357_v27, 5  ;;  %v3363_v23 = vrot.slane %v3361_v38, 4  ;;  %v3970_v38 = vrot.slane %v3968_v41, 4 }
 0x1ff   : > { %v2926_v49 = vmax.f32 %v2766_v3, 0.0  ;;  %4715 = vmatmul.bf16.gmra.mxu3 %v4175_v29  ;;  %v2353_v29 = vadd.f32 %v9697_v25, %v9701_v30 }
 0x200   : > { %v3360_v0 = vsel %vm9341_vm7, %v3355_v34, %v3359_v31  ;;  %v3364_v43 = vor.u32 %v3363_v23, %v3359_v31  ;;  %v4364_v34 = vunpack.c.l.b16 %v3969_v48  ;;  %v12331_v48 = vld [vmem:[#allocation48_spill] sm:$0xff] }
 0x201   : > { %v3006_v57 = vmul.f32 %v9350_v33, %v2926_v49  ;;  %2819 = vmatmul.bf16.gmra.mxu2 %v9795_v36  ;;  %v9821_v50 = vunpack.c.l.b16 %v3360_v0 }
 0x202   : > { %v9800_v7 = vpop.f32.mrf.mxu0  ;;  %v2558_v15 = vpop.f32.mrf.mxu1  ;;  %v3365_v23 = vrot.slane %v3364_v43, 4  ;;  %v1175_v43 = vpack.c.bf16 %v12331_v48, %v12331_v48 }
 0x203   : > { %v9803_v5 = vpack.c.bf16 %v3006_v57, %v3006_v57  ;;  %v2559_v17 = vadd.f32 %v2558_v15, %v2350_v35  ;;  %12329 = vst [vmem:[#allocation94_spill] sm:$0xff] %v9821_v50 }
 0x204   : > { %v9807_v12 = vpop.f32.mrf.mxu2 }
 0x205   : > { %v3371_v10 = vshrl.u32 %v9803_v5, 16  ;;  %v2768_v27 = vadd.f32 %v9712_v21, %v2559_v17  ;;  %v3971_v49 = vrot.slane %v9803_v5, 5  ;;  %v3367_v3 = vshll.u32 %v9803_v5, 16 }
 0x207   : > { %v2927_v32 = vmax.f32 %v2768_v27, 0.0  ;;  %v3972_v14 = vsel %vm9324_vm5, %v3970_v38, %v3971_v49  ;;  %v3373_v35 = vrot.slane %v3371_v10, 4  ;;  %v3369_v57 = vrot.slane %v3367_v3, 5  ;;  %v12332_v38 = vld [vmem:[#allocation49_spill] sm:$0xff] }
 0x208   : > { %v4365_v31 = vunpack.c.l.b16 %v3972_v14  ;;  %v1176_v3 = vpack.c.bf16 %v12332_v38, %v12332_v38 }
 0x209   : > { %v3007_v21 = vmul.f32 0.0, %v2927_v32  ;;  %v3370_v56 = vsel %vm9341_vm7, %v3365_v23, %v3369_v57  ;;  %v3374_v10 = vor.u32 %v3373_v35, %v3369_v57  ;;  %v3973_v32 = vrot.slane %v3971_v49, 4 }
 0x20a   : > { %v9815_v15 = vpop.f32.mrf.mxu0  ;;  %v2561_v41 = vpop.f32.mrf.mxu1  ;;  %v9817_v17 = vpack.c.b16 %v4365_v31, %v4364_v34  ;;  %v9823_v11 = vunpack.c.l.b16 %v3370_v56  ;;  %v1495_v35 = vunpack.c.l.b16 %v1175_v43  ;;  %v1496_v23 = vunpack.c.l.b16 %v1176_v3 }
 0x20b   : > { %v3126_v30 = vpack.c.bf16 %v3007_v21, %v3007_v21  ;;  %v2562_v27 = vadd.f32 %v2561_v41, %v2353_v29  ;;  %v2355_v29 = vadd.f32 %v9697_v25, %v9723_v18 }
 0x20c   : > { %12330 = vst [vmem:[#allocation95_spill] sm:$0xff] %v9823_v11  ;;  %v9832_v0 = vpop.f32.mrf.mxu2  ;;  %v9843_v41 = vpack.c.b16 %v1496_v23, %v1495_v35  ;;  %v12335_v11 = vld [vmem:[#allocation50_spill] sm:$0xff] }
 0x20d   : > { %v3377_v14 = vshll.u32 %v3126_v30, 16  ;;  %v3974_v34 = vrot.slane %v3126_v30, 5  ;;  %v2771_v31 = vadd.f32 %v9733_v47, %v2562_v27  ;;  %2406 = vmatmul.bf16.gmra.mxu0 %v9683_v40  ;;  %2600 = vmatmul.bf16.gmra.mxu1 %v9643_v8  ;;  %v8462_v47 = vld [vmem:[%s12109_s3 + $0xb8] sm:$0xff]  ;;  %v3375_v8 = vrot.slane %v3374_v10, 4  ;;  %v9845_v30 = vpop.f32.mrf.mxu3 }
 0x20e   : > { %12333 = vst [vmem:[#allocation49_spill] sm:$0xff] %v9845_v30  ;;  %4980 = vmatpush.bf16.msrb.mxu0 %v8462_v47  ;;  %v1177_v30 = vpack.c.bf16 %v12335_v11, %v12335_v11 }
 0x20f   : > { %v3379_v57 = vrot.slane %v3377_v14, 5  ;;  %v2928_v49 = vmax.f32 %v2771_v31, 0.0  ;;  %v3975_v21 = vsel %vm9324_vm5, %v3973_v32, %v3974_v34  ;;  %v4126_v32 = vunpack.c.l.b16 %v9803_v5 }
 0x211   : > { %v3008_v27 = vmul.f32 %v9304_v26, %v2928_v49  ;;  %v3380_v18 = vsel %vm9341_vm7, %v3375_v8, %v3379_v57  ;;  %2824 = vmatmul.bf16.gmra.mxu2 %v9843_v41  ;;  %v2358_v49 = vadd.f32 %v9697_v25, %v9739_v16  ;;  %v1178_v16 = vpack.c.bf16 %v12336_v55, %v12336_v55 }
 0x212   : > { %v9850_v43 = vpop.f32.mrf.mxu0  ;;  %v2563_v38 = vpop.f32.mrf.mxu1 }
 0x213   : > { %v3081_v3 = vpack.c.bf16 %v3008_v27, %v3008_v27  ;;  %v2564_v14 = vadd.f32 %v2563_v38, %v2355_v29 }
 0x214   : > { %v9855_v23 = vpop.f32.mrf.mxu2 }
 0x215   : > { %v3382_v10 = vshrl.u32 %v3081_v3, 16  ;;  %v3385_v34 = vshll.u32 %v3081_v3, 16  ;;  %v2773_v31 = vadd.f32 %v9750_v28, %v2564_v14  ;;  %v4127_v35 = vunpack.c.l.b16 %v3081_v3  ;;  %v9861_v5 = vpop.f32.mrf.mxu3 }
 0x216   : > { %12334 = vst [vmem:[#allocation96_spill] sm:$0xff] %v9861_v5  ;;  %v8027_v50 = vrot.slane %v3081_v3, 9  ;;  %v1497_v3 = vunpack.c.l.b16 %v1177_v30 }
 0x217   : > { %v2929_v57 = vmax.f32 %v2773_v31, 0.0  ;;  %v4176_v47 = vpack.c.b16 %v4127_v35, %v4126_v32  ;;  %v3384_v8 = vrot.slane %v3382_v10, 4  ;;  %v3387_v56 = vrot.slane %v3385_v34, 5 }
 0x218   : > { %v2360_v10 = vadd.f32 %v9697_v25, %v9761_v42  ;;  %v1498_v35 = vunpack.c.l.b16 %v1178_v16 }
 0x219   : > { %v3082_v48 = vpack.c.bf16 %v2929_v57, %v2929_v57  ;;  %4720 = vmatmul.bf16.gmra.mxu3 %v4176_v47  ;;  %v3388_v28 = vor.u32 %v3387_v56, %v3384_v8  ;;  %v4366_v57 = vunpack.c.l.b16 %v3975_v21 }
 0x21a   : > { %v9859_v27 = vpop.f32.mrf.mxu0  ;;  %v2566_v29 = vpop.f32.mrf.mxu1  ;;  %v9876_v42 = vpack.c.b16 %v1498_v35, %v1497_v3 }
 0x21b   : > { %v2567_v38 = vadd.f32 %v2566_v29, %v2358_v49  ;;  %v3395_v14 = vshrl.u32 %v3082_v48, 16  ;;  %v3978_v32 = vrot.slane %v3082_v48, 5  ;;  %v3391_v56 = vshll.u32 %v3082_v48, 16 }
 0x21c   : > { %v9872_v31 = vpop.f32.mrf.mxu2  ;;  %v3389_v29 = vrot.slane %v3388_v28, 4 }
 0x21d   : > { %v2776_v34 = vadd.f32 %v9773_v20, %v2567_v38  ;;  %2411 = vmatmul.bf16.gmra.mxu0 %v9716_v4  ;;  %2605 = vmatmul.bf16.gmra.mxu1 %v9683_v40  ;;  %v3979_v49 = vsel %vm9324_vm5, %v8027_v50, %v3978_v32  ;;  %v3393_v55 = vrot.slane %v3391_v56, 5  ;;  %v3397_v20 = vrot.slane %v3395_v14, 4  ;;  %v9890_v28 = vpop.f32.mrf.mxu3 }
 0x21e   : > { %v4367_v8 = vunpack.c.l.b16 %v3979_v49  ;;  %v9886_v50 = vunpack.c.l.b16 %v3380_v18  ;;  %12339 = vst [vmem:[#allocation99_spill] sm:$0xff] %v9890_v28 }
 0x21f   : > { %v2930_v47 = vmax.f32 %v2776_v34, 0.0  ;;  %v3394_v40 = vsel %vm9341_vm7, %v3389_v29, %v3393_v55  ;;  %v3398_v3 = vor.u32 %v3397_v20, %v3393_v55  ;;  %v3980_v29 = vrot.slane %v3978_v32, 4 }
 0x220   : > { %v9879_v11 = vpack.c.b16 %v4367_v8, %v4366_v57  ;;  %12337 = vst [vmem:[#allocation97_spill] sm:$0xff] %v9886_v50  ;;  %v9888_v21 = vunpack.c.l.b16 %v3394_v40  ;;  %v4128_v57 = vunpack.c.l.b16 %v3082_v48  ;;  %v2363_v40 = vadd.f32 %v9697_v25, %v9777_v46  ;;  %v12340_v46 = vld [vmem:[#allocation52_spill] sm:$0xff] }
 0x221   : > { %v3010_v38 = vmul.f32 %v9350_v33, %v2930_v47  ;;  %2829 = vmatmul.bf16.gmra.mxu2 %v9876_v42  ;;  %v3399_v55 = vrot.slane %v3398_v3, 4 }
 0x222   : > { %v9883_v30 = vpop.f32.mrf.mxu0  ;;  %v2568_v16 = vpop.f32.mrf.mxu1  ;;  %12338 = vst [vmem:[#allocation98_spill] sm:$0xff] %v9888_v21  ;;  %v12347_v21 = vld [vmem:[#allocation55_spill] sm:$0xff] }
 0x223   : > { %v3083_v34 = vpack.c.bf16 %v3010_v38, %v3010_v38  ;;  %v2569_v14 = vadd.f32 %v2568_v16, %v2360_v10 }
 0x224   : > { %v9895_v8 = vpop.f32.mrf.mxu2 }
 0x225   : > { %v3405_v35 = vshrl.u32 %v3083_v34, 16  ;;  %v2778_v49 = vadd.f32 %v9789_v61, %v2569_v14  ;;  %v4129_v47 = vunpack.c.l.b16 %v3083_v34  ;;  %v3981_v18 = vrot.slane %v3083_v34, 5 }
 0x226   : > { %v3401_v5 = vshll.u32 %v3083_v34, 16 }
 0x227   : > { %v2931_v28 = vmax.f32 %v2778_v49, 0.0  ;;  %v4177_v38 = vpack.c.b16 %v4129_v47, %v4128_v57  ;;  %v3407_v10 = vrot.slane %v3405_v35, 4  ;;  %v3982_v16 = vsel %vm9324_vm5, %v3980_v29, %v3981_v18  ;;  %v12341_v35 = vld [vmem:[#allocation53_spill] sm:$0xff]  ;;  %v9909_v47 = vpop.f32.mrf.mxu3 }
 0x228   : > { %v3403_v20 = vrot.slane %v3401_v5, 5  ;;  %v1179_v49 = vpack.c.bf16 %v12340_v46, %v12340_v46  ;;  %v1180_v57 = vpack.c.bf16 %v12341_v35, %v12341_v35  ;;  %12342 = vst [vmem:[#allocation53_spill] sm:$0xff] %v9909_v47 }
 0x229   : > { %v3011_v56 = vmul.f32 0.0, %v2931_v28  ;;  %4725 = vmatmul.bf16.gmra.mxu3 %v4177_v38 }
 0x22a   : > { %v9901_v61 = vpop.f32.mrf.mxu0  ;;  %v2571_v48 = vpop.f32.mrf.mxu1  ;;  %v3404_v32 = vsel %vm9341_vm7, %v3399_v55, %v3403_v20  ;;  %v3408_v50 = vor.u32 %v3407_v10, %v3403_v20  ;;  %v1499_v38 = vunpack.c.l.b16 %v1179_v49  ;;  %v1500_v10 = vunpack.c.l.b16 %v1180_v57 }
 0x22b   : > { %v3127_v34 = vpack.c.bf16 %v3011_v56, %v3011_v56  ;;  %v2572_v14 = vadd.f32 %v2571_v48, %v2363_v40  ;;  %v3983_v56 = vrot.slane %v3981_v18, 4  ;;  %v2365_v40 = vadd.f32 %v9697_v25, %v9800_v7 }
 0x22c   : > { %v9914_v29 = vpop.f32.mrf.mxu2  ;;  %v9920_v35 = vpack.c.b16 %v1500_v10, %v1499_v38  ;;  %v9930_v57 = vunpack.c.l.b16 %v3404_v32  ;;  %v8452_v10 = vld [vmem:[%s12109_s3 + $0x68] sm:$0xff]  ;;  %v2368_v32 = vadd.f32 %v9697_v25, %v9815_v15  ;;  %v1182_v15 = vpack.c.bf16 %v12347_v21, %v12347_v21 }
 0x22d   : > { %v3411_v5 = vshll.u32 %v3127_v34, 16  ;;  %v3984_v28 = vrot.slane %v3127_v34, 5  ;;  %v2781_v3 = vadd.f32 %v9807_v12, %v2572_v14  ;;  %2416 = vmatmul.bf16.gmra.mxu0 %v9756_v54  ;;  %2610 = vmatmul.bf16.gmra.mxu1 %v9716_v4  ;;  %v3409_v34 = vrot.slane %v3408_v50, 4 }
 0x22e   : > { %v4368_v12 = vunpack.c.l.b16 %v3982_v16  ;;  %12343 = vst [vmem:[#allocation100_spill] sm:$0xff] %v9930_v57  ;;  %4823 = vmatpush.bf16.msrb.mxu3 %v8452_v10 }
 0x22f   : > { %v3413_v55 = vrot.slane %v3411_v5, 5  ;;  %v2932_v20 = vmax.f32 %v2781_v3, 0.0  ;;  %v3985_v48 = vsel %vm9324_vm5, %v3983_v56, %v3984_v28 }
 0x230   : > { %v4369_v14 = vunpack.c.l.b16 %v3985_v48 }
 0x231   : > { %v3012_v4 = vmul.f32 %v9304_v26, %v2932_v20  ;;  %v3414_v18 = vsel %vm9341_vm7, %v3409_v34, %v3413_v55  ;;  %2834 = vmatmul.bf16.gmra.mxu2 %v9920_v35  ;;  %v9942_v20 = vpop.f32.mrf.mxu3 }
 0x232   : > { %v9925_v46 = vpop.f32.mrf.mxu0  ;;  %v2573_v7 = vpop.f32.mrf.mxu1  ;;  %v9928_v49 = vpack.c.b16 %v4369_v14, %v4368_v12  ;;  %v9932_v5 = vunpack.c.l.b16 %v3414_v18  ;;  %12345 = vst [vmem:[#allocation102_spill] sm:$0xff] %v9942_v20 }
 0x233   : > { %v3084_v50 = vpack.c.bf16 %v3012_v4, %v3012_v4  ;;  %v2574_v28 = vadd.f32 %v2573_v7, %v2365_v40 }
 0x234   : > { %12344 = vst [vmem:[#allocation101_spill] sm:$0xff] %v9932_v5  ;;  %v9940_v55 = vpop.f32.mrf.mxu2  ;;  %v12346_v5 = vld [vmem:[#allocation54_spill] sm:$0xff] }
 0x235   : > { %v3416_v3 = vshrl.u32 %v3084_v50, 16  ;;  %v3419_v56 = vshll.u32 %v3084_v50, 16  ;;  %v2783_v38 = vadd.f32 %v9832_v0, %v2574_v28  ;;  %v4130_v0 = vunpack.c.l.b16 %v3084_v50 }
 0x236   : > { %v8028_v28 = vrot.slane %v3084_v50, 9  ;;  %v1181_v20 = vpack.c.bf16 %v12346_v5, %v12346_v5 }
 0x237   : > { %v2933_v48 = vmax.f32 %v2783_v38, 0.0  ;;  %v3418_v40 = vrot.slane %v3416_v3, 4  ;;  %v3421_v34 = vrot.slane %v3419_v56, 5 }
 0x238   : > { %v1501_v50 = vunpack.c.l.b16 %v1181_v20 }
 0x239   : > { %v3085_v12 = vpack.c.bf16 %v2933_v48, %v2933_v48  ;;  %v3422_v16 = vor.u32 %v3421_v34, %v3418_v40  ;;  %v1502_v48 = vunpack.c.l.b16 %v1182_v15  ;;  %v2370_v34 = vadd.f32 %v9697_v25, %v9850_v43 }
 0x23a   : > { %v9946_v14 = vpop.f32.mrf.mxu0  ;;  %v2576_v4 = vpop.f32.mrf.mxu1 }
 0x23b   : > { %v2577_v18 = vadd.f32 %v2576_v4, %v2368_v32  ;;  %v4131_v7 = vunpack.c.l.b16 %v3085_v12  ;;  %v3429_v57 = vshrl.u32 %v3085_v12, 16  ;;  %v3988_v38 = vrot.slane %v3085_v12, 5 }
 0x23c   : > { %v9955_v10 = vpop.f32.mrf.mxu2  ;;  %v3425_v32 = vshll.u32 %v3085_v12, 16  ;;  %v3423_v21 = vrot.slane %v3422_v16, 4 }
 0x23d   : > { %v2786_v3 = vadd.f32 %v9855_v23, %v2577_v18  ;;  %2421 = vmatmul.bf16.gmra.mxu0 %v9795_v36  ;;  %2615 = vmatmul.bf16.gmra.mxu1 %v9756_v54  ;;  %v4178_v56 = vpack.c.b16 %v4131_v7, %v4130_v0  ;;  %v3989_v40 = vsel %vm9324_vm5, %v8028_v28, %v3988_v38  ;;  %v3431_v5 = vrot.slane %v3429_v57, 4  ;;  %v9963_v54 = vpop.f32.mrf.mxu3 }
 0x23e   : > { %v3427_v23 = vrot.slane %v3425_v32, 5  ;;  %v9961_v18 = vpack.c.b16 %v1502_v48, %v1501_v50  ;;  %12348 = vst [vmem:[#allocation103_spill] sm:$0xff] %v9963_v54  ;;  %v2373_v50 = vadd.f32 %v9697_v25, %v9859_v27 }
 0x23f   : > { %v2934_v4 = vmax.f32 %v2786_v3, 0.0  ;;  %4730 = vmatmul.bf16.gmra.mxu3 %v4178_v56  ;;  %v3990_v56 = vrot.slane %v3988_v38, 4 }
 0x240   : > { %v3428_v20 = vsel %vm9341_vm7, %v3423_v21, %v3427_v23  ;;  %v3432_v16 = vor.u32 %v3431_v5, %v3427_v23  ;;  %v4370_v5 = vunpack.c.l.b16 %v3989_v40 }
 0x241   : > { %v3014_v0 = vmul.f32 %v9350_v33, %v2934_v4  ;;  %2839 = vmatmul.bf16.gmra.mxu2 %v9961_v18 }
 0x242   : > { %v9968_v12 = vpop.f32.mrf.mxu0  ;;  %v2578_v7 = vpop.f32.mrf.mxu1 }
 0x243   : > { %v9971_v43 = vpack.c.bf16 %v3014_v0, %v3014_v0  ;;  %v2579_v28 = vadd.f32 %v2578_v7, %v2370_v34  ;;  %v3433_v0 = vrot.slane %v3432_v16, 4  ;;  %v12352_v16 = vld [vmem:[#allocation56_spill] sm:$0xff] }
 0x244   : > { %v9975_v3 = vpop.f32.mrf.mxu2 }
 0x245   : > { %v3439_v15 = vshrl.u32 %v9971_v43, 16  ;;  %v2788_v57 = vadd.f32 %v9872_v31, %v2579_v28  ;;  %v3991_v32 = vrot.slane %v9971_v43, 5  ;;  %v3435_v21 = vshll.u32 %v9971_v43, 16  ;;  %v9983_v31 = vpop.f32.mrf.mxu3 }
 0x246   : > { %12349 = vst [vmem:[#allocation104_spill] sm:$0xff] %v9983_v31 }
 0x247   : > { %v2935_v48 = vmax.f32 %v2788_v57, 0.0  ;;  %v3992_v4 = vsel %vm9324_vm5, %v3990_v56, %v3991_v32  ;;  %v3441_v34 = vrot.slane %v3439_v15, 4  ;;  %v3437_v7 = vrot.slane %v3435_v21, 5 }
 0x248   : > { %v4371_v23 = vunpack.c.l.b16 %v3992_v4  ;;  %v9991_v57 = vunpack.c.l.b16 %v3428_v20  ;;  %v1183_v21 = vpack.c.bf16 %v12352_v16, %v12352_v16  ;;  %v12353_v4 = vld [vmem:[#allocation57_spill] sm:$0xff]  ;;  %v3993_v31 = vrot.slane %v3991_v32, 4 }
 0x249   : > { %v3015_v28 = vmul.f32 0.0, %v2935_v48  ;;  %v3438_v27 = vsel %vm9341_vm7, %v3433_v0, %v3437_v7  ;;  %v3442_v40 = vor.u32 %v3441_v34, %v3437_v7  ;;  %v1184_v48 = vpack.c.bf16 %v12353_v4, %v12353_v4 }
 0x24a   : > { %v9985_v38 = vpop.f32.mrf.mxu0  ;;  %v2581_v54 = vpop.f32.mrf.mxu1  ;;  %v9987_v47 = vpack.c.b16 %v4371_v23, %v4370_v5  ;;  %12350 = vst [vmem:[#allocation105_spill] sm:$0xff] %v9991_v57  ;;  %v9993_v15 = vunpack.c.l.b16 %v3438_v27  ;;  %v1503_v34 = vunpack.c.l.b16 %v1183_v21 }
 0x24b   : > { %v3128_v6 = vpack.c.bf16 %v3015_v28, %v3015_v28  ;;  %v2582_v56 = vadd.f32 %v2581_v54, %v2373_v50  ;;  %v2375_v50 = vadd.f32 %v9697_v25, %v9883_v30  ;;  %v1504_v0 = vunpack.c.l.b16 %v1184_v48 }
 0x24c   : > { %12351 = vst [vmem:[#allocation106_spill] sm:$0xff] %v9993_v15  ;;  %v10002_v20 = vpop.f32.mrf.mxu2  ;;  %v4132_v48 = vunpack.c.l.b16 %v9971_v43 }
 0x24d   : > { %v3445_v24 = vshll.u32 %v3128_v6, 16  ;;  %v3994_v5 = vrot.slane %v3128_v6, 5  ;;  %v2791_v23 = vadd.f32 %v9895_v8, %v2582_v56  ;;  %2426 = vmatmul.bf16.gmra.mxu0 %v9843_v41  ;;  %2620 = vmatmul.bf16.gmra.mxu1 %v9795_v36  ;;  %v3443_v8 = vrot.slane %v3442_v40, 4  ;;  %v10018_v30 = vpop.f32.mrf.mxu3 }
 0x24e   : > { %v10010_v28 = vpack.c.b16 %v1504_v0, %v1503_v34  ;;  %12354 = vst [vmem:[#allocation57_spill] sm:$0xff] %v10018_v30  ;;  %v8461_v34 = vld [vmem:[%s12109_s3 + $0xb0] sm:$0xff]  ;;  %v12356_v30 = vld [vmem:[#allocation58_spill] sm:$0xff] }
 0x24f   : > { %v3447_v7 = vrot.slane %v3445_v24, 5  ;;  %v2936_v32 = vmax.f32 %v2791_v23, 0.0  ;;  %v3995_v6 = vsel %vm9324_vm5, %v3993_v31, %v3994_v5  ;;  %4981 = vmatpush.bf16.msrb.mxu0 %v8461_v34  ;;  %v1185_v13 = vpack.c.bf16 %v12356_v30, %v12356_v30 }
 0x251   : > { %v3016_v36 = vmul.f32 %v9304_v26, %v2936_v32  ;;  %v3448_v27 = vsel %vm9341_vm7, %v3443_v8, %v3447_v7  ;;  %2844 = vmatmul.bf16.gmra.mxu2 %v10010_v28  ;;  %v2378_v7 = vadd.f32 %v9697_v25, %v9901_v61  ;;  %v12357_v61 = vld [vmem:[#allocation59_spill] sm:$0xff]  ;;  %v1505_v34 = vunpack.c.l.b16 %v1185_v13 }
 0x252   : > { %v10015_v56 = vpop.f32.mrf.mxu0  ;;  %v2583_v4 = vpop.f32.mrf.mxu1 }
 0x253   : > { %v3087_v24 = vpack.c.bf16 %v3016_v36, %v3016_v36  ;;  %v2584_v21 = vadd.f32 %v2583_v4, %v2375_v50 }
 0x254   : > { %v10025_v0 = vpop.f32.mrf.mxu2 }
 0x255   : > { %v3450_v31 = vshrl.u32 %v3087_v24, 16  ;;  %v3453_v40 = vshll.u32 %v3087_v24, 16  ;;  %v2793_v5 = vadd.f32 %v9914_v29, %v2584_v21  ;;  %v4133_v23 = vunpack.c.l.b16 %v3087_v24  ;;  %v10031_v21 = vpop.f32.mrf.mxu3 }
 0x256   : > { %12355 = vst [vmem:[#allocation107_spill] sm:$0xff] %v10031_v21  ;;  %v8029_v16 = vrot.slane %v3087_v24, 9 }
 0x257   : > { %v2937_v32 = vmax.f32 %v2793_v5, 0.0  ;;  %v4179_v8 = vpack.c.b16 %v4133_v23, %v4132_v48  ;;  %v3452_v50 = vrot.slane %v3450_v31, 4  ;;  %v3455_v36 = vrot.slane %v3453_v40, 5 }
 0x258   : > { %v1186_v48 = vpack.c.bf16 %v12357_v61, %v12357_v61  ;;  %v2380_v31 = vadd.f32 %v9697_v25, %v9925_v46 }
 0x259   : > { %v3088_v43 = vpack.c.bf16 %v2937_v32, %v2937_v32  ;;  %4735 = vmatmul.bf16.gmra.mxu3 %v4179_v8  ;;  %v3456_v57 = vor.u32 %v3455_v36, %v3452_v50  ;;  %v4372_v8 = vunpack.c.l.b16 %v3995_v6 }
 0x25a   : > { %v10029_v4 = vpop.f32.mrf.mxu0  ;;  %v2586_v29 = vpop.f32.mrf.mxu1 }
 0x25b   : > { %v2587_v54 = vadd.f32 %v2586_v29, %v2378_v7  ;;  %v3463_v15 = vshrl.u32 %v3088_v43, 16  ;;  %v3998_v5 = vrot.slane %v3088_v43, 5  ;;  %v3459_v24 = vshll.u32 %v3088_v43, 16 }
 0x25c   : > { %v10042_v23 = vpop.f32.mrf.mxu2  ;;  %v1506_v7 = vunpack.c.l.b16 %v1186_v48  ;;  %v3457_v29 = vrot.slane %v3456_v57, 4 }
 0x25d   : > { %v2796_v40 = vadd.f32 %v9940_v55, %v2587_v54  ;;  %2431 = vmatmul.bf16.gmra.mxu0 %v9876_v42  ;;  %2625 = vmatmul.bf16.gmra.mxu1 %v9843_v41  ;;  %v3999_v32 = vsel %vm9324_vm5, %v8029_v16, %v3998_v5  ;;  %v3461_v61 = vrot.slane %v3459_v24, 5  ;;  %v3465_v55 = vrot.slane %v3463_v15, 4 }
 0x25e   : > { %v4373_v36 = vunpack.c.l.b16 %v3999_v32  ;;  %v10046_v46 = vpack.c.b16 %v1506_v7, %v1505_v34  ;;  %v10056_v16 = vunpack.c.l.b16 %v3448_v27  ;;  %v10062_v34 = vpop.f32.mrf.mxu3 }
 0x25f   : > { %v2938_v50 = vmax.f32 %v2796_v40, 0.0  ;;  %v3462_v41 = vsel %vm9341_vm7, %v3457_v29, %v3461_v61  ;;  %v3466_v24 = vor.u32 %v3465_v55, %v3461_v61  ;;  %12360 = vst [vmem:[#allocation110_spill] sm:$0xff] %v10062_v34  ;;  %v4000_v29 = vrot.slane %v3998_v5, 4 }
 0x260   : > { %v10049_v30 = vpack.c.b16 %v4373_v36, %v4372_v8  ;;  %12358 = vst [vmem:[#allocation108_spill] sm:$0xff] %v10056_v16  ;;  %v10058_v6 = vunpack.c.l.b16 %v3462_v41  ;;  %v4134_v8 = vunpack.c.l.b16 %v3088_v43 }
 0x261   : > { %v3018_v54 = vmul.f32 %v9350_v33, %v2938_v50  ;;  %2849 = vmatmul.bf16.gmra.mxu2 %v10046_v46  ;;  %v3467_v55 = vrot.slane %v3466_v24, 4 }
 0x262   : > { %v10053_v13 = vpop.f32.mrf.mxu0  ;;  %v2588_v48 = vpop.f32.mrf.mxu1  ;;  %12359 = vst [vmem:[#allocation109_spill] sm:$0xff] %v10058_v6 }
 0x263   : > { %v3089_v57 = vpack.c.bf16 %v3018_v54, %v3018_v54  ;;  %v2589_v40 = vadd.f32 %v2588_v48, %v2380_v31  ;;  %v2383_v54 = vadd.f32 %v9697_v25, %v9946_v14  ;;  %v12361_v14 = vld [vmem:[#allocation60_spill] sm:$0xff] }
 0x264   : > { %v10065_v36 = vpop.f32.mrf.mxu2 }
 0x265   : > { %v3473_v7 = vshrl.u32 %v3089_v57, 16  ;;  %v2798_v32 = vadd.f32 %v9955_v10, %v2589_v40  ;;  %v4135_v50 = vunpack.c.l.b16 %v3089_v57  ;;  %v4001_v27 = vrot.slane %v3089_v57, 5 }
 0x266   : > { %v3469_v21 = vshll.u32 %v3089_v57, 16 }
 0x267   : > { %v2939_v31 = vmax.f32 %v2798_v32, 0.0  ;;  %v4180_v41 = vpack.c.b16 %v4135_v50, %v4134_v8  ;;  %v3475_v48 = vrot.slane %v3473_v7, 4  ;;  %v4002_v61 = vsel %vm9324_vm5, %v4000_v29, %v4001_v27  ;;  %v12362_v7 = vld [vmem:[#allocation61_spill] sm:$0xff] }
 0x268   : > { %v3471_v15 = vrot.slane %v3469_v21, 5  ;;  %v1187_v32 = vpack.c.bf16 %v12361_v14, %v12361_v14  ;;  %v1188_v8 = vpack.c.bf16 %v12362_v7, %v12362_v7 }
 0x269   : > { %v3019_v16 = vmul.f32 0.0, %v2939_v31  ;;  %4740 = vmatmul.bf16.gmra.mxu3 %v4180_v41  ;;  %v4003_v31 = vrot.slane %v4001_v27, 4  ;;  %v10086_v41 = vpop.f32.mrf.mxu3 }
 0x26a   : > { %v10071_v10 = vpop.f32.mrf.mxu0  ;;  %v2591_v43 = vpop.f32.mrf.mxu1  ;;  %v3472_v5 = vsel %vm9341_vm7, %v3467_v55, %v3471_v15  ;;  %v3476_v6 = vor.u32 %v3475_v48, %v3471_v15  ;;  %v1507_v15 = vunpack.c.l.b16 %v1187_v32  ;;  %12363 = vst [vmem:[#allocation61_spill] sm:$0xff] %v10086_v41 }
 0x26b   : > { %v3129_v57 = vpack.c.bf16 %v3019_v16, %v3019_v16  ;;  %v2592_v40 = vadd.f32 %v2591_v43, %v2383_v54  ;;  %v2385_v16 = vadd.f32 %v9697_v25, %v9968_v12  ;;  %v1508_v54 = vunpack.c.l.b16 %v1188_v8 }
 0x26c   : > { %v10082_v29 = vpop.f32.mrf.mxu2  ;;  %v10100_v8 = vunpack.c.l.b16 %v3472_v5  ;;  %v10115_v5 = vld [vmem:[%s12108_s2] ss:$0 sm:$0xff] }
 0x26d   : > { %v3479_v50 = vshll.u32 %v3129_v57, 16  ;;  %v4004_v24 = vrot.slane %v3129_v57, 5  ;;  %v2801_v21 = vadd.f32 %v9975_v3, %v2592_v40  ;;  %2436 = vmatmul.bf16.gmra.mxu0 %v9920_v35  ;;  %2630 = vmatmul.bf16.gmra.mxu1 %v9876_v42  ;;  %v3477_v3 = vrot.slane %v3476_v6, 4 }
 0x26e   : > { %v10090_v57 = vpack.c.b16 %v1508_v54, %v1507_v15  ;;  %v4374_v40 = vunpack.c.l.b16 %v4002_v61  ;;  %12365 = vst [vmem:[#allocation112_spill] sm:$0xff] %v10100_v8  ;;  %v8451_v54 = vld [vmem:[%s12109_s3 + $0x60] sm:$0xff] }
 0x26f   : > { %v3481_v48 = vrot.slane %v3479_v50, 5  ;;  %v2940_v55 = vmax.f32 %v2801_v21, 0.0  ;;  %v4005_v43 = vsel %vm9324_vm5, %v4003_v31, %v4004_v24  ;;  %4824 = vmatpush.bf16.msrb.mxu3 %v8451_v54 }
 0x270   : > { %v4375_v42 = vunpack.c.l.b16 %v4005_v43 }
 0x271   : > { %v3020_v7 = vmul.f32 %v9304_v26, %v2940_v55  ;;  %v3482_v27 = vsel %vm9341_vm7, %v3477_v3, %v3481_v48  ;;  %2854 = vmatmul.bf16.gmra.mxu2 %v10090_v57 }
 0x272   : > { %v10095_v25 = vpop.f32.mrf.mxu0  ;;  %v2593_v12 = vpop.f32.mrf.mxu1  ;;  %v10098_v32 = vpack.c.b16 %v4375_v42, %v4374_v40  ;;  %v10102_v50 = vunpack.c.l.b16 %v3482_v27 }
 0x273   : > { %v3090_v6 = vpack.c.bf16 %v3020_v7, %v3020_v7  ;;  %v2594_v24 = vadd.f32 %v2593_v12, %v2385_v16  ;;  %v2388_v16 = vadd.f32 %v10115_v5, %v9985_v38  ;;  %v10119_v40 = vpop.f32.mrf.mxu3  ;;  %v12369_v38 = vld [vmem:[#allocation63_spill] sm:$0xff] }
 0x274   : > { %12364 = vst [vmem:[#allocation111_spill] sm:$0xff] %v10098_v32  ;;  %v10110_v48 = vpop.f32.mrf.mxu2 }
 0x275   : > { %12366 = vst [vmem:[#allocation113_spill] sm:$0xff] %v10102_v50  ;;  %v3484_v21 = vshrl.u32 %v3090_v6, 16  ;;  %v3487_v31 = vshll.u32 %v3090_v6, 16  ;;  %v2803_v15 = vadd.f32 %v10002_v20, %v2594_v24  ;;  %v4136_v27 = vunpack.c.l.b16 %v3090_v6  ;;  %v12368_v50 = vld [vmem:[#allocation62_spill] sm:$0xff] }
 0x276   : > { %12367 = vst [vmem:[#allocation114_spill] sm:$0xff] %v10119_v40  ;;  %v8030_v61 = vrot.slane %v3090_v6, 9  ;;  %v1189_v41 = vpack.c.bf16 %v12368_v50, %v12368_v50 }
 0x277   : > { %v2941_v55 = vmax.f32 %v2803_v15, 0.0  ;;  %v3486_v43 = vrot.slane %v3484_v21, 4  ;;  %v3489_v3 = vrot.slane %v3487_v31, 5  ;;  %v1190_v15 = vpack.c.bf16 %v12369_v38, %v12369_v38 }
 0x278   : > { %v1509_v6 = vunpack.c.l.b16 %v1189_v41 }
 0x279   : > { %v3091_v20 = vpack.c.bf16 %v2941_v55, %v2941_v55  ;;  %v3490_v14 = vor.u32 %v3489_v3, %v3486_v43  ;;  %v1510_v43 = vunpack.c.l.b16 %v1190_v15 }
 0x27a   : > { %v10121_v42 = vpop.f32.mrf.mxu0  ;;  %v2596_v7 = vpop.f32.mrf.mxu1 }
 0x27b   : > { %v2597_v12 = vadd.f32 %v2596_v7, %v2388_v16  ;;  %v4137_v24 = vunpack.c.l.b16 %v3091_v20  ;;  %v3497_v8 = vshrl.u32 %v3091_v20, 16  ;;  %v4008_v21 = vrot.slane %v3091_v20, 5 }
 0x27c   : > { %v10130_v55 = vpop.f32.mrf.mxu2  ;;  %v3493_v16 = vshll.u32 %v3091_v20, 16  ;;  %v2390_v7 = vadd.f32 %v10115_v5, %v10015_v56  ;;  %v3491_v50 = vrot.slane %v3490_v14, 4 }
 0x27d   : > { %v2806_v31 = vadd.f32 %v10025_v0, %v2597_v12  ;;  %2441 = vmatmul.bf16.gmra.mxu0 %v9961_v18  ;;  %2635 = vmatmul.bf16.gmra.mxu1 %v9920_v35  ;;  %v4181_v54 = vpack.c.b16 %v4137_v24, %v4136_v27  ;;  %v4009_v3 = vsel %vm9324_vm5, %v8030_v61, %v4008_v21  ;;  %v3499_v40 = vrot.slane %v3497_v8, 4  ;;  %v10138_v35 = vpop.f32.mrf.mxu3 }
 0x27e   : > { %v3495_v0 = vrot.slane %v3493_v16, 5  ;;  %v10136_v12 = vpack.c.b16 %v1510_v43, %v1509_v6  ;;  %12370 = vst [vmem:[#allocation115_spill] sm:$0xff] %v10138_v35  ;;  %v4010_v8 = vrot.slane %v4008_v21, 4  ;;  %v4376_v34 = vunpack.c.l.b16 %v4009_v3 }
 0x27f   : > { %v2942_v38 = vmax.f32 %v2806_v31, 0.0  ;;  %4745 = vmatmul.bf16.gmra.mxu3 %v4181_v54 }
 0x280   : > { %v3496_v41 = vsel %vm9341_vm7, %v3491_v50, %v3495_v0  ;;  %v3500_v15 = vor.u32 %v3499_v40, %v3495_v0 }
 0x281   : > { %v3022_v27 = vmul.f32 %v9350_v33, %v2942_v38  ;;  %2859 = vmatmul.bf16.gmra.mxu2 %v10136_v12  ;;  %v2393_v38 = vadd.f32 %v10115_v5, %v10029_v4  ;;  %v10159_v32 = vunpack.c.l.b16 %v3496_v41 }
 0x282   : > { %v10143_v20 = vpop.f32.mrf.mxu0  ;;  %v2598_v61 = vpop.f32.mrf.mxu1 }
 0x283   : > { %v3092_v56 = vpack.c.bf16 %v3022_v27, %v3022_v27  ;;  %v2599_v24 = vadd.f32 %v2598_v61, %v2390_v7  ;;  %v3501_v7 = vrot.slane %v3500_v15, 4  ;;  %12371 = vst [vmem:[#allocation116_spill] sm:$0xff] %v10159_v32 }
 0x284   : > { %v10147_v54 = vpop.f32.mrf.mxu2 }
 0x285   : > { %v3507_v14 = vshrl.u32 %v3092_v56, 16  ;;  %v2808_v31 = vadd.f32 %v10042_v23, %v2599_v24  ;;  %v4011_v16 = vrot.slane %v3092_v56, 5  ;;  %v3503_v6 = vshll.u32 %v3092_v56, 16  ;;  %v10161_v4 = vpop.f32.mrf.mxu3 }
 0x286   : > { %12372 = vst [vmem:[#allocation117_spill] sm:$0xff] %v10161_v4 }
 0x287   : > { %v2943_v50 = vmax.f32 %v2808_v31, 0.0  ;;  %v4012_v43 = vsel %vm9324_vm5, %v4010_v8, %v4011_v16  ;;  %v3509_v35 = vrot.slane %v3507_v14, 4  ;;  %v3505_v40 = vrot.slane %v3503_v6, 5 }
 0x288   : > { %v4377_v27 = vunpack.c.l.b16 %v4012_v43  ;;  %v4013_v15 = vrot.slane %v4011_v16, 4 }
 0x289   : > { %v3023_v0 = vmul.f32 0.0, %v2943_v50  ;;  %v3506_v21 = vsel %vm9341_vm7, %v3501_v7, %v3505_v40  ;;  %v3510_v3 = vor.u32 %v3509_v35, %v3505_v40 }
 0x28a   : > { %v10153_v61 = vpop.f32.mrf.mxu0  ;;  %v2601_v23 = vpop.f32.mrf.mxu1  ;;  %v10155_v24 = vpack.c.b16 %v4377_v27, %v4376_v34  ;;  %v10163_v14 = vunpack.c.l.b16 %v3506_v21 }
 0x28b   : > { %v3130_v31 = vpack.c.bf16 %v3023_v0, %v3023_v0  ;;  %v2602_v8 = vadd.f32 %v2601_v23, %v2393_v38  ;;  %v2395_v38 = vadd.f32 %v10115_v5, %v10053_v13  ;;  %v3511_v16 = vrot.slane %v3510_v3, 4 }
 0x28c   : > { %12373 = vst [vmem:[#allocation118_spill] sm:$0xff] %v10163_v14  ;;  %v10168_v34 = vpop.f32.mrf.mxu2 }
 0x28d   : > { %v3513_v6 = vshll.u32 %v3130_v31, 16  ;;  %v4014_v50 = vrot.slane %v3130_v31, 5  ;;  %v2811_v43 = vadd.f32 %v10065_v36, %v2602_v8  ;;  %2446 = vmatmul.bf16.gmra.mxu0 %v10010_v28  ;;  %2640 = vmatmul.bf16.gmra.mxu1 %v9961_v18  ;;  %v10182_v23 = vpop.f32.mrf.mxu3  ;;  %v4138_v31 = vunpack.c.l.b16 %v3092_v56 }
 0x28e   : > { %12374 = vst [vmem:[#allocation119_spill] sm:$0xff] %v10182_v23 }
 0x28f   : > { %v3515_v27 = vrot.slane %v3513_v6, 5  ;;  %v2944_v7 = vmax.f32 %v2811_v43, 0.0  ;;  %v4015_v35 = vsel %vm9324_vm5, %v4013_v15, %v4014_v50  ;;  %v8460_v43 = vld [vmem:[%s12109_s3 + $0xa8] sm:$0xff] }
 0x290   : > { %4982 = vmatpush.bf16.msrb.mxu0 %v8460_v43 }
 0x291   : > { %v3024_v36 = vmul.f32 %v9304_v26, %v2944_v7  ;;  %v3516_v40 = vsel %vm9341_vm7, %v3511_v16, %v3515_v27  ;;  %2864 = vmatmul.bf16.gmra.mxu2 %v9109_v51  ;;  %v2398_v27 = vadd.f32 %v10115_v5, %v10071_v10  ;;  %v8478_v10 = vld [vmem:[%s12111_s5 + $0x78] sm:$0xff] }
 0x292   : > { %v10179_v18 = vpop.f32.mrf.mxu0  ;;  %v2603_v0 = vpop.f32.mrf.mxu1  ;;  %5824 = vmatpush.bf16.msrb.mxu2 %v8478_v10  ;;  %v8457_v10 = vld [vmem:[%s12109_s3 + $0x90] sm:$0xff] }
 0x293   : > { %v3093_v21 = vpack.c.bf16 %v3024_v36, %v3024_v36  ;;  %v2604_v13 = vadd.f32 %v2603_v0, %v2395_v38 }
 0x294   : > { %v10185_v50 = vpop.f32.mrf.mxu2 }
 0x295   : > { %v3518_v8 = vshrl.u32 %v3093_v21, 16  ;;  %v3521_v6 = vshll.u32 %v3093_v21, 16  ;;  %v2813_v15 = vadd.f32 %v10082_v29, %v2604_v13  ;;  %v4139_v3 = vunpack.c.l.b16 %v3093_v21  ;;  %v8459_v29 = vld [vmem:[%s12109_s3 + $0xa0] sm:$0xff]  ;;  %v10203_v43 = vpop.f32.mrf.mxu3 }
 0x296   : > { %4983 = vmatpush.bf16.msrb.mxu0 %v8459_v29  ;;  %12375 = vst [vmem:[#allocation120_spill] sm:$0xff] %v10203_v43  ;;  %v4378_v29 = vunpack.c.l.b16 %v4015_v35 }
 0x297   : > { %v2945_v7 = vmax.f32 %v2813_v15, 0.0  ;;  %v4182_v16 = vpack.c.b16 %v4139_v3, %v4138_v31  ;;  %v3520_v36 = vrot.slane %v3518_v8, 4  ;;  %v3523_v38 = vrot.slane %v3521_v6, 5  ;;  %v8470_v31 = vld [vmem:[%s12111_s5 + $0x38] sm:$0xff] }
 0x298   : > { %v8031_v6 = vrot.slane %v3093_v21, 9  ;;  %5695 = vmatpush.bf16.msra.mxu1 %v8470_v31 }
 0x299   : > { %v3094_v56 = vpack.c.bf16 %v2945_v7, %v2945_v7  ;;  %4750 = vmatmul.bf16.gmra.mxu3 %v4182_v16  ;;  %v3524_v41 = vor.u32 %v3523_v38, %v3520_v36  ;;  %v8458_v16 = vld [vmem:[%s12109_s3 + $0x98] sm:$0xff] }
 0x29a   : > { %v10195_v0 = vpop.f32.mrf.mxu0  ;;  %v2606_v13 = vpop.f32.mrf.mxu1  ;;  %4984 = vmatpush.bf16.msrb.mxu0 %v8458_v16 }
 0x29b   : > { %v2607_v23 = vadd.f32 %v2606_v13, %v2398_v27  ;;  %v3531_v8 = vshrl.u32 %v3094_v56, 16  ;;  %v4018_v15 = vrot.slane %v3094_v56, 5  ;;  %v3527_v3 = vshll.u32 %v3094_v56, 16 }
 0x29c   : > { %v10208_v27 = vpop.f32.mrf.mxu2  ;;  %v3525_v36 = vrot.slane %v3524_v41, 4  ;;  %v10225_v41 = vunpack.c.l.b16 %v3516_v40 }
 0x29d   : > { %v2816_v7 = vadd.f32 %v10110_v48, %v2607_v23  ;;  %2451 = vmatmul.bf16.gmra.mxu0 %v10046_v46  ;;  %2645 = vmatmul.bf16.gmra.mxu1 %v10010_v28  ;;  %v4019_v21 = vsel %vm9324_vm5, %v8031_v6, %v4018_v15  ;;  %v3529_v38 = vrot.slane %v3527_v3, 5  ;;  %v2400_v48 = vadd.f32 %v10115_v5, %v10095_v25 }
 0x29e   : > { %v4379_v28 = vunpack.c.l.b16 %v4019_v21  ;;  %v3533_v43 = vrot.slane %v3531_v8, 4  ;;  %12376 = vst [vmem:[#allocation121_spill] sm:$0xff] %v10225_v41  ;;  %4985 = vmatpush.bf16.msrb.mxu0 %v8457_v10  ;;  %v2403_v10 = vadd.f32 %v10115_v5, %v10121_v42  ;;  %v12384_v41 = vld [vmem:[#allocation66_spill] sm:$0xff] }
 0x29f   : > { %v2946_v23 = vmax.f32 %v2816_v7, 0.0  ;;  %v3530_v13 = vsel %vm9341_vm7, %v3525_v36, %v3529_v38 }
 0x2a0   : > { %v10223_v31 = vpack.c.b16 %v4379_v28, %v4378_v29  ;;  %v10227_v6 = vunpack.c.l.b16 %v3530_v13  ;;  %v3534_v16 = vor.u32 %v3533_v43, %v3529_v38  ;;  %v8456_v28 = vld [vmem:[%s12109_s3 + $0x88] sm:$0xff]  ;;  %v4020_v13 = vrot.slane %v4018_v15, 4  ;;  %v8455_v15 = vld [vmem:[%s12109_s3 + $0x80] sm:$0xff] }
 0x2a1   : > { %v3026_v32 = vmul.f32 %v9350_v33, %v2946_v23  ;;  %2869 = vmatmul.bf16.gmra.mxu2 %v9142_v58  ;;  %v4140_v23 = vunpack.c.l.b16 %v3094_v56 }
 0x2a2   : > { %12377 = vst [vmem:[#allocation122_spill] sm:$0xff] %v10227_v6  ;;  %v10229_v25 = vpop.f32.mrf.mxu0  ;;  %v2608_v35 = vpop.f32.mrf.mxu1  ;;  %4986 = vmatpush.bf16.msrb.mxu0 %v8456_v28 }
 0x2a3   : > { %v3095_v3 = vpack.c.bf16 %v3026_v32, %v3026_v32  ;;  %v2609_v7 = vadd.f32 %v2608_v35, %v2400_v48  ;;  %v10240_v48 = vpop.f32.mrf.mxu3  ;;  %v3535_v35 = vrot.slane %v3534_v16, 4 }
 0x2a4   : > { %v10235_v29 = vpop.f32.mrf.mxu2  ;;  %12378 = vst [vmem:[#allocation123_spill] sm:$0xff] %v10240_v48 }
 0x2a5   : > { %v3541_v21 = vshrl.u32 %v3095_v3, 16  ;;  %v2818_v36 = vadd.f32 %v10130_v55, %v2609_v7  ;;  %v4141_v40 = vunpack.c.l.b16 %v3095_v3  ;;  %v4021_v14 = vrot.slane %v3095_v3, 5 }
 0x2a6   : > { %v3537_v32 = vshll.u32 %v3095_v3, 16  ;;  %4987 = vmatpush.bf16.msrb.mxu0 %v8455_v15 }
 0x2a7   : > { %v2947_v43 = vmax.f32 %v2818_v36, 0.0  ;;  %v4183_v38 = vpack.c.b16 %v4141_v40, %v4140_v23  ;;  %v3543_v55 = vrot.slane %v3541_v21, 4  ;;  %v4022_v56 = vsel %vm9324_vm5, %v4020_v13, %v4021_v14 }
 0x2a8   : > { %v3539_v7 = vrot.slane %v3537_v32, 5  ;;  %v4023_v32 = vrot.slane %v4021_v14, 4 }
 0x2a9   : > { %v3027_v8 = vmul.f32 0.0, %v2947_v43  ;;  %4755 = vmatmul.bf16.gmra.mxu3 %v4183_v38  ;;  %v2405_v43 = vadd.f32 %v10115_v5, %v10143_v20 }
 0x2aa   : > { %v10249_v3 = vpop.f32.mrf.mxu0  ;;  %v2611_v48 = vpop.f32.mrf.mxu1  ;;  %v3540_v42 = vsel %vm9341_vm7, %v3535_v35, %v3539_v7  ;;  %v3544_v21 = vor.u32 %v3543_v55, %v3539_v7 }
 0x2ab   : > { %v3131_v36 = vpack.c.bf16 %v3027_v8, %v3027_v8  ;;  %v2612_v23 = vadd.f32 %v2611_v48, %v2403_v10  ;;  %v8450_v8 = vld [vmem:[%s12109_s3 + $0x58] sm:$0xff]  ;;  %v4380_v10 = vunpack.c.l.b16 %v4022_v56  ;;  %v10265_v7 = vpop.f32.mrf.mxu3 }
 0x2ac   : > { %v10256_v13 = vpop.f32.mrf.mxu2  ;;  %12379 = vst [vmem:[#allocation124_spill] sm:$0xff] %v10265_v7  ;;  %4825 = vmatpush.bf16.msrb.mxu3 %v8450_v8  ;;  %v2408_v8 = vadd.f32 %v10115_v5, %v10153_v61  ;;  %v1274_v61 = vpack.c.bf16 %v12384_v41, %v12384_v41 }
 0x2ad   : > { %v3547_v40 = vshll.u32 %v3131_v36, 16  ;;  %v4024_v28 = vrot.slane %v3131_v36, 5  ;;  %v2821_v16 = vadd.f32 %v10147_v54, %v2612_v23  ;;  %2456 = vmatmul.bf16.gmra.mxu0 %v10090_v57  ;;  %2650 = vmatmul.bf16.gmra.mxu1 %v10046_v46  ;;  %v3545_v54 = vrot.slane %v3544_v21, 4 }
 0x2ae   : > { %v10275_v23 = vunpack.c.l.b16 %v3540_v42 }
 0x2af   : > { %v3549_v38 = vrot.slane %v3547_v40, 5  ;;  %v2948_v35 = vmax.f32 %v2821_v16, 0.0  ;;  %v4025_v48 = vsel %vm9324_vm5, %v4023_v32, %v4024_v28 }
 0x2b0   : > { %v4381_v55 = vunpack.c.l.b16 %v4025_v48  ;;  %12380 = vst [vmem:[#allocation125_spill] sm:$0xff] %v10275_v23 }
 0x2b1   : > { %v3028_v46 = vmul.f32 %v9304_v26, %v2948_v35  ;;  %v3550_v20 = vsel %vm9341_vm7, %v3545_v54, %v3549_v38  ;;  %2874 = vmatmul.bf16.gmra.mxu2 %v9166_v2 }
 0x2b2   : > { %v10270_v14 = vpop.f32.mrf.mxu0  ;;  %v2613_v15 = vpop.f32.mrf.mxu1  ;;  %v10273_v36 = vpack.c.b16 %v4381_v55, %v4380_v10  ;;  %v10277_v21 = vunpack.c.l.b16 %v3550_v20 }
 0x2b3   : > { %v3096_v56 = vpack.c.bf16 %v3028_v46, %v3028_v46  ;;  %v2614_v40 = vadd.f32 %v2613_v15, %v2405_v43  ;;  %v10286_v10 = vpop.f32.mrf.mxu3 }
 0x2b4   : > { %12381 = vst [vmem:[#allocation126_spill] sm:$0xff] %v10277_v21  ;;  %v10282_v35 = vpop.f32.mrf.mxu2 }
 0x2b5   : > { %v3552_v16 = vshrl.u32 %v3096_v56, 16  ;;  %v3555_v32 = vshll.u32 %v3096_v56, 16  ;;  %v2823_v38 = vadd.f32 %v10168_v34, %v2614_v40  ;;  %12382 = vst [vmem:[#allocation127_spill] sm:$0xff] %v10286_v10  ;;  %v4142_v20 = vunpack.c.l.b16 %v3096_v56  ;;  %v12383_v40 = vld [vmem:[#allocation65_spill] sm:$0xff] }
 0x2b6   : > { %v8032_v23 = vrot.slane %v3096_v56, 9  ;;  %v1273_v7 = vpack.c.bf16 %v12383_v40, %v12383_v40 }
 0x2b7   : > { %v2949_v48 = vmax.f32 %v2823_v38, 0.0  ;;  %v3554_v54 = vrot.slane %v3552_v16, 4  ;;  %v3557_v42 = vrot.slane %v3555_v32, 5 }
 0x2b8   : > { %v1753_v56 = vunpack.c.l.b16 %v1273_v7 }
 0x2b9   : > { %v3097_v55 = vpack.c.bf16 %v2949_v48, %v2949_v48  ;;  %v3558_v21 = vor.u32 %v3557_v42, %v3554_v54  ;;  %v1754_v54 = vunpack.c.l.b16 %v1274_v61 }
 0x2ba   : > { %v10288_v46 = vpop.f32.mrf.mxu0  ;;  %v2616_v43 = vpop.f32.mrf.mxu1 }
 0x2bb   : > { %v2617_v15 = vadd.f32 %v2616_v43, %v2408_v8  ;;  %v4143_v28 = vunpack.c.l.b16 %v3097_v55  ;;  %v3565_v34 = vshrl.u32 %v3097_v55, 16  ;;  %v4028_v16 = vrot.slane %v3097_v55, 5 }
 0x2bc   : > { %v10297_v48 = vpop.f32.mrf.mxu2  ;;  %v3561_v8 = vshll.u32 %v3097_v55, 16  ;;  %v2410_v43 = vadd.f32 %v10115_v5, %v10179_v18  ;;  %v3559_v40 = vrot.slane %v3558_v21, 4 }
 0x2bd   : > { %v2826_v32 = vadd.f32 %v10185_v50, %v2617_v15  ;;  %2461 = vmatmul.bf16.gmra.mxu0 %v10136_v12  ;;  %2655 = vmatmul.bf16.gmra.mxu1 %v10090_v57  ;;  %v4184_v38 = vpack.c.b16 %v4143_v28, %v4142_v20  ;;  %v4029_v42 = vsel %vm9324_vm5, %v8032_v23, %v4028_v16  ;;  %v3567_v10 = vrot.slane %v3565_v34, 4  ;;  %v10311_v23 = vpop.f32.mrf.mxu3 }
 0x2be   : > { %v3563_v50 = vrot.slane %v3561_v8, 5  ;;  %v10303_v15 = vpack.c.b16 %v1754_v54, %v1753_v56  ;;  %12385 = vst [vmem:[#allocation65_spill] sm:$0xff] %v10311_v23  ;;  %v2413_v54 = vadd.f32 %v10115_v5, %v10195_v0 }
 0x2bf   : > { %v2950_v41 = vmax.f32 %v2826_v32, 0.0  ;;  %4760 = vmatmul.bf16.gmra.mxu3 %v4184_v38  ;;  %v4030_v38 = vrot.slane %v4028_v16, 4 }
 0x2c0   : > { %v3564_v28 = vsel %vm9341_vm7, %v3559_v40, %v3563_v50  ;;  %v3568_v21 = vor.u32 %v3567_v10, %v3563_v50  ;;  %v4382_v10 = vunpack.c.l.b16 %v4029_v42 }
 0x2c1   : > { %v3030_v57 = vmul.f32 %v9350_v33, %v2950_v41  ;;  %2879 = vmatmul.bf16.gmra.mxu2 %v10303_v15  ;;  %v10331_v4 = vunpack.c.l.b16 %v3564_v28 }
 0x2c2   : > { %v10308_v7 = vpop.f32.mrf.mxu0  ;;  %v2618_v55 = vpop.f32.mrf.mxu1 }
 0x2c3   : > { %v10313_v18 = vpack.c.bf16 %v3030_v57, %v3030_v57  ;;  %v2619_v20 = vadd.f32 %v2618_v55, %v2410_v43  ;;  %v3569_v57 = vrot.slane %v3568_v21, 4  ;;  %12387 = vst [vmem:[#allocation128_spill] sm:$0xff] %v10331_v4  ;;  %v12390_v21 = vld [vmem:[#allocation67_spill] sm:$0xff]  ;;  %v12394_v4 = vld [vmem:[#allocation70_spill] sm:$0xff] }
 0x2c4   : > { %v10317_v32 = vpop.f32.mrf.mxu2 }
 0x2c5   : > { %v3575_v61 = vshrl.u32 %v10313_v18, 16  ;;  %v2828_v34 = vadd.f32 %v10208_v27, %v2619_v20  ;;  %v4031_v8 = vrot.slane %v10313_v18, 5  ;;  %v3571_v56 = vshll.u32 %v10313_v18, 16  ;;  %v10333_v0 = vpop.f32.mrf.mxu3 }
 0x2c6   : > { %12388 = vst [vmem:[#allocation129_spill] sm:$0xff] %v10333_v0 }
 0x2c7   : > { %v2951_v41 = vmax.f32 %v2828_v34, 0.0  ;;  %v4032_v40 = vsel %vm9324_vm5, %v4030_v38, %v4031_v8  ;;  %v3577_v43 = vrot.slane %v3575_v61, 4  ;;  %v3573_v55 = vrot.slane %v3571_v56, 5 }
 0x2c8   : > { %v4383_v50 = vunpack.c.l.b16 %v4032_v40  ;;  %v1275_v56 = vpack.c.bf16 %v12390_v21, %v12390_v21 }
 0x2c9   : > { %v3031_v27 = vmul.f32 0.0, %v2951_v41  ;;  %v3574_v6 = vsel %vm9341_vm7, %v3569_v57, %v3573_v55  ;;  %v3578_v42 = vor.u32 %v3577_v43, %v3573_v55  ;;  %v12391_v41 = vld [vmem:[#allocation68_spill] sm:$0xff] }
 0x2ca   : > { %v10325_v20 = vpop.f32.mrf.mxu0  ;;  %v2621_v16 = vpop.f32.mrf.mxu1  ;;  %v10327_v23 = vpack.c.b16 %v4383_v50, %v4382_v10  ;;  %v10335_v61 = vunpack.c.l.b16 %v3574_v6  ;;  %v1276_v40 = vpack.c.bf16 %v12391_v41, %v12391_v41  ;;  %v4033_v10 = vrot.slane %v4031_v8, 4 }
 0x2cb   : > { %v3132_v34 = vpack.c.bf16 %v3031_v27, %v3031_v27  ;;  %v2622_v38 = vadd.f32 %v2621_v16, %v2413_v54  ;;  %v2415_v54 = vadd.f32 %v10115_v5, %v10229_v25  ;;  %v1755_v43 = vunpack.c.l.b16 %v1275_v56 }
 0x2cc   : > { %12386 = vst [vmem:[#allocation66_spill] sm:$0xff] %v10327_v23  ;;  %v10344_v28 = vpop.f32.mrf.mxu2  ;;  %v1756_v55 = vunpack.c.l.b16 %v1276_v40  ;;  %v4144_v41 = vunpack.c.l.b16 %v10313_v18 }
 0x2cd   : > { %12389 = vst [vmem:[#allocation130_spill] sm:$0xff] %v10335_v61  ;;  %v3581_v50 = vshll.u32 %v3132_v34, 16  ;;  %v4034_v23 = vrot.slane %v3132_v34, 5  ;;  %v2831_v57 = vadd.f32 %v10235_v29, %v2622_v38  ;;  %2660 = vmatmul.bf16.gmra.mxu1 %v10136_v12  ;;  %4988 = vmatmul.bf16.vlgmr.msrb.gmra.mxu0 %v9371_v9  ;;  %v3579_v29 = vrot.slane %v3578_v42, 4  ;;  %v10361_v40 = vpop.f32.mrf.mxu3 }
 0x2ce   : > { %v10352_v34 = vpack.c.b16 %v1756_v55, %v1755_v43  ;;  %12392 = vst [vmem:[#allocation67_spill] sm:$0xff] %v10361_v40  ;;  %v2418_v43 = vadd.f32 %v10115_v5, %v10249_v3  ;;  %v1354_v61 = vpack.c.bf16 %v12394_v4, %v12394_v4 }
 0x2cf   : > { %v3583_v27 = vrot.slane %v3581_v50, 5  ;;  %v2952_v8 = vmax.f32 %v2831_v57, 0.0  ;;  %v4035_v16 = vsel %vm9324_vm5, %v4033_v10, %v4034_v23 }
 0x2d1   : > { %v3032_v9 = vmul.f32 %v9304_v26, %v2952_v8  ;;  %v3584_v12 = vsel %vm9341_vm7, %v3579_v29, %v3583_v27  ;;  %2884 = vmatmul.bf16.gmra.mxu2 %v10352_v34 }
 0x2d2   : > { %v10357_v38 = vpop.f32.mrf.mxu0  ;;  %v2623_v21 = vpop.f32.mrf.mxu1 }
 0x2d3   : > { %v3099_v25 = vpack.c.bf16 %v3032_v9, %v3032_v9  ;;  %v2624_v56 = vadd.f32 %v2623_v21, %v2415_v54 }
 0x2d4   : > { %v10364_v57 = vpop.f32.mrf.mxu2 }
 0x2d5   : > { %v3586_v23 = vshrl.u32 %v3099_v25, 16  ;;  %v3589_v42 = vshll.u32 %v3099_v25, 16  ;;  %v2833_v10 = vadd.f32 %v10256_v13, %v2624_v56  ;;  %v4145_v50 = vunpack.c.l.b16 %v3099_v25  ;;  %v12393_v13 = vld [vmem:[#allocation69_spill] sm:$0xff]  ;;  %v10383_v4 = vpop.f32.mrf.mxu3 }
 0x2d6   : > { %v8033_v6 = vrot.slane %v3099_v25, 9  ;;  %v1353_v56 = vpack.c.bf16 %v12393_v13, %v12393_v13 }
 0x2d7   : > { %v2953_v55 = vmax.f32 %v2833_v10, 0.0  ;;  %v4185_v27 = vpack.c.b16 %v4145_v50, %v4144_v41  ;;  %v3588_v8 = vrot.slane %v3586_v23, 4  ;;  %v3591_v29 = vrot.slane %v3589_v42, 5 }
 0x2d8   : > { %v2420_v41 = vadd.f32 %v10115_v5, %v10270_v14  ;;  %v1993_v10 = vunpack.c.l.b16 %v1353_v56  ;;  %v1994_v50 = vunpack.c.l.b16 %v1354_v61 }
 0x2d9   : > { %v3100_v9 = vpack.c.bf16 %v2953_v55, %v2953_v55  ;;  %4765 = vmatmul.bf16.gmra.mxu3 %v4185_v27  ;;  %v3592_v40 = vor.u32 %v3591_v29, %v3588_v8  ;;  %v4384_v55 = vunpack.c.l.b16 %v4035_v16 }
 0x2da   : > { %v10368_v54 = vpop.f32.mrf.mxu0  ;;  %v2626_v18 = vpop.f32.mrf.mxu1 }
 0x2db   : > { %v2627_v21 = vadd.f32 %v2626_v18, %v2418_v43  ;;  %v3599_v0 = vshrl.u32 %v3100_v9, 16  ;;  %v4038_v3 = vrot.slane %v3100_v9, 5  ;;  %v3595_v25 = vshll.u32 %v3100_v9, 16 }
 0x2dc   : > { %v10379_v42 = vpop.f32.mrf.mxu2  ;;  %v3593_v14 = vrot.slane %v3592_v40, 4 }
 0x2dd   : > { %v2836_v23 = vadd.f32 %v10282_v35, %v2627_v21  ;;  %2665 = vmatmul.bf16.gmra.mxu1 %v9109_v51  ;;  %4993 = vmatmul.bf16.gmra.mxu0 %v9423_v37  ;;  %v4039_v43 = vsel %vm9324_vm5, %v8033_v6, %v4038_v3  ;;  %v3597_v29 = vrot.slane %v3595_v25, 5  ;;  %v2035_v35 = vpack.c.b16 %v1994_v50, %v1993_v10 }
 0x2de   : > { %v4385_v8 = vunpack.c.l.b16 %v4039_v43  ;;  %v3601_v18 = vrot.slane %v3599_v0, 4  ;;  %v10392_v6 = vunpack.c.l.b16 %v3584_v12  ;;  %v4146_v50 = vunpack.c.l.b16 %v3100_v9 }
 0x2df   : > { %v2954_v27 = vmax.f32 %v2836_v23, 0.0  ;;  %v3598_v21 = vsel %vm9341_vm7, %v3593_v14, %v3597_v29  ;;  %v2423_v12 = vadd.f32 %v10115_v5, %v10288_v46 }
 0x2e0   : > { %v10386_v37 = vpack.c.b16 %v4385_v8, %v4384_v55  ;;  %v10394_v16 = vunpack.c.l.b16 %v3598_v21  ;;  %v3602_v23 = vor.u32 %v3601_v18, %v3597_v29 }
 0x2e1   : > { %v3034_v51 = vmul.f32 %v9350_v33, %v2954_v27  ;;  %2889 = vmatmul.bf16.gmra.mxu2 %v2035_v35  ;;  %v4040_v27 = vrot.slane %v4038_v3, 4 }
 0x2e2   : > { %v10390_v61 = vpop.f32.mrf.mxu0  ;;  %v2628_v13 = vpop.f32.mrf.mxu1  ;;  %v3603_v29 = vrot.slane %v3602_v23, 4 }
 0x2e3   : > { %v3101_v56 = vpack.c.bf16 %v3034_v51, %v3034_v51  ;;  %v2629_v40 = vadd.f32 %v2628_v13, %v2420_v41  ;;  %v10405_v13 = vpop.f32.mrf.mxu3 }
 0x2e4   : > { %v10399_v55 = vpop.f32.mrf.mxu2 }
 0x2e5   : > { %v3609_v25 = vshrl.u32 %v3101_v56, 16  ;;  %v2838_v10 = vadd.f32 %v10297_v48, %v2629_v40  ;;  %v4147_v43 = vunpack.c.l.b16 %v3101_v56  ;;  %v4041_v8 = vrot.slane %v3101_v56, 5 }
 0x2e6   : > { %v3605_v14 = vshll.u32 %v3101_v56, 16 }
 0x2e7   : > { %v2955_v35 = vmax.f32 %v2838_v10, 0.0  ;;  %v4186_v51 = vpack.c.b16 %v4147_v43, %v4146_v50  ;;  %v3611_v41 = vrot.slane %v3609_v25, 4  ;;  %v4042_v21 = vsel %vm9324_vm5, %v4040_v27, %v4041_v8  ;;  %v12395_v50 = vld [vmem:[#allocation71_spill] sm:$0xff]  ;;  %v12396_v43 = vld [vmem:[#allocation72_spill] sm:$0xff] }
 0x2e8   : > { %v3607_v18 = vrot.slane %v3605_v14, 5  ;;  %v1355_v25 = vpack.c.bf16 %v12395_v50, %v12395_v50  ;;  %v1356_v23 = vpack.c.bf16 %v12396_v43, %v12396_v43 }
 0x2e9   : > { %v3035_v48 = vmul.f32 0.0, %v2955_v35  ;;  %4770 = vmatmul.bf16.gmra.mxu3 %v4186_v51  ;;  %v4043_v51 = vrot.slane %v4041_v8, 4 }
 0x2ea   : > { %v10407_v9 = vpop.f32.mrf.mxu0  ;;  %v2631_v3 = vpop.f32.mrf.mxu1  ;;  %v3608_v56 = vsel %vm9341_vm7, %v3603_v29, %v3607_v18  ;;  %v3612_v10 = vor.u32 %v3611_v41, %v3607_v18  ;;  %v2425_v29 = vadd.f32 %v10115_v5, %v10308_v7  ;;  %v1996_v41 = vunpack.c.l.b16 %v1356_v23 }
 0x2eb   : > { %v3133_v40 = vpack.c.bf16 %v3035_v48, %v3035_v48  ;;  %v2632_v46 = vadd.f32 %v2631_v3, %v2423_v12  ;;  %v1995_v12 = vunpack.c.l.b16 %v1355_v25  ;;  %v8477_v3 = vld [vmem:[%s12111_s5 + $0x70] sm:$0xff]  ;;  %v10433_v25 = vpop.f32.mrf.mxu3 }
 0x2ec   : > { %v3613_v8 = vrot.slane %v3612_v10, 4  ;;  %12397 = vst [vmem:[#allocation68_spill] sm:$0xff] %v10433_v25  ;;  %5825 = vmatpush.bf16.msrb.mxu2 %v8477_v3  ;;  %v10442_v10 = vunpack.c.l.b16 %v3608_v56  ;;  %v2428_v3 = vadd.f32 %v10115_v5, %v10325_v20 }
 0x2ed   : > { %v3615_v27 = vshll.u32 %v3133_v40, 16  ;;  %v4044_v14 = vrot.slane %v3133_v40, 5  ;;  %v2841_v35 = vadd.f32 %v10317_v32, %v2632_v46  ;;  %2670 = vmatmul.bf16.gmra.mxu1 %v9142_v58  ;;  %4998 = vmatmul.bf16.gmra.mxu0 %v9468_v19  ;;  %v8449_v32 = vld [vmem:[%s12109_s3 + $0x50] sm:$0xff]  ;;  %v10429_v19 = vpop.f32.mrf.mxu2  ;;  %v2036_v40 = vpack.c.b16 %v1996_v41, %v1995_v12 }
 0x2ee   : > { %v8469_v58 = vld [vmem:[%s12111_s5 + $0x30] sm:$0xff]  ;;  %v4386_v46 = vunpack.c.l.b16 %v4042_v21  ;;  %4826 = vmatpush.bf16.msrb.mxu3 %v8449_v32  ;;  %12398 = vst [vmem:[#allocation69_spill] sm:$0xff] %v10442_v10 }
 0x2ef   : > { %v3617_v18 = vrot.slane %v3615_v27, 5  ;;  %v2956_v48 = vmax.f32 %v2841_v35, 0.0  ;;  %v4045_v7 = vsel %vm9324_vm5, %v4043_v51, %v4044_v14  ;;  %5696 = vmatpush.bf16.msra.mxu1 %v8469_v58 }
 0x2f0   : > { %v4387_v50 = vunpack.c.l.b16 %v4045_v7 }
 0x2f1   : > { %v3036_v43 = vmul.f32 %v9304_v26, %v2956_v48  ;;  %v3618_v23 = vsel %vm9341_vm7, %v3613_v8, %v3617_v18  ;;  %2894 = vmatmul.bf16.gmra.mxu2 %v2036_v40 }
 0x2f2   : > { %v10438_v27 = vpop.f32.mrf.mxu0  ;;  %v2633_v35 = vpop.f32.mrf.mxu1  ;;  %v10440_v0 = vpack.c.b16 %v4387_v50, %v4386_v46  ;;  %v10444_v21 = vunpack.c.l.b16 %v3618_v23 }
 0x2f3   : > { %v3102_v14 = vpack.c.bf16 %v3036_v43, %v3036_v43  ;;  %v2634_v51 = vadd.f32 %v2633_v35, %v2425_v29  ;;  %v10455_v50 = vpop.f32.mrf.mxu3 }
 0x2f4   : > { %12399 = vst [vmem:[#allocation70_spill] sm:$0xff] %v10455_v50 }
 0x2f5   : > { %v3620_v41 = vshrl.u32 %v3102_v14, 16  ;;  %v3623_v48 = vshll.u32 %v3102_v14, 16  ;;  %v2843_v18 = vadd.f32 %v10344_v28, %v2634_v51  ;;  %v10451_v56 = vpop.f32.mrf.mxu2  ;;  %v4148_v23 = vunpack.c.l.b16 %v3102_v14 }
 0x2f6   : > { %v8034_v28 = vrot.slane %v3102_v14, 9 }
 0x2f7   : > { %v2957_v32 = vmax.f32 %v2843_v18, 0.0  ;;  %v3622_v58 = vrot.slane %v3620_v41, 4  ;;  %v3625_v7 = vrot.slane %v3623_v48, 5 }
 0x2f9   : > { %v3103_v8 = vpack.c.bf16 %v2957_v32, %v2957_v32  ;;  %v3626_v29 = vor.u32 %v3625_v7, %v3622_v58 }
 0x2fa   : > { %v10453_v40 = vpop.f32.mrf.mxu0  ;;  %v2636_v46 = vpop.f32.mrf.mxu1 }
 0x2fb   : > { %v2637_v43 = vadd.f32 %v2636_v46, %v2428_v3  ;;  %v4149_v35 = vunpack.c.l.b16 %v3103_v8  ;;  %v3633_v12 = vshrl.u32 %v3103_v8, 16  ;;  %v4048_v51 = vrot.slane %v3103_v8, 5 }
 0x2fc   : > { %v3629_v25 = vshll.u32 %v3103_v8, 16  ;;  %v3627_v18 = vrot.slane %v3626_v29, 4  ;;  %v2430_v3 = vadd.f32 %v10115_v5, %v10357_v38  ;;  %v10469_v8 = vpop.f32.mrf.mxu3 }
 0x2fd   : > { %v2846_v20 = vadd.f32 %v10364_v57, %v2637_v43  ;;  %2675 = vmatmul.bf16.gmra.mxu1 %v9166_v2  ;;  %5003 = vmatmul.bf16.gmra.mxu0 %v9513_v63  ;;  %v4187_v41 = vpack.c.b16 %v4149_v35, %v4148_v23  ;;  %v4049_v48 = vsel %vm9324_vm5, %v8034_v28, %v4048_v51  ;;  %v3635_v7 = vrot.slane %v3633_v12, 4  ;;  %v10471_v29 = vpop.f32.mrf.mxu2 }
 0x2fe   : > { %v3631_v32 = vrot.slane %v3629_v25, 5  ;;  %12400 = vst [vmem:[#allocation71_spill] sm:$0xff] %v10469_v8  ;;  %v4050_v35 = vrot.slane %v4048_v51, 4  ;;  %v2433_v12 = vadd.f32 %v10115_v5, %v10368_v54  ;;  %v4388_v8 = vunpack.c.l.b16 %v4049_v48 }
 0x2ff   : > { %v2958_v58 = vmax.f32 %v2846_v20, 0.0  ;;  %4775 = vmatmul.bf16.gmra.mxu3 %v4187_v41 }
 0x300   : > { %v3632_v14 = vsel %vm9341_vm7, %v3627_v18, %v3631_v32  ;;  %v3636_v25 = vor.u32 %v3635_v7, %v3631_v32 }
 0x301   : > { %v3038_v57 = vmul.f32 %v9350_v33, %v2958_v58 }
 0x302   : > { %v10467_v2 = vpop.f32.mrf.mxu0  ;;  %v2638_v63 = vpop.f32.mrf.mxu1 }
 0x303   : > { %v3104_v46 = vpack.c.bf16 %v3038_v57, %v3038_v57  ;;  %v2639_v43 = vadd.f32 %v2638_v63, %v2430_v3  ;;  %v3637_v3 = vrot.slane %v3636_v25, 4 }
 0x305   : > { %v3643_v23 = vshrl.u32 %v3104_v46, 16  ;;  %v2848_v38 = vadd.f32 %v10379_v42, %v2639_v43  ;;  %v4051_v28 = vrot.slane %v3104_v46, 5  ;;  %v3639_v20 = vshll.u32 %v3104_v46, 16 }
 0x306   : > { %v10484_v43 = vunpack.c.l.b16 %v3632_v14  ;;  %v2435_v14 = vadd.f32 %v10115_v5, %v10390_v61 }
 0x307   : > { %v2959_v41 = vmax.f32 %v2848_v38, 0.0  ;;  %v4052_v18 = vsel %vm9324_vm5, %v4050_v35, %v4051_v28  ;;  %v3645_v58 = vrot.slane %v3643_v23, 4  ;;  %v3641_v63 = vrot.slane %v3639_v20, 5  ;;  %v10488_v35 = vpop.f32.mrf.mxu3 }
 0x308   : > { %v4389_v57 = vunpack.c.l.b16 %v4052_v18  ;;  %v4053_v48 = vrot.slane %v4051_v28, 4  ;;  %12401 = vst [vmem:[#allocation72_spill] sm:$0xff] %v10488_v35 }
 0x309   : > { %v3039_v50 = vmul.f32 0.0, %v2959_v41  ;;  %v3642_v51 = vsel %vm9341_vm7, %v3637_v3, %v3641_v63  ;;  %v3646_v23 = vor.u32 %v3645_v58, %v3641_v63 }
 0x30a   : > { %v10478_v32 = vpop.f32.mrf.mxu0  ;;  %v2641_v7 = vpop.f32.mrf.mxu1  ;;  %v10480_v42 = vpack.c.b16 %v4389_v57, %v4388_v8  ;;  %v10486_v10 = vunpack.c.l.b16 %v3642_v51 }
 0x30b   : > { %v3134_v54 = vpack.c.bf16 %v3039_v50, %v3039_v50  ;;  %v2642_v38 = vadd.f32 %v2641_v7, %v2433_v12  ;;  %v10493_v8 = vpop.f32.mrf.mxu2  ;;  %v3647_v58 = vrot.slane %v3646_v23, 4  ;;  %v4150_v7 = vunpack.c.l.b16 %v3104_v46 }
 0x30d   : > { %v3649_v25 = vshll.u32 %v3134_v54, 16  ;;  %v4054_v20 = vrot.slane %v3134_v54, 5  ;;  %v2851_v41 = vadd.f32 %v10399_v55, %v2642_v38  ;;  %2680 = vmatmul.bf16.gmra.mxu1 %v10303_v15  ;;  %5008 = vmatmul.bf16.gmra.mxu0 %v9567_v45 }
 0x30f   : > { %v3651_v12 = vrot.slane %v3649_v25, 5  ;;  %v2960_v28 = vmax.f32 %v2851_v41, 0.0  ;;  %v4055_v18 = vsel %vm9324_vm5, %v4053_v48, %v4054_v20  ;;  %v2438_v48 = vadd.f32 %v10115_v5, %v10407_v9  ;;  %v10509_v23 = vpop.f32.mrf.mxu3 }
 0x311   : > { %v3040_v55 = vmul.f32 %v9304_v26, %v2960_v28  ;;  %v3652_v15 = vsel %vm9341_vm7, %v3647_v58, %v3651_v12 }
 0x312   : > { %v10504_v45 = vpop.f32.mrf.mxu0  ;;  %v2643_v57 = vpop.f32.mrf.mxu1 }
 0x313   : > { %v3105_v3 = vpack.c.bf16 %v3040_v55, %v3040_v55  ;;  %v2644_v63 = vadd.f32 %v2643_v57, %v2435_v14  ;;  %v10511_v41 = vpop.f32.mrf.mxu2 }
 0x315   : > { %v3654_v51 = vshrl.u32 %v3105_v3, 16  ;;  %v3657_v54 = vshll.u32 %v3105_v3, 16  ;;  %v2853_v61 = vadd.f32 %v10429_v19, %v2644_v63  ;;  %v4151_v38 = vunpack.c.l.b16 %v3105_v3 }
 0x316   : > { %v8035_v63 = vrot.slane %v3105_v3, 9 }
 0x317   : > { %v2961_v25 = vmax.f32 %v2853_v61, 0.0  ;;  %v4188_v20 = vpack.c.b16 %v4151_v38, %v4150_v7  ;;  %v3656_v12 = vrot.slane %v3654_v51, 4  ;;  %v3659_v28 = vrot.slane %v3657_v54, 5  ;;  %v10523_v54 = vld [vmem:[%s12108_s2] ss:$0 sm:$0xff] }
 0x318   : > { %v2440_v3 = vadd.f32 %v10523_v54, %v10438_v27  ;;  %v4390_v38 = vunpack.c.l.b16 %v4055_v18 }
 0x319   : > { %v3106_v58 = vpack.c.bf16 %v2961_v25, %v2961_v25  ;;  %4780 = vmatmul.bf16.gmra.mxu3 %v4188_v20  ;;  %v3660_v55 = vor.u32 %v3659_v28, %v3656_v12  ;;  %v10536_v12 = vunpack.c.l.b16 %v3652_v15  ;;  %v8448_v15 = vld [vmem:[%s12109_s3 + $0x48] sm:$0xff] }
 0x31a   : > { %v10513_v14 = vpop.f32.mrf.mxu0  ;;  %v2646_v46 = vpop.f32.mrf.mxu1  ;;  %4827 = vmatpush.bf16.msrb.mxu3 %v8448_v15 }
 0x31b   : > { %v2647_v57 = vadd.f32 %v2646_v46, %v2438_v48  ;;  %v3667_v19 = vshrl.u32 %v3106_v58, 16  ;;  %v4058_v50 = vrot.slane %v3106_v58, 5  ;;  %v3663_v35 = vshll.u32 %v3106_v58, 16  ;;  %v10529_v48 = vpop.f32.mrf.mxu3 }
 0x31c   : > { %v3661_v7 = vrot.slane %v3660_v55, 4  ;;  %12402 = vst [vmem:[#allocation131_spill] sm:$0xff] %v10529_v48 }
 0x31d   : > { %v2856_v5 = vadd.f32 %v10451_v56, %v2647_v57  ;;  %2685 = vmatmul.bf16.gmra.mxu1 %v10352_v34  ;;  %5013 = vmatmul.bf16.gmra.mxu0 %v9612_v39  ;;  %v4059_v9 = vsel %vm9324_vm5, %v8035_v63, %v4058_v50  ;;  %v3665_v51 = vrot.slane %v3663_v35, 5  ;;  %v3669_v39 = vrot.slane %v3667_v19, 4  ;;  %v10532_v35 = vpop.f32.mrf.mxu2 }
 0x31e   : > { %v4391_v56 = vunpack.c.l.b16 %v4059_v9  ;;  %v4152_v9 = vunpack.c.l.b16 %v3106_v58 }
 0x31f   : > { %v2962_v61 = vmax.f32 %v2856_v5, 0.0  ;;  %v3666_v34 = vsel %vm9341_vm7, %v3661_v7, %v3665_v51  ;;  %v3670_v19 = vor.u32 %v3669_v39, %v3665_v51 }
 0x320   : > { %v10534_v20 = vpack.c.b16 %v4391_v56, %v4390_v38  ;;  %v10538_v28 = vunpack.c.l.b16 %v3666_v34  ;;  %v2443_v34 = vadd.f32 %v10523_v54, %v10453_v40 }
 0x321   : > { %v3042_v25 = vmul.f32 %v9350_v33, %v2962_v61  ;;  %v4060_v61 = vrot.slane %v4058_v50, 4 }
 0x322   : > { %v10540_v27 = vpop.f32.mrf.mxu0  ;;  %v2648_v18 = vpop.f32.mrf.mxu1 }
 0x323   : > { %v3107_v46 = vpack.c.bf16 %v3042_v25, %v3042_v25  ;;  %v2649_v55 = vadd.f32 %v2648_v18, %v2440_v3  ;;  %v10552_v39 = vpop.f32.mrf.mxu3 }
 0x324   : > { %12403 = vst [vmem:[#allocation132_spill] sm:$0xff] %v10552_v39 }
 0x325   : > { %v3677_v63 = vshrl.u32 %v3107_v46, 16  ;;  %v2858_v5 = vadd.f32 %v10471_v29, %v2649_v55  ;;  %v4153_v7 = vunpack.c.l.b16 %v3107_v46  ;;  %v4061_v38 = vrot.slane %v3107_v46, 5 }
 0x326   : > { %v3673_v56 = vshll.u32 %v3107_v46, 16  ;;  %v3671_v29 = vrot.slane %v3670_v19, 4 }
 0x327   : > { %v2963_v3 = vmax.f32 %v2858_v5, 0.0  ;;  %v4189_v25 = vpack.c.b16 %v4153_v7, %v4152_v9  ;;  %v3679_v18 = vrot.slane %v3677_v63, 4  ;;  %v4062_v51 = vsel %vm9324_vm5, %v4060_v61, %v4061_v38  ;;  %v10558_v9 = vpop.f32.mrf.mxu2 }
 0x328   : > { %v3675_v58 = vrot.slane %v3673_v56, 5  ;;  %v4063_v61 = vrot.slane %v4061_v38, 4  ;;  %v2445_v56 = vadd.f32 %v10523_v54, %v10467_v2 }
 0x329   : > { %v3043_v55 = vmul.f32 0.0, %v2963_v3  ;;  %4785 = vmatmul.bf16.gmra.mxu3 %v4189_v25 }
 0x32a   : > { %v10554_v57 = vpop.f32.mrf.mxu0  ;;  %v2651_v50 = vpop.f32.mrf.mxu1  ;;  %v3676_v46 = vsel %vm9341_vm7, %v3671_v29, %v3675_v58  ;;  %v3680_v63 = vor.u32 %v3679_v18, %v3675_v58 }
 0x32b   : > { %v3135_v40 = vpack.c.bf16 %v3043_v55, %v3043_v55  ;;  %v2652_v5 = vadd.f32 %v2651_v50, %v2443_v34  ;;  %v4392_v34 = vunpack.c.l.b16 %v4062_v51 }
 0x32c   : > { %v3681_v55 = vrot.slane %v3680_v63, 4 }
 0x32d   : > { %v3683_v7 = vshll.u32 %v3135_v40, 16  ;;  %v4064_v15 = vrot.slane %v3135_v40, 5  ;;  %v2861_v19 = vadd.f32 %v10493_v8, %v2652_v5  ;;  %5018 = vmatmul.bf16.gmra.mxu0 %v9660_v60  ;;  %v10573_v40 = vunpack.c.l.b16 %v3676_v46  ;;  %v10577_v5 = vpop.f32.mrf.mxu3 }
 0x32e   : > { %12406 = vst [vmem:[#allocation135_spill] sm:$0xff] %v10577_v5 }
 0x32f   : > { %v3685_v3 = vrot.slane %v3683_v7, 5  ;;  %v2964_v25 = vmax.f32 %v2861_v19, 0.0  ;;  %v4065_v29 = vsel %vm9324_vm5, %v4063_v61, %v4064_v15  ;;  %12404 = vst [vmem:[#allocation133_spill] sm:$0xff] %v10573_v40 }
 0x330   : > { %v4393_v50 = vunpack.c.l.b16 %v4065_v29 }
 0x331   : > { %v3044_v18 = vmul.f32 %v9304_v26, %v2964_v25  ;;  %v3686_v58 = vsel %vm9341_vm7, %v3681_v55, %v3685_v3  ;;  %v10582_v3 = vpop.f32.mrf.mxu2  ;;  %v2448_v25 = vadd.f32 %v10523_v54, %v10478_v32  ;;  %v8468_v32 = vld [vmem:[%s12111_s5 + $0x28] sm:$0xff] }
 0x332   : > { %v10569_v8 = vpop.f32.mrf.mxu0  ;;  %v2653_v60 = vpop.f32.mrf.mxu1  ;;  %v10571_v38 = vpack.c.b16 %v4393_v50, %v4392_v34  ;;  %v10575_v2 = vunpack.c.l.b16 %v3686_v58  ;;  %5697 = vmatpush.bf16.msra.mxu1 %v8468_v32 }
 0x333   : > { %v3108_v7 = vpack.c.bf16 %v3044_v18, %v3044_v18  ;;  %v2654_v63 = vadd.f32 %v2653_v60, %v2445_v56 }
 0x334   : > { %12405 = vst [vmem:[#allocation134_spill] sm:$0xff] %v10575_v2 }
 0x335   : > { %v3688_v15 = vshrl.u32 %v3108_v7, 16  ;;  %v3691_v19 = vshll.u32 %v3108_v7, 16  ;;  %v2863_v61 = vadd.f32 %v10511_v41, %v2654_v63  ;;  %v10588_v58 = vpop.f32.mrf.mxu3  ;;  %v4154_v51 = vunpack.c.l.b16 %v3108_v7  ;;  %v8476_v41 = vld [vmem:[%s12111_s5 + $0x68] sm:$0xff] }
 0x336   : > { %12407 = vst [vmem:[#allocation136_spill] sm:$0xff] %v10588_v58  ;;  %5826 = vmatpush.bf16.msrb.mxu2 %v8476_v41  ;;  %v2450_v58 = vadd.f32 %v10523_v54, %v10504_v45 }
 0x337   : > { %v2965_v46 = vmax.f32 %v2863_v61, 0.0  ;;  %v3690_v29 = vrot.slane %v3688_v15, 4  ;;  %v3693_v55 = vrot.slane %v3691_v19, 5  ;;  %v8036_v15 = vrot.slane %v3108_v7, 9 }
 0x339   : > { %v3109_v34 = vpack.c.bf16 %v2965_v46, %v2965_v46  ;;  %v3694_v56 = vor.u32 %v3693_v55, %v3690_v29  ;;  %v2872_v7 = vpop.f32.mrf.mxu2 }
 0x33a   : > { %v10586_v50 = vpop.f32.mrf.mxu0  ;;  %v2656_v18 = vpop.f32.mrf.mxu1 }
 0x33b   : > { %v2657_v60 = vadd.f32 %v2656_v18, %v2448_v25  ;;  %v4155_v5 = vunpack.c.l.b16 %v3109_v34  ;;  %v3701_v63 = vshrl.u32 %v3109_v34, 16  ;;  %v4068_v19 = vrot.slane %v3109_v34, 5 }
 0x33c   : > { %v3697_v61 = vshll.u32 %v3109_v34, 16  ;;  %v3695_v55 = vrot.slane %v3694_v56, 4 }
 0x33d   : > { %v2866_v46 = vadd.f32 %v10532_v35, %v2657_v60  ;;  %5023 = vmatmul.bf16.gmra.mxu0 %v9719_v52  ;;  %v4190_v29 = vpack.c.b16 %v4155_v5, %v4154_v51  ;;  %v4069_v25 = vsel %vm9324_vm5, %v8036_v15, %v4068_v19  ;;  %v3703_v35 = vrot.slane %v3701_v63, 4  ;;  %v10607_v56 = vpop.f32.mrf.mxu3 }
 0x33e   : > { %v3699_v18 = vrot.slane %v3697_v61, 5  ;;  %12408 = vst [vmem:[#allocation137_spill] sm:$0xff] %v10607_v56  ;;  %v4070_v61 = vrot.slane %v4068_v19, 4  ;;  %v4394_v2 = vunpack.c.l.b16 %v4069_v25 }
 0x33f   : > { %v2966_v39 = vmax.f32 %v2866_v46, 0.0  ;;  %4790 = vmatmul.bf16.gmra.mxu3 %v4190_v29 }
 0x340   : > { %v3700_v34 = vsel %vm9341_vm7, %v3695_v55, %v3699_v18  ;;  %v3704_v32 = vor.u32 %v3703_v35, %v3699_v18  ;;  %v2453_v55 = vadd.f32 %v10523_v54, %v10513_v14 }
 0x341   : > { %v3046_v52 = vmul.f32 %v9350_v33, %v2966_v39  ;;  %v10620_v14 = vunpack.c.l.b16 %v3700_v34 }
 0x342   : > { %v10605_v5 = vpop.f32.mrf.mxu0  ;;  %v2658_v51 = vpop.f32.mrf.mxu1 }
 0x343   : > { %v3110_v60 = vpack.c.bf16 %v3046_v52, %v3046_v52  ;;  %v2659_v41 = vadd.f32 %v2658_v51, %v2450_v58  ;;  %v3705_v58 = vrot.slane %v3704_v32, 4  ;;  %v2875_v51 = vpop.f32.mrf.mxu2  ;;  %12409 = vst [vmem:[#allocation138_spill] sm:$0xff] %v10620_v14 }
 0x345   : > { %v3711_v15 = vshrl.u32 %v3110_v60, 16  ;;  %v2868_v45 = vadd.f32 %v10558_v9, %v2659_v41  ;;  %v4071_v46 = vrot.slane %v3110_v60, 5  ;;  %v3707_v29 = vshll.u32 %v3110_v60, 16  ;;  %v10630_v34 = vpop.f32.mrf.mxu3 }
 0x346   : > { %12411 = vst [vmem:[#allocation140_spill] sm:$0xff] %v10630_v34 }
 0x347   : > { %v2967_v63 = vmax.f32 %v2868_v45, 0.0  ;;  %v4072_v39 = vsel %vm9324_vm5, %v4070_v61, %v4071_v46  ;;  %v3713_v40 = vrot.slane %v3711_v15, 4  ;;  %v3709_v18 = vrot.slane %v3707_v29, 5 }
 0x348   : > { %v4395_v52 = vunpack.c.l.b16 %v4072_v39  ;;  %v4073_v15 = vrot.slane %v4071_v46, 4  ;;  %v2455_v39 = vadd.f32 %v10523_v54, %v10540_v27  ;;  %v4156_v27 = vunpack.c.l.b16 %v3110_v60 }
 0x349   : > { %v3047_v35 = vmul.f32 0.0, %v2967_v63  ;;  %v3710_v19 = vsel %vm9341_vm7, %v3705_v58, %v3709_v18  ;;  %v3714_v25 = vor.u32 %v3713_v40, %v3709_v18 }
 0x34a   : > { %v2661_v56 = vpop.f32.mrf.mxu1  ;;  %v10614_v48 = vpop.f32.mrf.mxu0  ;;  %v10616_v9 = vpack.c.b16 %v4395_v52, %v4394_v2  ;;  %v10622_v61 = vunpack.c.l.b16 %v3710_v19 }
 0x34b   : > { %v3136_v41 = vpack.c.bf16 %v3047_v35, %v3047_v35  ;;  %v2662_v45 = vadd.f32 %v2661_v56, %v2453_v55  ;;  %v3715_v46 = vrot.slane %v3714_v25, 4  ;;  %v2877_v19 = vpop.f32.mrf.mxu2 }
 0x34c   : > { %12410 = vst [vmem:[#allocation139_spill] sm:$0xff] %v10622_v61 }
 0x34d   : > { %v3717_v32 = vshll.u32 %v3136_v41, 16  ;;  %v4074_v29 = vrot.slane %v3136_v41, 5  ;;  %v2871_v63 = vadd.f32 %v10582_v3, %v2662_v45  ;;  %5028 = vmatmul.bf16.gmra.mxu0 %v9764_v44  ;;  %v10641_v34 = vpop.f32.mrf.mxu3 }
 0x34f   : > { %v3719_v52 = vrot.slane %v3717_v32, 5  ;;  %v2968_v56 = vmax.f32 %v2871_v63, 0.0  ;;  %v4075_v40 = vsel %vm9324_vm5, %v4073_v15, %v4074_v29  ;;  %v2458_v15 = vadd.f32 %v10523_v54, %v10554_v57 }
 0x351   : > { %v3048_v55 = vmul.f32 %v9304_v26, %v2968_v56  ;;  %v3720_v3 = vsel %vm9341_vm7, %v3715_v46, %v3719_v52 }
 0x352   : > { %v2663_v44 = vpop.f32.mrf.mxu1  ;;  %v10637_v58 = vpop.f32.mrf.mxu0 }
 0x353   : > { %v3111_v18 = vpack.c.bf16 %v3048_v55, %v3048_v55  ;;  %v2664_v35 = vadd.f32 %v2663_v44, %v2455_v39  ;;  %v2880_v57 = vpop.f32.mrf.mxu2 }
 0x355   : > { %v3722_v41 = vshrl.u32 %v3111_v18, 16  ;;  %v3725_v45 = vshll.u32 %v3111_v18, 16  ;;  %v2873_v32 = vadd.f32 %v2872_v7, %v2664_v35  ;;  %v4157_v63 = vunpack.c.l.b16 %v3111_v18 }
 0x356   : > { %v8037_v44 = vrot.slane %v3111_v18, 9 }
 0x357   : > { %v2969_v25 = vmax.f32 %v2873_v32, 0.0  ;;  %v4191_v29 = vpack.c.b16 %v4157_v63, %v4156_v27  ;;  %v3724_v56 = vrot.slane %v3722_v41, 4  ;;  %v3727_v2 = vrot.slane %v3725_v45, 5 }
 0x358   : > { %v4396_v41 = vunpack.c.l.b16 %v4075_v40 }
 0x359   : > { %v3112_v52 = vpack.c.bf16 %v2969_v25, %v2969_v25  ;;  %4795 = vmatmul.bf16.gmra.mxu3 %v4191_v29  ;;  %v3728_v39 = vor.u32 %v3727_v2, %v3724_v56  ;;  %v2460_v25 = vadd.f32 %v10523_v54, %v10569_v8  ;;  %v10654_v29 = vpop.f32.mrf.mxu3  ;;  %v10657_v56 = vunpack.c.l.b16 %v3720_v3  ;;  %v8447_v3 = vld [vmem:[%s12109_s3 + $0x40] sm:$0xff] }
 0x35a   : > { %v2666_v46 = vpop.f32.mrf.mxu1  ;;  %v10643_v55 = vpop.f32.mrf.mxu0  ;;  %12412 = vst [vmem:[#allocation141_spill] sm:$0xff] %v10654_v29  ;;  %4828 = vmatpush.bf16.msrb.mxu3 %v8447_v3 }
 0x35b   : > { %v2667_v60 = vadd.f32 %v2666_v46, %v2458_v15  ;;  %v4078_v14 = vrot.slane %v3112_v52, 5  ;;  %v3735_v7 = vshrl.u32 %v3112_v52, 16  ;;  %v3731_v35 = vshll.u32 %v3112_v52, 16 }
 0x35c   : > { %v3729_v32 = vrot.slane %v3728_v39, 4 }
 0x35d   : > { %v2876_v61 = vadd.f32 %v2875_v51, %v2667_v60  ;;  %5033 = vmatmul.bf16.gmra.mxu0 %v9817_v17  ;;  %v4079_v27 = vsel %vm9324_vm5, %v8037_v44, %v4078_v14  ;;  %v3733_v63 = vrot.slane %v3731_v35, 5  ;;  %v3737_v51 = vrot.slane %v3735_v7, 4 }
 0x35e   : > { %v4397_v45 = vunpack.c.l.b16 %v4079_v27  ;;  %v4158_v7 = vunpack.c.l.b16 %v3112_v52 }
 0x35f   : > { %v2970_v2 = vmax.f32 %v2876_v61, 0.0  ;;  %v3734_v18 = vsel %vm9341_vm7, %v3729_v32, %v3733_v63  ;;  %v3738_v44 = vor.u32 %v3737_v51, %v3733_v63 }
 0x360   : > { %v10650_v15 = vpack.c.b16 %v4397_v45, %v4396_v41  ;;  %v10659_v40 = vunpack.c.l.b16 %v3734_v18  ;;  %v4080_v45 = vrot.slane %v4078_v14, 4  ;;  %v2463_v18 = vadd.f32 %v10523_v54, %v10586_v50 }
 0x361   : > { %v3050_v17 = vmul.f32 %v9350_v33, %v2970_v2  ;;  %v3739_v52 = vrot.slane %v3738_v44, 4 }
 0x362   : > { %v2668_v46 = vpop.f32.mrf.mxu1  ;;  %v10661_v39 = vpop.f32.mrf.mxu0 }
 0x363   : > { %v3113_v60 = vpack.c.bf16 %v3050_v17, %v3050_v17  ;;  %v2669_v8 = vadd.f32 %v2668_v46, %v2460_v25  ;;  %v2882_v46 = vpop.f32.mrf.mxu2 }
 0x365   : > { %v3745_v35 = vshrl.u32 %v3113_v60, 16  ;;  %v2878_v27 = vadd.f32 %v2877_v19, %v2669_v8  ;;  %v4159_v41 = vunpack.c.l.b16 %v3113_v60  ;;  %v4081_v32 = vrot.slane %v3113_v60, 5 }
 0x366   : > { %v3741_v2 = vshll.u32 %v3113_v60, 16 }
 0x367   : > { %v2971_v17 = vmax.f32 %v2878_v27, 0.0  ;;  %v4192_v25 = vpack.c.b16 %v4159_v41, %v4158_v7  ;;  %v3747_v61 = vrot.slane %v3745_v35, 4  ;;  %v4082_v19 = vsel %vm9324_vm5, %v4080_v45, %v4081_v32  ;;  %v10676_v7 = vpop.f32.mrf.mxu3 }
 0x368   : > { %v3743_v63 = vrot.slane %v3741_v2, 5  ;;  %12413 = vst [vmem:[#allocation142_spill] sm:$0xff] %v10676_v7  ;;  %v4083_v44 = vrot.slane %v4081_v32, 4  ;;  %v2465_v45 = vadd.f32 %v10523_v54, %v10605_v5 }
 0x369   : > { %v3051_v51 = vmul.f32 0.0, %v2971_v17  ;;  %4800 = vmatmul.bf16.gmra.mxu3 %v4192_v25 }
 0x36a   : > { %v2671_v8 = vpop.f32.mrf.mxu1  ;;  %v10672_v29 = vpop.f32.mrf.mxu0  ;;  %v3744_v14 = vsel %vm9341_vm7, %v3739_v52, %v3743_v63  ;;  %v3748_v27 = vor.u32 %v3747_v61, %v3743_v63 }
 0x36b   : > { %v3137_v60 = vpack.c.bf16 %v3051_v51, %v3051_v51  ;;  %v2672_v50 = vadd.f32 %v2671_v8, %v2463_v18  ;;  %v4398_v51 = vunpack.c.l.b16 %v4082_v19  ;;  %v2885_v63 = vpop.f32.mrf.mxu2  ;;  %v10690_v5 = vunpack.c.l.b16 %v3744_v14 }
 0x36c   : > { %v3749_v52 = vrot.slane %v3748_v27, 4 }
 0x36d   : > { %v3751_v41 = vshll.u32 %v3137_v60, 16  ;;  %v4084_v35 = vrot.slane %v3137_v60, 5  ;;  %v2881_v3 = vadd.f32 %v2880_v57, %v2672_v50  ;;  %5038 = vmatmul.bf16.gmra.mxu0 %v9879_v11  ;;  %12414 = vst [vmem:[#allocation143_spill] sm:$0xff] %v10690_v5 }
 0x36f   : > { %v3753_v2 = vrot.slane %v3751_v41, 5  ;;  %v2972_v17 = vmax.f32 %v2881_v3, 0.0  ;;  %v4085_v25 = vsel %vm9324_vm5, %v4083_v44, %v4084_v35  ;;  %v10694_v27 = vpop.f32.mrf.mxu3 }
 0x370   : > { %v4399_v18 = vunpack.c.l.b16 %v4085_v25  ;;  %12416 = vst [vmem:[#allocation145_spill] sm:$0xff] %v10694_v27 }
 0x371   : > { %v3052_v61 = vmul.f32 %v9304_v26, %v2972_v17  ;;  %v3754_v57 = vsel %vm9341_vm7, %v3749_v52, %v3753_v2  ;;  %v2468_v52 = vadd.f32 %v10523_v54, %v9208_v59 }
 0x372   : > { %v2673_v8 = vpop.f32.mrf.mxu1  ;;  %v10686_v11 = vpop.f32.mrf.mxu0  ;;  %v10688_v32 = vpack.c.b16 %v4399_v18, %v4398_v51  ;;  %v10692_v60 = vunpack.c.l.b16 %v3754_v57 }
 0x373   : > { %v3114_v50 = vpack.c.bf16 %v3052_v61, %v3052_v61  ;;  %v2674_v41 = vadd.f32 %v2673_v8, %v2465_v45  ;;  %v2887_v8 = vpop.f32.mrf.mxu2 }
 0x374   : > { %12415 = vst [vmem:[#allocation144_spill] sm:$0xff] %v10692_v60 }
 0x375   : > { %v3756_v35 = vshrl.u32 %v3114_v50, 16  ;;  %v3759_v3 = vshll.u32 %v3114_v50, 16  ;;  %v2883_v44 = vadd.f32 %v2882_v46, %v2674_v41  ;;  %v4160_v18 = vunpack.c.l.b16 %v3114_v50 }
 0x376   : > { %v8038_v7 = vrot.slane %v3114_v50, 9 }
 0x377   : > { %v2973_v2 = vmax.f32 %v2883_v44, 0.0  ;;  %v3758_v17 = vrot.slane %v3756_v35, 4  ;;  %v3761_v25 = vrot.slane %v3759_v3, 5  ;;  %v10705_v35 = vpop.f32.mrf.mxu3 }
 0x378   : > { %12417 = vst [vmem:[#allocation146_spill] sm:$0xff] %v10705_v35 }
 0x379   : > { %v3115_v14 = vpack.c.bf16 %v2973_v2, %v2973_v2  ;;  %v3762_v57 = vor.u32 %v3761_v25, %v3758_v17  ;;  %v2470_v25 = vadd.f32 %v10523_v54, %v9221_v1 }
 0x37a   : > { %v2676_v51 = vpop.f32.mrf.mxu1  ;;  %v10700_v45 = vpop.f32.mrf.mxu0 }
 0x37b   : > { %v2677_v61 = vadd.f32 %v2676_v51, %v2468_v52  ;;  %v4161_v27 = vunpack.c.l.b16 %v3115_v14  ;;  %v4088_v19 = vrot.slane %v3115_v14, 5  ;;  %v3769_v5 = vshrl.u32 %v3115_v14, 16 }
 0x37c   : > { %v3765_v60 = vshll.u32 %v3115_v14, 16  ;;  %v3763_v3 = vrot.slane %v3762_v57, 4 }
 0x37d   : > { %v2886_v46 = vadd.f32 %v2885_v63, %v2677_v61  ;;  %5043 = vmatmul.bf16.gmra.mxu0 %v9928_v49  ;;  %v4193_v41 = vpack.c.b16 %v4161_v27, %v4160_v18  ;;  %v4089_v59 = vsel %vm9324_vm5, %v8038_v7, %v4088_v19  ;;  %v3771_v50 = vrot.slane %v3769_v5, 4 }
 0x37e   : > { %v3767_v44 = vrot.slane %v3765_v60, 5  ;;  %v2890_v60 = vpop.f32.mrf.mxu2  ;;  %v4090_v57 = vrot.slane %v4088_v19, 4 }
 0x37f   : > { %v2974_v2 = vmax.f32 %v2886_v46, 0.0  ;;  %4805 = vmatmul.bf16.gmra.mxu3 %v4193_v41  ;;  %v10716_v1 = vpop.f32.mrf.mxu3 }
 0x380   : > { %v3768_v17 = vsel %vm9341_vm7, %v3763_v3, %v3767_v44  ;;  %v3772_v14 = vor.u32 %v3771_v50, %v3767_v44  ;;  %12418 = vst [vmem:[#allocation147_spill] sm:$0xff] %v10716_v1 }
 0x381   : > { %v3054_v63 = vmul.f32 %v9350_v33, %v2974_v2  ;;  %v4400_v2 = vunpack.c.l.b16 %v4089_v59 }
 0x382   : > { %v2678_v49 = vpop.f32.mrf.mxu1  ;;  %v10712_v18 = vpop.f32.mrf.mxu0 }
 0x383   : > { %v3116_v27 = vpack.c.bf16 %v3054_v63, %v3054_v63  ;;  %v2679_v52 = vadd.f32 %v2678_v49, %v2470_v25  ;;  %v3773_v63 = vrot.slane %v3772_v14, 4 }
 0x385   : > { %v3779_v7 = vshrl.u32 %v3116_v27, 16  ;;  %v2888_v51 = vadd.f32 %v2887_v8, %v2679_v52  ;;  %v4091_v61 = vrot.slane %v3116_v27, 5  ;;  %v3775_v46 = vshll.u32 %v3116_v27, 16 }
 0x386   : > { %v2473_v8 = vadd.f32 %v10523_v54, %v9232_v53  ;;  %v10724_v52 = vunpack.c.l.b16 %v3768_v17  ;;  %v2892_v17 = vpop.f32.mrf.mxu2 }
 0x387   : > { %v2975_v41 = vmax.f32 %v2888_v51, 0.0  ;;  %v4092_v5 = vsel %vm9324_vm5, %v4090_v57, %v4091_v61  ;;  %v3781_v3 = vrot.slane %v3779_v7, 4  ;;  %v3777_v25 = vrot.slane %v3775_v46, 5 }
 0x388   : > { %v4401_v35 = vunpack.c.l.b16 %v4092_v5  ;;  %12419 = vst [vmem:[#allocation148_spill] sm:$0xff] %v10724_v52  ;;  %v4093_v5 = vrot.slane %v4091_v61, 4  ;;  %v8467_v61 = vld [vmem:[%s12111_s5 + $0x20] sm:$0xff] }
 0x389   : > { %v3055_v44 = vmul.f32 0.0, %v2975_v41  ;;  %v3778_v19 = vsel %vm9341_vm7, %v3773_v63, %v3777_v25  ;;  %v3782_v59 = vor.u32 %v3781_v3, %v3777_v25  ;;  %v8475_v63 = vld [vmem:[%s12111_s5 + $0x60] sm:$0xff]  ;;  %v12421_v3 = vld [vmem:[#allocation73_spill] sm:$0xff]  ;;  %5698 = vmatpush.bf16.msra.mxu1 %v8467_v61 }
 0x38a   : > { %v2681_v50 = vpop.f32.mrf.mxu1  ;;  %v10720_v49 = vpack.c.b16 %v4401_v35, %v4400_v2  ;;  %v10726_v57 = vunpack.c.l.b16 %v3778_v19  ;;  %v10731_v2 = vpop.f32.mrf.mxu0  ;;  %v2475_v25 = vadd.f32 %v10523_v54, %v12421_v3  ;;  %5827 = vmatpush.bf16.msrb.mxu2 %v8475_v63 }
 0x38b   : > { %v3138_v51 = vpack.c.bf16 %v3055_v44, %v3055_v44  ;;  %v2682_v7 = vadd.f32 %v2681_v50, %v2473_v8  ;;  %v10746_v44 = vpop.f32.mrf.mxu3 }
 0x38c   : > { %12420 = vst [vmem:[#allocation149_spill] sm:$0xff] %v10726_v57 }
 0x38d   : > { %v3785_v14 = vshll.u32 %v3138_v51, 16  ;;  %v4094_v46 = vrot.slane %v3138_v51, 5  ;;  %v2891_v1 = vadd.f32 %v2890_v60, %v2682_v7  ;;  %5048 = vmatmul.bf16.gmra.mxu0 %v9987_v47  ;;  %v3783_v47 = vrot.slane %v3782_v59, 4  ;;  %12422 = vst [vmem:[#allocation73_spill] sm:$0xff] %v10746_v44 }
 0x38e   : > { %v4162_v7 = vunpack.c.l.b16 %v3116_v27  ;;  %v8486_v27 = vld [vmem:[%s12111_s5 + $0xb8] sm:$0xff] }
 0x38f   : > { %v3787_v35 = vrot.slane %v3785_v14, 5  ;;  %v2976_v41 = vmax.f32 %v2891_v1, 0.0  ;;  %v4095_v60 = vsel %vm9324_vm5, %v4093_v5, %v4094_v46  ;;  %5953 = vmatpush.bf16.msra.mxu3 %v8486_v27 }
 0x391   : > { %v3056_v1 = vmul.f32 %v9304_v26, %v2976_v41  ;;  %v3788_v8 = vsel %vm9341_vm7, %v3783_v47, %v3787_v35  ;;  %v12423_v26 = vld [vmem:[#allocation74_spill] sm:$0xff]  ;;  %v2895_v35 = vpop.f32.mrf.mxu2 }
 0x392   : > { %v2683_v50 = vpop.f32.mrf.mxu1  ;;  %v2478_v41 = vadd.f32 %v10523_v54, %v12423_v26  ;;  %v10750_v61 = vpop.f32.mrf.mxu0 }
 0x393   : > { %v3117_v19 = vpack.c.bf16 %v3056_v1, %v3056_v1  ;;  %v2684_v51 = vadd.f32 %v2683_v50, %v2475_v25  ;;  %v10755_v47 = vpop.f32.mrf.mxu3 }
 0x394   : > { %12424 = vst [vmem:[#allocation74_spill] sm:$0xff] %v10755_v47 }
 0x395   : > { %v3790_v14 = vshrl.u32 %v3117_v19, 16  ;;  %v3793_v53 = vshll.u32 %v3117_v19, 16  ;;  %v2893_v5 = vadd.f32 %v2892_v17, %v2684_v51  ;;  %v4163_v59 = vunpack.c.l.b16 %v3117_v19 }
 0x396   : > { %v8039_v50 = vrot.slane %v3117_v19, 9 }
 0x397   : > { %v2977_v46 = vmax.f32 %v2893_v5, 0.0  ;;  %v4194_v52 = vpack.c.b16 %v4163_v59, %v4162_v7  ;;  %v3792_v3 = vrot.slane %v3790_v14, 4  ;;  %v3795_v57 = vrot.slane %v3793_v53, 5 }
 0x398   : > { %v4402_v5 = vunpack.c.l.b16 %v4095_v60 }
 0x399   : > { %v3118_v63 = vpack.c.bf16 %v2977_v46, %v2977_v46  ;;  %4810 = vmatmul.bf16.gmra.mxu3 %v4194_v52  ;;  %v3796_v25 = vor.u32 %v3795_v57, %v3792_v3  ;;  %v12425_v3 = vld [vmem:[#allocation75_spill] sm:$0xff] }
 0x39a   : > { %v2686_v17 = vpop.f32.mrf.mxu1 }
 0x39b   : > { %v2687_v1 = vadd.f32 %v2686_v17, %v2478_v41  ;;  %v4098_v53 = vrot.slane %v3118_v63, 5  ;;  %v3803_v51 = vshrl.u32 %v3118_v63, 16  ;;  %v3799_v7 = vshll.u32 %v3118_v63, 16 }
 0x39c   : > { %v3797_v46 = vrot.slane %v3796_v25, 4  ;;  %v2480_v41 = vadd.f32 %v10523_v54, %v12425_v3  ;;  %v10771_v25 = vpop.f32.mrf.mxu0 }
 0x39d   : > { %v2896_v14 = vadd.f32 %v2895_v35, %v2687_v1  ;;  %5053 = vmatmul.bf16.gmra.mxu0 %v10049_v30  ;;  %v4099_v52 = vsel %vm9324_vm5, %v8039_v50, %v4098_v53  ;;  %v3801_v26 = vrot.slane %v3799_v7, 5  ;;  %v3805_v19 = vrot.slane %v3803_v51, 4  ;;  %v10775_v7 = vpop.f32.mrf.mxu3  ;;  %v2897_v51 = vpop.f32.mrf.mxu2 }
 0x39e   : > { %v4403_v59 = vunpack.c.l.b16 %v4099_v52  ;;  %v10767_v30 = vunpack.c.l.b16 %v3788_v8  ;;  %12428 = vst [vmem:[#allocation151_spill] sm:$0xff] %v10775_v7  ;;  %v4100_v8 = vrot.slane %v4098_v53, 4 }
 0x39f   : > { %v2978_v44 = vmax.f32 %v2896_v14, 0.0  ;;  %v3802_v57 = vsel %vm9341_vm7, %v3797_v46, %v3801_v26  ;;  %v3806_v14 = vor.u32 %v3805_v19, %v3801_v26 }
 0x3a0   : > { %v10760_v47 = vpack.c.b16 %v4403_v59, %v4402_v5  ;;  %12426 = vst [vmem:[#allocation75_spill] sm:$0xff] %v10767_v30  ;;  %v10769_v27 = vunpack.c.l.b16 %v3802_v57  ;;  %v4164_v5 = vunpack.c.l.b16 %v3118_v63 }
 0x3a1   : > { %v3058_v35 = vmul.f32 %v9350_v33, %v2978_v44 }
 0x3a2   : > { %12427 = vst [vmem:[#allocation150_spill] sm:$0xff] %v10769_v27  ;;  %v2688_v60 = vpop.f32.mrf.mxu1 }
 0x3a3   : > { %v3119_v17 = vpack.c.bf16 %v3058_v35, %v3058_v35  ;;  %v2689_v1 = vadd.f32 %v2688_v60, %v2480_v41  ;;  %v3807_v35 = vrot.slane %v3806_v14, 4 }
 0x3a5   : > { %v3813_v52 = vshrl.u32 %v3119_v17, 16  ;;  %v2898_v54 = vadd.f32 %v2897_v51, %v2689_v1  ;;  %v4165_v33 = vunpack.c.l.b16 %v3119_v17  ;;  %v4101_v44 = vrot.slane %v3119_v17, 5  ;;  %v10781_v63 = vpop.f32.mrf.mxu3 }
 0x3a6   : > { %v3809_v59 = vshll.u32 %v3119_v17, 16  ;;  %12429 = vst [vmem:[#allocation152_spill] sm:$0xff] %v10781_v63  ;;  %v10783_v17 = vpop.f32.mrf.mxu0 }
 0x3a7   : > { %v2979_v46 = vmax.f32 %v2898_v54, 0.0  ;;  %v4195_v57 = vpack.c.b16 %v4165_v33, %v4164_v5  ;;  %v3815_v3 = vrot.slane %v3813_v52, 4  ;;  %v4102_v41 = vsel %vm9324_vm5, %v4100_v8, %v4101_v44  ;;  %v12430_v54 = vld [vmem:[#allocation111_spill] sm:$0xff] }
 0x3a8   : > { %v3811_v60 = vrot.slane %v3809_v59, 5  ;;  %v4103_v52 = vrot.slane %v4101_v44, 4  ;;  %v4404_v8 = vunpack.c.l.b16 %v4102_v41 }
 0x3a9   : > { %v3059_v50 = vmul.f32 0.0, %v2979_v46  ;;  %4815 = vmatmul.bf16.gmra.mxu3 %v4195_v57 }
 0x3aa   : > { %v3812_v26 = vsel %vm9341_vm7, %v3807_v35, %v3811_v60  ;;  %v3816_v1 = vor.u32 %v3815_v3, %v3811_v60  ;;  %v12449_v35 = vld [vmem:[#allocation85_spill] sm:$0xff] }
 0x3ab   : > { %v3139_v19 = vpack.c.bf16 %v3059_v50, %v3059_v50  ;;  %v10792_v57 = vunpack.c.l.b16 %v3812_v26  ;;  %v12438_v26 = vld [vmem:[#allocation82_spill] sm:$0xff] }
 0x3ac   : > { %v3817_v33 = vrot.slane %v3816_v1, 4  ;;  %v12435_v1 = vld [vmem:[#allocation79_spill] sm:$0xff] }
 0x3ad   : > { %v3819_v53 = vshll.u32 %v3139_v19, 16  ;;  %v4104_v51 = vrot.slane %v3139_v19, 5  ;;  %5058 = vmatmul.bf16.gmra.mxu0 %v12430_v54  ;;  %12431 = vst [vmem:[#allocation111_spill] sm:$0xff] %v10792_v57  ;;  %v10798_v44 = vpop.f32.mrf.mxu3  ;;  %v12434_v19 = vld [vmem:[#allocation80_spill] sm:$0xff] }
 0x3ae   : > { %12433 = vst [vmem:[#allocation154_spill] sm:$0xff] %v10798_v44  ;;  %v10800_v60 = vpop.f32.mrf.mxu0  ;;  %v12436_v41 = vpack.c.b16 %v12434_v19, %v12435_v1 }
 0x3af   : > { %v3821_v5 = vrot.slane %v3819_v53, 5  ;;  %v4105_v14 = vsel %vm9324_vm5, %v4103_v52, %v4104_v51  ;;  %v12439_v51 = vld [vmem:[#allocation81_spill] sm:$0xff] }
 0x3b0   : > { %v4405_v59 = vunpack.c.l.b16 %v4105_v14  ;;  %v12440_v54 = vpack.c.b16 %v12438_v26, %v12439_v51 }
 0x3b1   : > { %v3822_v50 = vsel %vm9341_vm7, %v3817_v33, %v3821_v5 }
 0x3b2   : > { %v10790_v46 = vpack.c.b16 %v4405_v59, %v4404_v8  ;;  %v10794_v3 = vunpack.c.l.b16 %v3822_v50  ;;  %v8485_v8 = vld [vmem:[%s12111_s5 + $0xb0] sm:$0xff]  ;;  %v8466_v59 = vld [vmem:[%s12111_s5 + $0x18] sm:$0xff]  ;;  %v12444_v50 = vld [vmem:[#allocation83_spill] sm:$0xff] }
 0x3b3   : > { %5954 = vmatpush.bf16.msra.mxu3 %v8485_v8  ;;  %5699 = vmatpush.bf16.msra.mxu1 %v8466_v59 }
 0x3b4   : > { %12432 = vst [vmem:[#allocation153_spill] sm:$0xff] %v10794_v3 }
 0x3b5   : > { %v10806_v22 = vpop.f32.mrf.mxu3 }
 0x3b6   : > { %12437 = vst [vmem:[#allocation80_spill] sm:$0xff] %v10806_v22  ;;  %v10808_v53 = vpop.f32.mrf.mxu0 }
 0x3b9   : > { %4829 = vmatmul.bf16.vlgmr.msrb.gmra.mxu3 %v12436_v41 }
 0x3bd   : > { %5063 = vmatmul.bf16.gmra.mxu0 %v10155_v24  ;;  %v10813_v52 = vpop.f32.mrf.mxu3  ;;  %v8474_v24 = vld [vmem:[%s12111_s5 + $0x58] sm:$0xff] }
 0x3be   : > { %12441 = vst [vmem:[#allocation79_spill] sm:$0xff] %v10813_v52  ;;  %v10815_v5 = vpop.f32.mrf.mxu0  ;;  %5828 = vmatpush.bf16.msrb.mxu2 %v8474_v24  ;;  %v12451_v24 = vld [vmem:[#allocation66_spill] sm:$0xff] }
 0x3c5   : > { %v10818_v14 = vpop.f32.mrf.mxu3 }
 0x3c6   : > { %12442 = vst [vmem:[#allocation82_spill] sm:$0xff] %v10818_v14  ;;  %v10820_v33 = vpop.f32.mrf.mxu0 }
 0x3c9   : > { %4834 = vmatmul.bf16.gmra.mxu3 %v12440_v54  ;;  %v12448_v54 = vld [vmem:[#allocation86_spill] sm:$0xff] }
 0x3ca   : > { %v12450_v62 = vpack.c.b16 %v12448_v54, %v12449_v35  ;;  %v12459_v54 = vld [vmem:[#allocation37_spill] sm:$0xff] }
 0x3cd   : > { %5068 = vmatmul.bf16.gmra.mxu0 %v10223_v31  ;;  %v12443_v31 = vld [vmem:[#allocation84_spill] sm:$0xff]  ;;  %v10834_v1 = vpop.f32.mrf.mxu3 }
 0x3ce   : > { %v12445_v19 = vpack.c.b16 %v12443_v31, %v12444_v50  ;;  %12446 = vst [vmem:[#allocation81_spill] sm:$0xff] %v10834_v1  ;;  %v10837_v41 = vpop.f32.mrf.mxu0  ;;  %v12454_v50 = vld [vmem:[#allocation88_spill] sm:$0xff] }
 0x3d6   : > { %v10841_v51 = vpop.f32.mrf.mxu0 }
 0x3d9   : > { %4839 = vmatmul.bf16.gmra.mxu3 %v12445_v19 }
 0x3dc   : > { %v10839_v26 = vpop.f32.mrf.mxu3 }
 0x3dd   : > { %5073 = vmatmul.bf16.gmra.mxu0 %v10273_v36  ;;  %12447 = vst [vmem:[#allocation84_spill] sm:$0xff] %v10839_v26  ;;  %v12455_v36 = vld [vmem:[#allocation87_spill] sm:$0xff] }
 0x3de   : > { %v10849_v59 = vpop.f32.mrf.mxu0  ;;  %v12456_v19 = vpack.c.b16 %v12454_v50, %v12455_v36  ;;  %v8484_v50 = vld [vmem:[%s12111_s5 + $0xa8] sm:$0xff] }
 0x3df   : > { %5955 = vmatpush.bf16.msra.mxu3 %v8484_v50  ;;  %v12469_v50 = vld [vmem:[#allocation41_spill] sm:$0xff] }
 0x3e4   : > { %v10847_v8 = vpop.f32.mrf.mxu3 }
 0x3e5   : > { %12452 = vst [vmem:[#allocation83_spill] sm:$0xff] %v10847_v8 }
 0x3e6   : > { %v10856_v1 = vpop.f32.mrf.mxu0 }
 0x3e9   : > { %4844 = vmatmul.bf16.gmra.mxu3 %v12450_v62  ;;  %v12458_v62 = vld [vmem:[#allocation89_spill] sm:$0xff] }
 0x3ec   : > { %v10851_v31 = vpop.f32.mrf.mxu3 }
 0x3ed   : > { %5078 = vmatmul.bf16.gmra.mxu0 %v12451_v24  ;;  %12453 = vst [vmem:[#allocation86_spill] sm:$0xff] %v10851_v31  ;;  %v12460_v24 = vpack.c.b16 %v12458_v62, %v12459_v54 }
 0x3ee   : > { %v10861_v35 = vpop.f32.mrf.mxu0 }
 0x3f4   : > { %v10859_v26 = vpop.f32.mrf.mxu3 }
 0x3f5   : > { %12457 = vst [vmem:[#allocation85_spill] sm:$0xff] %v10859_v26  ;;  %v12464_v26 = vld [vmem:[#allocation90_spill] sm:$0xff] }
 0x3f6   : > { %v10872_v36 = vpop.f32.mrf.mxu0 }
 0x3f9   : > { %4849 = vmatmul.bf16.gmra.mxu3 %v12456_v19  ;;  %v12463_v19 = vld [vmem:[#allocation91_spill] sm:$0xff] }
 0x3fa   : > { %v12465_v31 = vpack.c.b16 %v12463_v19, %v12464_v26  ;;  %v8463_v19 = vld [vmem:[%s12111_s5] sm:$0xff] }
 0x3fd   : > { %5083 = vmatmul.bf16.gmra.mxu0 %v10386_v37 }
 0x3fe   : > { %v10879_v14 = vpop.f32.mrf.mxu0 }
 0x402   : > { %v10866_v8 = vpop.f32.mrf.mxu3 }
 0x403   : > { %12461 = vst [vmem:[#allocation66_spill] sm:$0xff] %v10866_v8 }
 0x406   : > { %v10886_v54 = vpop.f32.mrf.mxu0 }
 0x409   : > { %4854 = vmatmul.bf16.gmra.mxu3 %v12460_v24  ;;  %v12468_v24 = vld [vmem:[#allocation92_spill] sm:$0xff] }
 0x40a   : > { %v10874_v37 = vpop.f32.mrf.mxu3  ;;  %v12470_v8 = vpack.c.b16 %v12468_v24, %v12469_v50  ;;  %v12473_v50 = vld [vmem:[#allocation93_spill] sm:$0xff] }
 0x40b   : > { %12462 = vst [vmem:[#allocation88_spill] sm:$0xff] %v10874_v37  ;;  %v8465_v37 = vld [vmem:[%s12111_s5 + $0x10] sm:$0xff] }
 0x40c   : > { %5700 = vmatpush.bf16.msra.mxu1 %v8465_v37 }
 0x40d   : > { %5088 = vmatmul.bf16.gmra.mxu0 %v10440_v0 }
 0x419   : > { %4859 = vmatmul.bf16.gmra.mxu3 %v12465_v31  ;;  %v10900_v31 = vpop.f32.mrf.mxu0 }
 0x41c   : > { %v10881_v62 = vpop.f32.mrf.mxu3 }
 0x41d   : > { %12466 = vst [vmem:[#allocation87_spill] sm:$0xff] %v10881_v62  ;;  %5093 = vmatmul.bf16.gmra.mxu0 %v10480_v42  ;;  %v8464_v42 = vld [vmem:[%s12111_s5 + $0x8] sm:$0xff] }
 0x41e   : > { %5701 = vmatpush.bf16.msra.mxu1 %v8464_v42  ;;  %v12474_v42 = vld [vmem:[#allocation45_spill] sm:$0xff] }
 0x421   : > { %v10915_v37 = vpop.f32.mrf.mxu0 }
 0x422   : > { %5702 = vmatpush.bf16.msra.mxu1 %v8463_v19  ;;  %v12477_v19 = vld [vmem:[#allocation96_spill] sm:$0xff] }
 0x424   : > { %v10884_v0 = vpop.f32.mrf.mxu3 }
 0x425   : > { %12467 = vst [vmem:[#allocation89_spill] sm:$0xff] %v10884_v0  ;;  %v12476_v0 = vld [vmem:[#allocation49_spill] sm:$0xff] }
 0x429   : > { %4864 = vmatmul.bf16.gmra.mxu3 %v12470_v8  ;;  %v8473_v8 = vld [vmem:[%s12111_s5 + $0x50] sm:$0xff]  ;;  %v10926_v44 = vpop.f32.mrf.mxu0 }
 0x42a   : > { %5829 = vmatpush.bf16.msrb.mxu2 %v8473_v8 }
 0x42c   : > { %v10894_v26 = vpop.f32.mrf.mxu3 }
 0x42d   : > { %12471 = vst [vmem:[#allocation37_spill] sm:$0xff] %v10894_v26  ;;  %5098 = vmatmul.bf16.gmra.mxu0 %v10534_v20  ;;  %v10913_v20 = vld [vmem:[%s12110_s4] ss:$0 sm:$0xff]  ;;  %v12475_v26 = vpack.c.b16 %v12473_v50, %v12474_v42  ;;  %v12478_v42 = vld [vmem:[#allocation95_spill] sm:$0xff] }
 0x42e   : > { %v4672_v62 = vadd.f32 %v10913_v20, %v12476_v0  ;;  %v12479_v0 = vld [vmem:[#allocation94_spill] sm:$0xff] }
 0x42f   : > { %v12480_v30 = vpack.c.b16 %v12478_v42, %v12479_v0 }
 0x434   : > { %v10908_v24 = vpop.f32.mrf.mxu3 }
 0x435   : > { %12472 = vst [vmem:[#allocation91_spill] sm:$0xff] %v10908_v24  ;;  %v4674_v24 = vadd.f32 %v10913_v20, %v12477_v19  ;;  %v10934_v19 = vpop.f32.mrf.mxu0 }
 0x439   : > { %4869 = vmatmul.bf16.gmra.mxu3 %v12475_v26 }
 0x43c   : > { %v4830_v52 = vpop.f32.mrf.mxu3 }
 0x43d   : > { %v4831_v22 = vadd.f32 %v4830_v52, %v4672_v62  ;;  %5103 = vmatmul.bf16.gmra.mxu0 %v10571_v38  ;;  %v12481_v52 = vld [vmem:[#allocation99_spill] sm:$0xff]  ;;  %v10943_v0 = vpop.f32.mrf.mxu0 }
 0x43e   : > { %v4677_v38 = vadd.f32 %v10913_v20, %v12481_v52 }
 0x43f   : > { %v4990_v8 = vadd.f32 %v10614_v48, %v4831_v22 }
 0x441   : > { %v5139_v63 = vmax.f32 %v4990_v8, 0.0 }
 0x443   : > { %v5199_v3 = vmul.f32 0.0, %v5139_v63 }
 0x444   : > { %v4832_v7 = vpop.f32.mrf.mxu3 }
 0x445   : > { %v4833_v57 = vadd.f32 %v4832_v7, %v4674_v24  ;;  %v5259_v48 = vpack.c.bf16 %v5199_v3, %v5199_v3  ;;  %v12482_v24 = vld [vmem:[#allocation53_spill] sm:$0xff] }
 0x447   : > { %v4992_v26 = vadd.f32 %v10637_v58, %v4833_v57  ;;  %v5367_v7 = vunpack.c.l.b16 %v5259_v48 }
 0x449   : > { %v5140_v50 = vmax.f32 %v4992_v26, 0.0  ;;  %4874 = vmatmul.bf16.gmra.mxu3 %v12480_v30  ;;  %v4679_v30 = vadd.f32 %v10913_v20, %v12482_v24 }
 0x44b   : > { %v5200_v22 = vmul.f32 0.0, %v5140_v50  ;;  %v8483_v50 = vld [vmem:[%s12111_s5 + $0xa0] sm:$0xff] }
 0x44c   : > { %v4835_v62 = vpop.f32.mrf.mxu3  ;;  %5956 = vmatpush.bf16.msra.mxu3 %v8483_v50 }
 0x44d   : > { %v5260_v27 = vpack.c.bf16 %v5200_v22, %v5200_v22  ;;  %v4836_v8 = vadd.f32 %v4835_v62, %v4677_v38  ;;  %5108 = vmatmul.bf16.gmra.mxu0 %v10616_v9  ;;  %v12484_v38 = vld [vmem:[#allocation97_spill] sm:$0xff]  ;;  %v12486_v22 = vld [vmem:[#allocation102_spill] sm:$0xff] }
 0x44e   : > { %v4682_v62 = vadd.f32 %v10913_v20, %v12486_v22 }
 0x44f   : > { %v5368_v63 = vunpack.c.l.b16 %v5260_v27  ;;  %v4995_v58 = vadd.f32 %v10643_v55, %v4836_v8  ;;  %v12483_v55 = vld [vmem:[#allocation98_spill] sm:$0xff] }
 0x450   : > { %v12485_v48 = vpack.c.b16 %v12483_v55, %v12484_v38 }
 0x451   : > { %v5415_v57 = vpack.c.b16 %v5368_v63, %v5367_v7  ;;  %v5141_v26 = vmax.f32 %v4995_v58, 0.0  ;;  %v8472_v58 = vld [vmem:[%s12111_s5 + $0x48] sm:$0xff] }
 0x452   : > { %5830 = vmatpush.bf16.msrb.mxu2 %v8472_v58 }
 0x453   : > { %5703 = vmatmul.bf16.vlgmr.msra.gmra.mxu1 %v5415_v57  ;;  %v5201_v52 = vmul.f32 0.0, %v5141_v26 }
 0x454   : > { %v4837_v42 = vpop.f32.mrf.mxu3 }
 0x455   : > { %v4838_v3 = vadd.f32 %v4837_v42, %v4679_v30  ;;  %v5261_v8 = vpack.c.bf16 %v5201_v52, %v5201_v52  ;;  %v8471_v42 = vld [vmem:[%s12111_s5 + $0x40] sm:$0xff]  ;;  %v12487_v52 = vld [vmem:[#allocation103_spill] sm:$0xff] }
 0x456   : > { %5831 = vmatpush.bf16.msrb.mxu2 %v8471_v42 }
 0x457   : > { %v4997_v9 = vadd.f32 %v10661_v39, %v4838_v3  ;;  %v5369_v39 = vunpack.c.l.b16 %v5261_v8  ;;  %v10959_v3 = vpop.f32.mrf.mxu0 }
 0x459   : > { %v5142_v27 = vmax.f32 %v4997_v9, 0.0  ;;  %4879 = vmatmul.bf16.gmra.mxu3 %v12485_v48  ;;  %v4684_v9 = vadd.f32 %v10913_v20, %v12487_v52 }
 0x45b   : > { %v5202_v7 = vmul.f32 0.0, %v5142_v27 }
 0x45c   : > { %v4840_v63 = vpop.f32.mrf.mxu3 }
 0x45d   : > { %v5262_v57 = vpack.c.bf16 %v5202_v7, %v5202_v7  ;;  %v4841_v24 = vadd.f32 %v4840_v63, %v4682_v62  ;;  %5113 = vmatmul.bf16.gmra.mxu0 %v10650_v15  ;;  %v12489_v62 = vld [vmem:[#allocation100_spill] sm:$0xff] }
 0x45e   : > { %v12491_v7 = vld [vmem:[#allocation104_spill] sm:$0xff] }
 0x45f   : > { %v5370_v30 = vunpack.c.l.b16 %v5262_v57  ;;  %v5000_v26 = vadd.f32 %v10672_v29, %v4841_v24  ;;  %v12488_v29 = vld [vmem:[#allocation101_spill] sm:$0xff]  ;;  %v4687_v63 = vadd.f32 %v10913_v20, %v12491_v7  ;;  %v10969_v58 = vpop.f32.mrf.mxu0 }
 0x460   : > { %v12490_v8 = vpack.c.b16 %v12488_v29, %v12489_v62 }
 0x461   : > { %v5416_v50 = vpack.c.b16 %v5370_v30, %v5369_v39  ;;  %v5143_v27 = vmax.f32 %v5000_v26, 0.0 }
 0x463   : > { %5708 = vmatmul.bf16.gmra.mxu1 %v5416_v50  ;;  %v5203_v38 = vmul.f32 0.0, %v5143_v27 }
 0x464   : > { %v4842_v55 = vpop.f32.mrf.mxu3 }
 0x465   : > { %v4843_v15 = vadd.f32 %v4842_v55, %v4684_v9  ;;  %v5263_v57 = vpack.c.bf16 %v5203_v38, %v5203_v38  ;;  %v12492_v9 = vld [vmem:[#allocation57_spill] sm:$0xff] }
 0x466   : > { %v4689_v27 = vadd.f32 %v10913_v20, %v12492_v9 }
 0x467   : > { %v5002_v48 = vadd.f32 %v10686_v11, %v4843_v15  ;;  %v5371_v42 = vunpack.c.l.b16 %v5263_v57  ;;  %v10975_v15 = vpop.f32.mrf.mxu0 }
 0x469   : > { %v5144_v22 = vmax.f32 %v5002_v48, 0.0  ;;  %4884 = vmatmul.bf16.gmra.mxu3 %v12490_v8  ;;  %v12493_v8 = vld [vmem:[#allocation106_spill] sm:$0xff] }
 0x46b   : > { %v5204_v24 = vmul.f32 0.0, %v5144_v22 }
 0x46c   : > { %v4845_v39 = vpop.f32.mrf.mxu3 }
 0x46d   : > { %v5264_v30 = vpack.c.bf16 %v5204_v24, %v5204_v24  ;;  %v4846_v26 = vadd.f32 %v4845_v39, %v4687_v63  ;;  %5118 = vmatmul.bf16.gmra.mxu0 %v10688_v32  ;;  %v12494_v32 = vld [vmem:[#allocation105_spill] sm:$0xff]  ;;  %v12496_v63 = vld [vmem:[#allocation107_spill] sm:$0xff] }
 0x46e   : > { %v12495_v7 = vpack.c.b16 %v12493_v8, %v12494_v32  ;;  %v12501_v32 = vld [vmem:[#allocation61_spill] sm:$0xff] }
 0x46f   : > { %v5372_v50 = vunpack.c.l.b16 %v5264_v30  ;;  %v5005_v11 = vadd.f32 %v10700_v45, %v4846_v26  ;;  %v4692_v45 = vadd.f32 %v10913_v20, %v12496_v63 }
 0x471   : > { %v5417_v52 = vpack.c.b16 %v5372_v50, %v5371_v42  ;;  %v5145_v48 = vmax.f32 %v5005_v11, 0.0  ;;  %v10984_v42 = vpop.f32.mrf.mxu0  ;;  %v12497_v11 = vld [vmem:[#allocation110_spill] sm:$0xff] }
 0x473   : > { %5713 = vmatmul.bf16.gmra.mxu1 %v5417_v52  ;;  %v5265_v29 = vpack.c.bf16 %v5145_v48, %v5145_v48  ;;  %v4694_v52 = vadd.f32 %v10913_v20, %v12497_v11 }
 0x474   : > { %v4847_v55 = vpop.f32.mrf.mxu3 }
 0x475   : > { %v4848_v38 = vadd.f32 %v4847_v55, %v4689_v27  ;;  %v5373_v39 = vunpack.c.l.b16 %v5265_v29 }
 0x477   : > { %v5007_v22 = vadd.f32 %v10712_v18, %v4848_v38 }
 0x479   : > { %v5146_v62 = vmax.f32 %v5007_v22, 0.0  ;;  %4889 = vmatmul.bf16.gmra.mxu3 %v12495_v7  ;;  %v10990_v38 = vpop.f32.mrf.mxu0 }
 0x47b   : > { %v5266_v57 = vpack.c.bf16 %v5146_v62, %v5146_v62  ;;  %v12499_v62 = vld [vmem:[#allocation108_spill] sm:$0xff] }
 0x47c   : > { %v4850_v24 = vpop.f32.mrf.mxu3 }
 0x47d   : > { %v5374_v30 = vunpack.c.l.b16 %v5266_v57  ;;  %v4851_v26 = vadd.f32 %v4850_v24, %v4692_v45  ;;  %5123 = vmatmul.bf16.gmra.mxu0 %v10720_v49  ;;  %v12498_v49 = vld [vmem:[#allocation109_spill] sm:$0xff] }
 0x47e   : > { %v12500_v8 = vpack.c.b16 %v12498_v49, %v12499_v62  ;;  %v12506_v49 = vld [vmem:[#allocation115_spill] sm:$0xff] }
 0x47f   : > { %v5418_v50 = vpack.c.b16 %v5374_v30, %v5373_v39  ;;  %v5010_v18 = vadd.f32 %v10731_v2, %v4851_v26  ;;  %v4697_v2 = vadd.f32 %v10913_v20, %v12501_v32  ;;  %v12502_v26 = vld [vmem:[#allocation114_spill] sm:$0xff] }
 0x481   : > { %5832 = vmatmul.bf16.vlgmr.msrb.gmra.mxu2 %v5418_v50  ;;  %v5147_v27 = vmax.f32 %v5010_v18, 0.0  ;;  %v11004_v18 = vpop.f32.mrf.mxu0 }
 0x483   : > { %5718 = vmatmul.bf16.gmra.mxu1 %v5418_v50  ;;  %v5267_v22 = vpack.c.bf16 %v5147_v27, %v5147_v27  ;;  %v4699_v50 = vadd.f32 %v10913_v20, %v12502_v26 }
 0x484   : > { %v4852_v9 = vpop.f32.mrf.mxu3 }
 0x485   : > { %v4853_v55 = vadd.f32 %v4852_v9, %v4694_v52  ;;  %v5375_v45 = vunpack.c.l.b16 %v5267_v22  ;;  %v12504_v22 = vld [vmem:[#allocation112_spill] sm:$0xff] }
 0x487   : > { %v5012_v48 = vadd.f32 %v10750_v61, %v4853_v55  ;;  %v8482_v61 = vld [vmem:[%s12111_s5 + $0x98] sm:$0xff] }
 0x488   : > { %5957 = vmatpush.bf16.msra.mxu3 %v8482_v61 }
 0x489   : > { %v5148_v29 = vmax.f32 %v5012_v48, 0.0  ;;  %4894 = vmatmul.bf16.gmra.mxu3 %v12500_v8  ;;  %v12503_v48 = vld [vmem:[#allocation113_spill] sm:$0xff]  ;;  %v11012_v32 = vpop.f32.mrf.mxu0 }
 0x48b   : > { %v5268_v7 = vpack.c.bf16 %v5148_v29, %v5148_v29  ;;  %v12505_v29 = vpack.c.b16 %v12503_v48, %v12504_v22 }
 0x48c   : > { %v4855_v63 = vpop.f32.mrf.mxu3 }
 0x48d   : > { %v5376_v57 = vunpack.c.l.b16 %v5268_v7  ;;  %v4856_v24 = vadd.f32 %v4855_v63, %v4697_v2  ;;  %5128 = vmatmul.bf16.gmra.mxu0 %v10760_v47 }
 0x48f   : > { %v5419_v39 = vpack.c.b16 %v5376_v57, %v5375_v45  ;;  %v5015_v30 = vadd.f32 %v10771_v25, %v4856_v24  ;;  %v4702_v25 = vadd.f32 %v10913_v20, %v12506_v49  ;;  %v12507_v57 = vld [vmem:[#allocation117_spill] sm:$0xff] }
 0x490   : > { %v4704_v24 = vadd.f32 %v10913_v20, %v12507_v57  ;;  %v12513_v57 = vld [vmem:[#allocation122_spill] sm:$0xff] }
 0x491   : > { %5837 = vmatmul.bf16.gmra.mxu2 %v5419_v39  ;;  %v5149_v52 = vmax.f32 %v5015_v30, 0.0 }
 0x493   : > { %5723 = vmatmul.bf16.gmra.mxu1 %v5419_v39  ;;  %v5269_v27 = vpack.c.bf16 %v5149_v52, %v5149_v52  ;;  %v12508_v52 = vld [vmem:[#allocation118_spill] sm:$0xff] }
 0x494   : > { %v4857_v11 = vpop.f32.mrf.mxu3 }
 0x495   : > { %v4858_v9 = vadd.f32 %v4857_v11, %v4699_v50  ;;  %v5377_v2 = vunpack.c.l.b16 %v5269_v27 }
 0x497   : > { %v5017_v47 = vadd.f32 %v10783_v17, %v4858_v9  ;;  %v12509_v9 = vld [vmem:[#allocation116_spill] sm:$0xff] }
 0x499   : > { %v5150_v55 = vmax.f32 %v5017_v47, 0.0  ;;  %4899 = vmatmul.bf16.gmra.mxu3 %v12505_v29  ;;  %v12510_v47 = vpack.c.b16 %v12508_v52, %v12509_v9 }
 0x49b   : > { %v5270_v62 = vpack.c.bf16 %v5150_v55, %v5150_v55 }
 0x49c   : > { %v4860_v8 = vpop.f32.mrf.mxu3 }
 0x49d   : > { %v5378_v7 = vunpack.c.l.b16 %v5270_v62  ;;  %v4861_v63 = vadd.f32 %v4860_v8, %v4702_v25  ;;  %5133 = vmatmul.bf16.gmra.mxu0 %v10790_v46  ;;  %v12511_v46 = vld [vmem:[#allocation119_spill] sm:$0xff] }
 0x49e   : > { %v4707_v27 = vadd.f32 %v10913_v20, %v12511_v46 }
 0x49f   : > { %v5420_v45 = vpack.c.b16 %v5378_v7, %v5377_v2  ;;  %v5020_v17 = vadd.f32 %v10800_v60, %v4861_v63 }
 0x4a1   : > { %5842 = vmatmul.bf16.gmra.mxu2 %v5420_v45  ;;  %v5151_v39 = vmax.f32 %v5020_v17, 0.0 }
 0x4a3   : > { %5728 = vmatmul.bf16.gmra.mxu1 %v5420_v45  ;;  %v5271_v50 = vpack.c.bf16 %v5151_v39, %v5151_v39  ;;  %v12516_v39 = vld [vmem:[#allocation123_spill] sm:$0xff] }
 0x4a4   : > { %v4862_v61 = vpop.f32.mrf.mxu3 }
 0x4a5   : > { %v4863_v30 = vadd.f32 %v4862_v61, %v4704_v24  ;;  %v5379_v48 = vunpack.c.l.b16 %v5271_v50  ;;  %v12514_v24 = vld [vmem:[#allocation121_spill] sm:$0xff] }
 0x4a6   : > { %v12515_v61 = vpack.c.b16 %v12513_v57, %v12514_v24  ;;  %v8481_v24 = vld [vmem:[%s12111_s5 + $0x90] sm:$0xff] }
 0x4a7   : > { %v5022_v26 = vadd.f32 %v10808_v53, %v4863_v30  ;;  %v12512_v53 = vld [vmem:[#allocation120_spill] sm:$0xff]  ;;  %5958 = vmatpush.bf16.msra.mxu3 %v8481_v24 }
 0x4a8   : > { %v4709_v62 = vadd.f32 %v10913_v20, %v12512_v53  ;;  %v12519_v53 = vld [vmem:[#allocation125_spill] sm:$0xff] }
 0x4a9   : > { %v5152_v11 = vmax.f32 %v5022_v26, 0.0  ;;  %4904 = vmatmul.bf16.gmra.mxu3 %v12510_v47 }
 0x4ab   : > { %v5272_v60 = vpack.c.bf16 %v5152_v11, %v5152_v11 }
 0x4ac   : > { %v4865_v55 = vpop.f32.mrf.mxu3 }
 0x4ad   : > { %v5380_v22 = vunpack.c.l.b16 %v5272_v60  ;;  %v4866_v29 = vadd.f32 %v4865_v55, %v4707_v27 }
 0x4af   : > { %v11024_v49 = vpack.c.b16 %v5380_v22, %v5379_v48  ;;  %v5025_v25 = vadd.f32 %v10815_v5, %v4866_v29  ;;  %v4712_v5 = vadd.f32 %v10913_v20, %v12516_v39  ;;  %v8510_v48 = vld [vmem:[%s12113_s7 + $0xb8] sm:$0xff] }
 0x4b0   : > { %7067 = vmatpush.bf16.msra.mxu0 %v8510_v48 }
 0x4b1   : > { %5847 = vmatmul.bf16.gmra.mxu2 %v11024_v49  ;;  %v5153_v2 = vmax.f32 %v5025_v25, 0.0 }
 0x4b3   : > { %5733 = vmatmul.bf16.gmra.mxu1 %v11024_v49  ;;  %v5273_v45 = vpack.c.bf16 %v5153_v2, %v5153_v2 }
 0x4b4   : > { %v4867_v8 = vpop.f32.mrf.mxu3 }
 0x4b5   : > { %v4868_v7 = vadd.f32 %v4867_v8, %v4709_v62  ;;  %v5381_v50 = vunpack.c.l.b16 %v5273_v45  ;;  %v12521_v8 = vld [vmem:[#allocation127_spill] sm:$0xff] }
 0x4b6   : > { %v4717_v2 = vadd.f32 %v10913_v20, %v12521_v8 }
 0x4b7   : > { %v5027_v63 = vadd.f32 %v10820_v33, %v4868_v7  ;;  %v12517_v33 = vld [vmem:[#allocation124_spill] sm:$0xff] }
 0x4b8   : > { %v4714_v46 = vadd.f32 %v10913_v20, %v12517_v33 }
 0x4b9   : > { %v5154_v17 = vmax.f32 %v5027_v63, 0.0  ;;  %4909 = vmatmul.bf16.gmra.mxu3 %v12515_v61 }
 0x4bb   : > { %v5274_v30 = vpack.c.bf16 %v5154_v17, %v5154_v17 }
 0x4bc   : > { %v4870_v26 = vpop.f32.mrf.mxu3 }
 0x4bd   : > { %v5382_v11 = vunpack.c.l.b16 %v5274_v30  ;;  %v4871_v52 = vadd.f32 %v4870_v26, %v4712_v5  ;;  %v12522_v5 = vld [vmem:[#allocation65_spill] sm:$0xff] }
 0x4be   : > { %v4719_v30 = vadd.f32 %v10913_v20, %v12522_v5 }
 0x4bf   : > { %v11037_v9 = vpack.c.b16 %v5382_v11, %v5381_v50  ;;  %v5030_v47 = vadd.f32 %v10837_v41, %v4871_v52  ;;  %v12518_v41 = vld [vmem:[#allocation126_spill] sm:$0xff] }
 0x4c0   : > { %v12520_v62 = vpack.c.b16 %v12518_v41, %v12519_v53 }
 0x4c1   : > { %5852 = vmatmul.bf16.gmra.mxu2 %v11037_v9  ;;  %v5155_v60 = vmax.f32 %v5030_v47, 0.0 }
 0x4c3   : > { %5738 = vmatmul.bf16.gmra.mxu1 %v11037_v9  ;;  %v5275_v29 = vpack.c.bf16 %v5155_v60, %v5155_v60  ;;  %v12524_v60 = vld [vmem:[#allocation128_spill] sm:$0xff] }
 0x4c4   : > { %v4872_v27 = vpop.f32.mrf.mxu3 }
 0x4c5   : > { %v4873_v55 = vadd.f32 %v4872_v27, %v4714_v46  ;;  %v5383_v45 = vunpack.c.l.b16 %v5275_v29  ;;  %v12523_v27 = vld [vmem:[#allocation130_spill] sm:$0xff] }
 0x4c7   : > { %v5032_v22 = vadd.f32 %v10841_v51, %v4873_v55  ;;  %v12525_v55 = vpack.c.b16 %v12523_v27, %v12524_v60 }
 0x4c9   : > { %v5156_v25 = vmax.f32 %v5032_v22, 0.0  ;;  %4914 = vmatmul.bf16.gmra.mxu3 %v12520_v62 }
 0x4cb   : > { %v5276_v7 = vpack.c.bf16 %v5156_v25, %v5156_v25 }
 0x4cc   : > { %v4875_v63 = vpop.f32.mrf.mxu3 }
 0x4cd   : > { %v5384_v17 = vunpack.c.l.b16 %v5276_v7  ;;  %v4876_v57 = vadd.f32 %v4875_v63, %v4717_v2  ;;  %v12527_v2 = vld [vmem:[#allocation67_spill] sm:$0xff] }
 0x4ce   : > { %v4724_v7 = vadd.f32 %v10913_v20, %v12527_v2 }
 0x4cf   : > { %v11056_v51 = vpack.c.b16 %v5384_v17, %v5383_v45  ;;  %v5035_v39 = vadd.f32 %v10849_v59, %v4876_v57  ;;  %v12526_v59 = vld [vmem:[#allocation129_spill] sm:$0xff] }
 0x4d0   : > { %v11058_v61 = vpop.f32.mrf.mxu1  ;;  %v4722_v48 = vadd.f32 %v10913_v20, %v12526_v59 }
 0x4d1   : > { %5857 = vmatmul.bf16.gmra.mxu2 %v11056_v51  ;;  %v5157_v50 = vmax.f32 %v5035_v39, 0.0 }
 0x4d3   : > { %5743 = vmatmul.bf16.gmra.mxu1 %v11056_v51  ;;  %v5277_v33 = vpack.c.bf16 %v5157_v50, %v5157_v50 }
 0x4d4   : > { %v4877_v26 = vpop.f32.mrf.mxu3 }
 0x4d5   : > { %v4878_v11 = vadd.f32 %v4877_v26, %v4719_v30  ;;  %v5385_v25 = vunpack.c.l.b16 %v5277_v33  ;;  %v12528_v30 = vpack.c.b16 %v10394_v16, %v10392_v6  ;;  %v4729_v6 = vadd.f32 %v10913_v20, %v10405_v13 }
 0x4d7   : > { %v5037_v52 = vadd.f32 %v10856_v1, %v4878_v11 }
 0x4d8   : > { %v11066_v47 = vpop.f32.mrf.mxu1 }
 0x4d9   : > { %v5158_v46 = vmax.f32 %v5037_v52, 0.0  ;;  %4919 = vmatmul.bf16.gmra.mxu3 %v12525_v55 }
 0x4db   : > { %v5278_v22 = vpack.c.bf16 %v5158_v46, %v5158_v46 }
 0x4dc   : > { %v4880_v29 = vpop.f32.mrf.mxu3 }
 0x4dd   : > { %v5386_v41 = vunpack.c.l.b16 %v5278_v22  ;;  %v4881_v53 = vadd.f32 %v4880_v29, %v4722_v48  ;;  %v12529_v29 = vld [vmem:[#allocation69_spill] sm:$0xff] }
 0x4df   : > { %v11073_v62 = vpack.c.b16 %v5386_v41, %v5385_v25  ;;  %v5040_v1 = vadd.f32 %v10861_v35, %v4881_v53  ;;  %v4727_v35 = vadd.f32 %v10913_v20, %v10383_v4  ;;  %v12530_v25 = vpack.c.b16 %v10444_v21, %v12529_v29 }
 0x4e0   : > { %v11075_v8 = vpop.f32.mrf.mxu1 }
 0x4e1   : > { %5862 = vmatmul.bf16.gmra.mxu2 %v11073_v62  ;;  %v5159_v45 = vmax.f32 %v5040_v1, 0.0 }
 0x4e3   : > { %5748 = vmatmul.bf16.gmra.mxu1 %v11073_v62  ;;  %v5279_v39 = vpack.c.bf16 %v5159_v45, %v5159_v45 }
 0x4e4   : > { %v4882_v63 = vpop.f32.mrf.mxu3 }
 0x4e5   : > { %v4883_v17 = vadd.f32 %v4882_v63, %v4724_v7  ;;  %v5387_v11 = vunpack.c.l.b16 %v5279_v39  ;;  %v11113_v63 = vld [vmem:[%s12112_s6] ss:$0 sm:$0xff] }
 0x4e7   : > { %v5042_v57 = vadd.f32 %v10872_v36, %v4883_v17 }
 0x4e8   : > { %v11083_v24 = vpop.f32.mrf.mxu1 }
 0x4e9   : > { %v5160_v5 = vmax.f32 %v5042_v57, 0.0  ;;  %4924 = vmatmul.bf16.gmra.mxu3 %v12528_v30  ;;  %v12532_v57 = vld [vmem:[#allocation70_spill] sm:$0xff] }
 0x4ea   : > { %v4734_v39 = vadd.f32 %v10913_v20, %v12532_v57 }
 0x4eb   : > { %v5280_v26 = vpack.c.bf16 %v5160_v5, %v5160_v5  ;;  %v5705_v5 = vadd.f32 %v11113_v63, %v11058_v61  ;;  %v12533_v61 = vpack.c.b16 %v10486_v10, %v10484_v43  ;;  %v12535_v43 = vld [vmem:[#allocation72_spill] sm:$0xff] }
 0x4ec   : > { %v4885_v50 = vpop.f32.mrf.mxu3 }
 0x4ed   : > { %v5388_v52 = vunpack.c.l.b16 %v5280_v26  ;;  %v4886_v33 = vadd.f32 %v4885_v50, %v4727_v35 }
 0x4ef   : > { %v11090_v46 = vpack.c.b16 %v5388_v52, %v5387_v11  ;;  %v5045_v36 = vadd.f32 %v10879_v14, %v4886_v33  ;;  %v12531_v14 = vld [vmem:[#allocation68_spill] sm:$0xff] }
 0x4f0   : > { %v11092_v27 = vpop.f32.mrf.mxu1  ;;  %v4732_v41 = vadd.f32 %v10913_v20, %v12531_v14 }
 0x4f1   : > { %5867 = vmatmul.bf16.gmra.mxu2 %v11090_v46  ;;  %v5161_v4 = vmax.f32 %v5045_v36, 0.0 }
 0x4f3   : > { %5753 = vmatmul.bf16.gmra.mxu1 %v11090_v46  ;;  %v5281_v48 = vpack.c.bf16 %v5161_v4, %v5161_v4 }
 0x4f4   : > { %v4887_v16 = vpop.f32.mrf.mxu3 }
 0x4f5   : > { %v4888_v60 = vadd.f32 %v4887_v16, %v4729_v6  ;;  %v5389_v1 = vunpack.c.l.b16 %v5281_v48  ;;  %v12534_v16 = vld [vmem:[#allocation71_spill] sm:$0xff] }
 0x4f6   : > { %v4737_v4 = vadd.f32 %v10913_v20, %v12534_v16  ;;  %v12537_v16 = vld [vmem:[#allocation131_spill] sm:$0xff] }
 0x4f7   : > { %v5047_v55 = vadd.f32 %v10886_v54, %v4888_v60  ;;  %v8509_v54 = vld [vmem:[%s12113_s7 + $0xb0] sm:$0xff]  ;;  %v5707_v60 = vadd.f32 %v11113_v63, %v11066_v47  ;;  %v5710_v47 = vadd.f32 %v11113_v63, %v11075_v8  ;;  %v4742_v8 = vadd.f32 %v10913_v20, %v10509_v23 }
 0x4f8   : > { %v11100_v59 = vpop.f32.mrf.mxu1  ;;  %7068 = vmatpush.bf16.msra.mxu0 %v8509_v54 }
 0x4f9   : > { %v5162_v22 = vmax.f32 %v5047_v55, 0.0  ;;  %4929 = vmatmul.bf16.gmra.mxu3 %v12530_v25 }
 0x4fb   : > { %v5282_v53 = vpack.c.bf16 %v5162_v22, %v5162_v22 }
 0x4fc   : > { %v4890_v13 = vpop.f32.mrf.mxu3 }
 0x4fd   : > { %v5390_v2 = vunpack.c.l.b16 %v5282_v53  ;;  %v4891_v7 = vadd.f32 %v4890_v13, %v4732_v41  ;;  %v4739_v13 = vadd.f32 %v10913_v20, %v12535_v43 }
 0x4ff   : > { %v11115_v45 = vpack.c.b16 %v5390_v2, %v5389_v1  ;;  %v5050_v17 = vadd.f32 %v10900_v31, %v4891_v7  ;;  %v8480_v31 = vld [vmem:[%s12111_s5 + $0x88] sm:$0xff] }
 0x500   : > { %v11117_v21 = vpop.f32.mrf.mxu1  ;;  %5959 = vmatpush.bf16.msra.mxu3 %v8480_v31 }
 0x501   : > { %5872 = vmatmul.bf16.gmra.mxu2 %v11115_v45  ;;  %v5163_v26 = vmax.f32 %v5050_v17, 0.0 }
 0x503   : > { %5758 = vmatmul.bf16.gmra.mxu1 %v11115_v45  ;;  %v5283_v36 = vpack.c.bf16 %v5163_v26, %v5163_v26 }
 0x504   : > { %v4892_v30 = vpop.f32.mrf.mxu3  ;;  %v5833_v35 = vpop.f32.mrf.mxu2 }
 0x505   : > { %v4893_v50 = vadd.f32 %v4892_v30, %v4734_v39  ;;  %v11126_v11 = vadd.f32 %v5833_v35, %v5705_v5  ;;  %v5391_v29 = vunpack.c.l.b16 %v5283_v36  ;;  %v12536_v30 = vpack.c.b16 %v10538_v28, %v10536_v12  ;;  %v8494_v12 = vld [vmem:[%s12113_s7 + $0x38] sm:$0xff] }
 0x506   : > { %v5712_v35 = vadd.f32 %v11113_v63, %v11083_v24  ;;  %6889 = vmatpush.bf16.msrb.mxu1 %v8494_v12 }
 0x507   : > { %v5052_v52 = vadd.f32 %v10915_v37, %v4893_v50 }
 0x508   : > { %v11132_v33 = vpop.f32.mrf.mxu1 }
 0x509   : > { %v5164_v6 = vmax.f32 %v5052_v52, 0.0  ;;  %4934 = vmatmul.bf16.gmra.mxu3 %v12533_v61  ;;  %v8502_v61 = vld [vmem:[%s12113_s7 + $0x78] sm:$0xff] }
 0x50a   : > { %6978 = vmatpush.bf16.msra.mxu2 %v8502_v61 }
 0x50b   : > { %v5284_v55 = vpack.c.bf16 %v5164_v6, %v5164_v6 }
 0x50c   : > { %v4895_v48 = vpop.f32.mrf.mxu3  ;;  %v5835_v22 = vpop.f32.mrf.mxu2 }
 0x50d   : > { %v5392_v37 = vunpack.c.l.b16 %v5284_v55  ;;  %v4896_v25 = vadd.f32 %v4895_v48, %v4737_v4  ;;  %v11141_v14 = vadd.f32 %v5835_v22, %v5707_v60  ;;  %v4744_v4 = vadd.f32 %v10913_v20, %v12537_v16 }
 0x50e   : > { %v5715_v60 = vadd.f32 %v11113_v63, %v11092_v27 }
 0x50f   : > { %v11143_v41 = vpack.c.b16 %v5392_v37, %v5391_v29  ;;  %v5055_v10 = vadd.f32 %v10926_v44, %v4896_v25 }
 0x510   : > { %v11145_v53 = vpop.f32.mrf.mxu1 }
 0x511   : > { %5877 = vmatmul.bf16.gmra.mxu2 %v11143_v41  ;;  %v5165_v7 = vmax.f32 %v5055_v10, 0.0 }
 0x513   : > { %5763 = vmatmul.bf16.gmra.mxu1 %v11143_v41  ;;  %v5285_v44 = vpack.c.bf16 %v5165_v7, %v5165_v7  ;;  %v5717_v7 = vadd.f32 %v11113_v63, %v11100_v59 }
 0x514   : > { %v4897_v1 = vpop.f32.mrf.mxu3  ;;  %v5838_v2 = vpop.f32.mrf.mxu2 }
 0x515   : > { %v4898_v54 = vadd.f32 %v4897_v1, %v4739_v13  ;;  %v11154_v17 = vadd.f32 %v5838_v2, %v5710_v47  ;;  %v5393_v52 = vunpack.c.l.b16 %v5285_v44  ;;  %v12538_v13 = vld [vmem:[#allocation134_spill] sm:$0xff]  ;;  %v12539_v47 = vld [vmem:[#allocation133_spill] sm:$0xff]  ;;  %v12541_v2 = vld [vmem:[#allocation132_spill] sm:$0xff] }
 0x516   : > { %v12540_v1 = vpack.c.b16 %v12538_v13, %v12539_v47  ;;  %v4747_v27 = vadd.f32 %v10913_v20, %v12541_v2 }
 0x517   : > { %v5057_v57 = vadd.f32 %v10934_v19, %v4898_v54 }
 0x518   : > { %v11157_v39 = vpop.f32.mrf.mxu1 }
 0x519   : > { %v5166_v5 = vmax.f32 %v5057_v57, 0.0  ;;  %4939 = vmatmul.bf16.gmra.mxu3 %v12536_v30 }
 0x51b   : > { %v5286_v26 = vpack.c.bf16 %v5166_v5, %v5166_v5 }
 0x51c   : > { %v4900_v50 = vpop.f32.mrf.mxu3  ;;  %v5840_v31 = vpop.f32.mrf.mxu2 }
 0x51d   : > { %v5394_v36 = vunpack.c.l.b16 %v5286_v26  ;;  %v4901_v19 = vadd.f32 %v4900_v50, %v4742_v8  ;;  %v11166_v6 = vadd.f32 %v5840_v31, %v5712_v35  ;;  %v11199_v35 = vpop.f32.mrf.mxu0 }
 0x51f   : > { %v11174_v23 = vpack.c.b16 %v5394_v36, %v5393_v52  ;;  %v5060_v24 = vadd.f32 %v10943_v0, %v4901_v19  ;;  %v12542_v52 = vld [vmem:[#allocation135_spill] sm:$0xff]  ;;  %v5720_v36 = vadd.f32 %v11113_v63, %v11117_v21  ;;  %v12546_v21 = vld [vmem:[#allocation136_spill] sm:$0xff] }
 0x520   : > { %v11176_v28 = vpop.f32.mrf.mxu1  ;;  %v4749_v59 = vadd.f32 %v10913_v20, %v12542_v52 }
 0x521   : > { %5882 = vmatmul.bf16.gmra.mxu2 %v11174_v23  ;;  %v5167_v22 = vmax.f32 %v5060_v24, 0.0 }
 0x523   : > { %5768 = vmatmul.bf16.gmra.mxu1 %v11174_v23  ;;  %v5287_v0 = vpack.c.bf16 %v5167_v22, %v5167_v22  ;;  %v12543_v22 = vld [vmem:[#allocation139_spill] sm:$0xff] }
 0x524   : > { %v4902_v55 = vpop.f32.mrf.mxu3  ;;  %v5843_v48 = vpop.f32.mrf.mxu2 }
 0x525   : > { %v4903_v29 = vadd.f32 %v4902_v55, %v4744_v4  ;;  %v11185_v37 = vadd.f32 %v5843_v48, %v5715_v60  ;;  %v5395_v5 = vunpack.c.l.b16 %v5287_v0  ;;  %v4752_v0 = vadd.f32 %v10913_v20, %v12546_v21 }
 0x527   : > { %v5062_v25 = vadd.f32 %v10959_v3, %v4903_v29  ;;  %v12544_v29 = vld [vmem:[#allocation138_spill] sm:$0xff] }
 0x528   : > { %v11188_v10 = vpop.f32.mrf.mxu1 }
 0x529   : > { %v5168_v43 = vmax.f32 %v5062_v25, 0.0  ;;  %4944 = vmatmul.bf16.gmra.mxu3 %v12540_v1  ;;  %v12545_v25 = vpack.c.b16 %v12543_v22, %v12544_v29  ;;  %v5727_v29 = vadd.f32 %v11113_v63, %v11157_v39 }
 0x52b   : > { %v5288_v54 = vpack.c.bf16 %v5168_v43, %v5168_v43  ;;  %v5722_v43 = vadd.f32 %v11113_v63, %v11132_v33  ;;  %v12547_v33 = vld [vmem:[#allocation137_spill] sm:$0xff] }
 0x52c   : > { %v4905_v57 = vpop.f32.mrf.mxu3  ;;  %v5845_v44 = vpop.f32.mrf.mxu2 }
 0x52d   : > { %v5396_v30 = vunpack.c.l.b16 %v5288_v54  ;;  %v4906_v3 = vadd.f32 %v4905_v57, %v4747_v27  ;;  %v11197_v8 = vadd.f32 %v5845_v44, %v5717_v7  ;;  %v8508_v54 = vld [vmem:[%s12113_s7 + $0xa8] sm:$0xff] }
 0x52e   : > { %7069 = vmatpush.bf16.msra.mxu0 %v8508_v54  ;;  %v5730_v54 = vadd.f32 %v11113_v63, %v11176_v28  ;;  %v12553_v28 = vld [vmem:[#allocation141_spill] sm:$0xff] }
 0x52f   : > { %v11201_v26 = vpack.c.b16 %v5396_v30, %v5395_v5  ;;  %v5065_v31 = vadd.f32 %v10969_v58, %v4906_v3  ;;  %v11217_v58 = vpop.f32.mrf.mxu0  ;;  %v4754_v30 = vadd.f32 %v10913_v20, %v12547_v33 }
 0x530   : > { %v11203_v50 = vpop.f32.mrf.mxu1 }
 0x531   : > { %5887 = vmatmul.bf16.gmra.mxu2 %v11201_v26  ;;  %v5169_v12 = vmax.f32 %v5065_v31, 0.0  ;;  %v5725_v31 = vadd.f32 %v11113_v63, %v11145_v53  ;;  %v12548_v53 = vpack.c.b16 %v10659_v40, %v10657_v56  ;;  %v8501_v56 = vld [vmem:[%s12113_s7 + $0x70] sm:$0xff] }
 0x532   : > { %v8493_v40 = vld [vmem:[%s12113_s7 + $0x30] sm:$0xff]  ;;  %6979 = vmatpush.bf16.msra.mxu2 %v8501_v56 }
 0x533   : > { %5773 = vmatmul.bf16.gmra.mxu1 %v11201_v26  ;;  %v5289_v55 = vpack.c.bf16 %v5169_v12, %v5169_v12 }
 0x534   : > { %v4907_v19 = vpop.f32.mrf.mxu3  ;;  %v5848_v61 = vpop.f32.mrf.mxu2  ;;  %6890 = vmatpush.bf16.msrb.mxu1 %v8493_v40  ;;  %v12554_v40 = vld [vmem:[#allocation142_spill] sm:$0xff] }
 0x535   : > { %v4908_v24 = vadd.f32 %v4907_v19, %v4749_v59  ;;  %v11212_v16 = vadd.f32 %v5848_v61, %v5720_v36 }
 0x537   : > { %v5067_v4 = vadd.f32 %v10975_v15, %v4908_v24  ;;  %v5397_v15 = vunpack.c.l.b16 %v5289_v55  ;;  %v11239_v3 = vpop.f32.mrf.mxu0 }
 0x538   : > { %v11215_v60 = vpop.f32.mrf.mxu1 }
 0x539   : > { %v5170_v48 = vmax.f32 %v5067_v4, 0.0  ;;  %4949 = vmatmul.bf16.gmra.mxu3 %v12545_v25 }
 0x53b   : > { %v5290_v13 = vpack.c.bf16 %v5170_v48, %v5170_v48  ;;  %v12549_v48 = vld [vmem:[#allocation140_spill] sm:$0xff] }
 0x53c   : > { %v4910_v47 = vpop.f32.mrf.mxu3  ;;  %v5850_v1 = vpop.f32.mrf.mxu2  ;;  %v4757_v22 = vadd.f32 %v10913_v20, %v12549_v48 }
 0x53d   : > { %v5398_v2 = vunpack.c.l.b16 %v5290_v13  ;;  %v4911_v27 = vadd.f32 %v4910_v47, %v4752_v0  ;;  %v11226_v7 = vadd.f32 %v5850_v1, %v5722_v43 }
 0x53f   : > { %v11231_v57 = vpack.c.b16 %v5398_v2, %v5397_v15  ;;  %v5070_v5 = vadd.f32 %v10984_v42, %v4911_v27  ;;  %v8479_v42 = vld [vmem:[%s12111_s5 + $0x80] sm:$0xff]  ;;  %v11259_v43 = vpop.f32.mrf.mxu0  ;;  %v4759_v27 = vadd.f32 %v10913_v20, %v10641_v34  ;;  %v12550_v34 = vld [vmem:[#allocation144_spill] sm:$0xff] }
 0x540   : > { %v11233_v44 = vpop.f32.mrf.mxu1  ;;  %5960 = vmatpush.bf16.msra.mxu3 %v8479_v42 }
 0x541   : > { %5892 = vmatmul.bf16.gmra.mxu2 %v11231_v57  ;;  %v5171_v36 = vmax.f32 %v5070_v5, 0.0 }
 0x543   : > { %5778 = vmatmul.bf16.gmra.mxu1 %v11231_v57  ;;  %v5291_v4 = vpack.c.bf16 %v5171_v36, %v5171_v36 }
 0x544   : > { %v4912_v52 = vpop.f32.mrf.mxu3  ;;  %v5853_v59 = vpop.f32.mrf.mxu2 }
 0x545   : > { %v4913_v19 = vadd.f32 %v4912_v52, %v4754_v30  ;;  %v11244_v61 = vadd.f32 %v5853_v59, %v5725_v31 }
 0x547   : > { %v5072_v12 = vadd.f32 %v10990_v38, %v4913_v19  ;;  %v5399_v38 = vunpack.c.l.b16 %v5291_v4  ;;  %v11282_v59 = vpop.f32.mrf.mxu0 }
 0x548   : > { %v11250_v24 = vpop.f32.mrf.mxu1 }
 0x549   : > { %v5172_v55 = vmax.f32 %v5072_v12, 0.0  ;;  %4954 = vmatmul.bf16.gmra.mxu3 %v12548_v53  ;;  %v12551_v12 = vld [vmem:[#allocation143_spill] sm:$0xff]  ;;  %v5732_v53 = vadd.f32 %v11113_v63, %v11188_v10  ;;  %v4764_v10 = vadd.f32 %v10913_v20, %v12554_v40 }
 0x54a   : > { %v12552_v4 = vpack.c.b16 %v12550_v34, %v12551_v12  ;;  %v12556_v34 = vld [vmem:[#allocation148_spill] sm:$0xff] }
 0x54b   : > { %v5292_v25 = vpack.c.bf16 %v5172_v55, %v5172_v55  ;;  %v4762_v55 = vadd.f32 %v10913_v20, %v12553_v28 }
 0x54c   : > { %v4915_v21 = vpop.f32.mrf.mxu3  ;;  %v5855_v0 = vpop.f32.mrf.mxu2 }
 0x54d   : > { %v5400_v13 = vunpack.c.l.b16 %v5292_v25  ;;  %v4916_v47 = vadd.f32 %v4915_v21, %v4757_v22  ;;  %v11261_v1 = vadd.f32 %v5855_v0, %v5727_v29 }
 0x54f   : > { %v11269_v15 = vpack.c.b16 %v5400_v13, %v5399_v38  ;;  %v5075_v2 = vadd.f32 %v11004_v18, %v4916_v47  ;;  %v11300_v47 = vpop.f32.mrf.mxu0 }
 0x550   : > { %v11271_v39 = vpop.f32.mrf.mxu1 }
 0x551   : > { %5897 = vmatmul.bf16.gmra.mxu2 %v11269_v15  ;;  %v5173_v30 = vmax.f32 %v5075_v2, 0.0  ;;  %v5735_v2 = vadd.f32 %v11113_v63, %v11203_v50 }
 0x553   : > { %5783 = vmatmul.bf16.gmra.mxu1 %v11269_v15  ;;  %v5293_v19 = vpack.c.bf16 %v5173_v30, %v5173_v30 }
 0x554   : > { %v4917_v5 = vpop.f32.mrf.mxu3  ;;  %v5858_v33 = vpop.f32.mrf.mxu2 }
 0x555   : > { %v4918_v31 = vadd.f32 %v4917_v5, %v4759_v27  ;;  %v11280_v52 = vadd.f32 %v5858_v33, %v5730_v54  ;;  %v5401_v25 = vunpack.c.l.b16 %v5293_v19 }
 0x557   : > { %v5077_v18 = vadd.f32 %v11012_v32, %v4918_v31  ;;  %v11319_v28 = vpop.f32.mrf.mxu0 }
 0x558   : > { %v11285_v36 = vpop.f32.mrf.mxu1 }
 0x559   : > { %v5174_v42 = vmax.f32 %v5077_v18, 0.0  ;;  %4959 = vmatmul.bf16.gmra.mxu3 %v12552_v4  ;;  %v12558_v4 = vld [vmem:[#allocation145_spill] sm:$0xff] }
 0x55a   : > { %v4767_v50 = vadd.f32 %v10913_v20, %v12558_v4  ;;  %v12561_v4 = vld [vmem:[#allocation75_spill] sm:$0xff] }
 0x55b   : > { %v5294_v48 = vpack.c.bf16 %v5174_v42, %v5174_v42  ;;  %v12555_v42 = vld [vmem:[#allocation149_spill] sm:$0xff] }
 0x55c   : > { %v4920_v22 = vpop.f32.mrf.mxu3  ;;  %v5860_v29 = vpop.f32.mrf.mxu2  ;;  %v12557_v12 = vpack.c.b16 %v12555_v42, %v12556_v34 }
 0x55d   : > { %v5402_v21 = vunpack.c.l.b16 %v5294_v48  ;;  %v4921_v32 = vadd.f32 %v4920_v22, %v4762_v55  ;;  %v11294_v0 = vadd.f32 %v5860_v29, %v5732_v53  ;;  %v5737_v55 = vadd.f32 %v11113_v63, %v11215_v60 }
 0x55e   : > { %v5740_v60 = vadd.f32 %v11113_v63, %v11233_v44 }
 0x55f   : > { %v11296_v38 = vpack.c.b16 %v5402_v21, %v5401_v25  ;;  %v5080_v56 = vadd.f32 %v11199_v35, %v4921_v32 }
 0x560   : > { %v11298_v13 = vpop.f32.mrf.mxu1 }
 0x561   : > { %5902 = vmatmul.bf16.gmra.mxu2 %v11296_v38  ;;  %v5175_v5 = vmax.f32 %v5080_v56, 0.0 }
 0x563   : > { %5788 = vmatmul.bf16.gmra.mxu1 %v11296_v38  ;;  %v5295_v35 = vpack.c.bf16 %v5175_v5, %v5175_v5  ;;  %v11336_v5 = vpop.f32.mrf.mxu0 }
 0x564   : > { %v4922_v27 = vpop.f32.mrf.mxu3  ;;  %v5863_v54 = vpop.f32.mrf.mxu2 }
 0x565   : > { %v4923_v33 = vadd.f32 %v4922_v27, %v4764_v10  ;;  %v11309_v30 = vadd.f32 %v5863_v54, %v5735_v2  ;;  %v12559_v10 = vld [vmem:[#allocation146_spill] sm:$0xff] }
 0x566   : > { %v4769_v2 = vadd.f32 %v10913_v20, %v12559_v10 }
 0x567   : > { %v5082_v31 = vadd.f32 %v11217_v58, %v4923_v33  ;;  %v5403_v58 = vunpack.c.l.b16 %v5295_v35 }
 0x568   : > { %v11312_v18 = vpop.f32.mrf.mxu1 }
 0x569   : > { %v5176_v19 = vmax.f32 %v5082_v31, 0.0  ;;  %4964 = vmatmul.bf16.gmra.mxu3 %v12557_v12  ;;  %v12560_v12 = vld [vmem:[#allocation150_spill] sm:$0xff] }
 0x56b   : > { %v5296_v53 = vpack.c.bf16 %v5176_v19, %v5176_v19 }
 0x56c   : > { %v4925_v48 = vpop.f32.mrf.mxu3  ;;  %v5865_v22 = vpop.f32.mrf.mxu2 }
 0x56d   : > { %v5404_v29 = vunpack.c.l.b16 %v5296_v53  ;;  %v4926_v25 = vadd.f32 %v4925_v48, %v4767_v50  ;;  %v11323_v21 = vadd.f32 %v5865_v22, %v5737_v55  ;;  %v12562_v50 = vpack.c.b16 %v12560_v12, %v12561_v4  ;;  %v12563_v55 = vld [vmem:[#allocation147_spill] sm:$0xff] }
 0x56e   : > { %v4772_v53 = vadd.f32 %v10913_v20, %v12563_v55  ;;  %v5742_v48 = vadd.f32 %v11113_v63, %v11250_v24 }
 0x56f   : > { %v11325_v32 = vpack.c.b16 %v5404_v29, %v5403_v58  ;;  %v5085_v40 = vadd.f32 %v11239_v3, %v4926_v25  ;;  %v8507_v3 = vld [vmem:[%s12113_s7 + $0xa0] sm:$0xff] }
 0x570   : > { %v11327_v56 = vpop.f32.mrf.mxu1  ;;  %7070 = vmatpush.bf16.msra.mxu0 %v8507_v3 }
 0x571   : > { %5907 = vmatmul.bf16.gmra.mxu2 %v11325_v32  ;;  %v5177_v33 = vmax.f32 %v5085_v40, 0.0 }
 0x573   : > { %5793 = vmatmul.bf16.gmra.mxu1 %v11325_v32  ;;  %v5297_v44 = vpack.c.bf16 %v5177_v33, %v5177_v33 }
 0x574   : > { %v4927_v27 = vpop.f32.mrf.mxu3  ;;  %v5868_v54 = vpop.f32.mrf.mxu2 }
 0x575   : > { %v4928_v31 = vadd.f32 %v4927_v27, %v4769_v2  ;;  %v11338_v35 = vadd.f32 %v5868_v54, %v5740_v60  ;;  %v5405_v25 = vunpack.c.l.b16 %v5297_v44  ;;  %v8500_v2 = vld [vmem:[%s12113_s7 + $0x68] sm:$0xff]  ;;  %v5099_v27 = vpop.f32.mrf.mxu0 }
 0x576   : > { %v8492_v60 = vld [vmem:[%s12113_s7 + $0x28] sm:$0xff]  ;;  %6980 = vmatpush.bf16.msra.mxu2 %v8500_v2 }
 0x577   : > { %v5087_v19 = vadd.f32 %v11259_v43, %v4928_v31  ;;  %6891 = vmatpush.bf16.msrb.mxu1 %v8492_v60  ;;  %v12564_v31 = vld [vmem:[#allocation73_spill] sm:$0xff] }
 0x578   : > { %v11344_v42 = vpop.f32.mrf.mxu1  ;;  %v4774_v3 = vadd.f32 %v10913_v20, %v12564_v31  ;;  %v12566_v20 = vld [vmem:[#allocation111_spill] sm:$0xff] }
 0x579   : > { %v5178_v34 = vmax.f32 %v5087_v19, 0.0  ;;  %4969 = vmatmul.bf16.gmra.mxu3 %v12562_v50  ;;  %v5745_v19 = vadd.f32 %v11113_v63, %v11271_v39  ;;  %v11383_v39 = vld [vmem:[%s12110_s4] ss:$0 sm:$0xff] }
 0x57b   : > { %v5298_v22 = vpack.c.bf16 %v5178_v34, %v5178_v34 }
 0x57c   : > { %v4930_v58 = vpop.f32.mrf.mxu3  ;;  %v5870_v29 = vpop.f32.mrf.mxu2 }
 0x57d   : > { %v5406_v43 = vunpack.c.l.b16 %v5298_v22  ;;  %v4931_v40 = vadd.f32 %v4930_v58, %v4772_v53  ;;  %v11353_v10 = vadd.f32 %v5870_v29, %v5742_v48  ;;  %v5101_v53 = vpop.f32.mrf.mxu0  ;;  %v12565_v58 = vld [vmem:[#allocation153_spill] sm:$0xff] }
 0x57e   : > { %v12567_v29 = vpack.c.b16 %v12565_v58, %v12566_v20 }
 0x57f   : > { %v11361_v54 = vpack.c.b16 %v5406_v43, %v5405_v25  ;;  %v5090_v33 = vadd.f32 %v11282_v59, %v4931_v40  ;;  %v12568_v25 = vld [vmem:[#allocation74_spill] sm:$0xff] }
 0x580   : > { %v11363_v24 = vpop.f32.mrf.mxu1  ;;  %v4777_v43 = vadd.f32 %v11383_v39, %v12568_v25 }
 0x581   : > { %5912 = vmatmul.bf16.gmra.mxu2 %v11361_v54  ;;  %v5179_v12 = vmax.f32 %v5090_v33, 0.0 }
 0x583   : > { %5798 = vmatmul.bf16.gmra.mxu1 %v11361_v54  ;;  %v5299_v59 = vpack.c.bf16 %v5179_v12, %v5179_v12  ;;  %v12569_v12 = vld [vmem:[#allocation151_spill] sm:$0xff] }
 0x584   : > { %v4932_v44 = vpop.f32.mrf.mxu3  ;;  %v5873_v34 = vpop.f32.mrf.mxu2 }
 0x585   : > { %v4933_v4 = vadd.f32 %v4932_v44, %v4774_v3  ;;  %v11372_v50 = vadd.f32 %v5873_v34, %v5745_v19  ;;  %v5407_v33 = vunpack.c.l.b16 %v5299_v59 }
 0x587   : > { %v5092_v55 = vadd.f32 %v11300_v47, %v4933_v4  ;;  %v5747_v47 = vadd.f32 %v11113_v63, %v11285_v36  ;;  %v4779_v4 = vadd.f32 %v11383_v39, %v12569_v12  ;;  %v5750_v36 = vadd.f32 %v11113_v63, %v11298_v13 }
 0x588   : > { %v11375_v22 = vpop.f32.mrf.mxu1  ;;  %v5752_v13 = vadd.f32 %v11113_v63, %v11312_v18  ;;  %v5755_v18 = vadd.f32 %v11113_v63, %v11327_v56  ;;  %v5757_v56 = vadd.f32 %v11113_v63, %v11344_v42 }
 0x589   : > { %v5180_v48 = vmax.f32 %v5092_v55, 0.0  ;;  %4974 = vmatmul.bf16.gmra.mxu3 %v12567_v29  ;;  %v5104_v55 = vpop.f32.mrf.mxu0 }
 0x58b   : > { %v5300_v40 = vpack.c.bf16 %v5180_v48, %v5180_v48 }
 0x58c   : > { %v4935_v2 = vpop.f32.mrf.mxu3  ;;  %v5875_v60 = vpop.f32.mrf.mxu2 }
 0x58d   : > { %v5408_v31 = vunpack.c.l.b16 %v5300_v40  ;;  %v4936_v3 = vadd.f32 %v4935_v2, %v4777_v43  ;;  %v11389_v19 = vadd.f32 %v5875_v60, %v5747_v47  ;;  %v12570_v40 = vld [vmem:[#allocation152_spill] sm:$0xff] }
 0x58e   : > { %v4782_v2 = vadd.f32 %v11383_v39, %v12570_v40 }
 0x58f   : > { %v11391_v44 = vpack.c.b16 %v5408_v31, %v5407_v33  ;;  %v5095_v34 = vadd.f32 %v11319_v28, %v4936_v3 }
 0x590   : > { %v11399_v48 = vpop.f32.mrf.mxu1 }
 0x591   : > { %5917 = vmatmul.bf16.gmra.mxu2 %v11391_v44  ;;  %v5181_v20 = vmax.f32 %v5095_v34, 0.0  ;;  %v5106_v3 = vpop.f32.mrf.mxu0 }
 0x593   : > { %5803 = vmatmul.bf16.gmra.mxu1 %v11391_v44  ;;  %v5301_v43 = vpack.c.bf16 %v5181_v20, %v5181_v20 }
 0x594   : > { %v4937_v59 = vpop.f32.mrf.mxu3  ;;  %v5878_v58 = vpop.f32.mrf.mxu2 }
 0x595   : > { %v4938_v29 = vadd.f32 %v4937_v59, %v4779_v4  ;;  %v11402_v25 = vadd.f32 %v5878_v58, %v5750_v36  ;;  %v5409_v34 = vunpack.c.l.b16 %v5301_v43  ;;  %v12572_v58 = vld [vmem:[#allocation154_spill] sm:$0xff] }
 0x596   : > { %v4784_v20 = vadd.f32 %v11383_v39, %v12572_v58 }
 0x597   : > { %v5097_v28 = vadd.f32 %v11336_v5, %v4938_v29 }
 0x598   : > { %v11410_v4 = vpop.f32.mrf.mxu1 }
 0x599   : > { %v5182_v47 = vmax.f32 %v5097_v28, 0.0  ;;  %5961 = vmatmul.bf16.vlgmr.msra.gmra.mxu3 %v11024_v49  ;;  %12571 = vst [vmem:[#allocation90_spill] sm:$0xff] %v11410_v4 }
 0x59b   : > { %v5302_v60 = vpack.c.bf16 %v5182_v47, %v5182_v47 }
 0x59c   : > { %v4940_v33 = vpop.f32.mrf.mxu3  ;;  %v5880_v31 = vpop.f32.mrf.mxu2 }
 0x59d   : > { %v5410_v12 = vunpack.c.l.b16 %v5302_v60  ;;  %v4941_v36 = vadd.f32 %v4940_v33, %v4782_v2  ;;  %v11412_v5 = vadd.f32 %v5880_v31, %v5752_v13  ;;  %v5109_v2 = vpop.f32.mrf.mxu0  ;;  %v12573_v31 = vld [vmem:[#allocation80_spill] sm:$0xff] }
 0x59f   : > { %v11414_v59 = vpack.c.b16 %v5410_v12, %v5409_v34  ;;  %v5100_v49 = vadd.f32 %v5099_v27, %v4941_v36  ;;  %v4787_v34 = vadd.f32 %v11383_v39, %v12573_v31 }
 0x5a0   : > { %v11424_v13 = vpop.f32.mrf.mxu1 }
 0x5a1   : > { %5922 = vmatmul.bf16.gmra.mxu2 %v11414_v59  ;;  %v5183_v43 = vmax.f32 %v5100_v49, 0.0 }
 0x5a3   : > { %5808 = vmatmul.bf16.gmra.mxu1 %v11414_v59  ;;  %v5303_v60 = vpack.c.bf16 %v5183_v43, %v5183_v43 }
 0x5a4   : > { %v4942_v29 = vpop.f32.mrf.mxu3  ;;  %v5883_v28 = vpop.f32.mrf.mxu2 }
 0x5a5   : > { %v4943_v47 = vadd.f32 %v4942_v29, %v4784_v20  ;;  %v11422_v40 = vadd.f32 %v5883_v28, %v5755_v18  ;;  %v5411_v58 = vunpack.c.l.b16 %v5303_v60  ;;  %v5111_v42 = vpop.f32.mrf.mxu0 }
 0x5a7   : > { %v5102_v27 = vadd.f32 %v5101_v53, %v4943_v47  ;;  %v8499_v53 = vld [vmem:[%s12113_s7 + $0x60] sm:$0xff] }
 0x5a8   : > { %6981 = vmatpush.bf16.msra.mxu2 %v8499_v53  ;;  %v11441_v43 = vpop.f32.mrf.mxu1 }
 0x5a9   : > { %v5184_v33 = vmax.f32 %v5102_v27, 0.0  ;;  %5966 = vmatmul.bf16.gmra.mxu3 %v11037_v9  ;;  %v8491_v9 = vld [vmem:[%s12113_s7 + $0x20] sm:$0xff]  ;;  %12574 = vst [vmem:[#allocation92_spill] sm:$0xff] %v11441_v43  ;;  %v12575_v27 = vld [vmem:[#allocation79_spill] sm:$0xff] }
 0x5aa   : > { %6892 = vmatpush.bf16.msrb.mxu1 %v8491_v9  ;;  %v4789_v60 = vadd.f32 %v11383_v39, %v12575_v27  ;;  %v5762_v9 = vadd.f32 %v11113_v63, %v11375_v22  ;;  %v5765_v22 = vadd.f32 %v11113_v63, %v11399_v48 }
 0x5ab   : > { %v5304_v12 = vpack.c.bf16 %v5184_v33, %v5184_v33  ;;  %v5760_v33 = vadd.f32 %v11113_v63, %v11363_v24 }
 0x5ac   : > { %v4945_v36 = vpop.f32.mrf.mxu3  ;;  %v5885_v49 = vpop.f32.mrf.mxu2 }
 0x5ad   : > { %v5412_v20 = vunpack.c.l.b16 %v5304_v12  ;;  %v4946_v18 = vadd.f32 %v4945_v36, %v4787_v34  ;;  %v11431_v29 = vadd.f32 %v5885_v49, %v5757_v56  ;;  %v5114_v53 = vpop.f32.mrf.mxu0 }
 0x5af   : > { %v11439_v28 = vpack.c.b16 %v5412_v20, %v5411_v58  ;;  %v5105_v47 = vadd.f32 %v5104_v55, %v4946_v18  ;;  %v8506_v55 = vld [vmem:[%s12113_s7 + $0x98] sm:$0xff]  ;;  %v12577_v18 = vld [vmem:[#allocation82_spill] sm:$0xff] }
 0x5b0   : > { %7071 = vmatpush.bf16.msra.mxu0 %v8506_v55  ;;  %v4792_v24 = vadd.f32 %v11383_v39, %v12577_v18  ;;  %v12579_v55 = vld [vmem:[#allocation81_spill] sm:$0xff] }
 0x5b1   : > { %5927 = vmatmul.bf16.gmra.mxu2 %v11439_v28  ;;  %v5185_v56 = vmax.f32 %v5105_v47, 0.0  ;;  %v11459_v47 = vpop.f32.mrf.mxu1 }
 0x5b3   : > { %5813 = vmatmul.bf16.gmra.mxu1 %v11439_v28  ;;  %v5305_v58 = vpack.c.bf16 %v5185_v56, %v5185_v56 }
 0x5b4   : > { %v4947_v31 = vpop.f32.mrf.mxu3  ;;  %v5888_v34 = vpop.f32.mrf.mxu2 }
 0x5b5   : > { %v4948_v12 = vadd.f32 %v4947_v31, %v4789_v60  ;;  %v11449_v36 = vadd.f32 %v5888_v34, %v5760_v33  ;;  %v5413_v31 = vunpack.c.l.b16 %v5305_v58  ;;  %v5116_v58 = vpop.f32.mrf.mxu0 }
 0x5b7   : > { %12576 = vst [vmem:[#allocation41_spill] sm:$0xff] %v11449_v36  ;;  %v5107_v49 = vadd.f32 %v5106_v3, %v4948_v12 }
 0x5b9   : > { %v5186_v20 = vmax.f32 %v5107_v49, 0.0  ;;  %5971 = vmatmul.bf16.gmra.mxu3 %v11056_v51  ;;  %v4794_v49 = vadd.f32 %v11383_v39, %v12579_v55 }
 0x5bb   : > { %v5306_v27 = vpack.c.bf16 %v5186_v20, %v5186_v20 }
 0x5bc   : > { %v4950_v60 = vpop.f32.mrf.mxu3  ;;  %v5890_v33 = vpop.f32.mrf.mxu2 }
 0x5bd   : > { %v5414_v34 = vunpack.c.l.b16 %v5306_v27  ;;  %v4951_v3 = vadd.f32 %v4950_v60, %v4792_v24  ;;  %v11461_v12 = vadd.f32 %v5890_v33, %v5762_v9  ;;  %v11471_v27 = vpop.f32.mrf.mxu1 }
 0x5be   : > { %12580 = vst [vmem:[#allocation45_spill] sm:$0xff] %v11471_v27  ;;  %v5119_v27 = vpop.f32.mrf.mxu0 }
 0x5bf   : > { %12578 = vst [vmem:[#allocation93_spill] sm:$0xff] %v11461_v12  ;;  %v11463_v56 = vpack.c.b16 %v5414_v34, %v5413_v31  ;;  %v5110_v51 = vadd.f32 %v5109_v2, %v4951_v3  ;;  %v12581_v34 = vld [vmem:[#allocation84_spill] sm:$0xff] }
 0x5c0   : > { %v4797_v3 = vadd.f32 %v11383_v39, %v12581_v34 }
 0x5c1   : > { %5932 = vmatmul.bf16.gmra.mxu2 %v11463_v56  ;;  %v5187_v24 = vmax.f32 %v5110_v51, 0.0 }
 0x5c3   : > { %5818 = vmatmul.bf16.gmra.mxu1 %v11463_v56  ;;  %v5307_v33 = vpack.c.bf16 %v5187_v24, %v5187_v24 }
 0x5c4   : > { %v4952_v20 = vpop.f32.mrf.mxu3  ;;  %v5893_v18 = vpop.f32.mrf.mxu2 }
 0x5c5   : > { %v4953_v9 = vadd.f32 %v4952_v20, %v4794_v49  ;;  %v11473_v60 = vadd.f32 %v5893_v18, %v5765_v22  ;;  %v5469_v4 = vunpack.c.l.b16 %v5307_v33  ;;  %v5779_v51 = vpop.f32.mrf.mxu1  ;;  %v5770_v20 = vadd.f32 %v11113_v63, %v11424_v13 }
 0x5c6   : > { %v5121_v34 = vpop.f32.mrf.mxu0 }
 0x5c7   : > { %v5112_v2 = vadd.f32 %v5111_v42, %v4953_v9  ;;  %v12582_v42 = vld [vmem:[#allocation83_spill] sm:$0xff] }
 0x5c9   : > { %v5188_v31 = vmax.f32 %v5112_v2, 0.0  ;;  %5976 = vmatmul.bf16.gmra.mxu3 %v11073_v62  ;;  %v4799_v62 = vadd.f32 %v11383_v39, %v12582_v42 }
 0x5cb   : > { %v5308_v48 = vpack.c.bf16 %v5188_v31, %v5188_v31 }
 0x5cc   : > { %v4955_v55 = vpop.f32.mrf.mxu3  ;;  %v11478_v43 = vpop.f32.mrf.mxu2 }
 0x5cd   : > { %v5470_v12 = vunpack.c.l.b16 %v5308_v48  ;;  %v4956_v36 = vadd.f32 %v4955_v55, %v4797_v3  ;;  %v11489_v3 = vpop.f32.mrf.mxu1 }
 0x5ce   : > { %12584 = vst [vmem:[#allocation96_spill] sm:$0xff] %v11489_v3 }
 0x5cf   : > { %v11480_v49 = vpack.c.b16 %v5470_v12, %v5469_v4  ;;  %v5115_v22 = vadd.f32 %v5114_v53, %v4956_v36  ;;  %v12585_v53 = vld [vmem:[#allocation86_spill] sm:$0xff] }
 0x5d0   : > { %v4802_v12 = vadd.f32 %v11383_v39, %v12585_v53 }
 0x5d1   : > { %5937 = vmatmul.bf16.gmra.mxu2 %v11480_v49  ;;  %v5189_v9 = vmax.f32 %v5115_v22, 0.0 }
 0x5d3   : > { %v5309_v4 = vpack.c.bf16 %v5189_v9, %v5189_v9 }
 0x5d4   : > { %v4957_v18 = vpop.f32.mrf.mxu3  ;;  %v5898_v24 = vpop.f32.mrf.mxu2 }
 0x5d5   : > { %v4958_v2 = vadd.f32 %v4957_v18, %v4799_v62  ;;  %v11487_v33 = vadd.f32 %v5898_v24, %v5770_v20  ;;  %v5471_v42 = vunpack.c.l.b16 %v5309_v4  ;;  %v12587_v24 = vld [vmem:[#allocation85_spill] sm:$0xff]  ;;  %v5784_v4 = vpop.f32.mrf.mxu1 }
 0x5d6   : > { %v4804_v9 = vadd.f32 %v11383_v39, %v12587_v24 }
 0x5d7   : > { %12583 = vst [vmem:[#allocation49_spill] sm:$0xff] %v11487_v33  ;;  %v5117_v31 = vadd.f32 %v5116_v58, %v4958_v2  ;;  %v8498_v58 = vld [vmem:[%s12113_s7 + $0x58] sm:$0xff]  ;;  %v5124_v2 = vpop.f32.mrf.mxu0 }
 0x5d8   : > { %6982 = vmatpush.bf16.msra.mxu2 %v8498_v58 }
 0x5d9   : > { %v5190_v36 = vmax.f32 %v5117_v31, 0.0  ;;  %5981 = vmatmul.bf16.gmra.mxu3 %v11090_v46  ;;  %v8490_v46 = vld [vmem:[%s12113_s7 + $0x18] sm:$0xff]  ;;  %v5775_v31 = vadd.f32 %v11113_v63, %v11459_v47 }
 0x5da   : > { %6893 = vmatpush.bf16.msrb.mxu1 %v8490_v46 }
 0x5db   : > { %v5310_v48 = vpack.c.bf16 %v5190_v36, %v5190_v36 }
 0x5dc   : > { %v4960_v55 = vpop.f32.mrf.mxu3  ;;  %v11494_v13 = vpop.f32.mrf.mxu2 }
 0x5dd   : > { %12586 = vst [vmem:[#allocation95_spill] sm:$0xff] %v11494_v13  ;;  %v5472_v22 = vunpack.c.l.b16 %v5310_v48  ;;  %v4961_v62 = vadd.f32 %v4960_v55, %v4802_v12  ;;  %v11516_v13 = vpop.f32.mrf.mxu1 }
 0x5de   : > { %12591 = vst [vmem:[#allocation53_spill] sm:$0xff] %v11516_v13 }
 0x5df   : > { %v11496_v20 = vpack.c.b16 %v5472_v22, %v5471_v42  ;;  %v5120_v18 = vadd.f32 %v5119_v27, %v4961_v62  ;;  %v12589_v62 = vld [vmem:[#allocation66_spill] sm:$0xff]  ;;  %v5126_v47 = vpop.f32.mrf.mxu0 }
 0x5e0   : > { %v4807_v58 = vadd.f32 %v11383_v39, %v12589_v62 }
 0x5e1   : > { %5942 = vmatmul.bf16.gmra.mxu2 %v11496_v20  ;;  %v5191_v12 = vmax.f32 %v5120_v18, 0.0 }
 0x5e3   : > { %v5311_v27 = vpack.c.bf16 %v5191_v12, %v5191_v12  ;;  %v5780_v12 = vadd.f32 %v11113_v63, %v5779_v51 }
 0x5e4   : > { %v4962_v36 = vpop.f32.mrf.mxu3  ;;  %v5903_v53 = vpop.f32.mrf.mxu2 }
 0x5e5   : > { %v4963_v48 = vadd.f32 %v4962_v36, %v4804_v9  ;;  %v11509_v55 = vadd.f32 %v5903_v53, %v5775_v31  ;;  %v5473_v33 = vunpack.c.l.b16 %v5311_v27 }
 0x5e7   : > { %12588 = vst [vmem:[#allocation94_spill] sm:$0xff] %v11509_v55  ;;  %v5122_v42 = vadd.f32 %v5121_v34, %v4963_v48  ;;  %v12592_v34 = vld [vmem:[#allocation88_spill] sm:$0xff] }
 0x5e8   : > { %v4809_v53 = vadd.f32 %v11383_v39, %v12592_v34 }
 0x5e9   : > { %v5192_v22 = vmax.f32 %v5122_v42, 0.0  ;;  %5986 = vmatmul.bf16.gmra.mxu3 %v11115_v45  ;;  %v8505_v45 = vld [vmem:[%s12113_s7 + $0x90] sm:$0xff] }
 0x5ea   : > { %7072 = vmatpush.bf16.msra.mxu0 %v8505_v45 }
 0x5eb   : > { %v5312_v46 = vpack.c.bf16 %v5192_v22, %v5192_v22 }
 0x5ec   : > { %v4965_v24 = vpop.f32.mrf.mxu3  ;;  %v11514_v3 = vpop.f32.mrf.mxu2 }
 0x5ed   : > { %12590 = vst [vmem:[#allocation99_spill] sm:$0xff] %v11514_v3  ;;  %v5474_v18 = vunpack.c.l.b16 %v5312_v46  ;;  %v4966_v9 = vadd.f32 %v4965_v24, %v4807_v58 }
 0x5ef   : > { %v5125_v31 = vadd.f32 %v5124_v2, %v4966_v9  ;;  %v11518_v36 = vpack.c.b16 %v5474_v18, %v5473_v33  ;;  %v5129_v33 = vpop.f32.mrf.mxu0  ;;  %v5789_v2 = vpop.f32.mrf.mxu1  ;;  %v12594_v18 = vld [vmem:[#allocation87_spill] sm:$0xff] }
 0x5f0   : > { %v4812_v9 = vadd.f32 %v11383_v39, %v12594_v18 }
 0x5f1   : > { %5947 = vmatmul.bf16.gmra.mxu2 %v11518_v36  ;;  %v5193_v48 = vmax.f32 %v5125_v31, 0.0 }
 0x5f3   : > { %v5253_v58 = vmul.f32 0.0, %v5193_v48 }
 0x5f4   : > { %v4967_v42 = vpop.f32.mrf.mxu3  ;;  %v5908_v27 = vpop.f32.mrf.mxu2 }
 0x5f5   : > { %v4968_v22 = vadd.f32 %v4967_v42, %v4809_v53  ;;  %v11527_v62 = vadd.f32 %v5908_v27, %v5780_v12  ;;  %v5313_v45 = vpack.c.bf16 %v5253_v58, %v5253_v58  ;;  %v12597_v27 = vld [vmem:[#allocation89_spill] sm:$0xff]  ;;  %v5785_v58 = vadd.f32 %v11113_v63, %v5784_v4  ;;  %v8488_v4 = vld [vmem:[%s12113_s7 + $0x8] sm:$0xff] }
 0x5f7   : > { %12593 = vst [vmem:[#allocation98_spill] sm:$0xff] %v11527_v62  ;;  %v5127_v46 = vadd.f32 %v5126_v47, %v4968_v22  ;;  %v11534_v53 = vunpack.c.l.b16 %v5313_v45  ;;  %v5131_v48 = vpop.f32.mrf.mxu0  ;;  %v11538_v47 = vpop.f32.mrf.mxu1  ;;  %v4814_v22 = vadd.f32 %v11383_v39, %v12597_v27 }
 0x5f8   : > { %12596 = vst [vmem:[#allocation102_spill] sm:$0xff] %v11538_v47 }
 0x5f9   : > { %v5194_v24 = vmax.f32 %v5127_v46, 0.0  ;;  %5991 = vmatmul.bf16.gmra.mxu3 %v11143_v41 }
 0x5fb   : > { %v5254_v34 = vmul.f32 0.0, %v5194_v24 }
 0x5fc   : > { %v4970_v13 = vpop.f32.mrf.mxu3  ;;  %v11532_v51 = vpop.f32.mrf.mxu2 }
 0x5fd   : > { %12595 = vst [vmem:[#allocation97_spill] sm:$0xff] %v11532_v51  ;;  %v5314_v31 = vpack.c.bf16 %v5254_v34, %v5254_v34  ;;  %v4971_v3 = vadd.f32 %v4970_v13, %v4812_v9 }
 0x5ff   : > { %v11536_v12 = vunpack.c.l.b16 %v5314_v31  ;;  %v5130_v42 = vadd.f32 %v5129_v33, %v4971_v3  ;;  %v8489_v3 = vld [vmem:[%s12113_s7 + $0x10] sm:$0xff]  ;;  %v12599_v31 = vld [vmem:[#allocation37_spill] sm:$0xff]  ;;  %v5134_v27 = vpop.f32.mrf.mxu0 }
 0x600   : > { %6894 = vmatpush.bf16.msrb.mxu1 %v8489_v3 }
 0x601   : > { %v5195_v46 = vmax.f32 %v5130_v42, 0.0  ;;  %v4817_v42 = vadd.f32 %v11383_v39, %v12599_v31 }
 0x603   : > { %v5255_v33 = vmul.f32 0.0, %v5195_v46 }
 0x604   : > { %v4972_v24 = vpop.f32.mrf.mxu3  ;;  %v5913_v18 = vpop.f32.mrf.mxu2  ;;  %6895 = vmatpush.bf16.msrb.mxu1 %v8488_v4  ;;  %v12601_v4 = vld [vmem:[#allocation91_spill] sm:$0xff] }
 0x605   : > { %v4973_v13 = vadd.f32 %v4972_v24, %v4814_v22  ;;  %v11545_v9 = vadd.f32 %v5913_v18, %v5785_v58  ;;  %v5794_v22 = vpop.f32.mrf.mxu1  ;;  %v5315_v58 = vpack.c.bf16 %v5255_v33, %v5255_v33  ;;  %v8497_v33 = vld [vmem:[%s12113_s7 + $0x50] sm:$0xff]  ;;  %v4819_v31 = vadd.f32 %v11383_v39, %v12601_v4  ;;  %v8504_v39 = vld [vmem:[%s12113_s7 + $0x88] sm:$0xff]  ;;  %v8495_v4 = vld [vmem:[%s12113_s7 + $0x40] sm:$0xff] }
 0x606   : > { %6983 = vmatpush.bf16.msra.mxu2 %v8497_v33  ;;  %v8496_v33 = vld [vmem:[%s12113_s7 + $0x48] sm:$0xff]  ;;  %7073 = vmatpush.bf16.msra.mxu0 %v8504_v39 }
 0x607   : > { %12598 = vst [vmem:[#allocation103_spill] sm:$0xff] %v11545_v9  ;;  %v5132_v45 = vadd.f32 %v5131_v48, %v4973_v13  ;;  %v11561_v13 = vunpack.c.l.b16 %v5315_v58  ;;  %v5136_v47 = vpop.f32.mrf.mxu0 }
 0x609   : > { %v5196_v34 = vmax.f32 %v5132_v45, 0.0  ;;  %5996 = vmatmul.bf16.gmra.mxu3 %v11174_v23  ;;  %v8487_v23 = vld [vmem:[%s12113_s7] sm:$0xff] }
 0x60a   : > { %6896 = vmatpush.bf16.msrb.mxu1 %v8487_v23  ;;  %6984 = vmatpush.bf16.msra.mxu2 %v8496_v33  ;;  %v12608_v33 = vmov 0.0  }
 0x60b   : > { %v5256_v24 = vmul.f32 0.0, %v5196_v34 }
 0x60c   : > { %v4975_v18 = vpop.f32.mrf.mxu3  ;;  %v11556_v41 = vpop.f32.mrf.mxu2 }
 0x60d   : > { %12600 = vst [vmem:[#allocation101_spill] sm:$0xff] %v11556_v41  ;;  %v5316_v48 = vpack.c.bf16 %v5256_v24, %v5256_v24  ;;  %v4976_v46 = vadd.f32 %v4975_v18, %v4817_v42  ;;  %v5790_v42 = vadd.f32 %v11113_v63, %v5789_v2 }
 0x60e   : > { %6985 = vmatpush.bf16.msra.mxu2 %v8495_v4 }
 0x60f   : > { %v11563_v3 = vunpack.c.l.b16 %v5316_v48  ;;  %v5135_v45 = vadd.f32 %v5134_v27, %v4976_v46  ;;  %v11573_v48 = vpop.f32.mrf.mxu1 }
 0x610   : > { %12602 = vst [vmem:[#allocation100_spill] sm:$0xff] %v11573_v48 }
 0x611   : > { %v5197_v24 = vmax.f32 %v5135_v45, 0.0 }
 0x613   : > { %v5257_v41 = vmul.f32 0.0, %v5197_v24 }
 0x614   : > { %v4977_v58 = vpop.f32.mrf.mxu3  ;;  %v5918_v18 = vpop.f32.mrf.mxu2 }
 0x615   : > { %v4978_v27 = vadd.f32 %v4977_v58, %v4819_v31  ;;  %v11575_v46 = vadd.f32 %v5918_v18, %v5790_v42  ;;  %v5317_v2 = vpack.c.bf16 %v5257_v41, %v5257_v41  ;;  %v12605_v58 = vld [vmem:[#allocation76_spill] sm:$0xff] }
 0x616   : > { %vm739_vm8 = vcmp.ge.s32.totalorder %v12605_v58, 2 }
 0x617   : > { %12603 = vst [vmem:[#allocation104_spill] sm:$0xff] %v11575_v46  ;;  %v5137_v23 = vadd.f32 %v5136_v47, %v4978_v27  ;;  %v8503_v47 = vld [vmem:[%s12113_s7 + $0x80] sm:$0xff]  ;;  %v5799_v41 = vpop.f32.mrf.mxu1  ;;  %v11594_v18 = vunpack.c.l.b16 %v5317_v2  ;;  %v11599_v39 = vsel %vm739_vm8, 1.0, %v12608_v33 }
 0x618   : > { %7074 = vmatpush.bf16.msra.mxu0 %v8503_v47 }
 0x619   : > { %v5198_v63 = vmax.f32 %v5137_v23, 0.0  ;;  %6001 = vmatmul.bf16.gmra.mxu3 %v11201_v26  ;;  %12606 = vst [vmem:[#allocation106_spill] sm:$0xff] %v11594_v18 }
 0x61b   : > { %v5258_v45 = vmul.f32 0.0, %v5198_v63 }
 0x61c   : > { %v11590_v31 = vpop.f32.mrf.mxu2  ;;  %v5962_v42 = vpop.f32.mrf.mxu3 }
 0x61d   : > { %12604 = vst [vmem:[#allocation57_spill] sm:$0xff] %v11590_v31  ;;  %v5318_v24 = vpack.c.bf16 %v5258_v45, %v5258_v45  ;;  %v5963_v26 = vadd.f32 %v5962_v42, %v11126_v11  ;;  %v11606_v45 = vld [vmem:[%s12112_s6] ss:$0 sm:$0xff] }
 0x61e   : > { %v5795_v11 = vadd.f32 %v11606_v45, %v5794_v22 }
 0x61f   : > { %v11596_v27 = vunpack.c.l.b16 %v5318_v24  ;;  %v6082_v23 = vmax.f32 %v5963_v26, 0.0  ;;  %v11613_v63 = vpop.f32.mrf.mxu1 }
 0x620   : > { %12610 = vst [vmem:[#allocation110_spill] sm:$0xff] %v11613_v63 }
 0x621   : > { %12607 = vst [vmem:[#allocation105_spill] sm:$0xff] %v11596_v27  ;;  %v6130_v4 = vmul.f32 %v11599_v39, %v6082_v23  ;;  %v12613_v23 = vld [vmem:[#allocation77_spill] sm:$0xff] }
 0x622   : > { %vm744_vm12 = vcmp.lt.s32.totalorder %v12613_v23, 18 }
 0x623   : > { %v6178_v58 = vpack.c.bf16 %v6130_v4, %v6130_v4  ;;  %v11629_v46 = vsel %vm744_vm12, 1.0, %v12608_v33 }
 0x624   : > { %v5923_v2 = vpop.f32.mrf.mxu2  ;;  %v5964_v47 = vpop.f32.mrf.mxu3 }
 0x625   : > { %v11610_v42 = vadd.f32 %v5923_v2, %v5795_v11  ;;  %v5965_v24 = vadd.f32 %v5964_v47, %v11141_v14  ;;  %v8232_v48 = vrot.slane %v6178_v58, 9  ;;  %v8248_v11 = vrot.slane %v6178_v58, 10 }
 0x627   : > { %12609 = vst [vmem:[#allocation107_spill] sm:$0xff] %v11610_v42  ;;  %v6083_v26 = vmax.f32 %v5965_v24, 0.0  ;;  %v6501_v24 = vunpack.c.l.b16 %v6178_v58 }
 0x629   : > { %6006 = vmatmul.bf16.gmra.mxu3 %v11231_v57  ;;  %v6179_v34 = vpack.c.bf16 %v6083_v26, %v6083_v26 }
 0x62b   : > { %v6276_v2 = vrot.slane %v6179_v34, 5  ;;  %v6391_v42 = vrot.slane %v6179_v34, 6  ;;  %v6502_v14 = vunpack.c.l.b16 %v6179_v34  ;;  %v5800_v34 = vadd.f32 %v11606_v45, %v5799_v41 }
 0x62c   : > { %v11621_v4 = vpop.f32.mrf.mxu2  ;;  %v5967_v47 = vpop.f32.mrf.mxu3 }
 0x62d   : > { %12614 = vst [vmem:[#allocation109_spill] sm:$0xff] %v11621_v4  ;;  %v5968_v63 = vadd.f32 %v5967_v47, %v11154_v17  ;;  %v6277_v57 = vsel %vm9324_vm5, %v8232_v48, %v6276_v2  ;;  %v6392_v26 = vsel %vm11616_vm11, %v8248_v11, %v6391_v42  ;;  %v6533_v23 = vpack.c.b16 %v6502_v14, %v6501_v24  ;;  %v5804_v4 = vpop.f32.mrf.mxu1 }
 0x62e   : > { %v6278_v62 = vrot.slane %v6276_v2, 4  ;;  %v6393_v17 = vrot.slane %v6391_v42, 4  ;;  %v6565_v11 = vunpack.c.l.b16 %v6277_v57  ;;  %v6629_v41 = vunpack.c.l.b16 %v6392_v26 }
 0x62f   : > { %v6084_v9 = vmax.f32 %v5968_v63, 0.0  ;;  %6897 = vmatmul.bf16.vlgmr.msrb.gmra.mxu1 %v6533_v23 }
 0x631   : > { %v6132_v51 = vmul.f32 %v11629_v46, %v6084_v9 }
 0x633   : > { %v6210_v58 = vpack.c.bf16 %v6132_v51, %v6132_v51 }
 0x634   : > { %v5928_v47 = vpop.f32.mrf.mxu2  ;;  %v5969_v18 = vpop.f32.mrf.mxu3 }
 0x635   : > { %v6279_v48 = vrot.slane %v6210_v58, 5  ;;  %v6394_v27 = vrot.slane %v6210_v58, 6  ;;  %v11633_v55 = vadd.f32 %v5928_v47, %v5800_v34  ;;  %v5970_v33 = vadd.f32 %v5969_v18, %v11166_v6  ;;  %v11644_v18 = vpop.f32.mrf.mxu1 }
 0x636   : > { %v5805_v58 = vadd.f32 %v11606_v45, %v5804_v4 }
 0x637   : > { %v6280_v63 = vsel %vm9324_vm5, %v6278_v62, %v6279_v48  ;;  %v6395_v9 = vsel %vm11616_vm11, %v6393_v17, %v6394_v27  ;;  %v6085_v2 = vmax.f32 %v5970_v33, 0.0 }
 0x638   : > { %v6566_v14 = vunpack.c.l.b16 %v6280_v63  ;;  %v6630_v51 = vunpack.c.l.b16 %v6395_v9 }
 0x639   : > { %6011 = vmatmul.bf16.gmra.mxu3 %v11269_v15  ;;  %v6133_v23 = vmul.f32 %v11599_v39, %v6085_v2 }
 0x63a   : > { %v6597_v42 = vpack.c.b16 %v6566_v14, %v6565_v11  ;;  %v6661_v24 = vpack.c.b16 %v6630_v51, %v6629_v41 }
 0x63b   : > { %v6180_v57 = vpack.c.bf16 %v6133_v23, %v6133_v23 }
 0x63c   : > { %v11642_v34 = vpop.f32.mrf.mxu2  ;;  %v5972_v6 = vpop.f32.mrf.mxu3  ;;  %6986 = vmatmul.bf16.vlgmr.msra.gmra.mxu2 %v6597_v42  ;;  %7075 = vmatmul.bf16.vlgmr.msra.gmra.mxu0 %v6661_v24 }
 0x63d   : > { %v5973_v62 = vadd.f32 %v5972_v6, %v11185_v37  ;;  %v8233_v48 = vrot.slane %v6180_v57, 9  ;;  %v8249_v33 = vrot.slane %v6180_v57, 10  ;;  %v6503_v9 = vunpack.c.l.b16 %v6180_v57  ;;  %v5809_v4 = vpop.f32.mrf.mxu1 }
 0x63f   : > { %v6086_v27 = vmax.f32 %v5973_v62, 0.0 }
 0x641   : > { %v6181_v26 = vpack.c.bf16 %v6086_v27, %v6086_v27 }
 0x643   : > { %v6283_v17 = vrot.slane %v6181_v26, 5  ;;  %v6398_v15 = vrot.slane %v6181_v26, 6  ;;  %v6504_v47 = vunpack.c.l.b16 %v6181_v26 }
 0x644   : > { %v5933_v11 = vpop.f32.mrf.mxu2  ;;  %v5974_v63 = vpop.f32.mrf.mxu3 }
 0x645   : > { %v11648_v41 = vadd.f32 %v5933_v11, %v5805_v58  ;;  %v5975_v14 = vadd.f32 %v5974_v63, %v11197_v8  ;;  %v6534_v51 = vpack.c.b16 %v6504_v47, %v6503_v9  ;;  %v6284_v37 = vsel %vm9324_vm5, %v8233_v48, %v6283_v17 }
 0x646   : > { %v6399_v2 = vsel %vm11616_vm11, %v8249_v33, %v6398_v15  ;;  %v6285_v6 = vrot.slane %v6283_v17, 4  ;;  %v6400_v8 = vrot.slane %v6398_v15, 4  ;;  %v6567_v48 = vunpack.c.l.b16 %v6284_v37  ;;  %v11664_v17 = vpop.f32.mrf.mxu1 }
 0x647   : > { %v6087_v42 = vmax.f32 %v5975_v14, 0.0  ;;  %6902 = vmatmul.bf16.gmra.mxu1 %v6534_v51  ;;  %v5810_v15 = vadd.f32 %v11606_v45, %v5809_v4 }
 0x649   : > { %v6135_v24 = vmul.f32 %v11629_v46, %v6087_v42  ;;  %6016 = vmatmul.bf16.gmra.mxu3 %v11296_v38  ;;  %v6631_v38 = vunpack.c.l.b16 %v6399_v2 }
 0x64b   : > { %v6211_v23 = vpack.c.bf16 %v6135_v24, %v6135_v24 }
 0x64c   : > { %v11657_v62 = vpop.f32.mrf.mxu2  ;;  %v5977_v27 = vpop.f32.mrf.mxu3 }
 0x64d   : > { %v6286_v57 = vrot.slane %v6211_v23, 5  ;;  %v6401_v26 = vrot.slane %v6211_v23, 6  ;;  %v5978_v58 = vadd.f32 %v5977_v27, %v11212_v16 }
 0x64f   : > { %v6287_v47 = vsel %vm9324_vm5, %v6285_v6, %v6286_v57  ;;  %v6402_v33 = vsel %vm11616_vm11, %v6400_v8, %v6401_v26  ;;  %v6088_v11 = vmax.f32 %v5978_v58, 0.0  ;;  %v5814_v8 = vpop.f32.mrf.mxu1 }
 0x650   : > { %v6568_v63 = vunpack.c.l.b16 %v6287_v47  ;;  %v6632_v9 = vunpack.c.l.b16 %v6402_v33 }
 0x651   : > { %v6136_v42 = vmul.f32 %v11599_v39, %v6088_v11 }
 0x652   : > { %v6598_v14 = vpack.c.b16 %v6568_v63, %v6567_v48  ;;  %v6662_v51 = vpack.c.b16 %v6632_v9, %v6631_v38 }
 0x653   : > { %v6182_v27 = vpack.c.bf16 %v6136_v42, %v6136_v42 }
 0x654   : > { %v5938_v16 = vpop.f32.mrf.mxu2  ;;  %v5979_v24 = vpop.f32.mrf.mxu3  ;;  %6991 = vmatmul.bf16.gmra.mxu2 %v6598_v14  ;;  %7080 = vmatmul.bf16.gmra.mxu0 %v6662_v51  ;;  %v5815_v51 = vadd.f32 %v11606_v45, %v5814_v8 }
 0x655   : > { %v11668_v37 = vadd.f32 %v5938_v16, %v5810_v15  ;;  %v5980_v23 = vadd.f32 %v5979_v24, %v11226_v7  ;;  %v8234_v4 = vrot.slane %v6182_v27, 9  ;;  %v8250_v47 = vrot.slane %v6182_v27, 10 }
 0x656   : > { %v6505_v11 = vunpack.c.l.b16 %v6182_v27 }
 0x657   : > { %v6089_v6 = vmax.f32 %v5980_v23, 0.0 }
 0x659   : > { %v6183_v2 = vpack.c.bf16 %v6089_v6, %v6089_v6  ;;  %6021 = vmatmul.bf16.gmra.mxu3 %v11325_v32 }
 0x65b   : > { %v6290_v57 = vrot.slane %v6183_v2, 5  ;;  %v6405_v26 = vrot.slane %v6183_v2, 6  ;;  %v6506_v58 = vunpack.c.l.b16 %v6183_v2 }
 0x65c   : > { %v11672_v48 = vpop.f32.mrf.mxu2  ;;  %v5982_v33 = vpop.f32.mrf.mxu3 }
 0x65d   : > { %v5983_v63 = vadd.f32 %v5982_v33, %v11244_v61  ;;  %v6535_v38 = vpack.c.b16 %v6506_v58, %v6505_v11  ;;  %v6291_v7 = vsel %vm9324_vm5, %v8234_v4, %v6290_v57  ;;  %v6406_v9 = vsel %vm11616_vm11, %v8250_v47, %v6405_v26  ;;  %v11684_v58 = vpop.f32.mrf.mxu1 }
 0x65e   : > { %v6292_v42 = vrot.slane %v6290_v57, 4  ;;  %v6407_v16 = vrot.slane %v6405_v26, 4  ;;  %v6569_v47 = vunpack.c.l.b16 %v6291_v7  ;;  %v6633_v26 = vunpack.c.l.b16 %v6406_v9 }
 0x65f   : > { %v6090_v32 = vmax.f32 %v5983_v63, 0.0  ;;  %6907 = vmatmul.bf16.gmra.mxu1 %v6535_v38 }
 0x661   : > { %v6138_v14 = vmul.f32 %v11629_v46, %v6090_v32 }
 0x663   : > { %v6212_v15 = vpack.c.bf16 %v6138_v14, %v6138_v14 }
 0x664   : > { %v5943_v24 = vpop.f32.mrf.mxu2  ;;  %v5984_v23 = vpop.f32.mrf.mxu3 }
 0x665   : > { %v6293_v6 = vrot.slane %v6212_v15, 5  ;;  %v6408_v61 = vrot.slane %v6212_v15, 6  ;;  %v11681_v27 = vadd.f32 %v5943_v24, %v5815_v51  ;;  %v5985_v2 = vadd.f32 %v5984_v23, %v11261_v1  ;;  %v5819_v15 = vpop.f32.mrf.mxu1 }
 0x666   : > { %v5820_v9 = vadd.f32 %v11606_v45, %v5819_v15 }
 0x667   : > { %v6294_v4 = vsel %vm9324_vm5, %v6292_v42, %v6293_v6  ;;  %v6409_v8 = vsel %vm11616_vm11, %v6407_v16, %v6408_v61  ;;  %v6091_v33 = vmax.f32 %v5985_v2, 0.0 }
 0x668   : > { %v6570_v57 = vunpack.c.l.b16 %v6294_v4  ;;  %v6634_v11 = vunpack.c.l.b16 %v6409_v8 }
 0x669   : > { %6026 = vmatmul.bf16.gmra.mxu3 %v11361_v54  ;;  %v6139_v32 = vmul.f32 %v11599_v39, %v6091_v33 }
 0x66a   : > { %v6599_v63 = vpack.c.b16 %v6570_v57, %v6569_v47  ;;  %v6663_v38 = vpack.c.b16 %v6634_v11, %v6633_v26 }
 0x66b   : > { %v6184_v42 = vpack.c.bf16 %v6139_v32, %v6139_v32 }
 0x66c   : > { %v11692_v1 = vpop.f32.mrf.mxu2  ;;  %v5987_v14 = vpop.f32.mrf.mxu3  ;;  %6996 = vmatmul.bf16.gmra.mxu2 %v6599_v63  ;;  %7085 = vmatmul.bf16.gmra.mxu0 %v6663_v38 }
 0x66d   : > { %v5988_v7 = vadd.f32 %v5987_v14, %v11280_v52  ;;  %v8235_v6 = vrot.slane %v6184_v42, 9  ;;  %v8251_v61 = vrot.slane %v6184_v42, 10  ;;  %v6507_v47 = vunpack.c.l.b16 %v6184_v42 }
 0x66f   : > { %v6092_v51 = vmax.f32 %v5988_v7, 0.0 }
 0x671   : > { %v6185_v16 = vpack.c.bf16 %v6092_v51, %v6092_v51 }
 0x673   : > { %v6297_v24 = vrot.slane %v6185_v16, 5  ;;  %v6412_v23 = vrot.slane %v6185_v16, 6  ;;  %v6508_v54 = vunpack.c.l.b16 %v6185_v16 }
 0x674   : > { %v5948_v2 = vpop.f32.mrf.mxu2  ;;  %v5989_v4 = vpop.f32.mrf.mxu3 }
 0x675   : > { %v11696_v8 = vadd.f32 %v5948_v2, %v5820_v9  ;;  %v5990_v33 = vadd.f32 %v5989_v4, %v11294_v0  ;;  %v6536_v57 = vpack.c.b16 %v6508_v54, %v6507_v47  ;;  %v6298_v52 = vsel %vm9324_vm5, %v8235_v6, %v6297_v24 }
 0x676   : > { %v6413_v26 = vsel %vm11616_vm11, %v8251_v61, %v6412_v23  ;;  %v6299_v32 = vrot.slane %v6297_v24, 4  ;;  %v6414_v7 = vrot.slane %v6412_v23, 4  ;;  %v6571_v54 = vunpack.c.l.b16 %v6298_v52 }
 0x677   : > { %v6093_v11 = vmax.f32 %v5990_v33, 0.0  ;;  %6912 = vmatmul.bf16.gmra.mxu1 %v6536_v57  ;;  %v6635_v61 = vunpack.c.l.b16 %v6413_v26 }
 0x679   : > { %v6141_v63 = vmul.f32 %v11629_v46, %v6093_v11  ;;  %6031 = vmatmul.bf16.gmra.mxu3 %v11391_v44 }
 0x67b   : > { %v6213_v38 = vpack.c.bf16 %v6141_v63, %v6141_v63 }
 0x67c   : > { %v5992_v14 = vpop.f32.mrf.mxu3 }
 0x67d   : > { %v6300_v51 = vrot.slane %v6213_v38, 5  ;;  %v6415_v15 = vrot.slane %v6213_v38, 6  ;;  %v5993_v0 = vadd.f32 %v5992_v14, %v11309_v30 }
 0x67f   : > { %v6094_v42 = vmax.f32 %v5993_v0, 0.0  ;;  %v6301_v16 = vsel %vm9324_vm5, %v6299_v32, %v6300_v51  ;;  %v6416_v9 = vsel %vm11616_vm11, %v6414_v7, %v6415_v15 }
 0x680   : > { %v6572_v6 = vunpack.c.l.b16 %v6301_v16  ;;  %v6636_v2 = vunpack.c.l.b16 %v6416_v9 }
 0x681   : > { %v6142_v24 = vmul.f32 %v11599_v39, %v6094_v42 }
 0x682   : > { %v6600_v44 = vpack.c.b16 %v6572_v6, %v6571_v54  ;;  %v6664_v4 = vpack.c.b16 %v6636_v2, %v6635_v61 }
 0x683   : > { %v6186_v47 = vpack.c.bf16 %v6142_v24, %v6142_v24 }
 0x684   : > { %v5994_v23 = vpop.f32.mrf.mxu3  ;;  %7001 = vmatmul.bf16.gmra.mxu2 %v6600_v44  ;;  %7090 = vmatmul.bf16.gmra.mxu0 %v6664_v4 }
 0x685   : > { %v5995_v30 = vadd.f32 %v5994_v23, %v11323_v21  ;;  %v6509_v52 = vunpack.c.l.b16 %v6186_v47  ;;  %v8236_v26 = vrot.slane %v6186_v47, 9  ;;  %v8252_v32 = vrot.slane %v6186_v47, 10 }
 0x687   : > { %v6095_v33 = vmax.f32 %v5995_v30, 0.0 }
 0x689   : > { %v6187_v57 = vpack.c.bf16 %v6095_v33, %v6095_v33  ;;  %6036 = vmatmul.bf16.gmra.mxu3 %v11414_v59 }
 0x68b   : > { %v6304_v11 = vrot.slane %v6187_v57, 5  ;;  %v6419_v63 = vrot.slane %v6187_v57, 6  ;;  %v6510_v38 = vunpack.c.l.b16 %v6187_v57 }
 0x68c   : > { %v5997_v14 = vpop.f32.mrf.mxu3 }
 0x68d   : > { %v5998_v7 = vadd.f32 %v5997_v14, %v11338_v35  ;;  %v6537_v51 = vpack.c.b16 %v6510_v38, %v6509_v52  ;;  %v6305_v15 = vsel %vm9324_vm5, %v8236_v26, %v6304_v11  ;;  %v6420_v21 = vsel %vm11616_vm11, %v8252_v32, %v6419_v63 }
 0x68e   : > { %v6306_v16 = vrot.slane %v6304_v11, 4  ;;  %v6421_v54 = vrot.slane %v6419_v63, 4  ;;  %v6573_v24 = vunpack.c.l.b16 %v6305_v15  ;;  %v6637_v30 = vunpack.c.l.b16 %v6420_v21 }
 0x68f   : > { %v6096_v0 = vmax.f32 %v5998_v7, 0.0  ;;  %6917 = vmatmul.bf16.gmra.mxu1 %v6537_v51 }
 0x691   : > { %v6144_v59 = vmul.f32 %v11629_v46, %v6096_v0 }
 0x693   : > { %v6214_v42 = vpack.c.bf16 %v6144_v59, %v6144_v59 }
 0x694   : > { %v5999_v9 = vpop.f32.mrf.mxu3 }
 0x695   : > { %v6307_v6 = vrot.slane %v6214_v42, 5  ;;  %v6422_v61 = vrot.slane %v6214_v42, 6  ;;  %v6000_v2 = vadd.f32 %v5999_v9, %v11353_v10 }
 0x697   : > { %v6097_v35 = vmax.f32 %v6000_v2, 0.0  ;;  %v6308_v44 = vsel %vm9324_vm5, %v6306_v16, %v6307_v6  ;;  %v6423_v4 = vsel %vm11616_vm11, %v6421_v54, %v6422_v61 }
 0x698   : > { %v6574_v23 = vunpack.c.l.b16 %v6308_v44  ;;  %v6638_v47 = vunpack.c.l.b16 %v6423_v4 }
 0x699   : > { %6041 = vmatmul.bf16.gmra.mxu3 %v11439_v28  ;;  %v6145_v11 = vmul.f32 %v11599_v39, %v6097_v35 }
 0x69a   : > { %v6601_v33 = vpack.c.b16 %v6574_v23, %v6573_v24  ;;  %v6665_v57 = vpack.c.b16 %v6638_v47, %v6637_v30 }
 0x69b   : > { %v6188_v52 = vpack.c.bf16 %v6145_v11, %v6145_v11 }
 0x69c   : > { %v6002_v63 = vpop.f32.mrf.mxu3  ;;  %7006 = vmatmul.bf16.gmra.mxu2 %v6601_v33  ;;  %7095 = vmatmul.bf16.gmra.mxu0 %v6665_v57 }
 0x69d   : > { %v6003_v10 = vadd.f32 %v6002_v63, %v11372_v50  ;;  %v6511_v7 = vunpack.c.l.b16 %v6188_v52  ;;  %v8237_v15 = vrot.slane %v6188_v52, 9  ;;  %v8253_v21 = vrot.slane %v6188_v52, 10 }
 0x69f   : > { %v6098_v38 = vmax.f32 %v6003_v10, 0.0 }
 0x6a1   : > { %v6189_v26 = vpack.c.bf16 %v6098_v38, %v6098_v38  ;;  %v11743_v38 = vpop.f32.mrf.mxu2 }
 0x6a3   : > { %v6311_v32 = vrot.slane %v6189_v26, 5  ;;  %v6426_v14 = vrot.slane %v6189_v26, 6  ;;  %v6512_v51 = vunpack.c.l.b16 %v6189_v26 }
 0x6a4   : > { %v6004_v0 = vpop.f32.mrf.mxu3 }
 0x6a5   : > { %v6005_v28 = vadd.f32 %v6004_v0, %v11389_v19  ;;  %v6538_v59 = vpack.c.b16 %v6512_v51, %v6511_v7  ;;  %v6312_v42 = vsel %vm9324_vm5, %v8237_v15, %v6311_v32  ;;  %v6427_v16 = vsel %vm11616_vm11, %v8253_v21, %v6426_v14  ;;  %v11749_v51 = vld [vmem:[%s12114_s8] ss:$0 sm:$0xff] }
 0x6a6   : > { %v6313_v6 = vrot.slane %v6311_v32, 4  ;;  %v6428_v2 = vrot.slane %v6426_v14, 4  ;;  %v6575_v30 = vunpack.c.l.b16 %v6312_v42  ;;  %v6639_v33 = vunpack.c.l.b16 %v6427_v16 }
 0x6a7   : > { %v6099_v50 = vmax.f32 %v6005_v28, 0.0  ;;  %6922 = vmatmul.bf16.gmra.mxu1 %v6538_v59 }
 0x6a9   : > { %v6147_v9 = vmul.f32 %v11629_v46, %v6099_v50  ;;  %6046 = vmatmul.bf16.gmra.mxu3 %v11463_v56  ;;  %v11739_v56 = vpop.f32.mrf.mxu1 }
 0x6ab   : > { %v6215_v54 = vpack.c.bf16 %v6147_v9, %v6147_v9  ;;  %v12616_v9 = vld [vmem:[#allocation10_spill] sm:$0xff] }
 0x6ac   : > { %v6007_v61 = vpop.f32.mrf.mxu3 }
 0x6ad   : > { %v6314_v35 = vrot.slane %v6215_v54, 5  ;;  %v6429_v44 = vrot.slane %v6215_v54, 6  ;;  %v6008_v19 = vadd.f32 %v6007_v61, %v11402_v25  ;;  %v7254_v54 = vrot.slane %v12616_v9, 3 }
 0x6af   : > { %v6100_v4 = vmax.f32 %v6008_v19, 0.0  ;;  %v6315_v24 = vsel %vm9324_vm5, %v6313_v6, %v6314_v35  ;;  %v6430_v23 = vsel %vm11616_vm11, %v6428_v2, %v6429_v44  ;;  %v12617_v6 = vld [vmem:[#allocation11_spill] sm:$0xff] }
 0x6b0   : > { %v6576_v47 = vunpack.c.l.b16 %v6315_v24  ;;  %v6640_v57 = vunpack.c.l.b16 %v6430_v23  ;;  %v7255_v61 = vrot.slane %v12617_v6, 3 }
 0x6b1   : > { %v6148_v10 = vmul.f32 %v11599_v39, %v6100_v4  ;;  %v6898_v14 = vpop.f32.mrf.mxu1 }
 0x6b2   : > { %v6602_v11 = vpack.c.b16 %v6576_v47, %v6575_v30  ;;  %v6666_v63 = vpack.c.b16 %v6640_v57, %v6639_v33  ;;  %v7256_v23 = vsel %vm7253_vm13, %v7254_v54, %v7255_v61 }
 0x6b3   : > { %v6190_v26 = vpack.c.bf16 %v6148_v10, %v6148_v10  ;;  %v12618_v10 = vld [vmem:[#allocation12_spill] sm:$0xff] }
 0x6b4   : > { %v6009_v52 = vpop.f32.mrf.mxu3  ;;  %7011 = vmatmul.bf16.gmra.mxu2 %v6602_v11  ;;  %7100 = vmatmul.bf16.gmra.mxu0 %v6666_v63 }
 0x6b5   : > { %v6010_v25 = vadd.f32 %v6009_v52, %v11412_v5  ;;  %v6513_v0 = vunpack.c.l.b16 %v6190_v26  ;;  %v8238_v59 = vrot.slane %v6190_v26, 9  ;;  %v8254_v42 = vrot.slane %v6190_v26, 10 }
 0x6b6   : > { %v7257_v52 = vrot.slane %v12618_v10, 3 }
 0x6b7   : > { %v6101_v32 = vmax.f32 %v6010_v25, 0.0 }
 0x6b9   : > { %v6191_v7 = vpack.c.bf16 %v6101_v32, %v6101_v32  ;;  %6051 = vmatmul.bf16.gmra.mxu3 %v11480_v49  ;;  %v6899_v49 = vadd.f32 %v11749_v51, %v6898_v14  ;;  %v7076_v44 = vpop.f32.mrf.mxu0  ;;  %v6900_v47 = vpop.f32.mrf.mxu1 }
 0x6bb   : > { %v6318_v15 = vrot.slane %v6191_v7, 5  ;;  %v6433_v21 = vrot.slane %v6191_v7, 6  ;;  %v6514_v28 = vunpack.c.l.b16 %v6191_v7  ;;  %v6901_v7 = vadd.f32 %v11749_v51, %v6900_v47 }
 0x6bc   : > { %v6012_v5 = vpop.f32.mrf.mxu3 }
 0x6bd   : > { %v6013_v16 = vadd.f32 %v6012_v5, %v11422_v40  ;;  %v6539_v50 = vpack.c.b16 %v6514_v28, %v6513_v0  ;;  %v6319_v2 = vsel %vm9324_vm5, %v8238_v59, %v6318_v15  ;;  %v6434_v35 = vsel %vm11616_vm11, %v8254_v42, %v6433_v21 }
 0x6be   : > { %v6320_v57 = vrot.slane %v6318_v15, 4  ;;  %v6435_v25 = vrot.slane %v6433_v21, 4  ;;  %v6577_v5 = vunpack.c.l.b16 %v6319_v2  ;;  %v6641_v21 = vunpack.c.l.b16 %v6434_v35 }
 0x6bf   : > { %v6102_v19 = vmax.f32 %v6013_v16, 0.0  ;;  %6927 = vmatmul.bf16.gmra.mxu1 %v6539_v50  ;;  %v6987_v4 = vpop.f32.mrf.mxu2 }
 0x6c0   : > { %v6988_v24 = vadd.f32 %v6987_v4, %v6899_v49 }
 0x6c1   : > { %v6150_v40 = vmul.f32 %v11629_v46, %v6102_v19  ;;  %v7078_v54 = vpop.f32.mrf.mxu0 }
 0x6c2   : > { %v7077_v30 = vadd.f32 %v7076_v44, %v6988_v24  ;;  %v12619_v24 = vld [vmem:[#allocation41_spill] sm:$0xff] }
 0x6c3   : > { %v6216_v33 = vpack.c.bf16 %v6150_v40, %v6150_v40 }
 0x6c4   : > { %v7366_v11 = vadd.f32 %v7256_v23, %v7077_v30  ;;  %v6014_v63 = vpop.f32.mrf.mxu3  ;;  %v6903_v47 = vpop.f32.mrf.mxu1 }
 0x6c5   : > { %v6321_v26 = vrot.slane %v6216_v33, 5  ;;  %v6436_v32 = vrot.slane %v6216_v33, 6  ;;  %v6015_v14 = vadd.f32 %v6014_v63, %v11431_v29  ;;  %v7258_v29 = vsel %vm7253_vm13, %v7255_v61, %v7257_v52 }
 0x6c6   : > { %v7398_v0 = vmax.f32 %v7366_v11, 0.0 }
 0x6c7   : > { %v6103_v28 = vmax.f32 %v6015_v14, 0.0  ;;  %v6989_v59 = vpop.f32.mrf.mxu2  ;;  %v6322_v42 = vsel %vm9324_vm5, %v6320_v57, %v6321_v26  ;;  %v6437_v15 = vsel %vm11616_vm11, %v6435_v25, %v6436_v32  ;;  %v12620_v25 = vld [vmem:[#allocation93_spill] sm:$0xff] }
 0x6c8   : > { %7430 = vst [vmem:[%s9053_s29] sm:$0xff] %v7398_v0  ;;  %v6990_v16 = vadd.f32 %v6989_v59, %v6901_v7  ;;  %v6578_v50 = vunpack.c.l.b16 %v6322_v42  ;;  %v6642_v9 = vunpack.c.l.b16 %v6437_v15  ;;  %v12621_v14 = vld [vmem:[#allocation13_spill] sm:$0xff]  ;;  %v12622_v0 = vld [vmem:[#allocation14_spill] sm:$0xff]  ;;  %v6904_v59 = vadd.f32 %v11749_v51, %v6903_v47 }
 0x6c9   : > { %6056 = vmatmul.bf16.gmra.mxu3 %v11496_v20  ;;  %v6151_v19 = vmul.f32 %v11599_v39, %v6103_v28  ;;  %v7259_v7 = vrot.slane %v12621_v14, 3  ;;  %v7260_v28 = vrot.slane %v12622_v0, 3 }
 0x6ca   : > { %v7079_v6 = vadd.f32 %v7078_v54, %v6990_v16  ;;  %v6603_v49 = vpack.c.b16 %v6578_v50, %v6577_v5  ;;  %v6667_v44 = vpack.c.b16 %v6642_v9, %v6641_v21 }
 0x6cb   : > { %v6192_v35 = vpack.c.bf16 %v6151_v19, %v6151_v19  ;;  %v7261_v54 = vsel %vm7253_vm13, %v7259_v7, %v7260_v28 }
 0x6cc   : > { %v7367_v2 = vadd.f32 %v7258_v29, %v7079_v6  ;;  %v6017_v4 = vpop.f32.mrf.mxu3  ;;  %7016 = vmatmul.bf16.gmra.mxu2 %v6603_v49  ;;  %7105 = vmatmul.bf16.gmra.mxu0 %v6667_v44  ;;  %v6905_v6 = vpop.f32.mrf.mxu1 }
 0x6cd   : > { %v6018_v40 = vadd.f32 %v6017_v4, %v12619_v24  ;;  %v6515_v20 = vunpack.c.l.b16 %v6192_v35  ;;  %v8239_v63 = vrot.slane %v6192_v35, 9  ;;  %v8255_v10 = vrot.slane %v6192_v35, 10  ;;  %v12623_v4 = vld [vmem:[#allocation15_spill] sm:$0xff] }
 0x6ce   : > { %v7399_v23 = vmax.f32 %v7367_v2, 0.0  ;;  %v7262_v24 = vrot.slane %v12623_v4, 3  ;;  %v6906_v47 = vadd.f32 %v11749_v51, %v6905_v6 }
 0x6cf   : > { %v6104_v30 = vmax.f32 %v6018_v40, 0.0 }
 0x6d0   : > { %7431 = vst [vmem:[%s9053_s29 + $0x8] sm:$0xff] %v7399_v23  ;;  %v7263_v14 = vsel %vm7253_vm13, %v7260_v28, %v7262_v24  ;;  %v12625_v28 = vpack.c.b16 %v11536_v12, %v11534_v53  ;;  %v12627_v24 = vld [vmem:[#allocation16_spill] sm:$0xff] }
 0x6d1   : > { %v6193_v33 = vpack.c.bf16 %v6104_v30, %v6104_v30  ;;  %v7081_v15 = vpop.f32.mrf.mxu0  ;;  %v12629_v12 = vld [vmem:[#allocation92_spill] sm:$0xff] }
 0x6d3   : > { %v6325_v61 = vrot.slane %v6193_v33, 5  ;;  %v6440_v57 = vrot.slane %v6193_v33, 6  ;;  %v6516_v11 = vunpack.c.l.b16 %v6193_v33 }
 0x6d4   : > { %v6019_v52 = vpop.f32.mrf.mxu3 }
 0x6d5   : > { %v6020_v26 = vadd.f32 %v6019_v52, %v12620_v25  ;;  %v6540_v32 = vpack.c.b16 %v6516_v11, %v6515_v20  ;;  %v6326_v42 = vsel %vm9324_vm5, %v8239_v63, %v6325_v61  ;;  %v6441_v5 = vsel %vm11616_vm11, %v8255_v10, %v6440_v57 }
 0x6d6   : > { %v6327_v44 = vrot.slane %v6325_v61, 4  ;;  %v6442_v40 = vrot.slane %v6440_v57, 4  ;;  %v6579_v63 = vunpack.c.l.b16 %v6326_v42  ;;  %v6643_v57 = vunpack.c.l.b16 %v6441_v5 }
 0x6d7   : > { %v6105_v16 = vmax.f32 %v6020_v26, 0.0  ;;  %6932 = vmatmul.bf16.gmra.mxu1 %v6540_v32  ;;  %v6992_v50 = vpop.f32.mrf.mxu2  ;;  %v12624_v26 = vld [vmem:[#allocation90_spill] sm:$0xff] }
 0x6d8   : > { %v6993_v21 = vadd.f32 %v6992_v50, %v6904_v59 }
 0x6d9   : > { %v6153_v9 = vmul.f32 %v11629_v46, %v6105_v16  ;;  %6061 = vmatmul.bf16.gmra.mxu3 %v11518_v36  ;;  %v7083_v32 = vpop.f32.mrf.mxu0 }
 0x6da   : > { %v7082_v29 = vadd.f32 %v7081_v15, %v6993_v21 }
 0x6db   : > { %v6217_v49 = vpack.c.bf16 %v6153_v9, %v6153_v9 }
 0x6dc   : > { %v7368_v19 = vadd.f32 %v7261_v54, %v7082_v29  ;;  %v6022_v2 = vpop.f32.mrf.mxu3  ;;  %v6908_v29 = vpop.f32.mrf.mxu1 }
 0x6dd   : > { %v6328_v23 = vrot.slane %v6217_v49, 5  ;;  %v6443_v35 = vrot.slane %v6217_v49, 6  ;;  %v6023_v30 = vadd.f32 %v6022_v2, %v11473_v60  ;;  %v5767_v60 = vadd.f32 %v11606_v45, %v12624_v26 }
 0x6de   : > { %v7400_v33 = vmax.f32 %v7368_v19, 0.0  ;;  %v12626_v19 = vld [vmem:[#allocation49_spill] sm:$0xff] }
 0x6df   : > { %v6106_v20 = vmax.f32 %v6023_v30, 0.0  ;;  %v6994_v11 = vpop.f32.mrf.mxu2  ;;  %v6329_v36 = vsel %vm9324_vm5, %v6327_v44, %v6328_v23  ;;  %v6444_v61 = vsel %vm11616_vm11, %v6442_v40, %v6443_v35  ;;  %v5896_v42 = vadd.f32 %v11478_v43, %v5767_v60  ;;  %v12628_v23 = vld [vmem:[#allocation17_spill] sm:$0xff] }
 0x6e0   : > { %7432 = vst [vmem:[%s9053_s29 + $0x10] sm:$0xff] %v7400_v33  ;;  %v6995_v10 = vadd.f32 %v6994_v11, %v6906_v47  ;;  %v6580_v52 = vunpack.c.l.b16 %v6329_v36  ;;  %v6644_v25 = vunpack.c.l.b16 %v6444_v61  ;;  %v7264_v40 = vrot.slane %v12627_v24, 3 }
 0x6e1   : > { %v6154_v15 = vmul.f32 %v11599_v39, %v6106_v20  ;;  %v7265_v35 = vrot.slane %v12628_v23, 3  ;;  %v6909_v30 = vadd.f32 %v11749_v51, %v6908_v29 }
 0x6e2   : > { %v7084_v7 = vadd.f32 %v7083_v32, %v6995_v10  ;;  %v6604_v0 = vpack.c.b16 %v6580_v52, %v6579_v63  ;;  %v6668_v59 = vpack.c.b16 %v6644_v25, %v6643_v57  ;;  %v5772_v63 = vadd.f32 %v11606_v45, %v12629_v12  ;;  %v12630_v25 = vld [vmem:[#allocation95_spill] sm:$0xff] }
 0x6e3   : > { %v6194_v9 = vpack.c.bf16 %v6154_v15, %v6154_v15  ;;  %v7266_v10 = vsel %vm7253_vm13, %v7264_v40, %v7265_v35 }
 0x6e4   : > { %v7369_v16 = vadd.f32 %v7263_v14, %v7084_v7  ;;  %v6024_v50 = vpop.f32.mrf.mxu3  ;;  %7021 = vmatmul.bf16.gmra.mxu2 %v6604_v0  ;;  %7110 = vmatmul.bf16.gmra.mxu0 %v6668_v59  ;;  %v5901_v26 = vadd.f32 %v12630_v25, %v5772_v63  ;;  %v6910_v32 = vpop.f32.mrf.mxu1  ;;  %v12631_v7 = vld [vmem:[#allocation18_spill] sm:$0xff] }
 0x6e5   : > { %v6025_v5 = vadd.f32 %v6024_v50, %v5896_v42  ;;  %v6517_v49 = vunpack.c.l.b16 %v6194_v9  ;;  %v8240_v52 = vrot.slane %v6194_v9, 9  ;;  %v8256_v60 = vrot.slane %v6194_v9, 10  ;;  %v12633_v63 = vld [vmem:[#allocation94_spill] sm:$0xff] }
 0x6e6   : > { %v7401_v21 = vmax.f32 %v7369_v16, 0.0  ;;  %v7267_v0 = vrot.slane %v12631_v7, 3  ;;  %v6911_v9 = vadd.f32 %v11749_v51, %v6910_v32 }
 0x6e7   : > { %v6107_v54 = vmax.f32 %v6025_v5, 0.0 }
 0x6e8   : > { %7433 = vst [vmem:[%s9053_s29 + $0x18] sm:$0xff] %v7401_v21 }
 0x6e9   : > { %v6195_v6 = vpack.c.bf16 %v6107_v54, %v6107_v54  ;;  %6066 = vmatmul.bf16.gmra.mxu3 %v12625_v28  ;;  %v7086_v47 = vpop.f32.mrf.mxu0 }
 0x6eb   : > { %v6518_v44 = vunpack.c.l.b16 %v6195_v6  ;;  %v6332_v11 = vrot.slane %v6195_v6, 5  ;;  %v6447_v36 = vrot.slane %v6195_v6, 6 }
 0x6ec   : > { %v6027_v43 = vpop.f32.mrf.mxu3 }
 0x6ed   : > { %v6028_v2 = vadd.f32 %v6027_v43, %v12626_v19  ;;  %v6541_v4 = vpack.c.b16 %v6518_v44, %v6517_v49  ;;  %v6334_v59 = vrot.slane %v6332_v11, 4  ;;  %v6449_v42 = vrot.slane %v6447_v36, 4 }
 0x6ee   : > { %v6333_v50 = vsel %vm9324_vm5, %v8240_v52, %v6332_v11  ;;  %v6448_v29 = vsel %vm11616_vm11, %v8256_v60, %v6447_v36 }
 0x6ef   : > { %v6108_v33 = vmax.f32 %v6028_v2, 0.0  ;;  %6937 = vmatmul.bf16.gmra.mxu1 %v6541_v4  ;;  %v6997_v20 = vpop.f32.mrf.mxu2  ;;  %v6581_v43 = vunpack.c.l.b16 %v6333_v50  ;;  %v6645_v24 = vunpack.c.l.b16 %v6448_v29 }
 0x6f0   : > { %v6998_v53 = vadd.f32 %v6997_v20, %v6909_v30  ;;  %v7268_v30 = vsel %vm7253_vm13, %v7265_v35, %v7267_v0  ;;  %v12634_v35 = vld [vmem:[#allocation45_spill] sm:$0xff] }
 0x6f1   : > { %v6156_v61 = vmul.f32 %v11629_v46, %v6108_v33  ;;  %v7088_v23 = vpop.f32.mrf.mxu0  ;;  %v5777_v25 = vadd.f32 %v11606_v45, %v12634_v35 }
 0x6f2   : > { %v7087_v57 = vadd.f32 %v7086_v47, %v6998_v53  ;;  %v12632_v47 = vpack.c.b16 %v11563_v3, %v11561_v13 }
 0x6f3   : > { %v6218_v14 = vpack.c.bf16 %v6156_v61, %v6156_v61 }
 0x6f4   : > { %v7370_v15 = vadd.f32 %v7266_v10, %v7087_v57  ;;  %v6029_v16 = vpop.f32.mrf.mxu3  ;;  %v6913_v13 = vpop.f32.mrf.mxu1 }
 0x6f5   : > { %v6335_v5 = vrot.slane %v6218_v14, 5  ;;  %v6450_v21 = vrot.slane %v6218_v14, 6  ;;  %v6030_v54 = vadd.f32 %v6029_v16, %v5901_v26  ;;  %v12635_v26 = vld [vmem:[#allocation99_spill] sm:$0xff]  ;;  %v12637_v16 = vld [vmem:[#allocation20_spill] sm:$0xff] }
 0x6f6   : > { %v7402_v6 = vmax.f32 %v7370_v15, 0.0  ;;  %v5906_v60 = vadd.f32 %v12635_v26, %v5777_v25  ;;  %v7270_v50 = vrot.slane %v12637_v16, 3 }
 0x6f7   : > { %v6109_v28 = vmax.f32 %v6030_v54, 0.0  ;;  %v6999_v49 = vpop.f32.mrf.mxu2  ;;  %v6336_v44 = vsel %vm9324_vm5, %v6334_v59, %v6335_v5  ;;  %v6451_v19 = vsel %vm11616_vm11, %v6449_v42, %v6450_v21  ;;  %v12636_v42 = vld [vmem:[#allocation19_spill] sm:$0xff]  ;;  %v6914_v5 = vadd.f32 %v11749_v51, %v6913_v13 }
 0x6f8   : > { %7434 = vst [vmem:[%s9053_s29 + $0x20] sm:$0xff] %v7402_v6  ;;  %v7000_v2 = vadd.f32 %v6999_v49, %v6911_v9  ;;  %v6582_v4 = vunpack.c.l.b16 %v6336_v44  ;;  %v6646_v40 = vunpack.c.l.b16 %v6451_v19  ;;  %v7269_v15 = vrot.slane %v12636_v42, 3  ;;  %v12638_v44 = vld [vmem:[#allocation105_spill] sm:$0xff]  ;;  %v12643_v42 = vld [vmem:[#allocation96_spill] sm:$0xff] }
 0x6f9   : > { %6071 = vmatmul.bf16.gmra.mxu3 %v12632_v47  ;;  %v6157_v36 = vmul.f32 %v11599_v39, %v6109_v28 }
 0x6fa   : > { %v7089_v33 = vadd.f32 %v7088_v23, %v7000_v2  ;;  %v6605_v20 = vpack.c.b16 %v6582_v4, %v6581_v43  ;;  %v6669_v11 = vpack.c.b16 %v6646_v40, %v6645_v24  ;;  %v7271_v49 = vsel %vm7253_vm13, %v7269_v15, %v7270_v50  ;;  %v12639_v43 = vld [vmem:[#allocation106_spill] sm:$0xff] }
 0x6fb   : > { %v6196_v52 = vpack.c.bf16 %v6157_v36, %v6157_v36  ;;  %v12640_v19 = vpack.c.b16 %v12638_v44, %v12639_v43 }
 0x6fc   : > { %v7371_v53 = vadd.f32 %v7268_v30, %v7089_v33  ;;  %v6032_v12 = vpop.f32.mrf.mxu3  ;;  %7026 = vmatmul.bf16.gmra.mxu2 %v6605_v20  ;;  %7115 = vmatmul.bf16.gmra.mxu0 %v6669_v11  ;;  %v6915_v40 = vpop.f32.mrf.mxu1  ;;  %v12641_v30 = vld [vmem:[#allocation21_spill] sm:$0xff] }
 0x6fd   : > { %v6033_v61 = vadd.f32 %v6032_v12, %v12633_v63  ;;  %v6519_v32 = vunpack.c.l.b16 %v6196_v52  ;;  %v8241_v2 = vrot.slane %v6196_v52, 9  ;;  %v8257_v24 = vrot.slane %v6196_v52, 10 }
 0x6fe   : > { %v7403_v10 = vmax.f32 %v7371_v53, 0.0  ;;  %v7272_v47 = vrot.slane %v12641_v30, 3  ;;  %v6916_v52 = vadd.f32 %v11749_v51, %v6915_v40  ;;  %v12645_v30 = vld [vmem:[#allocation103_spill] sm:$0xff] }
 0x6ff   : > { %v6110_v57 = vmax.f32 %v6033_v61, 0.0  ;;  %v12642_v61 = vld [vmem:[#allocation98_spill] sm:$0xff] }
 0x700   : > { %7435 = vst [vmem:[%s9053_s29 + $0x28] sm:$0xff] %v7403_v10 }
 0x701   : > { %v6197_v3 = vpack.c.bf16 %v6110_v57, %v6110_v57  ;;  %v7091_v21 = vpop.f32.mrf.mxu0 }
 0x703   : > { %v6520_v14 = vunpack.c.l.b16 %v6197_v3  ;;  %v6339_v45 = vrot.slane %v6197_v3, 5  ;;  %v6454_v9 = vrot.slane %v6197_v3, 6 }
 0x704   : > { %v6034_v7 = vpop.f32.mrf.mxu3 }
 0x705   : > { %v6035_v0 = vadd.f32 %v6034_v7, %v5906_v60  ;;  %v6542_v59 = vpack.c.b16 %v6520_v14, %v6519_v32  ;;  %v6341_v33 = vrot.slane %v6339_v45, 4  ;;  %v6456_v20 = vrot.slane %v6454_v9, 4 }
 0x706   : > { %v6340_v53 = vsel %vm9324_vm5, %v8241_v2, %v6339_v45  ;;  %v6455_v57 = vsel %vm11616_vm11, %v8257_v24, %v6454_v9  ;;  %v12644_v45 = vld [vmem:[#allocation97_spill] sm:$0xff] }
 0x707   : > { %v6111_v54 = vmax.f32 %v6035_v0, 0.0  ;;  %6942 = vmatmul.bf16.gmra.mxu1 %v6542_v59  ;;  %v7002_v29 = vpop.f32.mrf.mxu2  ;;  %v6583_v26 = vunpack.c.l.b16 %v6340_v53  ;;  %v6647_v7 = vunpack.c.l.b16 %v6455_v57  ;;  %v11855_v59 = vld [vmem:[%s12112_s6] ss:$0 sm:$0xff] }
 0x708   : > { %v7003_v6 = vadd.f32 %v7002_v29, %v6914_v5  ;;  %v5782_v15 = vadd.f32 %v11855_v59, %v12643_v42  ;;  %v7273_v5 = vsel %vm7253_vm13, %v7270_v50, %v7272_v47 }
 0x709   : > { %v6159_v28 = vmul.f32 %v11629_v46, %v6111_v54  ;;  %6076 = vmatmul.bf16.gmra.mxu3 %v12640_v19  ;;  %v7093_v16 = vpop.f32.mrf.mxu0 }
 0x70a   : > { %v7092_v4 = vadd.f32 %v7091_v21, %v7003_v6  ;;  %v5911_v9 = vadd.f32 %v12644_v45, %v5782_v15 }
 0x70b   : > { %v6219_v23 = vpack.c.bf16 %v6159_v28, %v6159_v28 }
 0x70c   : > { %v7372_v11 = vadd.f32 %v7271_v49, %v7092_v4  ;;  %v6037_v36 = vpop.f32.mrf.mxu3  ;;  %v6918_v4 = vpop.f32.mrf.mxu1 }
 0x70d   : > { %v6342_v12 = vrot.slane %v6219_v23, 5  ;;  %v6457_v63 = vrot.slane %v6219_v23, 6  ;;  %v6038_v10 = vadd.f32 %v6037_v36, %v12642_v61  ;;  %v12647_v36 = vld [vmem:[#allocation23_spill] sm:$0xff] }
 0x70e   : > { %v7404_v35 = vmax.f32 %v7372_v11, 0.0  ;;  %v7275_v53 = vrot.slane %v12647_v36, 3 }
 0x70f   : > { %v6112_v25 = vmax.f32 %v6038_v10, 0.0  ;;  %v7004_v13 = vpop.f32.mrf.mxu2  ;;  %v6343_v3 = vsel %vm9324_vm5, %v6341_v33, %v6342_v12  ;;  %v6458_v60 = vsel %vm11616_vm11, %v6456_v20, %v6457_v63  ;;  %v12646_v20 = vld [vmem:[#allocation22_spill] sm:$0xff]  ;;  %v6919_v12 = vadd.f32 %v11749_v51, %v6918_v4 }
 0x710   : > { %7436 = vst [vmem:[%s9053_s29 + $0x30] sm:$0xff] %v7404_v35  ;;  %v7005_v32 = vadd.f32 %v7004_v13, %v6916_v52  ;;  %v6584_v14 = vunpack.c.l.b16 %v6343_v3  ;;  %v6648_v0 = vunpack.c.l.b16 %v6458_v60  ;;  %v7274_v11 = vrot.slane %v12646_v20, 3 }
 0x711   : > { %v6160_v6 = vmul.f32 %v11599_v39, %v6112_v25  ;;  %v12648_v25 = vld [vmem:[#allocation53_spill] sm:$0xff] }
 0x712   : > { %v7094_v21 = vadd.f32 %v7093_v16, %v7005_v32  ;;  %v6606_v54 = vpack.c.b16 %v6584_v14, %v6583_v26  ;;  %v6670_v29 = vpack.c.b16 %v6648_v0, %v6647_v7  ;;  %v5787_v13 = vadd.f32 %v11855_v59, %v12648_v25  ;;  %v12649_v14 = vld [vmem:[#allocation101_spill] sm:$0xff]  ;;  %v12650_v16 = vld [vmem:[#allocation24_spill] sm:$0xff] }
 0x713   : > { %v6198_v19 = vpack.c.bf16 %v6160_v6, %v6160_v6  ;;  %v7276_v26 = vsel %vm7253_vm13, %v7274_v11, %v7275_v53 }
 0x714   : > { %v7373_v28 = vadd.f32 %v7273_v5, %v7094_v21  ;;  %v6039_v49 = vpop.f32.mrf.mxu3  ;;  %7031 = vmatmul.bf16.gmra.mxu2 %v6606_v54  ;;  %7120 = vmatmul.bf16.gmra.mxu0 %v6670_v29  ;;  %v5916_v7 = vadd.f32 %v12649_v14, %v5787_v13  ;;  %v6920_v42 = vpop.f32.mrf.mxu1  ;;  %v7277_v5 = vrot.slane %v12650_v16, 3  ;;  %v12653_v14 = vld [vmem:[#allocation57_spill] sm:$0xff] }
 0x715   : > { %v6040_v44 = vadd.f32 %v6039_v49, %v5911_v9  ;;  %v6521_v40 = vunpack.c.l.b16 %v6198_v19  ;;  %v8242_v60 = vrot.slane %v6198_v19, 9  ;;  %v8258_v0 = vrot.slane %v6198_v19, 10 }
 0x716   : > { %v7405_v43 = vmax.f32 %v7373_v28, 0.0  ;;  %v7278_v11 = vsel %vm7253_vm13, %v7275_v53, %v7277_v5 }
 0x717   : > { %v6113_v2 = vmax.f32 %v6040_v44, 0.0 }
 0x718   : > { %7437 = vst [vmem:[%s9053_s29 + $0x38] sm:$0xff] %v7405_v43  ;;  %v6921_v43 = vadd.f32 %v11749_v51, %v6920_v42 }
 0x719   : > { %v6199_v24 = vpack.c.bf16 %v6113_v2, %v6113_v2  ;;  %v7096_v63 = vpop.f32.mrf.mxu0 }
 0x71b   : > { %v6522_v50 = vunpack.c.l.b16 %v6199_v24  ;;  %v6346_v57 = vrot.slane %v6199_v24, 5  ;;  %v6461_v52 = vrot.slane %v6199_v24, 6 }
 0x71c   : > { %v6042_v23 = vpop.f32.mrf.mxu3 }
 0x71d   : > { %v6043_v47 = vadd.f32 %v6042_v23, %v12645_v30  ;;  %v6543_v33 = vpack.c.b16 %v6522_v50, %v6521_v40  ;;  %v6348_v21 = vrot.slane %v6346_v57, 4  ;;  %v6463_v54 = vrot.slane %v6461_v52, 4 }
 0x71e   : > { %v6347_v9 = vsel %vm9324_vm5, %v8242_v60, %v6346_v57  ;;  %v6462_v44 = vsel %vm11616_vm11, %v8258_v0, %v6461_v52  ;;  %v12651_v52 = vld [vmem:[#allocation104_spill] sm:$0xff] }
 0x71f   : > { %v6114_v61 = vmax.f32 %v6043_v47, 0.0  ;;  %6947 = vmatmul.bf16.gmra.mxu1 %v6543_v33  ;;  %v7007_v10 = vpop.f32.mrf.mxu2  ;;  %v6585_v40 = vunpack.c.l.b16 %v6347_v9  ;;  %v6649_v47 = vunpack.c.l.b16 %v6462_v44 }
 0x720   : > { %v7008_v35 = vadd.f32 %v7007_v10, %v6919_v12 }
 0x721   : > { %v6162_v3 = vmul.f32 %v11629_v46, %v6114_v61  ;;  %v7098_v20 = vpop.f32.mrf.mxu0 }
 0x722   : > { %v7097_v32 = vadd.f32 %v7096_v63, %v7008_v35 }
 0x723   : > { %v6220_v15 = vpack.c.bf16 %v6162_v3, %v6162_v3 }
 0x724   : > { %v7374_v29 = vadd.f32 %v7276_v26, %v7097_v32  ;;  %v6044_v45 = vpop.f32.mrf.mxu3  ;;  %v12652_v26 = vld [vmem:[#allocation102_spill] sm:$0xff]  ;;  %v6923_v32 = vpop.f32.mrf.mxu1 }
 0x725   : > { %v6349_v6 = vrot.slane %v6220_v15, 5  ;;  %v6464_v28 = vrot.slane %v6220_v15, 6  ;;  %v6045_v49 = vadd.f32 %v6044_v45, %v5916_v7  ;;  %v5792_v60 = vadd.f32 %v11855_v59, %v12652_v26 }
 0x726   : > { %v7406_v19 = vmax.f32 %v7374_v29, 0.0  ;;  %v12655_v29 = vld [vmem:[#allocation26_spill] sm:$0xff]  ;;  %v6924_v9 = vadd.f32 %v11749_v51, %v6923_v32 }
 0x727   : > { %v6115_v2 = vmax.f32 %v6045_v49, 0.0  ;;  %v7009_v4 = vpop.f32.mrf.mxu2  ;;  %v6350_v24 = vsel %vm9324_vm5, %v6348_v21, %v6349_v6  ;;  %v6465_v50 = vsel %vm11616_vm11, %v6463_v54, %v6464_v28  ;;  %v5921_v7 = vadd.f32 %v12653_v14, %v5792_v60  ;;  %v12654_v21 = vld [vmem:[#allocation25_spill] sm:$0xff] }
 0x728   : > { %7438 = vst [vmem:[%s9053_s29 + $0x40] sm:$0xff] %v7406_v19  ;;  %v7010_v23 = vadd.f32 %v7009_v4, %v6921_v43  ;;  %v6586_v30 = vunpack.c.l.b16 %v6350_v24  ;;  %v6650_v33 = vunpack.c.l.b16 %v6465_v50  ;;  %v7279_v54 = vrot.slane %v12654_v21, 3 }
 0x729   : > { %v6163_v61 = vmul.f32 %v11599_v39, %v6115_v2  ;;  %v7280_v45 = vrot.slane %v12655_v29, 3 }
 0x72a   : > { %v7099_v36 = vadd.f32 %v7098_v20, %v7010_v23  ;;  %v6607_v12 = vpack.c.b16 %v6586_v30, %v6585_v40  ;;  %v6671_v63 = vpack.c.b16 %v6650_v33, %v6649_v47  ;;  %v12656_v47 = vld [vmem:[#allocation27_spill] sm:$0xff] }
 0x72b   : > { %v6200_v13 = vpack.c.bf16 %v6163_v61, %v6163_v61  ;;  %v7281_v4 = vsel %vm7253_vm13, %v7279_v54, %v7280_v45  ;;  %v7282_v33 = vrot.slane %v12656_v47, 3 }
 0x72c   : > { %v7375_v10 = vadd.f32 %v7278_v11, %v7099_v36  ;;  %v6047_v57 = vpop.f32.mrf.mxu3  ;;  %7036 = vmatmul.bf16.gmra.mxu2 %v6607_v12  ;;  %7125 = vmatmul.bf16.gmra.mxu0 %v6671_v63  ;;  %v6925_v23 = vpop.f32.mrf.mxu1 }
 0x72d   : > { %v6048_v35 = vadd.f32 %v6047_v57, %v12651_v52  ;;  %v6523_v0 = vunpack.c.l.b16 %v6200_v13  ;;  %v8243_v24 = vrot.slane %v6200_v13, 9  ;;  %v8259_v50 = vrot.slane %v6200_v13, 10  ;;  %v12657_v57 = vld [vmem:[#allocation107_spill] sm:$0xff] }
 0x72e   : > { %v7407_v25 = vmax.f32 %v7375_v10, 0.0  ;;  %v7283_v21 = vsel %vm7253_vm13, %v7280_v45, %v7282_v33 }
 0x72f   : > { %v6116_v3 = vmax.f32 %v6048_v35, 0.0 }
 0x730   : > { %7439 = vst [vmem:[%s9053_s29 + $0x48] sm:$0xff] %v7407_v25  ;;  %v6926_v25 = vadd.f32 %v11749_v51, %v6925_v23 }
 0x731   : > { %v6201_v53 = vpack.c.bf16 %v6116_v3, %v6116_v3  ;;  %v7101_v6 = vpop.f32.mrf.mxu0 }
 0x733   : > { %v6524_v42 = vunpack.c.l.b16 %v6201_v53  ;;  %v6353_v44 = vrot.slane %v6201_v53, 5  ;;  %v6468_v43 = vrot.slane %v6201_v53, 6 }
 0x734   : > { %v6049_v15 = vpop.f32.mrf.mxu3 }
 0x735   : > { %v6050_v16 = vadd.f32 %v6049_v15, %v5921_v7  ;;  %v6544_v5 = vpack.c.b16 %v6524_v42, %v6523_v0  ;;  %v6355_v20 = vrot.slane %v6353_v44, 4  ;;  %v6470_v11 = vrot.slane %v6468_v43, 4  ;;  %v12658_v15 = vld [vmem:[#allocation100_spill] sm:$0xff] }
 0x736   : > { %v6354_v63 = vsel %vm9324_vm5, %v8243_v24, %v6353_v44  ;;  %v6469_v35 = vsel %vm11616_vm11, %v8259_v50, %v6468_v43 }
 0x737   : > { %v6117_v28 = vmax.f32 %v6050_v16, 0.0  ;;  %6952 = vmatmul.bf16.gmra.mxu1 %v6544_v5  ;;  %v7012_v49 = vpop.f32.mrf.mxu2  ;;  %v6587_v32 = vunpack.c.l.b16 %v6354_v63  ;;  %v6651_v0 = vunpack.c.l.b16 %v6469_v35  ;;  %v5797_v16 = vadd.f32 %v11855_v59, %v12658_v15 }
 0x738   : > { %v7013_v19 = vadd.f32 %v7012_v49, %v6924_v9 }
 0x739   : > { %v6165_v2 = vmul.f32 %v11629_v46, %v6117_v28  ;;  %v7103_v5 = vpop.f32.mrf.mxu0 }
 0x73a   : > { %v7102_v40 = vadd.f32 %v7101_v6, %v7013_v19  ;;  %v12659_v6 = vld [vmem:[#allocation109_spill] sm:$0xff] }
 0x73b   : > { %v6221_v30 = vpack.c.bf16 %v6165_v2, %v6165_v2  ;;  %v5926_v28 = vadd.f32 %v12659_v6, %v5797_v16 }
 0x73c   : > { %v7376_v36 = vadd.f32 %v7281_v4, %v7102_v40  ;;  %v6052_v12 = vpop.f32.mrf.mxu3  ;;  %v6928_v40 = vpop.f32.mrf.mxu1 }
 0x73d   : > { %v6356_v61 = vrot.slane %v6221_v30, 5  ;;  %v6471_v10 = vrot.slane %v6221_v30, 6  ;;  %v6053_v52 = vadd.f32 %v6052_v12, %v12657_v57  ;;  %v6929_v63 = vadd.f32 %v11749_v51, %v6928_v40 }
 0x73e   : > { %v7408_v13 = vmax.f32 %v7376_v36, 0.0  ;;  %v12661_v36 = vld [vmem:[#allocation29_spill] sm:$0xff] }
 0x73f   : > { %v6118_v3 = vmax.f32 %v6053_v52, 0.0  ;;  %v7014_v26 = vpop.f32.mrf.mxu2  ;;  %v6357_v60 = vsel %vm9324_vm5, %v6355_v20, %v6356_v61  ;;  %v6472_v53 = vsel %vm11616_vm11, %v6470_v11, %v6471_v10  ;;  %v12660_v20 = vld [vmem:[#allocation28_spill] sm:$0xff]  ;;  %v7285_v12 = vrot.slane %v12661_v36, 3 }
 0x740   : > { %7440 = vst [vmem:[%s9053_s29 + $0x50] sm:$0xff] %v7408_v13  ;;  %v7015_v14 = vadd.f32 %v7014_v26, %v6926_v25  ;;  %v6588_v7 = vunpack.c.l.b16 %v6357_v60  ;;  %v6652_v42 = vunpack.c.l.b16 %v6472_v53  ;;  %v7284_v11 = vrot.slane %v12660_v20, 3  ;;  %v12662_v13 = vld [vmem:[#allocation110_spill] sm:$0xff] }
 0x741   : > { %v6166_v49 = vmul.f32 %v11599_v39, %v6118_v3  ;;  %v5802_v3 = vadd.f32 %v11855_v59, %v12662_v13 }
 0x742   : > { %v7104_v54 = vadd.f32 %v7103_v5, %v7015_v14  ;;  %v6608_v29 = vpack.c.b16 %v6588_v7, %v6587_v32  ;;  %v6672_v9 = vpack.c.b16 %v6652_v42, %v6651_v0  ;;  %v12663_v42 = vld [vmem:[#allocation30_spill] sm:$0xff] }
 0x743   : > { %v6202_v4 = vpack.c.bf16 %v6166_v49, %v6166_v49  ;;  %v5931_v53 = vadd.f32 %v11642_v34, %v5802_v3  ;;  %v7287_v15 = vrot.slane %v12663_v42, 3 }
 0x744   : > { %v7377_v44 = vadd.f32 %v7283_v21, %v7104_v54  ;;  %v6054_v43 = vpop.f32.mrf.mxu3  ;;  %7041 = vmatmul.bf16.gmra.mxu2 %v6608_v29  ;;  %7130 = vmatmul.bf16.gmra.mxu0 %v6672_v9  ;;  %v6930_v7 = vpop.f32.mrf.mxu1 }
 0x745   : > { %v6055_v19 = vadd.f32 %v6054_v43, %v5926_v28  ;;  %v6525_v23 = vunpack.c.l.b16 %v6202_v4  ;;  %v8244_v60 = vrot.slane %v6202_v4, 9  ;;  %v8260_v14 = vrot.slane %v6202_v4, 10 }
 0x746   : > { %v7409_v2 = vmax.f32 %v7377_v44, 0.0  ;;  %v6931_v34 = vadd.f32 %v11749_v51, %v6930_v7 }
 0x747   : > { %v6119_v24 = vmax.f32 %v6055_v19, 0.0 }
 0x748   : > { %7441 = vst [vmem:[%s9053_s29 + $0x58] sm:$0xff] %v7409_v2 }
 0x749   : > { %v6203_v50 = vpack.c.bf16 %v6119_v24, %v6119_v24  ;;  %v7106_v61 = vpop.f32.mrf.mxu0 }
 0x74b   : > { %v6526_v45 = vunpack.c.l.b16 %v6203_v50  ;;  %v6360_v52 = vrot.slane %v6203_v50, 5  ;;  %v6475_v35 = vrot.slane %v6203_v50, 6 }
 0x74c   : > { %v6057_v30 = vpop.f32.mrf.mxu3 }
 0x74d   : > { %v6058_v47 = vadd.f32 %v6057_v30, %v11633_v55  ;;  %v6545_v33 = vpack.c.b16 %v6526_v45, %v6525_v23  ;;  %v7286_v55 = vsel %vm7253_vm13, %v7284_v11, %v7285_v12  ;;  %v6362_v16 = vrot.slane %v6360_v52, 4 }
 0x74e   : > { %v6477_v5 = vrot.slane %v6475_v35, 4  ;;  %v6361_v29 = vsel %vm9324_vm5, %v8244_v60, %v6360_v52  ;;  %v6476_v49 = vsel %vm11616_vm11, %v8260_v14, %v6475_v35  ;;  %v12664_v14 = vld [vmem:[#allocation31_spill] sm:$0xff] }
 0x74f   : > { %v6120_v10 = vmax.f32 %v6058_v47, 0.0  ;;  %6957 = vmatmul.bf16.gmra.mxu1 %v6545_v33  ;;  %v7017_v57 = vpop.f32.mrf.mxu2  ;;  %v6589_v4 = vunpack.c.l.b16 %v6361_v29  ;;  %v6653_v23 = vunpack.c.l.b16 %v6476_v49  ;;  %v7288_v47 = vsel %vm7253_vm13, %v7285_v12, %v7287_v15 }
 0x750   : > { %v7018_v25 = vadd.f32 %v7017_v57, %v6929_v63  ;;  %v7289_v7 = vrot.slane %v12664_v14, 3 }
 0x751   : > { %v6168_v26 = vmul.f32 %v11629_v46, %v6120_v10  ;;  %v7108_v30 = vpop.f32.mrf.mxu0 }
 0x752   : > { %v7107_v32 = vadd.f32 %v7106_v61, %v7018_v25  ;;  %v5807_v25 = vadd.f32 %v11855_v59, %v11644_v18 }
 0x753   : > { %v6222_v0 = vpack.c.bf16 %v6168_v26, %v6168_v26 }
 0x754   : > { %v7378_v21 = vadd.f32 %v7286_v55, %v7107_v32  ;;  %v6059_v54 = vpop.f32.mrf.mxu3  ;;  %v6933_v13 = vpop.f32.mrf.mxu1  ;;  %v5936_v3 = vadd.f32 %v11657_v62, %v5807_v25 }
 0x755   : > { %v6363_v9 = vrot.slane %v6222_v0, 5  ;;  %v6478_v6 = vrot.slane %v6222_v0, 6  ;;  %v6060_v28 = vadd.f32 %v6059_v54, %v5931_v53  ;;  %v12665_v0 = vld [vmem:[#allocation32_spill] sm:$0xff]  ;;  %v6934_v42 = vadd.f32 %v11749_v51, %v6933_v13 }
 0x756   : > { %v7410_v44 = vmax.f32 %v7378_v21, 0.0 }
 0x757   : > { %v6121_v43 = vmax.f32 %v6060_v28, 0.0  ;;  %v7019_v19 = vpop.f32.mrf.mxu2  ;;  %v6364_v2 = vsel %vm9324_vm5, %v6362_v16, %v6363_v9  ;;  %v6479_v24 = vsel %vm11616_vm11, %v6477_v5, %v6478_v6 }
 0x758   : > { %7442 = vst [vmem:[%s9053_s29 + $0x60] sm:$0xff] %v7410_v44  ;;  %v7020_v40 = vadd.f32 %v7019_v19, %v6931_v34  ;;  %v6590_v50 = vunpack.c.l.b16 %v6364_v2  ;;  %v6654_v45 = vunpack.c.l.b16 %v6479_v24  ;;  %v12666_v44 = vld [vmem:[#allocation33_spill] sm:$0xff] }
 0x759   : > { %v6169_v36 = vmul.f32 %v11599_v39, %v6121_v43  ;;  %v7292_v43 = vrot.slane %v12666_v44, 3 }
 0x75a   : > { %v7109_v33 = vadd.f32 %v7108_v30, %v7020_v40  ;;  %v6609_v20 = vpack.c.b16 %v6590_v50, %v6589_v4  ;;  %v6673_v11 = vpack.c.b16 %v6654_v45, %v6653_v23 }
 0x75b   : > { %v6204_v52 = vpack.c.bf16 %v6169_v36, %v6169_v36 }
 0x75c   : > { %v7379_v63 = vadd.f32 %v7288_v47, %v7109_v33  ;;  %v6062_v61 = vpop.f32.mrf.mxu3  ;;  %7046 = vmatmul.bf16.gmra.mxu2 %v6609_v20  ;;  %7135 = vmatmul.bf16.gmra.mxu0 %v6673_v11  ;;  %v6935_v49 = vpop.f32.mrf.mxu1 }
 0x75d   : > { %v6063_v10 = vadd.f32 %v6062_v61, %v11648_v41  ;;  %v6527_v26 = vunpack.c.l.b16 %v6204_v52  ;;  %v7290_v41 = vrot.slane %v12665_v0, 3  ;;  %v8245_v9 = vrot.slane %v6204_v52, 9 }
 0x75e   : > { %v7411_v57 = vmax.f32 %v7379_v63, 0.0  ;;  %v8261_v28 = vrot.slane %v6204_v52, 10  ;;  %v6936_v47 = vadd.f32 %v11749_v51, %v6935_v49 }
 0x75f   : > { %v6122_v35 = vmax.f32 %v6063_v10, 0.0  ;;  %v7291_v29 = vsel %vm7253_vm13, %v7289_v7, %v7290_v41  ;;  %v7293_v25 = vsel %vm7253_vm13, %v7290_v41, %v7292_v43 }
 0x760   : > { %7443 = vst [vmem:[%s9053_s29 + $0x68] sm:$0xff] %v7411_v57 }
 0x761   : > { %v6205_v12 = vpack.c.bf16 %v6122_v35, %v6122_v35  ;;  %v7111_v15 = vpop.f32.mrf.mxu0  ;;  %v5812_v35 = vadd.f32 %v11855_v59, %v11664_v17 }
 0x763   : > { %v6528_v55 = vunpack.c.l.b16 %v6205_v12  ;;  %v6367_v18 = vrot.slane %v6205_v12, 5  ;;  %v6482_v21 = vrot.slane %v6205_v12, 6 }
 0x764   : > { %v6064_v60 = vpop.f32.mrf.mxu3 }
 0x765   : > { %v6065_v32 = vadd.f32 %v6064_v60, %v5936_v3  ;;  %v6546_v53 = vpack.c.b16 %v6528_v55, %v6527_v26  ;;  %v6369_v19 = vrot.slane %v6367_v18, 4  ;;  %v6484_v2 = vrot.slane %v6482_v21, 4 }
 0x766   : > { %v6368_v40 = vsel %vm9324_vm5, %v8245_v9, %v6367_v18  ;;  %v6483_v30 = vsel %vm11616_vm11, %v8261_v28, %v6482_v21  ;;  %v5941_v26 = vadd.f32 %v11672_v48, %v5812_v35  ;;  %v12667_v48 = vld [vmem:[#allocation34_spill] sm:$0xff] }
 0x767   : > { %v6123_v16 = vmax.f32 %v6065_v32, 0.0  ;;  %6962 = vmatmul.bf16.gmra.mxu1 %v6546_v53  ;;  %v7022_v5 = vpop.f32.mrf.mxu2  ;;  %v6591_v63 = vunpack.c.l.b16 %v6368_v40  ;;  %v6655_v52 = vunpack.c.l.b16 %v6483_v30  ;;  %v7294_v21 = vrot.slane %v12667_v48, 3  ;;  %v12669_v30 = vld [vmem:[#allocation36_spill] sm:$0xff] }
 0x768   : > { %v7023_v54 = vadd.f32 %v7022_v5, %v6934_v42 }
 0x769   : > { %v6171_v62 = vmul.f32 %v11629_v46, %v6123_v16  ;;  %v7113_v51 = vpop.f32.mrf.mxu0 }
 0x76a   : > { %v7112_v6 = vadd.f32 %v7111_v15, %v7023_v54  ;;  %v12668_v54 = vld [vmem:[#allocation35_spill] sm:$0xff] }
 0x76b   : > { %v6223_v34 = vpack.c.bf16 %v6171_v62, %v6171_v62  ;;  %v7295_v62 = vrot.slane %v12668_v54, 3 }
 0x76c   : > { %v7380_v4 = vadd.f32 %v7291_v29, %v7112_v6  ;;  %v6067_v24 = vpop.f32.mrf.mxu3  ;;  %v6938_v17 = vpop.f32.mrf.mxu1  ;;  %v11969_v29 = vld [vmem:[%s12114_s8] ss:$0 sm:$0xff] }
 0x76d   : > { %v6370_v50 = vrot.slane %v6223_v34, 5  ;;  %v6485_v23 = vrot.slane %v6223_v34, 6  ;;  %v6068_v45 = vadd.f32 %v6067_v24, %v11668_v37  ;;  %v6939_v9 = vadd.f32 %v11969_v29, %v6938_v17 }
 0x76e   : > { %v7412_v33 = vmax.f32 %v7380_v4, 0.0 }
 0x76f   : > { %v6124_v20 = vmax.f32 %v6068_v45, 0.0  ;;  %v7024_v11 = vpop.f32.mrf.mxu2  ;;  %v6371_v36 = vsel %vm9324_vm5, %v6369_v19, %v6370_v50  ;;  %v6486_v61 = vsel %vm11616_vm11, %v6484_v2, %v6485_v23  ;;  %v7296_v2 = vsel %vm7253_vm13, %v7294_v21, %v7295_v62 }
 0x770   : > { %7444 = vst [vmem:[%s9053_s29 + $0x70] sm:$0xff] %v7412_v33  ;;  %v7025_v10 = vadd.f32 %v7024_v11, %v6936_v47  ;;  %v6592_v57 = vunpack.c.l.b16 %v6371_v36  ;;  %v6656_v37 = vunpack.c.l.b16 %v6486_v61  ;;  %v7297_v47 = vrot.slane %v12669_v30, 3 }
 0x771   : > { %v6172_v55 = vmul.f32 %v11599_v39, %v6124_v20 }
 0x772   : > { %v7114_v13 = vadd.f32 %v7113_v51, %v7025_v10  ;;  %v6610_v12 = vpack.c.b16 %v6592_v57, %v6591_v63  ;;  %v6674_v3 = vpack.c.b16 %v6656_v37, %v6655_v52 }
 0x773   : > { %v6206_v7 = vpack.c.bf16 %v6172_v55, %v6172_v55 }
 0x774   : > { %v7381_v60 = vadd.f32 %v7293_v25, %v7114_v13  ;;  %v6069_v32 = vpop.f32.mrf.mxu3  ;;  %7051 = vmatmul.bf16.gmra.mxu2 %v6610_v12  ;;  %7140 = vmatmul.bf16.gmra.mxu0 %v6674_v3  ;;  %v6940_v23 = vpop.f32.mrf.mxu1 }
 0x775   : > { %v6070_v53 = vadd.f32 %v6069_v32, %v5941_v26  ;;  %v6529_v15 = vunpack.c.l.b16 %v6206_v7  ;;  %v8246_v4 = vrot.slane %v6206_v7, 9  ;;  %v8262_v50 = vrot.slane %v6206_v7, 10 }
 0x776   : > { %v7413_v14 = vmax.f32 %v7381_v60, 0.0  ;;  %v7298_v32 = vsel %vm7253_vm13, %v7295_v62, %v7297_v47 }
 0x777   : > { %v6125_v0 = vmax.f32 %v6070_v53, 0.0 }
 0x778   : > { %7445 = vst [vmem:[%s9053_s29 + $0x78] sm:$0xff] %v7413_v14 }
 0x779   : > { %v6207_v42 = vpack.c.bf16 %v6125_v0, %v6125_v0  ;;  %v7116_v6 = vpop.f32.mrf.mxu0 }
 0x77b   : > { %v6530_v41 = vunpack.c.l.b16 %v6207_v42  ;;  %v6374_v34 = vrot.slane %v6207_v42, 5  ;;  %v6489_v44 = vrot.slane %v6207_v42, 6 }
 0x77c   : > { %v6072_v16 = vpop.f32.mrf.mxu3 }
 0x77d   : > { %v6073_v5 = vadd.f32 %v6072_v16, %v11681_v27  ;;  %v6547_v18 = vpack.c.b16 %v6530_v41, %v6529_v15  ;;  %v5817_v27 = vadd.f32 %v11855_v59, %v11684_v58  ;;  %v6376_v33 = vrot.slane %v6374_v34, 4 }
 0x77e   : > { %v6491_v20 = vrot.slane %v6489_v44, 4  ;;  %v6375_v58 = vsel %vm9324_vm5, %v8246_v4, %v6374_v34  ;;  %v6490_v57 = vsel %vm11616_vm11, %v8262_v50, %v6489_v44  ;;  %v12671_v44 = vld [vmem:[#allocation39_spill] sm:$0xff] }
 0x77f   : > { %v6126_v28 = vmax.f32 %v6073_v5, 0.0  ;;  %6967 = vmatmul.bf16.gmra.mxu1 %v6547_v18  ;;  %v7027_v49 = vpop.f32.mrf.mxu2  ;;  %v5946_v40 = vadd.f32 %v11692_v1, %v5817_v27  ;;  %v6941_v1 = vadd.f32 %v11969_v29, %v6940_v23  ;;  %v6593_v25 = vunpack.c.l.b16 %v6375_v58 }
 0x780   : > { %v7028_v43 = vadd.f32 %v7027_v49, %v6939_v9  ;;  %v6657_v26 = vunpack.c.l.b16 %v6490_v57  ;;  %v5822_v18 = vadd.f32 %v11855_v59, %v11739_v56  ;;  %v12670_v49 = vld [vmem:[#allocation38_spill] sm:$0xff] }
 0x781   : > { %v6174_v19 = vmul.f32 %v11629_v46, %v6126_v28  ;;  %v7118_v60 = vpop.f32.mrf.mxu0  ;;  %v7299_v34 = vrot.slane %v12670_v49, 3 }
 0x782   : > { %v7117_v24 = vadd.f32 %v7116_v6, %v7028_v43  ;;  %v5951_v54 = vadd.f32 %v11743_v38, %v5822_v18 }
 0x783   : > { %v6224_v45 = vpack.c.bf16 %v6174_v19, %v6174_v19 }
 0x784   : > { %v7382_v11 = vadd.f32 %v7296_v2, %v7117_v24  ;;  %v6074_v36 = vpop.f32.mrf.mxu3  ;;  %v6943_v48 = vpop.f32.mrf.mxu1 }
 0x785   : > { %v6377_v63 = vrot.slane %v6224_v45, 5  ;;  %v6492_v61 = vrot.slane %v6224_v45, 6  ;;  %v6075_v10 = vadd.f32 %v6074_v36, %v5946_v40  ;;  %v6944_v43 = vadd.f32 %v11969_v29, %v6943_v48 }
 0x786   : > { %v7414_v52 = vmax.f32 %v7382_v11, 0.0 }
 0x787   : > { %v6127_v37 = vmax.f32 %v6075_v10, 0.0  ;;  %v7029_v35 = vpop.f32.mrf.mxu2  ;;  %v6378_v51 = vsel %vm9324_vm5, %v6376_v33, %v6377_v63  ;;  %v6493_v13 = vsel %vm11616_vm11, %v6491_v20, %v6492_v61  ;;  %v12672_v20 = vld [vmem:[#allocation40_spill] sm:$0xff] }
 0x788   : > { %7446 = vst [vmem:[%s9053_s29 + $0x80] sm:$0xff] %v7414_v52  ;;  %v7030_v12 = vadd.f32 %v7029_v35, %v6941_v1  ;;  %v6594_v3 = vunpack.c.l.b16 %v6378_v51  ;;  %v6658_v55 = vunpack.c.l.b16 %v6493_v13  ;;  %v7302_v11 = vrot.slane %v12672_v20, 3 }
 0x789   : > { %v6175_v0 = vmul.f32 %v11599_v39, %v6127_v37 }
 0x78a   : > { %v7119_v53 = vadd.f32 %v7118_v60, %v7030_v12  ;;  %v6611_v14 = vpack.c.b16 %v6594_v3, %v6593_v25  ;;  %v6675_v7 = vpack.c.b16 %v6658_v55, %v6657_v26 }
 0x78b   : > { %v6208_v16 = vpack.c.bf16 %v6175_v0, %v6175_v0  ;;  %v12674_v0 = vld [vmem:[#allocation43_spill] sm:$0xff] }
 0x78c   : > { %v7383_v17 = vadd.f32 %v7298_v32, %v7119_v53  ;;  %v6077_v42 = vpop.f32.mrf.mxu3  ;;  %7056 = vmatmul.bf16.gmra.mxu2 %v6611_v14  ;;  %7145 = vmatmul.bf16.gmra.mxu0 %v6675_v7  ;;  %v6945_v45 = vpop.f32.mrf.mxu1  ;;  %v12673_v14 = vld [vmem:[#allocation42_spill] sm:$0xff] }
 0x78d   : > { %v6078_v15 = vadd.f32 %v6077_v42, %v11696_v8  ;;  %v6531_v62 = vunpack.c.l.b16 %v6208_v16  ;;  %v7300_v8 = vrot.slane %v12671_v44, 3  ;;  %v8247_v40 = vrot.slane %v6208_v16, 9 }
 0x78e   : > { %v7415_v41 = vmax.f32 %v7383_v17, 0.0  ;;  %v8263_v23 = vrot.slane %v6208_v16, 10  ;;  %v6946_v10 = vadd.f32 %v11969_v29, %v6945_v45  ;;  %v7304_v7 = vrot.slane %v12673_v14, 3 }
 0x78f   : > { %v6128_v5 = vmax.f32 %v6078_v15, 0.0  ;;  %v7301_v24 = vsel %vm7253_vm13, %v7299_v34, %v7300_v8  ;;  %v7303_v26 = vsel %vm7253_vm13, %v7300_v8, %v7302_v11  ;;  %v7305_v17 = vrot.slane %v12674_v0, 3 }
 0x790   : > { %7447 = vst [vmem:[%s9053_s29 + $0x88] sm:$0xff] %v7415_v41 }
 0x791   : > { %v6209_v21 = vpack.c.bf16 %v6128_v5, %v6128_v5  ;;  %v7121_v27 = vpop.f32.mrf.mxu0  ;;  %v7306_v5 = vsel %vm7253_vm13, %v7304_v7, %v7305_v17 }
 0x793   : > { %v6532_v9 = vunpack.c.l.b16 %v6209_v21  ;;  %v6381_v56 = vrot.slane %v6209_v21, 5  ;;  %v6496_v4 = vrot.slane %v6209_v21, 6 }
 0x794   : > { %v6079_v39 = vpop.f32.mrf.mxu3 }
 0x795   : > { %v6080_v6 = vadd.f32 %v6079_v39, %v5951_v54  ;;  %v6548_v28 = vpack.c.b16 %v6532_v9, %v6531_v62  ;;  %v6383_v47 = vrot.slane %v6381_v56, 4  ;;  %v6382_v36 = vsel %vm9324_vm5, %v8247_v40, %v6381_v56  ;;  %v12675_v54 = vld [vmem:[#allocation44_spill] sm:$0xff]  ;;  %v12677_v56 = vld [vmem:[#allocation47_spill] sm:$0xff] }
 0x796   : > { %v6498_v58 = vrot.slane %v6496_v4, 4  ;;  %v6595_v37 = vunpack.c.l.b16 %v6382_v36  ;;  %v7307_v62 = vrot.slane %v12675_v54, 3 }
 0x797   : > { %v6129_v19 = vmax.f32 %v6080_v6, 0.0  ;;  %6972 = vmatmul.bf16.gmra.mxu1 %v6548_v28  ;;  %v7032_v2 = vpop.f32.mrf.mxu2 }
 0x798   : > { %v7033_v59 = vadd.f32 %v7032_v2, %v6944_v43  ;;  %v7308_v34 = vsel %vm7253_vm13, %v7305_v17, %v7307_v62 }
 0x799   : > { %v6177_v38 = vmul.f32 %v11629_v46, %v6129_v19  ;;  %v6497_v46 = vsel %vm11616_vm11, %v8263_v23, %v6496_v4  ;;  %v7123_v3 = vpop.f32.mrf.mxu0  ;;  %v12676_v19 = vld [vmem:[#allocation46_spill] sm:$0xff] }
 0x79a   : > { %v7122_v50 = vadd.f32 %v7121_v27, %v7033_v59  ;;  %v6659_v13 = vunpack.c.l.b16 %v6497_v46  ;;  %v7309_v2 = vrot.slane %v12676_v19, 3  ;;  %v7310_v59 = vrot.slane %v12677_v56, 3 }
 0x79b   : > { %v6225_v30 = vpack.c.bf16 %v6177_v38, %v6177_v38 }
 0x79c   : > { %v7384_v33 = vadd.f32 %v7301_v24, %v7122_v50  ;;  %v6948_v22 = vpop.f32.mrf.mxu1  ;;  %v7311_v50 = vsel %vm7253_vm13, %v7309_v2, %v7310_v59 }
 0x79d   : > { %v6384_v63 = vrot.slane %v6225_v30, 5  ;;  %v6499_v61 = vrot.slane %v6225_v30, 6  ;;  %v6949_v42 = vadd.f32 %v11969_v29, %v6948_v22 }
 0x79e   : > { %v7416_v57 = vmax.f32 %v7384_v33, 0.0 }
 0x79f   : > { %v7034_v1 = vpop.f32.mrf.mxu2  ;;  %v6385_v52 = vsel %vm9324_vm5, %v6383_v47, %v6384_v63  ;;  %v6500_v35 = vsel %vm11616_vm11, %v6498_v58, %v6499_v61  ;;  %v12678_v47 = vld [vmem:[#allocation48_spill] sm:$0xff] }
 0x7a0   : > { %7448 = vst [vmem:[%s9053_s29 + $0x90] sm:$0xff] %v7416_v57  ;;  %v7035_v51 = vadd.f32 %v7034_v1, %v6946_v10  ;;  %v6596_v25 = vunpack.c.l.b16 %v6385_v52  ;;  %v6660_v12 = vunpack.c.l.b16 %v6500_v35  ;;  %v7312_v33 = vrot.slane %v12678_v47, 3  ;;  %v12679_v52 = vld [vmem:[#allocation50_spill] sm:$0xff]  ;;  %v12680_v35 = vld [vmem:[#allocation51_spill] sm:$0xff] }
 0x7a2   : > { %v7124_v55 = vadd.f32 %v7123_v3, %v7035_v51  ;;  %v6612_v60 = vpack.c.b16 %v6596_v25, %v6595_v37  ;;  %v6676_v32 = vpack.c.b16 %v6660_v12, %v6659_v13  ;;  %v7313_v61 = vsel %vm7253_vm13, %v7310_v59, %v7312_v33 }
 0x7a3   : > { %v7314_v37 = vrot.slane %v12679_v52, 3  ;;  %v7315_v51 = vrot.slane %v12680_v35, 3 }
 0x7a4   : > { %v7385_v53 = vadd.f32 %v7303_v26, %v7124_v55  ;;  %7061 = vmatmul.bf16.gmra.mxu2 %v6612_v60  ;;  %7150 = vmatmul.bf16.gmra.mxu0 %v6676_v32  ;;  %v6950_v48 = vpop.f32.mrf.mxu1 }
 0x7a5   : > { %v6951_v9 = vadd.f32 %v11969_v29, %v6950_v48  ;;  %v7316_v26 = vsel %vm7253_vm13, %v7314_v37, %v7315_v51 }
 0x7a6   : > { %v7417_v31 = vmax.f32 %v7385_v53, 0.0  ;;  %v12681_v53 = vld [vmem:[#allocation52_spill] sm:$0xff] }
 0x7a8   : > { %7449 = vst [vmem:[%s9053_s29 + $0x98] sm:$0xff] %v7417_v31  ;;  %v7317_v31 = vrot.slane %v12681_v53, 3 }
 0x7a9   : > { %v7126_v15 = vpop.f32.mrf.mxu0 }
 0x7af   : > { %v7037_v41 = vpop.f32.mrf.mxu2 }
 0x7b0   : > { %v7038_v16 = vadd.f32 %v7037_v41, %v6949_v42  ;;  %v7318_v42 = vsel %vm7253_vm13, %v7315_v51, %v7317_v31 }
 0x7b1   : > { %v7128_v49 = vpop.f32.mrf.mxu0 }
 0x7b2   : > { %v7127_v18 = vadd.f32 %v7126_v15, %v7038_v16 }
 0x7b4   : > { %v7386_v21 = vadd.f32 %v7306_v5, %v7127_v18  ;;  %v6953_v27 = vpop.f32.mrf.mxu1  ;;  %v12682_v18 = vld [vmem:[#allocation54_spill] sm:$0xff] }
 0x7b5   : > { %v6954_v4 = vadd.f32 %v11969_v29, %v6953_v27  ;;  %v7319_v48 = vrot.slane %v12682_v18, 3 }
 0x7b6   : > { %v7418_v39 = vmax.f32 %v7386_v21, 0.0  ;;  %v12683_v21 = vld [vmem:[#allocation55_spill] sm:$0xff] }
 0x7b7   : > { %v7039_v6 = vpop.f32.mrf.mxu2  ;;  %v7320_v54 = vrot.slane %v12683_v21, 3 }
 0x7b8   : > { %7450 = vst [vmem:[%s9053_s29 + $0xa0] sm:$0xff] %v7418_v39  ;;  %v7040_v28 = vadd.f32 %v7039_v6, %v6951_v9 }
 0x7ba   : > { %v7129_v44 = vadd.f32 %v7128_v49, %v7040_v28  ;;  %v7321_v28 = vsel %vm7253_vm13, %v7319_v48, %v7320_v54 }
 0x7bc   : > { %v7387_v8 = vadd.f32 %v7308_v34, %v7129_v44  ;;  %v6955_v45 = vpop.f32.mrf.mxu1 }
 0x7bd   : > { %v6956_v20 = vadd.f32 %v11969_v29, %v6955_v45 }
 0x7be   : > { %v7419_v43 = vmax.f32 %v7387_v8, 0.0  ;;  %v12684_v8 = vld [vmem:[#allocation56_spill] sm:$0xff] }
 0x7c0   : > { %7451 = vst [vmem:[%s9053_s29 + $0xa8] sm:$0xff] %v7419_v43  ;;  %v7322_v43 = vrot.slane %v12684_v8, 3 }
 0x7c1   : > { %v7131_v38 = vpop.f32.mrf.mxu0 }
 0x7c7   : > { %v7042_v24 = vpop.f32.mrf.mxu2 }
 0x7c8   : > { %v7043_v40 = vadd.f32 %v7042_v24, %v6954_v4  ;;  %v7323_v4 = vsel %vm7253_vm13, %v7320_v54, %v7322_v43 }
 0x7c9   : > { %v7133_v63 = vpop.f32.mrf.mxu0 }
 0x7ca   : > { %v7132_v23 = vadd.f32 %v7131_v38, %v7043_v40 }
 0x7cc   : > { %v7388_v30 = vadd.f32 %v7311_v50, %v7132_v23  ;;  %v6958_v1 = vpop.f32.mrf.mxu1  ;;  %v12685_v23 = vld [vmem:[#allocation58_spill] sm:$0xff] }
 0x7cd   : > { %v6959_v25 = vadd.f32 %v11969_v29, %v6958_v1  ;;  %v7324_v45 = vrot.slane %v12685_v23, 3 }
 0x7ce   : > { %v7420_v11 = vmax.f32 %v7388_v30, 0.0  ;;  %v12686_v30 = vld [vmem:[#allocation59_spill] sm:$0xff] }
 0x7cf   : > { %v7044_v36 = vpop.f32.mrf.mxu2  ;;  %v7325_v47 = vrot.slane %v12686_v30, 3 }
 0x7d0   : > { %7452 = vst [vmem:[%s9053_s29 + $0xb0] sm:$0xff] %v7420_v11  ;;  %v7045_v58 = vadd.f32 %v7044_v36, %v6956_v20 }
 0x7d2   : > { %v7134_v46 = vadd.f32 %v7133_v63, %v7045_v58  ;;  %v7326_v58 = vsel %vm7253_vm13, %v7324_v45, %v7325_v47 }
 0x7d4   : > { %v7389_v10 = vadd.f32 %v7313_v61, %v7134_v46  ;;  %v6960_v60 = vpop.f32.mrf.mxu1 }
 0x7d5   : > { %v6961_v22 = vadd.f32 %v11969_v29, %v6960_v60 }
 0x7d6   : > { %v7421_v57 = vmax.f32 %v7389_v10, 0.0  ;;  %v12687_v10 = vld [vmem:[#allocation60_spill] sm:$0xff] }
 0x7d8   : > { %7453 = vst [vmem:[%s9053_s29 + $0xb8] sm:$0xff] %v7421_v57  ;;  %v7327_v57 = vrot.slane %v12687_v10, 3 }
 0x7d9   : > { %v7136_v13 = vpop.f32.mrf.mxu0 }
 0x7df   : > { %v7047_v12 = vpop.f32.mrf.mxu2 }
 0x7e0   : > { %v7048_v3 = vadd.f32 %v7047_v12, %v6959_v25  ;;  %v7328_v25 = vsel %vm7253_vm13, %v7325_v47, %v7327_v57 }
 0x7e1   : > { %v7138_v17 = vpop.f32.mrf.mxu0 }
 0x7e2   : > { %v7137_v55 = vadd.f32 %v7136_v13, %v7048_v3 }
 0x7e4   : > { %v7390_v32 = vadd.f32 %v7316_v26, %v7137_v55  ;;  %v6963_v5 = vpop.f32.mrf.mxu1  ;;  %v12688_v55 = vld [vmem:[#allocation62_spill] sm:$0xff] }
 0x7e5   : > { %v6964_v62 = vadd.f32 %v11969_v29, %v6963_v5  ;;  %v7329_v60 = vrot.slane %v12688_v55, 3 }
 0x7e6   : > { %v7422_v14 = vmax.f32 %v7390_v32, 0.0  ;;  %v12689_v32 = vld [vmem:[#allocation63_spill] sm:$0xff] }
 0x7e7   : > { %v7049_v7 = vpop.f32.mrf.mxu2  ;;  %v7330_v53 = vrot.slane %v12689_v32, 3 }
 0x7e8   : > { %7454 = vst [vmem:[%s9053_s29 + $0xc0] sm:$0xff] %v7422_v14  ;;  %v7050_v0 = vadd.f32 %v7049_v7, %v6961_v22 }
 0x7ea   : > { %v7139_v15 = vadd.f32 %v7138_v17, %v7050_v0  ;;  %v7331_v0 = vsel %vm7253_vm13, %v7329_v60, %v7330_v53 }
 0x7ec   : > { %v7391_v41 = vadd.f32 %v7318_v42, %v7139_v15  ;;  %v6965_v34 = vpop.f32.mrf.mxu1 }
 0x7ed   : > { %v6966_v27 = vadd.f32 %v11969_v29, %v6965_v34 }
 0x7ee   : > { %v7423_v16 = vmax.f32 %v7391_v41, 0.0  ;;  %v12690_v41 = vld [vmem:[#allocation64_spill] sm:$0xff] }
 0x7f0   : > { %7455 = vst [vmem:[%s9053_s29 + $0xc8] sm:$0xff] %v7423_v16  ;;  %v7332_v16 = vrot.slane %v12690_v41, 3 }
 0x7f1   : > { %v7141_v9 = vpop.f32.mrf.mxu0 }
 0x7f7   : > { %v7052_v39 = vpop.f32.mrf.mxu2 }
 0x7f8   : > { %v7053_v6 = vadd.f32 %v7052_v39, %v6964_v62  ;;  %v7333_v62 = vsel %vm7253_vm13, %v7330_v53, %v7332_v16 }
 0x7f9   : > { %v7143_v59 = vpop.f32.mrf.mxu0 }
 0x7fa   : > { %v7142_v49 = vadd.f32 %v7141_v9, %v7053_v6 }
 0x7fc   : > { %v7392_v44 = vadd.f32 %v7321_v28, %v7142_v49  ;;  %v6968_v50 = vpop.f32.mrf.mxu1 }
 0x7fd   : > { %v6969_v33 = vadd.f32 %v11969_v29, %v6968_v50 }
 0x7fe   : > { %v7424_v19 = vmax.f32 %v7392_v44, 0.0 }
 0x7ff   : > { %v7054_v2 = vpop.f32.mrf.mxu2 }
 0x800   : > { %7456 = vst [vmem:[%s9053_s29 + $0xd0] sm:$0xff] %v7424_v19  ;;  %v7055_v56 = vadd.f32 %v7054_v2, %v6966_v27 }
 0x802   : > { %v7144_v38 = vadd.f32 %v7143_v59, %v7055_v56 }
 0x804   : > { %v7393_v24 = vadd.f32 %v7323_v4, %v7144_v38  ;;  %v6970_v61 = vpop.f32.mrf.mxu1 }
 0x805   : > { %v6971_v1 = vadd.f32 %v11969_v29, %v6970_v61 }
 0x806   : > { %v7425_v40 = vmax.f32 %v7393_v24, 0.0 }
 0x808   : > { %7457 = vst [vmem:[%s9053_s29 + $0xd8] sm:$0xff] %v7425_v40 }
 0x809   : > { %v7146_v20 = vpop.f32.mrf.mxu0 }
 0x80f   : > { %v7057_v11 = vpop.f32.mrf.mxu2 }
 0x810   : > { %v7058_v36 = vadd.f32 %v7057_v11, %v6969_v33 }
 0x811   : > { %v7148_v51 = vpop.f32.mrf.mxu0 }
 0x812   : > { %v7147_v63 = vadd.f32 %v7146_v20, %v7058_v36 }
 0x814   : > { %v7394_v46 = vadd.f32 %v7326_v58, %v7147_v63  ;;  %v6973_v26 = vpop.f32.mrf.mxu1 }
 0x815   : > { %v6974_v31 = vadd.f32 %v11969_v29, %v6973_v26 }
 0x816   : > { %v7426_v52 = vmax.f32 %v7394_v46, 0.0 }
 0x817   : > { %v7059_v37 = vpop.f32.mrf.mxu2 }
 0x818   : > { %7458 = vst [vmem:[%s9053_s29 + $0xe0] sm:$0xff] %v7426_v52  ;;  %v7060_v35 = vadd.f32 %v7059_v37, %v6971_v1 }
 0x81a   : > { %v7149_v13 = vadd.f32 %v7148_v51, %v7060_v35 }
 0x81c   : > { %v7395_v12 = vadd.f32 %v7328_v25, %v7149_v13  ;;  %v6975_v42 = vpop.f32.mrf.mxu1 }
 0x81d   : > { %v6976_v5 = vadd.f32 %v11969_v29, %v6975_v42 }
 0x81e   : > { %v7427_v3 = vmax.f32 %v7395_v12, 0.0 }
 0x820   : > { %7459 = vst [vmem:[%s9053_s29 + $0xe8] sm:$0xff] %v7427_v3 }
 0x821   : > { %v7151_v22 = vpop.f32.mrf.mxu0 }
 0x827   : > { %v7062_v14 = vpop.f32.mrf.mxu2 }
 0x828   : > { %v7063_v7 = vadd.f32 %v7062_v14, %v6974_v31 }
 0x829   : > { %v7153_v54 = vpop.f32.mrf.mxu0 }
 0x82a   : > { %v7152_v17 = vadd.f32 %v7151_v22, %v7063_v7 }
 0x82c   : > { %v7396_v15 = vadd.f32 %v7331_v0, %v7152_v17 }
 0x82e   : > { %v7428_v18 = vmax.f32 %v7396_v15, 0.0 }
 0x82f   : > { %v7064_v48 = vpop.f32.mrf.mxu2 }
 0x830   : > { %7460 = vst [vmem:[%s9053_s29 + $0xf0] sm:$0xff] %v7428_v18  ;;  %v7065_v21 = vadd.f32 %v7064_v48, %v6976_v5 }
 0x832   : > { %v7154_v9 = vadd.f32 %v7153_v54, %v7065_v21 }
 0x834   : > { %v7397_v39 = vadd.f32 %v7333_v62, %v7154_v9 }
 0x836   : > { %v7429_v29 = vmax.f32 %v7397_v39, 0.0 }
 0x838   : > { %7461 = vst [vmem:[%s9053_s29 + $0xf8] sm:$0xff] %v7429_v29 }
 0x839   : > { %8616 = shalt.err (!%p8613_p3)
}
 0x83a   : > { %s8672_s29 = smov 128   ;;  %s8673_s28 = smov 8  }
 0x83b   : > { %8520 = dma.vmem_to_hbm [thread:$0]  (%p8764_p4), %s7479_s12, 4096, %s7481_s23, %s7463_s15, %s8672_s29, %s8672_s29, %s8673_s28  }
 0x83c PF: > { %p8526_p5 = scmp.ge.s32.totalorder %s8669_s14, 2  ;;  %s7495_s20 = sand.u32 1, %s8649_s30  }
 0x83d   : > { %s7496_s24 = scalar_lea.sflag [#allocation5], %s7495_s20 }
 0x83e   : > { %p8523_p6 = pnand %p8526_p5, %p8771_p8 }
 0x840   : > { %p8524_p7 = pneg %p8523_p6 }
 0x842   : > { %8644 = dma.done.wait (%p8524_p7), %s7496_s24, 4096  }
 0x843   : > { %8646 = vsyncadd (%p8524_p7), %s7496_s24, 4294963200  ;;  %s22_s14 = sadd.s32 1, %s8669_s14   ;;  %s12692_s30 = smov %s8653_s10 }
 0x844   : > { %p19_p9 = scmp.ge.s32.totalorder %s22_s14, 4   ;;  %s12693_s10 = smov %s8657_s11 }
 0x845   : > { %s12694_s11 = smov %s8777_s22  ;;  %s12695_s12 = smov %s8665_s13 }
 0x846   : > { %s12696_s13 = smov %s12698_s17  ;;  %21 = sbr.rel (!%p19_p9) target bundleno = 4 (0x4), region = 148 }
 0x84b   :  { %7502 = vsyncpa [#allocation5], 1 }
 0x84c   :  { %7504 = vsyncpa [#allocation5 + $0x1], 1 }
 0x84d   :  { %7505 = vsyncmov [#allocation3] }
 0x850   :  { %s7506_s19 = vpop.sfrf %7505 }
 0x851   :  { %p8413_p4 = scmp.ne.s32.totalorder %s7506_s19, 0 }
 0x853   :  { %7510 = shalt.err (%p8413_p4)  }
 0x854   :  { %7512 = vsyncmov [#allocation3 + $0x1] }
 0x857   :  { %s7513_s21 = vpop.sfrf %7512 }
 0x858   :  { %p8414_p8 = scmp.ne.s32.totalorder %s7513_s21, 0 }
 0x85a   :  { %7517 = shalt.err (%p8414_p8)  }

</bundles_post_ra>
